<compile_context>
chip_gen: v7x
topology: tpu7x:2x2x1
jax: 0.10.0
libtpu: 0.0.40
codegen_flags: <defaults>
</compile_context>

<pallas_src>
import functools

import jax
import jax.numpy as jnp
from jax import lax
from jax.experimental import pallas as pl
from jax.experimental.pallas import tpu as pltpu


def _layernorm(v, g, b, eps):
    mu = jnp.mean(v, axis=-1, keepdims=True)
    vc = v - mu
    var = jnp.mean(vc * vc, axis=-1, keepdims=True)
    return vc * lax.rsqrt(var + eps) * g + b


def _gelu_tanh(v):
    # TODO(synk): torch nn.GELU() is exact-erf; tanh-form GELU used here
    # (deviation ~1e-3, well below the bf16 matmul noise).
    c = 0.7978845608028654  # sqrt(2/pi)
    return 0.5 * v * (1.0 + jnp.tanh(c * (v + 0.044715 * v * v * v)))


# ----------------------------------------------------------------------------
# One fused kernel: embedding + depth x (LN -> fused QKV -> attention+residual
# -> LN -> FF1+GELU -> FF2+residual) + head, per batch element.
# ----------------------------------------------------------------------------
def _vit_kernel(patches_ref, cls_ref, pos_ref,
                emb_w_ref, emb_b_ref,
                qkv_w_ref, qkv_b_ref, ln_g_ref, ln_b_ref,
                ff1_w_ref, ff1_b_ref, ff2_w_ref, ff2_b_ref,
                hln_g_ref, hln_b_ref, head_w_ref, head_b_ref,
                out_ref, x_scr,
                *, heads, dim_head, depth, eps):
    e = heads * dim_head
    n_patch = patches_ref.shape[1]

    # ---- patch embedding (f32 tile cast to bf16 in-kernel: free VPU filler) --
    patches = patches_ref[0].astype(jnp.bfloat16)            # (n_patch, patch_dim)
    emb = jnp.dot(patches, emb_w_ref[...],
                  preferred_element_type=jnp.float32) + emb_b_ref[...]

    # Assemble [patch tokens | class token] via masked sublane stores into a
    # VMEM scratch (avoids an unaligned sublane concat), then add positions.
    x_scr[0:n_patch, :] = emb
    x_scr[n_patch:n_patch + 1, :] = cls_ref[0]
    x = x_scr[...] + pos_ref[0]                               # (n, e) f32

    # Shared-weight block parameters: loaded ONCE, resident across all layers.
    ln_g = ln_g_ref[...]
    ln_b = ln_b_ref[...]
    qkv_w = qkv_w_ref[...]
    qkv_b = qkv_b_ref[...]
    ff1_w = ff1_w_ref[...]
    ff1_b = ff1_b_ref[...]
    ff2_w = ff2_w_ref[...]
    ff2_b = ff2_b_ref[...]

    # ---- transformer: ONE shared block, depth iterations unrolled in-kernel --
    for _ in range(depth):
        # attention sub-block
        h1 = _layernorm(x, ln_g, ln_b, eps).astype(jnp.bfloat16)
        qkv = (jnp.dot(h1, qkv_w, preferred_element_type=jnp.float32)
               + qkv_b).astype(jnp.bfloat16)                  # (n, 3e)
        outs = []
        for h in range(heads):
            lo = h * dim_head
            qh = qkv[:, lo:lo + dim_head]
            kh = qkv[:, e + lo:e + lo + dim_head]
            vh = qkv[:, 2 * e + lo:2 * e + lo + dim_head]
            # q @ k^T via dot_general (contract the dim_head axes directly).
            # 1/sqrt(heads) is already folded into the Q projection weights.
            s = lax.dot_general(qh, kh, (((1,), (1,)), ((), ())),
                                preferred_element_type=jnp.float32)   # (n, n)
            s = s - jnp.max(s, axis=-1, keepdims=True)
            p = jnp.exp(s)
            p = p * pl.reciprocal(jnp.sum(p, axis=-1, keepdims=True),
                                  approx=True)
            outs.append(jnp.dot(p.astype(jnp.bfloat16), vh,
                                preferred_element_type=jnp.float32))  # (n, dh)
        x = x + jnp.concatenate(outs, axis=-1)                # fused residual

        # feed-forward sub-block
        h2 = _layernorm(x, ln_g, ln_b, eps).astype(jnp.bfloat16)
        up = jnp.dot(h2, ff1_w, preferred_element_type=jnp.float32) + ff1_b
        up = _gelu_tanh(up).astype(jnp.bfloat16)              # (n, hidden)
        down = jnp.dot(up, ff2_w, preferred_element_type=jnp.float32) + ff2_b
        x = x + down                                          # fused residual
        # TODO(synk): nn.Dropout layers omitted — identity at inference time.

    # ---- classifier head on token 0 (mirrors torch `out[:, 0]`) -------------
    tok0 = x[0:1, :]
    hn = _layernorm(tok0, hln_g_ref[...], hln_b_ref[...], eps).astype(jnp.bfloat16)
    logits = (jnp.dot(hn, head_w_ref[...], preferred_element_type=jnp.float32)
              + head_b_ref[...])                              # (1, classes_pad)
    out_ref[0] = logits


# ----------------------------------------------------------------------------
# Parameter prep: torch (out, in) weights -> transposed bf16, fused QKV with
# the 1/sqrt(heads) scale folded into Q, head weights zero-padded to 128 lanes.
# ----------------------------------------------------------------------------
def prepare_params(p, *, heads):
    s = float(heads) ** -0.5
    bf16 = jnp.bfloat16
    e = p["wq"].shape[0]
    classes = p["head_w"].shape[0]
    cp = ((classes + 127) // 128) * 128
    qkv_w = jnp.concatenate([p["wq"].T * s, p["wk"].T, p["wv"].T], axis=1)
    qkv_b = jnp.concatenate([p["bq"] * s, p["bk"], p["bv"]])[None, :]
    head_w = jnp.zeros((e, cp), jnp.float32).at[:, :classes].set(p["head_w"].T)
    head_b = jnp.zeros((1, cp), jnp.float32).at[0, :classes].set(p["head_b"])
    return {
        "embed_w": p["embed_w"].T.astype(bf16),
        "embed_b": p["embed_b"][None, :],
        "class_token": p["class_token"],
        "pos_encoding": p["pos_encoding"],
        "qkv_w": qkv_w.astype(bf16),
        "qkv_b": qkv_b,
        "ln_g": p["ln_g"][None, :], "ln_b": p["ln_b"][None, :],
        "ff1_w": p["ff1_w"].T.astype(bf16), "ff1_b": p["ff1_b"][None, :],
        "ff2_w": p["ff2_w"].T.astype(bf16), "ff2_b": p["ff2_b"][None, :],
        "head_ln_g": p["head_ln_g"][None, :], "head_ln_b": p["head_ln_b"][None, :],
        "head_w": head_w.astype(bf16), "head_b": head_b,
    }


def vit_forward(x_img, prep, *, patch_size, heads, depth, num_classes):
    b, c, hh, ww = x_img.shape
    n_patch = (hh // patch_size) * (ww // patch_size)
    patch_dim = c * patch_size * patch_size
    e = prep["qkv_w"].shape[0]
    dh = e // heads
    n = n_patch + 1
    hidden = prep["ff1_w"].shape[1]
    cp = prep["head_w"].shape[1]

    # "Patch extraction" is the raw reshape the PyTorch module performs.
    patches = x_img.reshape(b, n_patch, patch_dim)

    const2 = lambda i: (0, 0)
    const3 = lambda i: (0, 0, 0)
    in_specs = [
        pl.BlockSpec((1, n_patch, patch_dim), lambda i: (i, 0, 0)),  # patches
        pl.BlockSpec((1, 1, e), const3),          # class token
        pl.BlockSpec((1, n, e), const3),          # position encoding
        pl.BlockSpec((patch_dim, e), const2),     # embed W
        pl.BlockSpec((1, e), const2),             # embed b
        pl.BlockSpec((e, 3 * e), const2),         # fused qkv W
        pl.BlockSpec((1, 3 * e), const2),         # fused qkv b
        pl.BlockSpec((1, e), const2),             # ln gamma
        pl.BlockSpec((1, e), const2),             # ln beta
        pl.BlockSpec((e, hidden), const2),        # ff1 W
        pl.BlockSpec((1, hidden), const2),        # ff1 b
        pl.BlockSpec((hidden, e), const2),        # ff2 W
        pl.BlockSpec((1, e), const2),             # ff2 b
        pl.BlockSpec((1, e), const2),             # head ln gamma
        pl.BlockSpec((1, e), const2),             # head ln beta
        pl.BlockSpec((e, cp), const2),            # head W (padded)
        pl.BlockSpec((1, cp), const2),            # head b (padded)
    ]

    flops_block = (2 * n * e * 3 * e) + (4 * heads * n * n * dh) \
        + (4 * n * e * hidden)
    flops = b * (2 * n_patch * patch_dim * e + depth * flops_block + 2 * e * cp)
    transc = b * depth * (n * hidden + heads * n * n + 2 * n) + b
    bytes_weights = 2 * (patch_dim * e + 3 * e * e + 2 * e * hidden + e * cp) \
        + 4 * (8 * e + 3 * e + hidden + cp + n * e + e)
    bytes_accessed = b * n_patch * patch_dim * 4 + bytes_weights + b * cp * 4
    cost = pl.CostEstimate(flops=int(flops), transcendentals=int(transc),
                           bytes_accessed=int(bytes_accessed))

    out = pl.pallas_call(
        functools.partial(_vit_kernel, heads=heads, dim_head=dh,
                          depth=depth, eps=1e-5),
        out_shape=jax.ShapeDtypeStruct((b, 1, cp), jnp.float32),
        grid=(b,),
        in_specs=in_specs,
        out_specs=pl.BlockSpec((1, 1, cp), lambda i: (i, 0, 0)),
        scratch_shapes=[pltpu.VMEM((n, e), jnp.float32)],
        compiler_params=pltpu.CompilerParams(
            dimension_semantics=("parallel",)),
        cost_estimate=cost,
    )(patches, prep["class_token"], prep["pos_encoding"],
      prep["embed_w"], prep["embed_b"],
      prep["qkv_w"], prep["qkv_b"], prep["ln_g"], prep["ln_b"],
      prep["ff1_w"], prep["ff1_b"], prep["ff2_w"], prep["ff2_b"],
      prep["head_ln_g"], prep["head_ln_b"], prep["head_w"], prep["head_b"])
    return out[:, 0, :num_classes]


# ----------------------------------------------------------------------------
# Pure-JAX f32 reference mirroring the PyTorch forward exactly.
# ----------------------------------------------------------------------------
def vit_reference(x_img, p, *, patch_size, heads, depth):
    b, c, hh, ww = x_img.shape
    n_patch = (hh // patch_size) * (ww // patch_size)
    patch_dim = c * patch_size * patch_size
    e = p["wq"].shape[0]
    dh = e // heads

    def layernorm(y, g, beta):
        mu = jnp.mean(y, axis=-1, keepdims=True)
        var = jnp.mean((y - mu) ** 2, axis=-1, keepdims=True)
        return (y - mu) / jnp.sqrt(var + 1e-5) * g + beta

    patches = x_img.reshape(b, n_patch, patch_dim)
    emb = patches @ p["embed_w"].T + p["embed_b"]
    cls = jnp.broadcast_to(p["class_token"], (b, 1, e))
    x = jnp.concatenate([emb, cls], axis=1) + p["pos_encoding"]
    n = n_patch + 1

    def attention(y):
        def tr(z):
            return z.reshape(b, n, heads, dh).transpose(0, 2, 1, 3).reshape(
                b * heads, n, dh)
        q = tr(y @ p["wq"].T + p["bq"])
        k = tr(y @ p["wk"].T + p["bk"])
        v = tr(y @ p["wv"].T + p["bv"])
        a = jax.nn.softmax(jnp.matmul(q, k.transpose(0, 2, 1)) / heads ** 0.5,
                           axis=-1)
        o = jnp.matmul(a, v)
        return o.reshape(b, heads, n, dh).transpose(0, 2, 1, 3).reshape(b, n, e)

    def feed_forward(y):
        u = jax.nn.gelu(y @ p["ff1_w"].T + p["ff1_b"], approximate=False)
        return u @ p["ff2_w"].T + p["ff2_b"]

    for _ in range(depth):
        x = x + attention(layernorm(x, p["ln_g"], p["ln_b"]))
        x = x + feed_forward(layernorm(x, p["ln_g"], p["ln_b"]))

    tok0 = x[:, 0]
    hn = layernorm(tok0, p["head_ln_g"], p["head_ln_b"])
    return hn @ p["head_w"].T + p["head_b"]


if __name__ == "__main__":
    CLASSES = 10
    image_shape = (4, 16, 16)       # (c, h, w)
    patch_size = 8
    embedding = 128
    heads = 8
    hidden = 2048
    depth = 3
    batch = 2

    c, hh, ww = image_shape
    n_patch = (hh // patch_size) * (ww // patch_size)
    patch_dim = c * patch_size * patch_size
    seq_len = n_patch + 1

    key = jax.random.PRNGKey(0)
    keys = jax.random.split(key, 24)

    def unif(k, shape, bound):
        return jax.random.uniform(k, shape, jnp.float32, -bound, bound)

    se = embedding ** -0.5
    sp = patch_dim ** -0.5
    sh = hidden ** -0.5
    params = {
        "embed_w": unif(keys[0], (embedding, patch_dim), sp),
        "embed_b": unif(keys[1], (embedding,), sp),
        "class_token": jax.random.uniform(keys[2], (1, 1, embedding), jnp.float32),
        "pos_encoding": jax.random.uniform(keys[3], (1, seq_len, embedding),
                                           jnp.float32),
        "wq": unif(keys[4], (embedding, embedding), se),
        "bq": unif(keys[5], (embedding,), se),
        "wk": unif(keys[6], (embedding, embedding), se),
        "bk": unif(keys[7], (embedding,), se),
        "wv": unif(keys[8], (embedding, embedding), se),
        "bv": unif(keys[9], (embedding,), se),
        "ln_g": 1.0 + 0.1 * jax.random.normal(keys[10], (embedding,), jnp.float32),
        "ln_b": 0.1 * jax.random.normal(keys[11], (embedding,), jnp.float32),
        "ff1_w": unif(keys[12], (hidden, embedding), se),
        "ff1_b": unif(keys[13], (hidden,), se),
        "ff2_w": unif(keys[14], (embedding, hidden), sh),
        "ff2_b": unif(keys[15], (embedding,), sh),
        "head_ln_g": 1.0 + 0.1 * jax.random.normal(keys[16], (embedding,),
                                                   jnp.float32),
        "head_ln_b": 0.1 * jax.random.normal(keys[17], (embedding,), jnp.float32),
        "head_w": unif(keys[18], (CLASSES, embedding), se),
        "head_b": unif(keys[19], (CLASSES,), se),
    }
    x_img = jax.random.normal(keys[20], (batch, c, hh, ww), jnp.float32)

    prep = prepare_params(params, heads=heads)
    fwd = jax.jit(functools.partial(vit_forward, patch_size=patch_size,
                                    heads=heads, depth=depth,
                                    num_classes=CLASSES))
    logits = jax.block_until_ready(fwd(x_img, prep))

    ref = vit_reference(x_img, params, patch_size=patch_size, heads=heads,
                        depth=depth)
    assert logits.shape == (batch, CLASSES)
    max_err = float(jnp.max(jnp.abs(logits - ref)))
    # bf16 MXU inputs through 3 shared-weight layers give ~1e-2 deviation vs
    # the pure-f32 exact-GELU reference; 1e-1 is a safe bound.
    assert max_err < 1e-1, f"mismatch vs reference (max abs err {max_err:.4f})"

    print("KERNEL_OK")
</pallas_src>

<mosaic_0001>
module attributes {stable_mosaic.version = 11 : i64} {
  func.func @_vit_kernel(%arg0: i32, %arg1: memref<1x4x256xf32, #tpu.memory_space<vmem>>, %arg2: memref<1x1x128xf32, #tpu.memory_space<vmem>>, %arg3: memref<1x5x128xf32, #tpu.memory_space<vmem>>, %arg4: memref<256x128xbf16, #tpu.memory_space<vmem>>, %arg5: memref<1x128xf32, #tpu.memory_space<vmem>>, %arg6: memref<128x384xbf16, #tpu.memory_space<vmem>>, %arg7: memref<1x384xf32, #tpu.memory_space<vmem>>, %arg8: memref<1x128xf32, #tpu.memory_space<vmem>>, %arg9: memref<1x128xf32, #tpu.memory_space<vmem>>, %arg10: memref<128x2048xbf16, #tpu.memory_space<vmem>>, %arg11: memref<1x2048xf32, #tpu.memory_space<vmem>>, %arg12: memref<2048x128xbf16, #tpu.memory_space<vmem>>, %arg13: memref<1x128xf32, #tpu.memory_space<vmem>>, %arg14: memref<1x128xf32, #tpu.memory_space<vmem>>, %arg15: memref<1x128xf32, #tpu.memory_space<vmem>>, %arg16: memref<128x128xbf16, #tpu.memory_space<vmem>>, %arg17: memref<1x128xf32, #tpu.memory_space<vmem>>, %arg18: memref<1x1x128xf32, #tpu.memory_space<vmem>>, %arg19: memref<5x128xf32, #tpu.memory_space<vmem>>) attributes {dimension_semantics = [#tpu.dimension_semantics<parallel>], iteration_bounds = array<i64: 2>, scalar_prefetch = 0 : i64, scratch_operands = 1 : i64, tpu.core_type = #tpu.core_type<tc>, window_params = [{transform_indices = @transform_0, window_bounds = array<i64: 1, 4, 256>}, {pipeline_mode = #tpu.pipeline_mode<synchronous>, transform_indices = @transform_1, window_bounds = array<i64: 1, 1, 128>}, {pipeline_mode = #tpu.pipeline_mode<synchronous>, transform_indices = @transform_2, window_bounds = array<i64: 1, 5, 128>}, {pipeline_mode = #tpu.pipeline_mode<synchronous>, transform_indices = @transform_3, window_bounds = array<i64: 256, 128>}, {pipeline_mode = #tpu.pipeline_mode<synchronous>, transform_indices = @transform_4, window_bounds = array<i64: 1, 128>}, {pipeline_mode = #tpu.pipeline_mode<synchronous>, transform_indices = @transform_5, window_bounds = array<i64: 128, 384>}, {pipeline_mode = #tpu.pipeline_mode<synchronous>, transform_indices = @transform_6, window_bounds = array<i64: 1, 384>}, {pipeline_mode = #tpu.pipeline_mode<synchronous>, transform_indices = @transform_7, window_bounds = array<i64: 1, 128>}, {pipeline_mode = #tpu.pipeline_mode<synchronous>, transform_indices = @transform_8, window_bounds = array<i64: 1, 128>}, {pipeline_mode = #tpu.pipeline_mode<synchronous>, transform_indices = @transform_9, window_bounds = array<i64: 128, 2048>}, {pipeline_mode = #tpu.pipeline_mode<synchronous>, transform_indices = @transform_10, window_bounds = array<i64: 1, 2048>}, {pipeline_mode = #tpu.pipeline_mode<synchronous>, transform_indices = @transform_11, window_bounds = array<i64: 2048, 128>}, {pipeline_mode = #tpu.pipeline_mode<synchronous>, transform_indices = @transform_12, window_bounds = array<i64: 1, 128>}, {pipeline_mode = #tpu.pipeline_mode<synchronous>, transform_indices = @transform_13, window_bounds = array<i64: 1, 128>}, {pipeline_mode = #tpu.pipeline_mode<synchronous>, transform_indices = @transform_14, window_bounds = array<i64: 1, 128>}, {pipeline_mode = #tpu.pipeline_mode<synchronous>, transform_indices = @transform_15, window_bounds = array<i64: 128, 128>}, {pipeline_mode = #tpu.pipeline_mode<synchronous>, transform_indices = @transform_16, window_bounds = array<i64: 1, 128>}, {transform_indices = @transform_17, window_bounds = array<i64: 1, 1, 128>}]} {
    %c0 = arith.constant 0 : index
    %c0_0 = arith.constant 0 : index
    %c0_1 = arith.constant 0 : index
    %0 = vector.load %arg1[%c0, %c0_0, %c0_1] : memref<1x4x256xf32, #tpu.memory_space<vmem>>, vector<1x4x256xf32>
    %1 = vector.shape_cast %0 : vector<1x4x256xf32> to vector<4x256xf32>
    %2 = arith.truncf %1 : vector<4x256xf32> to vector<4x256xbf16>
    %c0_2 = arith.constant 0 : index
    %c0_3 = arith.constant 0 : index
    %3 = vector.load %arg4[%c0_2, %c0_3] : memref<256x128xbf16, #tpu.memory_space<vmem>>, vector<256x128xbf16>
    %cst = arith.constant dense<0.000000e+00> : vector<4x128xf32>
    %4 = tpu.matmul %2, %3, %cst {dimension_numbers = #tpu.dot_dimension_numbers<[1], [0], [0], [1], [0, 0, 1, 1], [], []>} : vector<4x256xbf16>, vector<256x128xbf16>, vector<4x128xf32> -> vector<4x128xf32>
    %c0_4 = arith.constant 0 : index
    %c0_5 = arith.constant 0 : index
    %5 = vector.load %arg5[%c0_4, %c0_5] : memref<1x128xf32, #tpu.memory_space<vmem>>, vector<1x128xf32>
    %6 = vector.broadcast %5 : vector<1x128xf32> to vector<4x128xf32>
    %7 = arith.addf %4, %6 : vector<4x128xf32>
    %c0_6 = arith.constant 0 : index
    %c0_7 = arith.constant 0 : index
    %8 = vector.load %arg19[%c0_6, %c0_7] : memref<5x128xf32, #tpu.memory_space<vmem>>, vector<4x128xf32>
    tpu.vector_store %arg19[%c0_6, %c0_7], %7 {strides = array<i32>} : memref<5x128xf32, #tpu.memory_space<vmem>>, vector<4x128xf32>,
    %c0_8 = arith.constant 0 : index
    %c0_9 = arith.constant 0 : index
    %c0_10 = arith.constant 0 : index
    %9 = vector.load %arg2[%c0_8, %c0_9, %c0_10] : memref<1x1x128xf32, #tpu.memory_space<vmem>>, vector<1x1x128xf32>
    %10 = vector.shape_cast %9 : vector<1x1x128xf32> to vector<1x128xf32>
    %c4 = arith.constant 4 : index
    %c0_11 = arith.constant 0 : index
    %11 = vector.load %arg19[%c4, %c0_11] : memref<5x128xf32, #tpu.memory_space<vmem>>, vector<1x128xf32>
    tpu.vector_store %arg19[%c4, %c0_11], %10 {strides = array<i32>} : memref<5x128xf32, #tpu.memory_space<vmem>>, vector<1x128xf32>,
    %c0_12 = arith.constant 0 : index
    %c0_13 = arith.constant 0 : index
    %12 = vector.load %arg19[%c0_12, %c0_13] : memref<5x128xf32, #tpu.memory_space<vmem>>, vector<5x128xf32>
    %c0_14 = arith.constant 0 : index
    %c0_15 = arith.constant 0 : index
    %c0_16 = arith.constant 0 : index
    %13 = vector.load %arg3[%c0_14, %c0_15, %c0_16] : memref<1x5x128xf32, #tpu.memory_space<vmem>>, vector<1x5x128xf32>
    %14 = vector.shape_cast %13 : vector<1x5x128xf32> to vector<5x128xf32>
    %15 = arith.addf %12, %14 : vector<5x128xf32>
    %c0_17 = arith.constant 0 : index
    %c0_18 = arith.constant 0 : index
    %16 = vector.load %arg8[%c0_17, %c0_18] : memref<1x128xf32, #tpu.memory_space<vmem>>, vector<1x128xf32>
    %c0_19 = arith.constant 0 : index
    %c0_20 = arith.constant 0 : index
    %17 = vector.load %arg9[%c0_19, %c0_20] : memref<1x128xf32, #tpu.memory_space<vmem>>, vector<1x128xf32>
    %c0_21 = arith.constant 0 : index
    %c0_22 = arith.constant 0 : index
    %18 = vector.load %arg6[%c0_21, %c0_22] : memref<128x384xbf16, #tpu.memory_space<vmem>>, vector<128x384xbf16>
    %c0_23 = arith.constant 0 : index
    %c0_24 = arith.constant 0 : index
    %19 = vector.load %arg7[%c0_23, %c0_24] : memref<1x384xf32, #tpu.memory_space<vmem>>, vector<1x384xf32>
    %c0_25 = arith.constant 0 : index
    %c0_26 = arith.constant 0 : index
    %20 = vector.load %arg10[%c0_25, %c0_26] : memref<128x2048xbf16, #tpu.memory_space<vmem>>, vector<128x2048xbf16>
    %c0_27 = arith.constant 0 : index
    %c0_28 = arith.constant 0 : index
    %21 = vector.load %arg11[%c0_27, %c0_28] : memref<1x2048xf32, #tpu.memory_space<vmem>>, vector<1x2048xf32>
    %c0_29 = arith.constant 0 : index
    %c0_30 = arith.constant 0 : index
    %22 = vector.load %arg12[%c0_29, %c0_30] : memref<2048x128xbf16, #tpu.memory_space<vmem>>, vector<2048x128xbf16>
    %c0_31 = arith.constant 0 : index
    %c0_32 = arith.constant 0 : index
    %23 = vector.load %arg13[%c0_31, %c0_32] : memref<1x128xf32, #tpu.memory_space<vmem>>, vector<1x128xf32>
    %cst_33 = arith.constant dense<0.000000e+00> : vector<5xf32>
    %24 = vector.multi_reduction <add>, %15, %cst_33 [1] : vector<5x128xf32> to vector<5xf32>
    %25 = vector.shape_cast %24 : vector<5xf32> to vector<5x1xf32>
    %cst_34 = arith.constant 1.280000e+02 : f32
    %26 = vector.broadcast %cst_34 : f32 to vector<5x1xf32>
    %27 = arith.divf %25, %26 : vector<5x1xf32>
    %28 = vector.broadcast %27 : vector<5x1xf32> to vector<5x128xf32>
    %29 = arith.subf %15, %28 : vector<5x128xf32>
    %30 = arith.mulf %29, %29 : vector<5x128xf32>
    %cst_35 = arith.constant dense<0.000000e+00> : vector<5xf32>
    %31 = vector.multi_reduction <add>, %30, %cst_35 [1] : vector<5x128xf32> to vector<5xf32>
    %32 = vector.shape_cast %31 : vector<5xf32> to vector<5x1xf32>
    %cst_36 = arith.constant 1.280000e+02 : f32
    %33 = vector.broadcast %cst_36 : f32 to vector<5x1xf32>
    %34 = arith.divf %32, %33 : vector<5x1xf32>
    %cst_37 = arith.constant 9.99999974E-6 : f32
    %35 = vector.broadcast %cst_37 : f32 to vector<5x1xf32>
    %36 = arith.addf %34, %35 : vector<5x1xf32>
    %37 = math.rsqrt %36 : vector<5x1xf32>
    %38 = vector.broadcast %37 : vector<5x1xf32> to vector<5x128xf32>
    %39 = arith.mulf %29, %38 : vector<5x128xf32>
    %40 = vector.broadcast %16 : vector<1x128xf32> to vector<5x128xf32>
    %41 = arith.mulf %39, %40 : vector<5x128xf32>
    %42 = vector.broadcast %17 : vector<1x128xf32> to vector<5x128xf32>
    %43 = arith.addf %41, %42 : vector<5x128xf32>
    %44 = arith.truncf %43 : vector<5x128xf32> to vector<5x128xbf16>
    %cst_38 = arith.constant dense<0.000000e+00> : vector<5x384xf32>
    %45 = tpu.matmul %44, %18, %cst_38 {dimension_numbers = #tpu.dot_dimension_numbers<[1], [0], [0], [1], [0, 0, 1, 1], [], []>} : vector<5x128xbf16>, vector<128x384xbf16>, vector<5x384xf32> -> vector<5x384xf32>
    %46 = vector.broadcast %19 : vector<1x384xf32> to vector<5x384xf32>
    %47 = arith.addf %45, %46 : vector<5x384xf32>
    %48 = arith.truncf %47 : vector<5x384xf32> to vector<5x384xbf16>
    %49 = vector.extract_strided_slice %48 {offsets = [0, 0], sizes = [5, 16], strides = [1, 1]} : vector<5x384xbf16> to vector<5x16xbf16>
    %50 = vector.extract_strided_slice %48 {offsets = [0, 128], sizes = [5, 16], strides = [1, 1]} : vector<5x384xbf16> to vector<5x16xbf16>
    %51 = vector.extract_strided_slice %48 {offsets = [0, 256], sizes = [5, 16], strides = [1, 1]} : vector<5x384xbf16> to vector<5x16xbf16>
    %cst_39 = arith.constant dense<0.000000e+00> : vector<5x5xf32>
    %52 = tpu.matmul %49, %50, %cst_39 {dimension_numbers = #tpu.dot_dimension_numbers<[1], [1], [0], [0], [0, 0, 1, 0], [], []>} : vector<5x16xbf16>, vector<5x16xbf16>, vector<5x5xf32> -> vector<5x5xf32>
    %cst_40 = arith.constant dense<0xFF800000> : vector<5xf32>
    %53 = vector.multi_reduction <maximumf>, %52, %cst_40 [1] : vector<5x5xf32> to vector<5xf32>
    %54 = vector.shape_cast %53 : vector<5xf32> to vector<5x1xf32>
    %55 = vector.broadcast %54 : vector<5x1xf32> to vector<5x5xf32>
    %56 = arith.subf %52, %55 : vector<5x5xf32>
    %57 = math.exp %56 : vector<5x5xf32>
    %cst_41 = arith.constant dense<0.000000e+00> : vector<5xf32>
    %58 = vector.multi_reduction <add>, %57, %cst_41 [1] : vector<5x5xf32> to vector<5xf32>
    %59 = vector.shape_cast %58 : vector<5xf32> to vector<5x1xf32>
    %60 = tpu.reciprocal %59 {approx = true} : vector<5x1xf32> -> vector<5x1xf32>
    %61 = vector.broadcast %60 : vector<5x1xf32> to vector<5x5xf32>
    %62 = arith.mulf %57, %61 : vector<5x5xf32>
    %63 = arith.truncf %62 : vector<5x5xf32> to vector<5x5xbf16>
    %cst_42 = arith.constant dense<0.000000e+00> : vector<5x16xf32>
    %64 = tpu.matmul %63, %51, %cst_42 {dimension_numbers = #tpu.dot_dimension_numbers<[1], [0], [0], [1], [0, 0, 1, 1], [], []>} : vector<5x5xbf16>, vector<5x16xbf16>, vector<5x16xf32> -> vector<5x16xf32>
    %65 = vector.extract_strided_slice %48 {offsets = [0, 16], sizes = [5, 16], strides = [1, 1]} : vector<5x384xbf16> to vector<5x16xbf16>
    %66 = vector.extract_strided_slice %48 {offsets = [0, 144], sizes = [5, 16], strides = [1, 1]} : vector<5x384xbf16> to vector<5x16xbf16>
    %67 = vector.extract_strided_slice %48 {offsets = [0, 272], sizes = [5, 16], strides = [1, 1]} : vector<5x384xbf16> to vector<5x16xbf16>
    %cst_43 = arith.constant dense<0.000000e+00> : vector<5x5xf32>
    %68 = tpu.matmul %65, %66, %cst_43 {dimension_numbers = #tpu.dot_dimension_numbers<[1], [1], [0], [0], [0, 0, 1, 0], [], []>} : vector<5x16xbf16>, vector<5x16xbf16>, vector<5x5xf32> -> vector<5x5xf32>
    %cst_44 = arith.constant dense<0xFF800000> : vector<5xf32>
    %69 = vector.multi_reduction <maximumf>, %68, %cst_44 [1] : vector<5x5xf32> to vector<5xf32>
    %70 = vector.shape_cast %69 : vector<5xf32> to vector<5x1xf32>
    %71 = vector.broadcast %70 : vector<5x1xf32> to vector<5x5xf32>
    %72 = arith.subf %68, %71 : vector<5x5xf32>
    %73 = math.exp %72 : vector<5x5xf32>
    %cst_45 = arith.constant dense<0.000000e+00> : vector<5xf32>
    %74 = vector.multi_reduction <add>, %73, %cst_45 [1] : vector<5x5xf32> to vector<5xf32>
    %75 = vector.shape_cast %74 : vector<5xf32> to vector<5x1xf32>
    %76 = tpu.reciprocal %75 {approx = true} : vector<5x1xf32> -> vector<5x1xf32>
    %77 = vector.broadcast %76 : vector<5x1xf32> to vector<5x5xf32>
    %78 = arith.mulf %73, %77 : vector<5x5xf32>
    %79 = arith.truncf %78 : vector<5x5xf32> to vector<5x5xbf16>
    %cst_46 = arith.constant dense<0.000000e+00> : vector<5x16xf32>
    %80 = tpu.matmul %79, %67, %cst_46 {dimension_numbers = #tpu.dot_dimension_numbers<[1], [0], [0], [1], [0, 0, 1, 1], [], []>} : vector<5x5xbf16>, vector<5x16xbf16>, vector<5x16xf32> -> vector<5x16xf32>
    %81 = vector.extract_strided_slice %48 {offsets = [0, 32], sizes = [5, 16], strides = [1, 1]} : vector<5x384xbf16> to vector<5x16xbf16>
    %82 = vector.extract_strided_slice %48 {offsets = [0, 160], sizes = [5, 16], strides = [1, 1]} : vector<5x384xbf16> to vector<5x16xbf16>
    %83 = vector.extract_strided_slice %48 {offsets = [0, 288], sizes = [5, 16], strides = [1, 1]} : vector<5x384xbf16> to vector<5x16xbf16>
    %cst_47 = arith.constant dense<0.000000e+00> : vector<5x5xf32>
    %84 = tpu.matmul %81, %82, %cst_47 {dimension_numbers = #tpu.dot_dimension_numbers<[1], [1], [0], [0], [0, 0, 1, 0], [], []>} : vector<5x16xbf16>, vector<5x16xbf16>, vector<5x5xf32> -> vector<5x5xf32>
    %cst_48 = arith.constant dense<0xFF800000> : vector<5xf32>
    %85 = vector.multi_reduction <maximumf>, %84, %cst_48 [1] : vector<5x5xf32> to vector<5xf32>
    %86 = vector.shape_cast %85 : vector<5xf32> to vector<5x1xf32>
    %87 = vector.broadcast %86 : vector<5x1xf32> to vector<5x5xf32>
    %88 = arith.subf %84, %87 : vector<5x5xf32>
    %89 = math.exp %88 : vector<5x5xf32>
    %cst_49 = arith.constant dense<0.000000e+00> : vector<5xf32>
    %90 = vector.multi_reduction <add>, %89, %cst_49 [1] : vector<5x5xf32> to vector<5xf32>
    %91 = vector.shape_cast %90 : vector<5xf32> to vector<5x1xf32>
    %92 = tpu.reciprocal %91 {approx = true} : vector<5x1xf32> -> vector<5x1xf32>
    %93 = vector.broadcast %92 : vector<5x1xf32> to vector<5x5xf32>
    %94 = arith.mulf %89, %93 : vector<5x5xf32>
    %95 = arith.truncf %94 : vector<5x5xf32> to vector<5x5xbf16>
    %cst_50 = arith.constant dense<0.000000e+00> : vector<5x16xf32>
    %96 = tpu.matmul %95, %83, %cst_50 {dimension_numbers = #tpu.dot_dimension_numbers<[1], [0], [0], [1], [0, 0, 1, 1], [], []>} : vector<5x5xbf16>, vector<5x16xbf16>, vector<5x16xf32> -> vector<5x16xf32>
    %97 = vector.extract_strided_slice %48 {offsets = [0, 48], sizes = [5, 16], strides = [1, 1]} : vector<5x384xbf16> to vector<5x16xbf16>
    %98 = vector.extract_strided_slice %48 {offsets = [0, 176], sizes = [5, 16], strides = [1, 1]} : vector<5x384xbf16> to vector<5x16xbf16>
    %99 = vector.extract_strided_slice %48 {offsets = [0, 304], sizes = [5, 16], strides = [1, 1]} : vector<5x384xbf16> to vector<5x16xbf16>
    %cst_51 = arith.constant dense<0.000000e+00> : vector<5x5xf32>
    %100 = tpu.matmul %97, %98, %cst_51 {dimension_numbers = #tpu.dot_dimension_numbers<[1], [1], [0], [0], [0, 0, 1, 0], [], []>} : vector<5x16xbf16>, vector<5x16xbf16>, vector<5x5xf32> -> vector<5x5xf32>
    %cst_52 = arith.constant dense<0xFF800000> : vector<5xf32>
    %101 = vector.multi_reduction <maximumf>, %100, %cst_52 [1] : vector<5x5xf32> to vector<5xf32>
    %102 = vector.shape_cast %101 : vector<5xf32> to vector<5x1xf32>
    %103 = vector.broadcast %102 : vector<5x1xf32> to vector<5x5xf32>
    %104 = arith.subf %100, %103 : vector<5x5xf32>
    %105 = math.exp %104 : vector<5x5xf32>
    %cst_53 = arith.constant dense<0.000000e+00> : vector<5xf32>
    %106 = vector.multi_reduction <add>, %105, %cst_53 [1] : vector<5x5xf32> to vector<5xf32>
    %107 = vector.shape_cast %106 : vector<5xf32> to vector<5x1xf32>
    %108 = tpu.reciprocal %107 {approx = true} : vector<5x1xf32> -> vector<5x1xf32>
    %109 = vector.broadcast %108 : vector<5x1xf32> to vector<5x5xf32>
    %110 = arith.mulf %105, %109 : vector<5x5xf32>
    %111 = arith.truncf %110 : vector<5x5xf32> to vector<5x5xbf16>
    %cst_54 = arith.constant dense<0.000000e+00> : vector<5x16xf32>
    %112 = tpu.matmul %111, %99, %cst_54 {dimension_numbers = #tpu.dot_dimension_numbers<[1], [0], [0], [1], [0, 0, 1, 1], [], []>} : vector<5x5xbf16>, vector<5x16xbf16>, vector<5x16xf32> -> vector<5x16xf32>
    %113 = vector.extract_strided_slice %48 {offsets = [0, 64], sizes = [5, 16], strides = [1, 1]} : vector<5x384xbf16> to vector<5x16xbf16>
    %114 = vector.extract_strided_slice %48 {offsets = [0, 192], sizes = [5, 16], strides = [1, 1]} : vector<5x384xbf16> to vector<5x16xbf16>
    %115 = vector.extract_strided_slice %48 {offsets = [0, 320], sizes = [5, 16], strides = [1, 1]} : vector<5x384xbf16> to vector<5x16xbf16>
    %cst_55 = arith.constant dense<0.000000e+00> : vector<5x5xf32>
    %116 = tpu.matmul %113, %114, %cst_55 {dimension_numbers = #tpu.dot_dimension_numbers<[1], [1], [0], [0], [0, 0, 1, 0], [], []>} : vector<5x16xbf16>, vector<5x16xbf16>, vector<5x5xf32> -> vector<5x5xf32>
    %cst_56 = arith.constant dense<0xFF800000> : vector<5xf32>
    %117 = vector.multi_reduction <maximumf>, %116, %cst_56 [1] : vector<5x5xf32> to vector<5xf32>
    %118 = vector.shape_cast %117 : vector<5xf32> to vector<5x1xf32>
    %119 = vector.broadcast %118 : vector<5x1xf32> to vector<5x5xf32>
    %120 = arith.subf %116, %119 : vector<5x5xf32>
    %121 = math.exp %120 : vector<5x5xf32>
    %cst_57 = arith.constant dense<0.000000e+00> : vector<5xf32>
    %122 = vector.multi_reduction <add>, %121, %cst_57 [1] : vector<5x5xf32> to vector<5xf32>
    %123 = vector.shape_cast %122 : vector<5xf32> to vector<5x1xf32>
    %124 = tpu.reciprocal %123 {approx = true} : vector<5x1xf32> -> vector<5x1xf32>
    %125 = vector.broadcast %124 : vector<5x1xf32> to vector<5x5xf32>
    %126 = arith.mulf %121, %125 : vector<5x5xf32>
    %127 = arith.truncf %126 : vector<5x5xf32> to vector<5x5xbf16>
    %cst_58 = arith.constant dense<0.000000e+00> : vector<5x16xf32>
    %128 = tpu.matmul %127, %115, %cst_58 {dimension_numbers = #tpu.dot_dimension_numbers<[1], [0], [0], [1], [0, 0, 1, 1], [], []>} : vector<5x5xbf16>, vector<5x16xbf16>, vector<5x16xf32> -> vector<5x16xf32>
    %129 = vector.extract_strided_slice %48 {offsets = [0, 80], sizes = [5, 16], strides = [1, 1]} : vector<5x384xbf16> to vector<5x16xbf16>
    %130 = vector.extract_strided_slice %48 {offsets = [0, 208], sizes = [5, 16], strides = [1, 1]} : vector<5x384xbf16> to vector<5x16xbf16>
    %131 = vector.extract_strided_slice %48 {offsets = [0, 336], sizes = [5, 16], strides = [1, 1]} : vector<5x384xbf16> to vector<5x16xbf16>
    %cst_59 = arith.constant dense<0.000000e+00> : vector<5x5xf32>
    %132 = tpu.matmul %129, %130, %cst_59 {dimension_numbers = #tpu.dot_dimension_numbers<[1], [1], [0], [0], [0, 0, 1, 0], [], []>} : vector<5x16xbf16>, vector<5x16xbf16>, vector<5x5xf32> -> vector<5x5xf32>
    %cst_60 = arith.constant dense<0xFF800000> : vector<5xf32>
    %133 = vector.multi_reduction <maximumf>, %132, %cst_60 [1] : vector<5x5xf32> to vector<5xf32>
    %134 = vector.shape_cast %133 : vector<5xf32> to vector<5x1xf32>
    %135 = vector.broadcast %134 : vector<5x1xf32> to vector<5x5xf32>
    %136 = arith.subf %132, %135 : vector<5x5xf32>
    %137 = math.exp %136 : vector<5x5xf32>
    %cst_61 = arith.constant dense<0.000000e+00> : vector<5xf32>
    %138 = vector.multi_reduction <add>, %137, %cst_61 [1] : vector<5x5xf32> to vector<5xf32>
    %139 = vector.shape_cast %138 : vector<5xf32> to vector<5x1xf32>
    %140 = tpu.reciprocal %139 {approx = true} : vector<5x1xf32> -> vector<5x1xf32>
    %141 = vector.broadcast %140 : vector<5x1xf32> to vector<5x5xf32>
    %142 = arith.mulf %137, %141 : vector<5x5xf32>
    %143 = arith.truncf %142 : vector<5x5xf32> to vector<5x5xbf16>
    %cst_62 = arith.constant dense<0.000000e+00> : vector<5x16xf32>
    %144 = tpu.matmul %143, %131, %cst_62 {dimension_numbers = #tpu.dot_dimension_numbers<[1], [0], [0], [1], [0, 0, 1, 1], [], []>} : vector<5x5xbf16>, vector<5x16xbf16>, vector<5x16xf32> -> vector<5x16xf32>
    %145 = vector.extract_strided_slice %48 {offsets = [0, 96], sizes = [5, 16], strides = [1, 1]} : vector<5x384xbf16> to vector<5x16xbf16>
    %146 = vector.extract_strided_slice %48 {offsets = [0, 224], sizes = [5, 16], strides = [1, 1]} : vector<5x384xbf16> to vector<5x16xbf16>
    %147 = vector.extract_strided_slice %48 {offsets = [0, 352], sizes = [5, 16], strides = [1, 1]} : vector<5x384xbf16> to vector<5x16xbf16>
    %cst_63 = arith.constant dense<0.000000e+00> : vector<5x5xf32>
    %148 = tpu.matmul %145, %146, %cst_63 {dimension_numbers = #tpu.dot_dimension_numbers<[1], [1], [0], [0], [0, 0, 1, 0], [], []>} : vector<5x16xbf16>, vector<5x16xbf16>, vector<5x5xf32> -> vector<5x5xf32>
    %cst_64 = arith.constant dense<0xFF800000> : vector<5xf32>
    %149 = vector.multi_reduction <maximumf>, %148, %cst_64 [1] : vector<5x5xf32> to vector<5xf32>
    %150 = vector.shape_cast %149 : vector<5xf32> to vector<5x1xf32>
    %151 = vector.broadcast %150 : vector<5x1xf32> to vector<5x5xf32>
    %152 = arith.subf %148, %151 : vector<5x5xf32>
    %153 = math.exp %152 : vector<5x5xf32>
    %cst_65 = arith.constant dense<0.000000e+00> : vector<5xf32>
    %154 = vector.multi_reduction <add>, %153, %cst_65 [1] : vector<5x5xf32> to vector<5xf32>
    %155 = vector.shape_cast %154 : vector<5xf32> to vector<5x1xf32>
    %156 = tpu.reciprocal %155 {approx = true} : vector<5x1xf32> -> vector<5x1xf32>
    %157 = vector.broadcast %156 : vector<5x1xf32> to vector<5x5xf32>
    %158 = arith.mulf %153, %157 : vector<5x5xf32>
    %159 = arith.truncf %158 : vector<5x5xf32> to vector<5x5xbf16>
    %cst_66 = arith.constant dense<0.000000e+00> : vector<5x16xf32>
    %160 = tpu.matmul %159, %147, %cst_66 {dimension_numbers = #tpu.dot_dimension_numbers<[1], [0], [0], [1], [0, 0, 1, 1], [], []>} : vector<5x5xbf16>, vector<5x16xbf16>, vector<5x16xf32> -> vector<5x16xf32>
    %161 = vector.extract_strided_slice %48 {offsets = [0, 112], sizes = [5, 16], strides = [1, 1]} : vector<5x384xbf16> to vector<5x16xbf16>
    %162 = vector.extract_strided_slice %48 {offsets = [0, 240], sizes = [5, 16], strides = [1, 1]} : vector<5x384xbf16> to vector<5x16xbf16>
    %163 = vector.extract_strided_slice %48 {offsets = [0, 368], sizes = [5, 16], strides = [1, 1]} : vector<5x384xbf16> to vector<5x16xbf16>
    %cst_67 = arith.constant dense<0.000000e+00> : vector<5x5xf32>
    %164 = tpu.matmul %161, %162, %cst_67 {dimension_numbers = #tpu.dot_dimension_numbers<[1], [1], [0], [0], [0, 0, 1, 0], [], []>} : vector<5x16xbf16>, vector<5x16xbf16>, vector<5x5xf32> -> vector<5x5xf32>
    %cst_68 = arith.constant dense<0xFF800000> : vector<5xf32>
    %165 = vector.multi_reduction <maximumf>, %164, %cst_68 [1] : vector<5x5xf32> to vector<5xf32>
    %166 = vector.shape_cast %165 : vector<5xf32> to vector<5x1xf32>
    %167 = vector.broadcast %166 : vector<5x1xf32> to vector<5x5xf32>
    %168 = arith.subf %164, %167 : vector<5x5xf32>
    %169 = math.exp %168 : vector<5x5xf32>
    %cst_69 = arith.constant dense<0.000000e+00> : vector<5xf32>
    %170 = vector.multi_reduction <add>, %169, %cst_69 [1] : vector<5x5xf32> to vector<5xf32>
    %171 = vector.shape_cast %170 : vector<5xf32> to vector<5x1xf32>
    %172 = tpu.reciprocal %171 {approx = true} : vector<5x1xf32> -> vector<5x1xf32>
    %173 = vector.broadcast %172 : vector<5x1xf32> to vector<5x5xf32>
    %174 = arith.mulf %169, %173 : vector<5x5xf32>
    %175 = arith.truncf %174 : vector<5x5xf32> to vector<5x5xbf16>
    %cst_70 = arith.constant dense<0.000000e+00> : vector<5x16xf32>
    %176 = tpu.matmul %175, %163, %cst_70 {dimension_numbers = #tpu.dot_dimension_numbers<[1], [0], [0], [1], [0, 0, 1, 1], [], []>} : vector<5x5xbf16>, vector<5x16xbf16>, vector<5x16xf32> -> vector<5x16xf32>
    %177 = tpu.concatenate %64, %80, %96, %112, %128, %144, %160, %176 in 1 : vector<5x16xf32>, vector<5x16xf32>, vector<5x16xf32>, vector<5x16xf32>, vector<5x16xf32>, vector<5x16xf32>, vector<5x16xf32>, vector<5x16xf32> -> vector<5x128xf32>
    %178 = arith.addf %15, %177 : vector<5x128xf32>
    %cst_71 = arith.constant dense<0.000000e+00> : vector<5xf32>
    %179 = vector.multi_reduction <add>, %178, %cst_71 [1] : vector<5x128xf32> to vector<5xf32>
    %180 = vector.shape_cast %179 : vector<5xf32> to vector<5x1xf32>
    %cst_72 = arith.constant 1.280000e+02 : f32
    %181 = vector.broadcast %cst_72 : f32 to vector<5x1xf32>
    %182 = arith.divf %180, %181 : vector<5x1xf32>
    %183 = vector.broadcast %182 : vector<5x1xf32> to vector<5x128xf32>
    %184 = arith.subf %178, %183 : vector<5x128xf32>
    %185 = arith.mulf %184, %184 : vector<5x128xf32>
    %cst_73 = arith.constant dense<0.000000e+00> : vector<5xf32>
    %186 = vector.multi_reduction <add>, %185, %cst_73 [1] : vector<5x128xf32> to vector<5xf32>
    %187 = vector.shape_cast %186 : vector<5xf32> to vector<5x1xf32>
    %cst_74 = arith.constant 1.280000e+02 : f32
    %188 = vector.broadcast %cst_74 : f32 to vector<5x1xf32>
    %189 = arith.divf %187, %188 : vector<5x1xf32>
    %cst_75 = arith.constant 9.99999974E-6 : f32
    %190 = vector.broadcast %cst_75 : f32 to vector<5x1xf32>
    %191 = arith.addf %189, %190 : vector<5x1xf32>
    %192 = math.rsqrt %191 : vector<5x1xf32>
    %193 = vector.broadcast %192 : vector<5x1xf32> to vector<5x128xf32>
    %194 = arith.mulf %184, %193 : vector<5x128xf32>
    %195 = vector.broadcast %16 : vector<1x128xf32> to vector<5x128xf32>
    %196 = arith.mulf %194, %195 : vector<5x128xf32>
    %197 = vector.broadcast %17 : vector<1x128xf32> to vector<5x128xf32>
    %198 = arith.addf %196, %197 : vector<5x128xf32>
    %199 = arith.truncf %198 : vector<5x128xf32> to vector<5x128xbf16>
    %cst_76 = arith.constant dense<0.000000e+00> : vector<5x2048xf32>
    %200 = tpu.matmul %199, %20, %cst_76 {dimension_numbers = #tpu.dot_dimension_numbers<[1], [0], [0], [1], [0, 0, 1, 1], [], []>} : vector<5x128xbf16>, vector<128x2048xbf16>, vector<5x2048xf32> -> vector<5x2048xf32>
    %201 = vector.broadcast %21 : vector<1x2048xf32> to vector<5x2048xf32>
    %202 = arith.addf %200, %201 : vector<5x2048xf32>
    %cst_77 = arith.constant 5.000000e-01 : f32
    %203 = vector.broadcast %cst_77 : f32 to vector<5x2048xf32>
    %204 = arith.mulf %203, %202 : vector<5x2048xf32>
    %cst_78 = arith.constant 4.471500e-02 : f32
    %205 = vector.broadcast %cst_78 : f32 to vector<5x2048xf32>
    %206 = arith.mulf %205, %202 : vector<5x2048xf32>
    %207 = arith.mulf %206, %202 : vector<5x2048xf32>
    %208 = arith.mulf %207, %202 : vector<5x2048xf32>
    %209 = arith.addf %202, %208 : vector<5x2048xf32>
    %cst_79 = arith.constant 0.797884583 : f32
    %210 = vector.broadcast %cst_79 : f32 to vector<5x2048xf32>
    %211 = arith.mulf %210, %209 : vector<5x2048xf32>
    %212 = math.tanh %211 : vector<5x2048xf32>
    %cst_80 = arith.constant 1.000000e+00 : f32
    %213 = vector.broadcast %cst_80 : f32 to vector<5x2048xf32>
    %214 = arith.addf %213, %212 : vector<5x2048xf32>
    %215 = arith.mulf %204, %214 : vector<5x2048xf32>
    %216 = arith.truncf %215 : vector<5x2048xf32> to vector<5x2048xbf16>
    %cst_81 = arith.constant dense<0.000000e+00> : vector<5x128xf32>
    %217 = tpu.matmul %216, %22, %cst_81 {dimension_numbers = #tpu.dot_dimension_numbers<[1], [0], [0], [1], [0, 0, 1, 1], [], []>} : vector<5x2048xbf16>, vector<2048x128xbf16>, vector<5x128xf32> -> vector<5x128xf32>
    %218 = vector.broadcast %23 : vector<1x128xf32> to vector<5x128xf32>
    %219 = arith.addf %217, %218 : vector<5x128xf32>
    %220 = arith.addf %178, %219 : vector<5x128xf32>
    %cst_82 = arith.constant dense<0.000000e+00> : vector<5xf32>
    %221 = vector.multi_reduction <add>, %220, %cst_82 [1] : vector<5x128xf32> to vector<5xf32>
    %222 = vector.shape_cast %221 : vector<5xf32> to vector<5x1xf32>
    %cst_83 = arith.constant 1.280000e+02 : f32
    %223 = vector.broadcast %cst_83 : f32 to vector<5x1xf32>
    %224 = arith.divf %222, %223 : vector<5x1xf32>
    %225 = vector.broadcast %224 : vector<5x1xf32> to vector<5x128xf32>
    %226 = arith.subf %220, %225 : vector<5x128xf32>
    %227 = arith.mulf %226, %226 : vector<5x128xf32>
    %cst_84 = arith.constant dense<0.000000e+00> : vector<5xf32>
    %228 = vector.multi_reduction <add>, %227, %cst_84 [1] : vector<5x128xf32> to vector<5xf32>
    %229 = vector.shape_cast %228 : vector<5xf32> to vector<5x1xf32>
    %cst_85 = arith.constant 1.280000e+02 : f32
    %230 = vector.broadcast %cst_85 : f32 to vector<5x1xf32>
    %231 = arith.divf %229, %230 : vector<5x1xf32>
    %cst_86 = arith.constant 9.99999974E-6 : f32
    %232 = vector.broadcast %cst_86 : f32 to vector<5x1xf32>
    %233 = arith.addf %231, %232 : vector<5x1xf32>
    %234 = math.rsqrt %233 : vector<5x1xf32>
    %235 = vector.broadcast %234 : vector<5x1xf32> to vector<5x128xf32>
    %236 = arith.mulf %226, %235 : vector<5x128xf32>
    %237 = vector.broadcast %16 : vector<1x128xf32> to vector<5x128xf32>
    %238 = arith.mulf %236, %237 : vector<5x128xf32>
    %239 = vector.broadcast %17 : vector<1x128xf32> to vector<5x128xf32>
    %240 = arith.addf %238, %239 : vector<5x128xf32>
    %241 = arith.truncf %240 : vector<5x128xf32> to vector<5x128xbf16>
    %cst_87 = arith.constant dense<0.000000e+00> : vector<5x384xf32>
    %242 = tpu.matmul %241, %18, %cst_87 {dimension_numbers = #tpu.dot_dimension_numbers<[1], [0], [0], [1], [0, 0, 1, 1], [], []>} : vector<5x128xbf16>, vector<128x384xbf16>, vector<5x384xf32> -> vector<5x384xf32>
    %243 = vector.broadcast %19 : vector<1x384xf32> to vector<5x384xf32>
    %244 = arith.addf %242, %243 : vector<5x384xf32>
    %245 = arith.truncf %244 : vector<5x384xf32> to vector<5x384xbf16>
    %246 = vector.extract_strided_slice %245 {offsets = [0, 0], sizes = [5, 16], strides = [1, 1]} : vector<5x384xbf16> to vector<5x16xbf16>
    %247 = vector.extract_strided_slice %245 {offsets = [0, 128], sizes = [5, 16], strides = [1, 1]} : vector<5x384xbf16> to vector<5x16xbf16>
    %248 = vector.extract_strided_slice %245 {offsets = [0, 256], sizes = [5, 16], strides = [1, 1]} : vector<5x384xbf16> to vector<5x16xbf16>
    %cst_88 = arith.constant dense<0.000000e+00> : vector<5x5xf32>
    %249 = tpu.matmul %246, %247, %cst_88 {dimension_numbers = #tpu.dot_dimension_numbers<[1], [1], [0], [0], [0, 0, 1, 0], [], []>} : vector<5x16xbf16>, vector<5x16xbf16>, vector<5x5xf32> -> vector<5x5xf32>
    %cst_89 = arith.constant dense<0xFF800000> : vector<5xf32>
    %250 = vector.multi_reduction <maximumf>, %249, %cst_89 [1] : vector<5x5xf32> to vector<5xf32>
    %251 = vector.shape_cast %250 : vector<5xf32> to vector<5x1xf32>
    %252 = vector.broadcast %251 : vector<5x1xf32> to vector<5x5xf32>
    %253 = arith.subf %249, %252 : vector<5x5xf32>
    %254 = math.exp %253 : vector<5x5xf32>
    %cst_90 = arith.constant dense<0.000000e+00> : vector<5xf32>
    %255 = vector.multi_reduction <add>, %254, %cst_90 [1] : vector<5x5xf32> to vector<5xf32>
    %256 = vector.shape_cast %255 : vector<5xf32> to vector<5x1xf32>
    %257 = tpu.reciprocal %256 {approx = true} : vector<5x1xf32> -> vector<5x1xf32>
    %258 = vector.broadcast %257 : vector<5x1xf32> to vector<5x5xf32>
    %259 = arith.mulf %254, %258 : vector<5x5xf32>
    %260 = arith.truncf %259 : vector<5x5xf32> to vector<5x5xbf16>
    %cst_91 = arith.constant dense<0.000000e+00> : vector<5x16xf32>
    %261 = tpu.matmul %260, %248, %cst_91 {dimension_numbers = #tpu.dot_dimension_numbers<[1], [0], [0], [1], [0, 0, 1, 1], [], []>} : vector<5x5xbf16>, vector<5x16xbf16>, vector<5x16xf32> -> vector<5x16xf32>
    %262 = vector.extract_strided_slice %245 {offsets = [0, 16], sizes = [5, 16], strides = [1, 1]} : vector<5x384xbf16> to vector<5x16xbf16>
    %263 = vector.extract_strided_slice %245 {offsets = [0, 144], sizes = [5, 16], strides = [1, 1]} : vector<5x384xbf16> to vector<5x16xbf16>
    %264 = vector.extract_strided_slice %245 {offsets = [0, 272], sizes = [5, 16], strides = [1, 1]} : vector<5x384xbf16> to vector<5x16xbf16>
    %cst_92 = arith.constant dense<0.000000e+00> : vector<5x5xf32>
    %265 = tpu.matmul %262, %263, %cst_92 {dimension_numbers = #tpu.dot_dimension_numbers<[1], [1], [0], [0], [0, 0, 1, 0], [], []>} : vector<5x16xbf16>, vector<5x16xbf16>, vector<5x5xf32> -> vector<5x5xf32>
    %cst_93 = arith.constant dense<0xFF800000> : vector<5xf32>
    %266 = vector.multi_reduction <maximumf>, %265, %cst_93 [1] : vector<5x5xf32> to vector<5xf32>
    %267 = vector.shape_cast %266 : vector<5xf32> to vector<5x1xf32>
    %268 = vector.broadcast %267 : vector<5x1xf32> to vector<5x5xf32>
    %269 = arith.subf %265, %268 : vector<5x5xf32>
    %270 = math.exp %269 : vector<5x5xf32>
    %cst_94 = arith.constant dense<0.000000e+00> : vector<5xf32>
    %271 = vector.multi_reduction <add>, %270, %cst_94 [1] : vector<5x5xf32> to vector<5xf32>
    %272 = vector.shape_cast %271 : vector<5xf32> to vector<5x1xf32>
    %273 = tpu.reciprocal %272 {approx = true} : vector<5x1xf32> -> vector<5x1xf32>
    %274 = vector.broadcast %273 : vector<5x1xf32> to vector<5x5xf32>
    %275 = arith.mulf %270, %274 : vector<5x5xf32>
    %276 = arith.truncf %275 : vector<5x5xf32> to vector<5x5xbf16>
    %cst_95 = arith.constant dense<0.000000e+00> : vector<5x16xf32>
    %277 = tpu.matmul %276, %264, %cst_95 {dimension_numbers = #tpu.dot_dimension_numbers<[1], [0], [0], [1], [0, 0, 1, 1], [], []>} : vector<5x5xbf16>, vector<5x16xbf16>, vector<5x16xf32> -> vector<5x16xf32>
    %278 = vector.extract_strided_slice %245 {offsets = [0, 32], sizes = [5, 16], strides = [1, 1]} : vector<5x384xbf16> to vector<5x16xbf16>
    %279 = vector.extract_strided_slice %245 {offsets = [0, 160], sizes = [5, 16], strides = [1, 1]} : vector<5x384xbf16> to vector<5x16xbf16>
    %280 = vector.extract_strided_slice %245 {offsets = [0, 288], sizes = [5, 16], strides = [1, 1]} : vector<5x384xbf16> to vector<5x16xbf16>
    %cst_96 = arith.constant dense<0.000000e+00> : vector<5x5xf32>
    %281 = tpu.matmul %278, %279, %cst_96 {dimension_numbers = #tpu.dot_dimension_numbers<[1], [1], [0], [0], [0, 0, 1, 0], [], []>} : vector<5x16xbf16>, vector<5x16xbf16>, vector<5x5xf32> -> vector<5x5xf32>
    %cst_97 = arith.constant dense<0xFF800000> : vector<5xf32>
    %282 = vector.multi_reduction <maximumf>, %281, %cst_97 [1] : vector<5x5xf32> to vector<5xf32>
    %283 = vector.shape_cast %282 : vector<5xf32> to vector<5x1xf32>
    %284 = vector.broadcast %283 : vector<5x1xf32> to vector<5x5xf32>
    %285 = arith.subf %281, %284 : vector<5x5xf32>
    %286 = math.exp %285 : vector<5x5xf32>
    %cst_98 = arith.constant dense<0.000000e+00> : vector<5xf32>
    %287 = vector.multi_reduction <add>, %286, %cst_98 [1] : vector<5x5xf32> to vector<5xf32>
    %288 = vector.shape_cast %287 : vector<5xf32> to vector<5x1xf32>
    %289 = tpu.reciprocal %288 {approx = true} : vector<5x1xf32> -> vector<5x1xf32>
    %290 = vector.broadcast %289 : vector<5x1xf32> to vector<5x5xf32>
    %291 = arith.mulf %286, %290 : vector<5x5xf32>
    %292 = arith.truncf %291 : vector<5x5xf32> to vector<5x5xbf16>
    %cst_99 = arith.constant dense<0.000000e+00> : vector<5x16xf32>
    %293 = tpu.matmul %292, %280, %cst_99 {dimension_numbers = #tpu.dot_dimension_numbers<[1], [0], [0], [1], [0, 0, 1, 1], [], []>} : vector<5x5xbf16>, vector<5x16xbf16>, vector<5x16xf32> -> vector<5x16xf32>
    %294 = vector.extract_strided_slice %245 {offsets = [0, 48], sizes = [5, 16], strides = [1, 1]} : vector<5x384xbf16> to vector<5x16xbf16>
    %295 = vector.extract_strided_slice %245 {offsets = [0, 176], sizes = [5, 16], strides = [1, 1]} : vector<5x384xbf16> to vector<5x16xbf16>
    %296 = vector.extract_strided_slice %245 {offsets = [0, 304], sizes = [5, 16], strides = [1, 1]} : vector<5x384xbf16> to vector<5x16xbf16>
    %cst_100 = arith.constant dense<0.000000e+00> : vector<5x5xf32>
    %297 = tpu.matmul %294, %295, %cst_100 {dimension_numbers = #tpu.dot_dimension_numbers<[1], [1], [0], [0], [0, 0, 1, 0], [], []>} : vector<5x16xbf16>, vector<5x16xbf16>, vector<5x5xf32> -> vector<5x5xf32>
    %cst_101 = arith.constant dense<0xFF800000> : vector<5xf32>
    %298 = vector.multi_reduction <maximumf>, %297, %cst_101 [1] : vector<5x5xf32> to vector<5xf32>
    %299 = vector.shape_cast %298 : vector<5xf32> to vector<5x1xf32>
    %300 = vector.broadcast %299 : vector<5x1xf32> to vector<5x5xf32>
    %301 = arith.subf %297, %300 : vector<5x5xf32>
    %302 = math.exp %301 : vector<5x5xf32>
    %cst_102 = arith.constant dense<0.000000e+00> : vector<5xf32>
    %303 = vector.multi_reduction <add>, %302, %cst_102 [1] : vector<5x5xf32> to vector<5xf32>
    %304 = vector.shape_cast %303 : vector<5xf32> to vector<5x1xf32>
    %305 = tpu.reciprocal %304 {approx = true} : vector<5x1xf32> -> vector<5x1xf32>
    %306 = vector.broadcast %305 : vector<5x1xf32> to vector<5x5xf32>
    %307 = arith.mulf %302, %306 : vector<5x5xf32>
    %308 = arith.truncf %307 : vector<5x5xf32> to vector<5x5xbf16>
    %cst_103 = arith.constant dense<0.000000e+00> : vector<5x16xf32>
    %309 = tpu.matmul %308, %296, %cst_103 {dimension_numbers = #tpu.dot_dimension_numbers<[1], [0], [0], [1], [0, 0, 1, 1], [], []>} : vector<5x5xbf16>, vector<5x16xbf16>, vector<5x16xf32> -> vector<5x16xf32>
    %310 = vector.extract_strided_slice %245 {offsets = [0, 64], sizes = [5, 16], strides = [1, 1]} : vector<5x384xbf16> to vector<5x16xbf16>
    %311 = vector.extract_strided_slice %245 {offsets = [0, 192], sizes = [5, 16], strides = [1, 1]} : vector<5x384xbf16> to vector<5x16xbf16>
    %312 = vector.extract_strided_slice %245 {offsets = [0, 320], sizes = [5, 16], strides = [1, 1]} : vector<5x384xbf16> to vector<5x16xbf16>
    %cst_104 = arith.constant dense<0.000000e+00> : vector<5x5xf32>
    %313 = tpu.matmul %310, %311, %cst_104 {dimension_numbers = #tpu.dot_dimension_numbers<[1], [1], [0], [0], [0, 0, 1, 0], [], []>} : vector<5x16xbf16>, vector<5x16xbf16>, vector<5x5xf32> -> vector<5x5xf32>
    %cst_105 = arith.constant dense<0xFF800000> : vector<5xf32>
    %314 = vector.multi_reduction <maximumf>, %313, %cst_105 [1] : vector<5x5xf32> to vector<5xf32>
    %315 = vector.shape_cast %314 : vector<5xf32> to vector<5x1xf32>
    %316 = vector.broadcast %315 : vector<5x1xf32> to vector<5x5xf32>
    %317 = arith.subf %313, %316 : vector<5x5xf32>
    %318 = math.exp %317 : vector<5x5xf32>
    %cst_106 = arith.constant dense<0.000000e+00> : vector<5xf32>
    %319 = vector.multi_reduction <add>, %318, %cst_106 [1] : vector<5x5xf32> to vector<5xf32>
    %320 = vector.shape_cast %319 : vector<5xf32> to vector<5x1xf32>
    %321 = tpu.reciprocal %320 {approx = true} : vector<5x1xf32> -> vector<5x1xf32>
    %322 = vector.broadcast %321 : vector<5x1xf32> to vector<5x5xf32>
    %323 = arith.mulf %318, %322 : vector<5x5xf32>
    %324 = arith.truncf %323 : vector<5x5xf32> to vector<5x5xbf16>
    %cst_107 = arith.constant dense<0.000000e+00> : vector<5x16xf32>
    %325 = tpu.matmul %324, %312, %cst_107 {dimension_numbers = #tpu.dot_dimension_numbers<[1], [0], [0], [1], [0, 0, 1, 1], [], []>} : vector<5x5xbf16>, vector<5x16xbf16>, vector<5x16xf32> -> vector<5x16xf32>
    %326 = vector.extract_strided_slice %245 {offsets = [0, 80], sizes = [5, 16], strides = [1, 1]} : vector<5x384xbf16> to vector<5x16xbf16>
    %327 = vector.extract_strided_slice %245 {offsets = [0, 208], sizes = [5, 16], strides = [1, 1]} : vector<5x384xbf16> to vector<5x16xbf16>
    %328 = vector.extract_strided_slice %245 {offsets = [0, 336], sizes = [5, 16], strides = [1, 1]} : vector<5x384xbf16> to vector<5x16xbf16>
    %cst_108 = arith.constant dense<0.000000e+00> : vector<5x5xf32>
    %329 = tpu.matmul %326, %327, %cst_108 {dimension_numbers = #tpu.dot_dimension_numbers<[1], [1], [0], [0], [0, 0, 1, 0], [], []>} : vector<5x16xbf16>, vector<5x16xbf16>, vector<5x5xf32> -> vector<5x5xf32>
    %cst_109 = arith.constant dense<0xFF800000> : vector<5xf32>
    %330 = vector.multi_reduction <maximumf>, %329, %cst_109 [1] : vector<5x5xf32> to vector<5xf32>
    %331 = vector.shape_cast %330 : vector<5xf32> to vector<5x1xf32>
    %332 = vector.broadcast %331 : vector<5x1xf32> to vector<5x5xf32>
    %333 = arith.subf %329, %332 : vector<5x5xf32>
    %334 = math.exp %333 : vector<5x5xf32>
    %cst_110 = arith.constant dense<0.000000e+00> : vector<5xf32>
    %335 = vector.multi_reduction <add>, %334, %cst_110 [1] : vector<5x5xf32> to vector<5xf32>
    %336 = vector.shape_cast %335 : vector<5xf32> to vector<5x1xf32>
    %337 = tpu.reciprocal %336 {approx = true} : vector<5x1xf32> -> vector<5x1xf32>
    %338 = vector.broadcast %337 : vector<5x1xf32> to vector<5x5xf32>
    %339 = arith.mulf %334, %338 : vector<5x5xf32>
    %340 = arith.truncf %339 : vector<5x5xf32> to vector<5x5xbf16>
    %cst_111 = arith.constant dense<0.000000e+00> : vector<5x16xf32>
    %341 = tpu.matmul %340, %328, %cst_111 {dimension_numbers = #tpu.dot_dimension_numbers<[1], [0], [0], [1], [0, 0, 1, 1], [], []>} : vector<5x5xbf16>, vector<5x16xbf16>, vector<5x16xf32> -> vector<5x16xf32>
    %342 = vector.extract_strided_slice %245 {offsets = [0, 96], sizes = [5, 16], strides = [1, 1]} : vector<5x384xbf16> to vector<5x16xbf16>
    %343 = vector.extract_strided_slice %245 {offsets = [0, 224], sizes = [5, 16], strides = [1, 1]} : vector<5x384xbf16> to vector<5x16xbf16>
    %344 = vector.extract_strided_slice %245 {offsets = [0, 352], sizes = [5, 16], strides = [1, 1]} : vector<5x384xbf16> to vector<5x16xbf16>
    %cst_112 = arith.constant dense<0.000000e+00> : vector<5x5xf32>
    %345 = tpu.matmul %342, %343, %cst_112 {dimension_numbers = #tpu.dot_dimension_numbers<[1], [1], [0], [0], [0, 0, 1, 0], [], []>} : vector<5x16xbf16>, vector<5x16xbf16>, vector<5x5xf32> -> vector<5x5xf32>
    %cst_113 = arith.constant dense<0xFF800000> : vector<5xf32>
    %346 = vector.multi_reduction <maximumf>, %345, %cst_113 [1] : vector<5x5xf32> to vector<5xf32>
    %347 = vector.shape_cast %346 : vector<5xf32> to vector<5x1xf32>
    %348 = vector.broadcast %347 : vector<5x1xf32> to vector<5x5xf32>
    %349 = arith.subf %345, %348 : vector<5x5xf32>
    %350 = math.exp %349 : vector<5x5xf32>
    %cst_114 = arith.constant dense<0.000000e+00> : vector<5xf32>
    %351 = vector.multi_reduction <add>, %350, %cst_114 [1] : vector<5x5xf32> to vector<5xf32>
    %352 = vector.shape_cast %351 : vector<5xf32> to vector<5x1xf32>
    %353 = tpu.reciprocal %352 {approx = true} : vector<5x1xf32> -> vector<5x1xf32>
    %354 = vector.broadcast %353 : vector<5x1xf32> to vector<5x5xf32>
    %355 = arith.mulf %350, %354 : vector<5x5xf32>
    %356 = arith.truncf %355 : vector<5x5xf32> to vector<5x5xbf16>
    %cst_115 = arith.constant dense<0.000000e+00> : vector<5x16xf32>
    %357 = tpu.matmul %356, %344, %cst_115 {dimension_numbers = #tpu.dot_dimension_numbers<[1], [0], [0], [1], [0, 0, 1, 1], [], []>} : vector<5x5xbf16>, vector<5x16xbf16>, vector<5x16xf32> -> vector<5x16xf32>
    %358 = vector.extract_strided_slice %245 {offsets = [0, 112], sizes = [5, 16], strides = [1, 1]} : vector<5x384xbf16> to vector<5x16xbf16>
    %359 = vector.extract_strided_slice %245 {offsets = [0, 240], sizes = [5, 16], strides = [1, 1]} : vector<5x384xbf16> to vector<5x16xbf16>
    %360 = vector.extract_strided_slice %245 {offsets = [0, 368], sizes = [5, 16], strides = [1, 1]} : vector<5x384xbf16> to vector<5x16xbf16>
    %cst_116 = arith.constant dense<0.000000e+00> : vector<5x5xf32>
    %361 = tpu.matmul %358, %359, %cst_116 {dimension_numbers = #tpu.dot_dimension_numbers<[1], [1], [0], [0], [0, 0, 1, 0], [], []>} : vector<5x16xbf16>, vector<5x16xbf16>, vector<5x5xf32> -> vector<5x5xf32>
    %cst_117 = arith.constant dense<0xFF800000> : vector<5xf32>
    %362 = vector.multi_reduction <maximumf>, %361, %cst_117 [1] : vector<5x5xf32> to vector<5xf32>
    %363 = vector.shape_cast %362 : vector<5xf32> to vector<5x1xf32>
    %364 = vector.broadcast %363 : vector<5x1xf32> to vector<5x5xf32>
    %365 = arith.subf %361, %364 : vector<5x5xf32>
    %366 = math.exp %365 : vector<5x5xf32>
    %cst_118 = arith.constant dense<0.000000e+00> : vector<5xf32>
    %367 = vector.multi_reduction <add>, %366, %cst_118 [1] : vector<5x5xf32> to vector<5xf32>
    %368 = vector.shape_cast %367 : vector<5xf32> to vector<5x1xf32>
    %369 = tpu.reciprocal %368 {approx = true} : vector<5x1xf32> -> vector<5x1xf32>
    %370 = vector.broadcast %369 : vector<5x1xf32> to vector<5x5xf32>
    %371 = arith.mulf %366, %370 : vector<5x5xf32>
    %372 = arith.truncf %371 : vector<5x5xf32> to vector<5x5xbf16>
    %cst_119 = arith.constant dense<0.000000e+00> : vector<5x16xf32>
    %373 = tpu.matmul %372, %360, %cst_119 {dimension_numbers = #tpu.dot_dimension_numbers<[1], [0], [0], [1], [0, 0, 1, 1], [], []>} : vector<5x5xbf16>, vector<5x16xbf16>, vector<5x16xf32> -> vector<5x16xf32>
    %374 = tpu.concatenate %261, %277, %293, %309, %325, %341, %357, %373 in 1 : vector<5x16xf32>, vector<5x16xf32>, vector<5x16xf32>, vector<5x16xf32>, vector<5x16xf32>, vector<5x16xf32>, vector<5x16xf32>, vector<5x16xf32> -> vector<5x128xf32>
    %375 = arith.addf %220, %374 : vector<5x128xf32>
    %cst_120 = arith.constant dense<0.000000e+00> : vector<5xf32>
    %376 = vector.multi_reduction <add>, %375, %cst_120 [1] : vector<5x128xf32> to vector<5xf32>
    %377 = vector.shape_cast %376 : vector<5xf32> to vector<5x1xf32>
    %cst_121 = arith.constant 1.280000e+02 : f32
    %378 = vector.broadcast %cst_121 : f32 to vector<5x1xf32>
    %379 = arith.divf %377, %378 : vector<5x1xf32>
    %380 = vector.broadcast %379 : vector<5x1xf32> to vector<5x128xf32>
    %381 = arith.subf %375, %380 : vector<5x128xf32>
    %382 = arith.mulf %381, %381 : vector<5x128xf32>
    %cst_122 = arith.constant dense<0.000000e+00> : vector<5xf32>
    %383 = vector.multi_reduction <add>, %382, %cst_122 [1] : vector<5x128xf32> to vector<5xf32>
    %384 = vector.shape_cast %383 : vector<5xf32> to vector<5x1xf32>
    %cst_123 = arith.constant 1.280000e+02 : f32
    %385 = vector.broadcast %cst_123 : f32 to vector<5x1xf32>
    %386 = arith.divf %384, %385 : vector<5x1xf32>
    %cst_124 = arith.constant 9.99999974E-6 : f32
    %387 = vector.broadcast %cst_124 : f32 to vector<5x1xf32>
    %388 = arith.addf %386, %387 : vector<5x1xf32>
    %389 = math.rsqrt %388 : vector<5x1xf32>
    %390 = vector.broadcast %389 : vector<5x1xf32> to vector<5x128xf32>
    %391 = arith.mulf %381, %390 : vector<5x128xf32>
    %392 = vector.broadcast %16 : vector<1x128xf32> to vector<5x128xf32>
    %393 = arith.mulf %391, %392 : vector<5x128xf32>
    %394 = vector.broadcast %17 : vector<1x128xf32> to vector<5x128xf32>
    %395 = arith.addf %393, %394 : vector<5x128xf32>
    %396 = arith.truncf %395 : vector<5x128xf32> to vector<5x128xbf16>
    %cst_125 = arith.constant dense<0.000000e+00> : vector<5x2048xf32>
    %397 = tpu.matmul %396, %20, %cst_125 {dimension_numbers = #tpu.dot_dimension_numbers<[1], [0], [0], [1], [0, 0, 1, 1], [], []>} : vector<5x128xbf16>, vector<128x2048xbf16>, vector<5x2048xf32> -> vector<5x2048xf32>
    %398 = vector.broadcast %21 : vector<1x2048xf32> to vector<5x2048xf32>
    %399 = arith.addf %397, %398 : vector<5x2048xf32>
    %cst_126 = arith.constant 5.000000e-01 : f32
    %400 = vector.broadcast %cst_126 : f32 to vector<5x2048xf32>
    %401 = arith.mulf %400, %399 : vector<5x2048xf32>
    %cst_127 = arith.constant 4.471500e-02 : f32
    %402 = vector.broadcast %cst_127 : f32 to vector<5x2048xf32>
    %403 = arith.mulf %402, %399 : vector<5x2048xf32>
    %404 = arith.mulf %403, %399 : vector<5x2048xf32>
    %405 = arith.mulf %404, %399 : vector<5x2048xf32>
    %406 = arith.addf %399, %405 : vector<5x2048xf32>
    %cst_128 = arith.constant 0.797884583 : f32
    %407 = vector.broadcast %cst_128 : f32 to vector<5x2048xf32>
    %408 = arith.mulf %407, %406 : vector<5x2048xf32>
    %409 = math.tanh %408 : vector<5x2048xf32>
    %cst_129 = arith.constant 1.000000e+00 : f32
    %410 = vector.broadcast %cst_129 : f32 to vector<5x2048xf32>
    %411 = arith.addf %410, %409 : vector<5x2048xf32>
    %412 = arith.mulf %401, %411 : vector<5x2048xf32>
    %413 = arith.truncf %412 : vector<5x2048xf32> to vector<5x2048xbf16>
    %cst_130 = arith.constant dense<0.000000e+00> : vector<5x128xf32>
    %414 = tpu.matmul %413, %22, %cst_130 {dimension_numbers = #tpu.dot_dimension_numbers<[1], [0], [0], [1], [0, 0, 1, 1], [], []>} : vector<5x2048xbf16>, vector<2048x128xbf16>, vector<5x128xf32> -> vector<5x128xf32>
    %415 = vector.broadcast %23 : vector<1x128xf32> to vector<5x128xf32>
    %416 = arith.addf %414, %415 : vector<5x128xf32>
    %417 = arith.addf %375, %416 : vector<5x128xf32>
    %cst_131 = arith.constant dense<0.000000e+00> : vector<5xf32>
    %418 = vector.multi_reduction <add>, %417, %cst_131 [1] : vector<5x128xf32> to vector<5xf32>
    %419 = vector.shape_cast %418 : vector<5xf32> to vector<5x1xf32>
    %cst_132 = arith.constant 1.280000e+02 : f32
    %420 = vector.broadcast %cst_132 : f32 to vector<5x1xf32>
    %421 = arith.divf %419, %420 : vector<5x1xf32>
    %422 = vector.broadcast %421 : vector<5x1xf32> to vector<5x128xf32>
    %423 = arith.subf %417, %422 : vector<5x128xf32>
    %424 = arith.mulf %423, %423 : vector<5x128xf32>
    %cst_133 = arith.constant dense<0.000000e+00> : vector<5xf32>
    %425 = vector.multi_reduction <add>, %424, %cst_133 [1] : vector<5x128xf32> to vector<5xf32>
    %426 = vector.shape_cast %425 : vector<5xf32> to vector<5x1xf32>
    %cst_134 = arith.constant 1.280000e+02 : f32
    %427 = vector.broadcast %cst_134 : f32 to vector<5x1xf32>
    %428 = arith.divf %426, %427 : vector<5x1xf32>
    %cst_135 = arith.constant 9.99999974E-6 : f32
    %429 = vector.broadcast %cst_135 : f32 to vector<5x1xf32>
    %430 = arith.addf %428, %429 : vector<5x1xf32>
    %431 = math.rsqrt %430 : vector<5x1xf32>
    %432 = vector.broadcast %431 : vector<5x1xf32> to vector<5x128xf32>
    %433 = arith.mulf %423, %432 : vector<5x128xf32>
    %434 = vector.broadcast %16 : vector<1x128xf32> to vector<5x128xf32>
    %435 = arith.mulf %433, %434 : vector<5x128xf32>
    %436 = vector.broadcast %17 : vector<1x128xf32> to vector<5x128xf32>
    %437 = arith.addf %435, %436 : vector<5x128xf32>
    %438 = arith.truncf %437 : vector<5x128xf32> to vector<5x128xbf16>
    %cst_136 = arith.constant dense<0.000000e+00> : vector<5x384xf32>
    %439 = tpu.matmul %438, %18, %cst_136 {dimension_numbers = #tpu.dot_dimension_numbers<[1], [0], [0], [1], [0, 0, 1, 1], [], []>} : vector<5x128xbf16>, vector<128x384xbf16>, vector<5x384xf32> -> vector<5x384xf32>
    %440 = vector.broadcast %19 : vector<1x384xf32> to vector<5x384xf32>
    %441 = arith.addf %439, %440 : vector<5x384xf32>
    %442 = arith.truncf %441 : vector<5x384xf32> to vector<5x384xbf16>
    %443 = vector.extract_strided_slice %442 {offsets = [0, 0], sizes = [5, 16], strides = [1, 1]} : vector<5x384xbf16> to vector<5x16xbf16>
    %444 = vector.extract_strided_slice %442 {offsets = [0, 128], sizes = [5, 16], strides = [1, 1]} : vector<5x384xbf16> to vector<5x16xbf16>
    %445 = vector.extract_strided_slice %442 {offsets = [0, 256], sizes = [5, 16], strides = [1, 1]} : vector<5x384xbf16> to vector<5x16xbf16>
    %cst_137 = arith.constant dense<0.000000e+00> : vector<5x5xf32>
    %446 = tpu.matmul %443, %444, %cst_137 {dimension_numbers = #tpu.dot_dimension_numbers<[1], [1], [0], [0], [0, 0, 1, 0], [], []>} : vector<5x16xbf16>, vector<5x16xbf16>, vector<5x5xf32> -> vector<5x5xf32>
    %cst_138 = arith.constant dense<0xFF800000> : vector<5xf32>
    %447 = vector.multi_reduction <maximumf>, %446, %cst_138 [1] : vector<5x5xf32> to vector<5xf32>
    %448 = vector.shape_cast %447 : vector<5xf32> to vector<5x1xf32>
    %449 = vector.broadcast %448 : vector<5x1xf32> to vector<5x5xf32>
    %450 = arith.subf %446, %449 : vector<5x5xf32>
    %451 = math.exp %450 : vector<5x5xf32>
    %cst_139 = arith.constant dense<0.000000e+00> : vector<5xf32>
    %452 = vector.multi_reduction <add>, %451, %cst_139 [1] : vector<5x5xf32> to vector<5xf32>
    %453 = vector.shape_cast %452 : vector<5xf32> to vector<5x1xf32>
    %454 = tpu.reciprocal %453 {approx = true} : vector<5x1xf32> -> vector<5x1xf32>
    %455 = vector.broadcast %454 : vector<5x1xf32> to vector<5x5xf32>
    %456 = arith.mulf %451, %455 : vector<5x5xf32>
    %457 = arith.truncf %456 : vector<5x5xf32> to vector<5x5xbf16>
    %cst_140 = arith.constant dense<0.000000e+00> : vector<5x16xf32>
    %458 = tpu.matmul %457, %445, %cst_140 {dimension_numbers = #tpu.dot_dimension_numbers<[1], [0], [0], [1], [0, 0, 1, 1], [], []>} : vector<5x5xbf16>, vector<5x16xbf16>, vector<5x16xf32> -> vector<5x16xf32>
    %459 = vector.extract_strided_slice %442 {offsets = [0, 16], sizes = [5, 16], strides = [1, 1]} : vector<5x384xbf16> to vector<5x16xbf16>
    %460 = vector.extract_strided_slice %442 {offsets = [0, 144], sizes = [5, 16], strides = [1, 1]} : vector<5x384xbf16> to vector<5x16xbf16>
    %461 = vector.extract_strided_slice %442 {offsets = [0, 272], sizes = [5, 16], strides = [1, 1]} : vector<5x384xbf16> to vector<5x16xbf16>
    %cst_141 = arith.constant dense<0.000000e+00> : vector<5x5xf32>
    %462 = tpu.matmul %459, %460, %cst_141 {dimension_numbers = #tpu.dot_dimension_numbers<[1], [1], [0], [0], [0, 0, 1, 0], [], []>} : vector<5x16xbf16>, vector<5x16xbf16>, vector<5x5xf32> -> vector<5x5xf32>
    %cst_142 = arith.constant dense<0xFF800000> : vector<5xf32>
    %463 = vector.multi_reduction <maximumf>, %462, %cst_142 [1] : vector<5x5xf32> to vector<5xf32>
    %464 = vector.shape_cast %463 : vector<5xf32> to vector<5x1xf32>
    %465 = vector.broadcast %464 : vector<5x1xf32> to vector<5x5xf32>
    %466 = arith.subf %462, %465 : vector<5x5xf32>
    %467 = math.exp %466 : vector<5x5xf32>
    %cst_143 = arith.constant dense<0.000000e+00> : vector<5xf32>
    %468 = vector.multi_reduction <add>, %467, %cst_143 [1] : vector<5x5xf32> to vector<5xf32>
    %469 = vector.shape_cast %468 : vector<5xf32> to vector<5x1xf32>
    %470 = tpu.reciprocal %469 {approx = true} : vector<5x1xf32> -> vector<5x1xf32>
    %471 = vector.broadcast %470 : vector<5x1xf32> to vector<5x5xf32>
    %472 = arith.mulf %467, %471 : vector<5x5xf32>
    %473 = arith.truncf %472 : vector<5x5xf32> to vector<5x5xbf16>
    %cst_144 = arith.constant dense<0.000000e+00> : vector<5x16xf32>
    %474 = tpu.matmul %473, %461, %cst_144 {dimension_numbers = #tpu.dot_dimension_numbers<[1], [0], [0], [1], [0, 0, 1, 1], [], []>} : vector<5x5xbf16>, vector<5x16xbf16>, vector<5x16xf32> -> vector<5x16xf32>
    %475 = vector.extract_strided_slice %442 {offsets = [0, 32], sizes = [5, 16], strides = [1, 1]} : vector<5x384xbf16> to vector<5x16xbf16>
    %476 = vector.extract_strided_slice %442 {offsets = [0, 160], sizes = [5, 16], strides = [1, 1]} : vector<5x384xbf16> to vector<5x16xbf16>
    %477 = vector.extract_strided_slice %442 {offsets = [0, 288], sizes = [5, 16], strides = [1, 1]} : vector<5x384xbf16> to vector<5x16xbf16>
    %cst_145 = arith.constant dense<0.000000e+00> : vector<5x5xf32>
    %478 = tpu.matmul %475, %476, %cst_145 {dimension_numbers = #tpu.dot_dimension_numbers<[1], [1], [0], [0], [0, 0, 1, 0], [], []>} : vector<5x16xbf16>, vector<5x16xbf16>, vector<5x5xf32> -> vector<5x5xf32>
    %cst_146 = arith.constant dense<0xFF800000> : vector<5xf32>
    %479 = vector.multi_reduction <maximumf>, %478, %cst_146 [1] : vector<5x5xf32> to vector<5xf32>
    %480 = vector.shape_cast %479 : vector<5xf32> to vector<5x1xf32>
    %481 = vector.broadcast %480 : vector<5x1xf32> to vector<5x5xf32>
    %482 = arith.subf %478, %481 : vector<5x5xf32>
    %483 = math.exp %482 : vector<5x5xf32>
    %cst_147 = arith.constant dense<0.000000e+00> : vector<5xf32>
    %484 = vector.multi_reduction <add>, %483, %cst_147 [1] : vector<5x5xf32> to vector<5xf32>
    %485 = vector.shape_cast %484 : vector<5xf32> to vector<5x1xf32>
    %486 = tpu.reciprocal %485 {approx = true} : vector<5x1xf32> -> vector<5x1xf32>
    %487 = vector.broadcast %486 : vector<5x1xf32> to vector<5x5xf32>
    %488 = arith.mulf %483, %487 : vector<5x5xf32>
    %489 = arith.truncf %488 : vector<5x5xf32> to vector<5x5xbf16>
    %cst_148 = arith.constant dense<0.000000e+00> : vector<5x16xf32>
    %490 = tpu.matmul %489, %477, %cst_148 {dimension_numbers = #tpu.dot_dimension_numbers<[1], [0], [0], [1], [0, 0, 1, 1], [], []>} : vector<5x5xbf16>, vector<5x16xbf16>, vector<5x16xf32> -> vector<5x16xf32>
    %491 = vector.extract_strided_slice %442 {offsets = [0, 48], sizes = [5, 16], strides = [1, 1]} : vector<5x384xbf16> to vector<5x16xbf16>
    %492 = vector.extract_strided_slice %442 {offsets = [0, 176], sizes = [5, 16], strides = [1, 1]} : vector<5x384xbf16> to vector<5x16xbf16>
    %493 = vector.extract_strided_slice %442 {offsets = [0, 304], sizes = [5, 16], strides = [1, 1]} : vector<5x384xbf16> to vector<5x16xbf16>
    %cst_149 = arith.constant dense<0.000000e+00> : vector<5x5xf32>
    %494 = tpu.matmul %491, %492, %cst_149 {dimension_numbers = #tpu.dot_dimension_numbers<[1], [1], [0], [0], [0, 0, 1, 0], [], []>} : vector<5x16xbf16>, vector<5x16xbf16>, vector<5x5xf32> -> vector<5x5xf32>
    %cst_150 = arith.constant dense<0xFF800000> : vector<5xf32>
    %495 = vector.multi_reduction <maximumf>, %494, %cst_150 [1] : vector<5x5xf32> to vector<5xf32>
    %496 = vector.shape_cast %495 : vector<5xf32> to vector<5x1xf32>
    %497 = vector.broadcast %496 : vector<5x1xf32> to vector<5x5xf32>
    %498 = arith.subf %494, %497 : vector<5x5xf32>
    %499 = math.exp %498 : vector<5x5xf32>
    %cst_151 = arith.constant dense<0.000000e+00> : vector<5xf32>
    %500 = vector.multi_reduction <add>, %499, %cst_151 [1] : vector<5x5xf32> to vector<5xf32>
    %501 = vector.shape_cast %500 : vector<5xf32> to vector<5x1xf32>
    %502 = tpu.reciprocal %501 {approx = true} : vector<5x1xf32> -> vector<5x1xf32>
    %503 = vector.broadcast %502 : vector<5x1xf32> to vector<5x5xf32>
    %504 = arith.mulf %499, %503 : vector<5x5xf32>
    %505 = arith.truncf %504 : vector<5x5xf32> to vector<5x5xbf16>
    %cst_152 = arith.constant dense<0.000000e+00> : vector<5x16xf32>
    %506 = tpu.matmul %505, %493, %cst_152 {dimension_numbers = #tpu.dot_dimension_numbers<[1], [0], [0], [1], [0, 0, 1, 1], [], []>} : vector<5x5xbf16>, vector<5x16xbf16>, vector<5x16xf32> -> vector<5x16xf32>
    %507 = vector.extract_strided_slice %442 {offsets = [0, 64], sizes = [5, 16], strides = [1, 1]} : vector<5x384xbf16> to vector<5x16xbf16>
    %508 = vector.extract_strided_slice %442 {offsets = [0, 192], sizes = [5, 16], strides = [1, 1]} : vector<5x384xbf16> to vector<5x16xbf16>
    %509 = vector.extract_strided_slice %442 {offsets = [0, 320], sizes = [5, 16], strides = [1, 1]} : vector<5x384xbf16> to vector<5x16xbf16>
    %cst_153 = arith.constant dense<0.000000e+00> : vector<5x5xf32>
    %510 = tpu.matmul %507, %508, %cst_153 {dimension_numbers = #tpu.dot_dimension_numbers<[1], [1], [0], [0], [0, 0, 1, 0], [], []>} : vector<5x16xbf16>, vector<5x16xbf16>, vector<5x5xf32> -> vector<5x5xf32>
    %cst_154 = arith.constant dense<0xFF800000> : vector<5xf32>
    %511 = vector.multi_reduction <maximumf>, %510, %cst_154 [1] : vector<5x5xf32> to vector<5xf32>
    %512 = vector.shape_cast %511 : vector<5xf32> to vector<5x1xf32>
    %513 = vector.broadcast %512 : vector<5x1xf32> to vector<5x5xf32>
    %514 = arith.subf %510, %513 : vector<5x5xf32>
    %515 = math.exp %514 : vector<5x5xf32>
    %cst_155 = arith.constant dense<0.000000e+00> : vector<5xf32>
    %516 = vector.multi_reduction <add>, %515, %cst_155 [1] : vector<5x5xf32> to vector<5xf32>
    %517 = vector.shape_cast %516 : vector<5xf32> to vector<5x1xf32>
    %518 = tpu.reciprocal %517 {approx = true} : vector<5x1xf32> -> vector<5x1xf32>
    %519 = vector.broadcast %518 : vector<5x1xf32> to vector<5x5xf32>
    %520 = arith.mulf %515, %519 : vector<5x5xf32>
    %521 = arith.truncf %520 : vector<5x5xf32> to vector<5x5xbf16>
    %cst_156 = arith.constant dense<0.000000e+00> : vector<5x16xf32>
    %522 = tpu.matmul %521, %509, %cst_156 {dimension_numbers = #tpu.dot_dimension_numbers<[1], [0], [0], [1], [0, 0, 1, 1], [], []>} : vector<5x5xbf16>, vector<5x16xbf16>, vector<5x16xf32> -> vector<5x16xf32>
    %523 = vector.extract_strided_slice %442 {offsets = [0, 80], sizes = [5, 16], strides = [1, 1]} : vector<5x384xbf16> to vector<5x16xbf16>
    %524 = vector.extract_strided_slice %442 {offsets = [0, 208], sizes = [5, 16], strides = [1, 1]} : vector<5x384xbf16> to vector<5x16xbf16>
    %525 = vector.extract_strided_slice %442 {offsets = [0, 336], sizes = [5, 16], strides = [1, 1]} : vector<5x384xbf16> to vector<5x16xbf16>
    %cst_157 = arith.constant dense<0.000000e+00> : vector<5x5xf32>
    %526 = tpu.matmul %523, %524, %cst_157 {dimension_numbers = #tpu.dot_dimension_numbers<[1], [1], [0], [0], [0, 0, 1, 0], [], []>} : vector<5x16xbf16>, vector<5x16xbf16>, vector<5x5xf32> -> vector<5x5xf32>
    %cst_158 = arith.constant dense<0xFF800000> : vector<5xf32>
    %527 = vector.multi_reduction <maximumf>, %526, %cst_158 [1] : vector<5x5xf32> to vector<5xf32>
    %528 = vector.shape_cast %527 : vector<5xf32> to vector<5x1xf32>
    %529 = vector.broadcast %528 : vector<5x1xf32> to vector<5x5xf32>
    %530 = arith.subf %526, %529 : vector<5x5xf32>
    %531 = math.exp %530 : vector<5x5xf32>
    %cst_159 = arith.constant dense<0.000000e+00> : vector<5xf32>
    %532 = vector.multi_reduction <add>, %531, %cst_159 [1] : vector<5x5xf32> to vector<5xf32>
    %533 = vector.shape_cast %532 : vector<5xf32> to vector<5x1xf32>
    %534 = tpu.reciprocal %533 {approx = true} : vector<5x1xf32> -> vector<5x1xf32>
    %535 = vector.broadcast %534 : vector<5x1xf32> to vector<5x5xf32>
    %536 = arith.mulf %531, %535 : vector<5x5xf32>
    %537 = arith.truncf %536 : vector<5x5xf32> to vector<5x5xbf16>
    %cst_160 = arith.constant dense<0.000000e+00> : vector<5x16xf32>
    %538 = tpu.matmul %537, %525, %cst_160 {dimension_numbers = #tpu.dot_dimension_numbers<[1], [0], [0], [1], [0, 0, 1, 1], [], []>} : vector<5x5xbf16>, vector<5x16xbf16>, vector<5x16xf32> -> vector<5x16xf32>
    %539 = vector.extract_strided_slice %442 {offsets = [0, 96], sizes = [5, 16], strides = [1, 1]} : vector<5x384xbf16> to vector<5x16xbf16>
    %540 = vector.extract_strided_slice %442 {offsets = [0, 224], sizes = [5, 16], strides = [1, 1]} : vector<5x384xbf16> to vector<5x16xbf16>
    %541 = vector.extract_strided_slice %442 {offsets = [0, 352], sizes = [5, 16], strides = [1, 1]} : vector<5x384xbf16> to vector<5x16xbf16>
    %cst_161 = arith.constant dense<0.000000e+00> : vector<5x5xf32>
    %542 = tpu.matmul %539, %540, %cst_161 {dimension_numbers = #tpu.dot_dimension_numbers<[1], [1], [0], [0], [0, 0, 1, 0], [], []>} : vector<5x16xbf16>, vector<5x16xbf16>, vector<5x5xf32> -> vector<5x5xf32>
    %cst_162 = arith.constant dense<0xFF800000> : vector<5xf32>
    %543 = vector.multi_reduction <maximumf>, %542, %cst_162 [1] : vector<5x5xf32> to vector<5xf32>
    %544 = vector.shape_cast %543 : vector<5xf32> to vector<5x1xf32>
    %545 = vector.broadcast %544 : vector<5x1xf32> to vector<5x5xf32>
    %546 = arith.subf %542, %545 : vector<5x5xf32>
    %547 = math.exp %546 : vector<5x5xf32>
    %cst_163 = arith.constant dense<0.000000e+00> : vector<5xf32>
    %548 = vector.multi_reduction <add>, %547, %cst_163 [1] : vector<5x5xf32> to vector<5xf32>
    %549 = vector.shape_cast %548 : vector<5xf32> to vector<5x1xf32>
    %550 = tpu.reciprocal %549 {approx = true} : vector<5x1xf32> -> vector<5x1xf32>
    %551 = vector.broadcast %550 : vector<5x1xf32> to vector<5x5xf32>
    %552 = arith.mulf %547, %551 : vector<5x5xf32>
    %553 = arith.truncf %552 : vector<5x5xf32> to vector<5x5xbf16>
    %cst_164 = arith.constant dense<0.000000e+00> : vector<5x16xf32>
    %554 = tpu.matmul %553, %541, %cst_164 {dimension_numbers = #tpu.dot_dimension_numbers<[1], [0], [0], [1], [0, 0, 1, 1], [], []>} : vector<5x5xbf16>, vector<5x16xbf16>, vector<5x16xf32> -> vector<5x16xf32>
    %555 = vector.extract_strided_slice %442 {offsets = [0, 112], sizes = [5, 16], strides = [1, 1]} : vector<5x384xbf16> to vector<5x16xbf16>
    %556 = vector.extract_strided_slice %442 {offsets = [0, 240], sizes = [5, 16], strides = [1, 1]} : vector<5x384xbf16> to vector<5x16xbf16>
    %557 = vector.extract_strided_slice %442 {offsets = [0, 368], sizes = [5, 16], strides = [1, 1]} : vector<5x384xbf16> to vector<5x16xbf16>
    %cst_165 = arith.constant dense<0.000000e+00> : vector<5x5xf32>
    %558 = tpu.matmul %555, %556, %cst_165 {dimension_numbers = #tpu.dot_dimension_numbers<[1], [1], [0], [0], [0, 0, 1, 0], [], []>} : vector<5x16xbf16>, vector<5x16xbf16>, vector<5x5xf32> -> vector<5x5xf32>
    %cst_166 = arith.constant dense<0xFF800000> : vector<5xf32>
    %559 = vector.multi_reduction <maximumf>, %558, %cst_166 [1] : vector<5x5xf32> to vector<5xf32>
    %560 = vector.shape_cast %559 : vector<5xf32> to vector<5x1xf32>
    %561 = vector.broadcast %560 : vector<5x1xf32> to vector<5x5xf32>
    %562 = arith.subf %558, %561 : vector<5x5xf32>
    %563 = math.exp %562 : vector<5x5xf32>
    %cst_167 = arith.constant dense<0.000000e+00> : vector<5xf32>
    %564 = vector.multi_reduction <add>, %563, %cst_167 [1] : vector<5x5xf32> to vector<5xf32>
    %565 = vector.shape_cast %564 : vector<5xf32> to vector<5x1xf32>
    %566 = tpu.reciprocal %565 {approx = true} : vector<5x1xf32> -> vector<5x1xf32>
    %567 = vector.broadcast %566 : vector<5x1xf32> to vector<5x5xf32>
    %568 = arith.mulf %563, %567 : vector<5x5xf32>
    %569 = arith.truncf %568 : vector<5x5xf32> to vector<5x5xbf16>
    %cst_168 = arith.constant dense<0.000000e+00> : vector<5x16xf32>
    %570 = tpu.matmul %569, %557, %cst_168 {dimension_numbers = #tpu.dot_dimension_numbers<[1], [0], [0], [1], [0, 0, 1, 1], [], []>} : vector<5x5xbf16>, vector<5x16xbf16>, vector<5x16xf32> -> vector<5x16xf32>
    %571 = tpu.concatenate %458, %474, %490, %506, %522, %538, %554, %570 in 1 : vector<5x16xf32>, vector<5x16xf32>, vector<5x16xf32>, vector<5x16xf32>, vector<5x16xf32>, vector<5x16xf32>, vector<5x16xf32>, vector<5x16xf32> -> vector<5x128xf32>
    %572 = arith.addf %417, %571 : vector<5x128xf32>
    %cst_169 = arith.constant dense<0.000000e+00> : vector<5xf32>
    %573 = vector.multi_reduction <add>, %572, %cst_169 [1] : vector<5x128xf32> to vector<5xf32>
    %574 = vector.shape_cast %573 : vector<5xf32> to vector<5x1xf32>
    %cst_170 = arith.constant 1.280000e+02 : f32
    %575 = vector.broadcast %cst_170 : f32 to vector<5x1xf32>
    %576 = arith.divf %574, %575 : vector<5x1xf32>
    %577 = vector.broadcast %576 : vector<5x1xf32> to vector<5x128xf32>
    %578 = arith.subf %572, %577 : vector<5x128xf32>
    %579 = arith.mulf %578, %578 : vector<5x128xf32>
    %cst_171 = arith.constant dense<0.000000e+00> : vector<5xf32>
    %580 = vector.multi_reduction <add>, %579, %cst_171 [1] : vector<5x128xf32> to vector<5xf32>
    %581 = vector.shape_cast %580 : vector<5xf32> to vector<5x1xf32>
    %cst_172 = arith.constant 1.280000e+02 : f32
    %582 = vector.broadcast %cst_172 : f32 to vector<5x1xf32>
    %583 = arith.divf %581, %582 : vector<5x1xf32>
    %cst_173 = arith.constant 9.99999974E-6 : f32
    %584 = vector.broadcast %cst_173 : f32 to vector<5x1xf32>
    %585 = arith.addf %583, %584 : vector<5x1xf32>
    %586 = math.rsqrt %585 : vector<5x1xf32>
    %587 = vector.broadcast %586 : vector<5x1xf32> to vector<5x128xf32>
    %588 = arith.mulf %578, %587 : vector<5x128xf32>
    %589 = vector.broadcast %16 : vector<1x128xf32> to vector<5x128xf32>
    %590 = arith.mulf %588, %589 : vector<5x128xf32>
    %591 = vector.broadcast %17 : vector<1x128xf32> to vector<5x128xf32>
    %592 = arith.addf %590, %591 : vector<5x128xf32>
    %593 = arith.truncf %592 : vector<5x128xf32> to vector<5x128xbf16>
    %cst_174 = arith.constant dense<0.000000e+00> : vector<5x2048xf32>
    %594 = tpu.matmul %593, %20, %cst_174 {dimension_numbers = #tpu.dot_dimension_numbers<[1], [0], [0], [1], [0, 0, 1, 1], [], []>} : vector<5x128xbf16>, vector<128x2048xbf16>, vector<5x2048xf32> -> vector<5x2048xf32>
    %595 = vector.broadcast %21 : vector<1x2048xf32> to vector<5x2048xf32>
    %596 = arith.addf %594, %595 : vector<5x2048xf32>
    %cst_175 = arith.constant 5.000000e-01 : f32
    %597 = vector.broadcast %cst_175 : f32 to vector<5x2048xf32>
    %598 = arith.mulf %597, %596 : vector<5x2048xf32>
    %cst_176 = arith.constant 4.471500e-02 : f32
    %599 = vector.broadcast %cst_176 : f32 to vector<5x2048xf32>
    %600 = arith.mulf %599, %596 : vector<5x2048xf32>
    %601 = arith.mulf %600, %596 : vector<5x2048xf32>
    %602 = arith.mulf %601, %596 : vector<5x2048xf32>
    %603 = arith.addf %596, %602 : vector<5x2048xf32>
    %cst_177 = arith.constant 0.797884583 : f32
    %604 = vector.broadcast %cst_177 : f32 to vector<5x2048xf32>
    %605 = arith.mulf %604, %603 : vector<5x2048xf32>
    %606 = math.tanh %605 : vector<5x2048xf32>
    %cst_178 = arith.constant 1.000000e+00 : f32
    %607 = vector.broadcast %cst_178 : f32 to vector<5x2048xf32>
    %608 = arith.addf %607, %606 : vector<5x2048xf32>
    %609 = arith.mulf %598, %608 : vector<5x2048xf32>
    %610 = arith.truncf %609 : vector<5x2048xf32> to vector<5x2048xbf16>
    %cst_179 = arith.constant dense<0.000000e+00> : vector<5x128xf32>
    %611 = tpu.matmul %610, %22, %cst_179 {dimension_numbers = #tpu.dot_dimension_numbers<[1], [0], [0], [1], [0, 0, 1, 1], [], []>} : vector<5x2048xbf16>, vector<2048x128xbf16>, vector<5x128xf32> -> vector<5x128xf32>
    %612 = vector.broadcast %23 : vector<1x128xf32> to vector<5x128xf32>
    %613 = arith.addf %611, %612 : vector<5x128xf32>
    %614 = arith.addf %572, %613 : vector<5x128xf32>
    %615 = vector.extract_strided_slice %614 {offsets = [0, 0], sizes = [1, 128], strides = [1, 1]} : vector<5x128xf32> to vector<1x128xf32>
    %c0_180 = arith.constant 0 : index
    %c0_181 = arith.constant 0 : index
    %616 = vector.load %arg14[%c0_180, %c0_181] : memref<1x128xf32, #tpu.memory_space<vmem>>, vector<1x128xf32>
    %c0_182 = arith.constant 0 : index
    %c0_183 = arith.constant 0 : index
    %617 = vector.load %arg15[%c0_182, %c0_183] : memref<1x128xf32, #tpu.memory_space<vmem>>, vector<1x128xf32>
    %cst_184 = arith.constant dense<0.000000e+00> : vector<1xf32>
    %618 = vector.multi_reduction <add>, %615, %cst_184 [1] : vector<1x128xf32> to vector<1xf32>
    %619 = vector.shape_cast %618 : vector<1xf32> to vector<1x1xf32>
    %cst_185 = arith.constant 1.280000e+02 : f32
    %620 = vector.broadcast %cst_185 : f32 to vector<1x1xf32>
    %621 = arith.divf %619, %620 : vector<1x1xf32>
    %622 = vector.broadcast %621 : vector<1x1xf32> to vector<1x128xf32>
    %623 = arith.subf %615, %622 : vector<1x128xf32>
    %624 = arith.mulf %623, %623 : vector<1x128xf32>
    %cst_186 = arith.constant dense<0.000000e+00> : vector<1xf32>
    %625 = vector.multi_reduction <add>, %624, %cst_186 [1] : vector<1x128xf32> to vector<1xf32>
    %626 = vector.shape_cast %625 : vector<1xf32> to vector<1x1xf32>
    %cst_187 = arith.constant 1.280000e+02 : f32
    %627 = vector.broadcast %cst_187 : f32 to vector<1x1xf32>
    %628 = arith.divf %626, %627 : vector<1x1xf32>
    %cst_188 = arith.constant 9.99999974E-6 : f32
    %629 = vector.broadcast %cst_188 : f32 to vector<1x1xf32>
    %630 = arith.addf %628, %629 : vector<1x1xf32>
    %631 = math.rsqrt %630 : vector<1x1xf32>
    %632 = vector.broadcast %631 : vector<1x1xf32> to vector<1x128xf32>
    %633 = arith.mulf %623, %632 : vector<1x128xf32>
    %634 = arith.mulf %633, %616 : vector<1x128xf32>
    %635 = arith.addf %634, %617 : vector<1x128xf32>
    %636 = arith.truncf %635 : vector<1x128xf32> to vector<1x128xbf16>
    %c0_189 = arith.constant 0 : index
    %c0_190 = arith.constant 0 : index
    %637 = vector.load %arg16[%c0_189, %c0_190] : memref<128x128xbf16, #tpu.memory_space<vmem>>, vector<128x128xbf16>
    %cst_191 = arith.constant dense<0.000000e+00> : vector<1x128xf32>
    %638 = tpu.matmul %636, %637, %cst_191 {dimension_numbers = #tpu.dot_dimension_numbers<[1], [0], [0], [1], [0, 0, 1, 1], [], []>} : vector<1x128xbf16>, vector<128x128xbf16>, vector<1x128xf32> -> vector<1x128xf32>
    %c0_192 = arith.constant 0 : index
    %c0_193 = arith.constant 0 : index
    %639 = vector.load %arg17[%c0_192, %c0_193] : memref<1x128xf32, #tpu.memory_space<vmem>>, vector<1x128xf32>
    %640 = arith.addf %638, %639 : vector<1x128xf32>
    %c0_194 = arith.constant 0 : index
    %c0_195 = arith.constant 0 : index
    %c0_196 = arith.constant 0 : index
    %641 = vector.load %arg18[%c0_194, %c0_195, %c0_196] : memref<1x1x128xf32, #tpu.memory_space<vmem>>, vector<1x1x128xf32>
    %642 = vector.shape_cast %641 : vector<1x1x128xf32> to vector<1x128xf32>
    %643 = vector.shape_cast %640 : vector<1x128xf32> to vector<1x1x128xf32>
    tpu.vector_store %arg18[%c0_194, %c0_195, %c0_196], %643 {strides = array<i32>} : memref<1x1x128xf32, #tpu.memory_space<vmem>>, vector<1x1x128xf32>,
    return
  }
  func.func @transform_0(%arg0: i32) -> (i32, i32, i32) {
    %c0_i32 = arith.constant 0 : i32
    %c0_i32_0 = arith.constant 0 : i32
    %c0_i32_1 = arith.constant 0 : i32
    return %arg0, %c0_i32, %c0_i32_0 : i32, i32, i32
  }
  func.func @transform_1(%arg0: i32) -> (i32, i32, i32) {
    %c0_i32 = arith.constant 0 : i32
    %c0_i32_0 = arith.constant 0 : i32
    %c0_i32_1 = arith.constant 0 : i32
    %c0_i32_2 = arith.constant 0 : i32
    return %c0_i32, %c0_i32_0, %c0_i32_1 : i32, i32, i32
  }
  func.func @transform_2(%arg0: i32) -> (i32, i32, i32) {
    %c0_i32 = arith.constant 0 : i32
    %c0_i32_0 = arith.constant 0 : i32
    %c0_i32_1 = arith.constant 0 : i32
    %c0_i32_2 = arith.constant 0 : i32
    return %c0_i32, %c0_i32_0, %c0_i32_1 : i32, i32, i32
  }
  func.func @transform_3(%arg0: i32) -> (i32, i32) {
    %c0_i32 = arith.constant 0 : i32
    %c0_i32_0 = arith.constant 0 : i32
    %c0_i32_1 = arith.constant 0 : i32
    return %c0_i32, %c0_i32_0 : i32, i32
  }
  func.func @transform_4(%arg0: i32) -> (i32, i32) {
    %c0_i32 = arith.constant 0 : i32
    %c0_i32_0 = arith.constant 0 : i32
    %c0_i32_1 = arith.constant 0 : i32
    return %c0_i32, %c0_i32_0 : i32, i32
  }
  func.func @transform_5(%arg0: i32) -> (i32, i32) {
    %c0_i32 = arith.constant 0 : i32
    %c0_i32_0 = arith.constant 0 : i32
    %c0_i32_1 = arith.constant 0 : i32
    return %c0_i32, %c0_i32_0 : i32, i32
  }
  func.func @transform_6(%arg0: i32) -> (i32, i32) {
    %c0_i32 = arith.constant 0 : i32
    %c0_i32_0 = arith.constant 0 : i32
    %c0_i32_1 = arith.constant 0 : i32
    return %c0_i32, %c0_i32_0 : i32, i32
  }
  func.func @transform_7(%arg0: i32) -> (i32, i32) {
    %c0_i32 = arith.constant 0 : i32
    %c0_i32_0 = arith.constant 0 : i32
    %c0_i32_1 = arith.constant 0 : i32
    return %c0_i32, %c0_i32_0 : i32, i32
  }
  func.func @transform_8(%arg0: i32) -> (i32, i32) {
    %c0_i32 = arith.constant 0 : i32
    %c0_i32_0 = arith.constant 0 : i32
    %c0_i32_1 = arith.constant 0 : i32
    return %c0_i32, %c0_i32_0 : i32, i32
  }
  func.func @transform_9(%arg0: i32) -> (i32, i32) {
    %c0_i32 = arith.constant 0 : i32
    %c0_i32_0 = arith.constant 0 : i32
    %c0_i32_1 = arith.constant 0 : i32
    return %c0_i32, %c0_i32_0 : i32, i32
  }
  func.func @transform_10(%arg0: i32) -> (i32, i32) {
    %c0_i32 = arith.constant 0 : i32
    %c0_i32_0 = arith.constant 0 : i32
    %c0_i32_1 = arith.constant 0 : i32
    return %c0_i32, %c0_i32_0 : i32, i32
  }
  func.func @transform_11(%arg0: i32) -> (i32, i32) {
    %c0_i32 = arith.constant 0 : i32
    %c0_i32_0 = arith.constant 0 : i32
    %c0_i32_1 = arith.constant 0 : i32
    return %c0_i32, %c0_i32_0 : i32, i32
  }
  func.func @transform_12(%arg0: i32) -> (i32, i32) {
    %c0_i32 = arith.constant 0 : i32
    %c0_i32_0 = arith.constant 0 : i32
    %c0_i32_1 = arith.constant 0 : i32
    return %c0_i32, %c0_i32_0 : i32, i32
  }
  func.func @transform_13(%arg0: i32) -> (i32, i32) {
    %c0_i32 = arith.constant 0 : i32
    %c0_i32_0 = arith.constant 0 : i32
    %c0_i32_1 = arith.constant 0 : i32
    return %c0_i32, %c0_i32_0 : i32, i32
  }
  func.func @transform_14(%arg0: i32) -> (i32, i32) {
    %c0_i32 = arith.constant 0 : i32
    %c0_i32_0 = arith.constant 0 : i32
    %c0_i32_1 = arith.constant 0 : i32
    return %c0_i32, %c0_i32_0 : i32, i32
  }
  func.func @transform_15(%arg0: i32) -> (i32, i32) {
    %c0_i32 = arith.constant 0 : i32
    %c0_i32_0 = arith.constant 0 : i32
    %c0_i32_1 = arith.constant 0 : i32
    return %c0_i32, %c0_i32_0 : i32, i32
  }
  func.func @transform_16(%arg0: i32) -> (i32, i32) {
    %c0_i32 = arith.constant 0 : i32
    %c0_i32_0 = arith.constant 0 : i32
    %c0_i32_1 = arith.constant 0 : i32
    return %c0_i32, %c0_i32_0 : i32, i32
  }
  func.func @transform_17(%arg0: i32) -> (i32, i32, i32) {
    %c0_i32 = arith.constant 0 : i32
    %c0_i32_0 = arith.constant 0 : i32
    %c0_i32_1 = arith.constant 0 : i32
    return %arg0, %c0_i32, %c0_i32_0 : i32, i32, i32
  }
}

</mosaic_0001>

<bundles_post_ra>
// kernel: vit_forward.1
= control target key start
LH: loop header
LB: loop body
LE: loop exit
PB: predicated region body
PF: predicated region fallthrough
CT: control target
= control target key end

     0   :  { %s13542_s0 = inlined_call_operand.vmem [shape: f32[2,4,256], index: 0, kind: input, shape index: {}]   ;;  %s13543_s1 = inlined_call_operand.vmem [shape: f32[1,1,128], index: 1, kind: input, shape index: {}]   ;;  %s13544_s2 = inlined_call_operand.vmem [shape: f32[1,5,128], index: 2, kind: input, shape index: {}]   ;;  %s13545_s3 = inlined_call_operand.hbm [shape: bf16[256,128], index: 3, kind: input, shape index: {}]   ;;  %s13546_s4 = inlined_call_operand.vmem [shape: f32[1,128], index: 4, kind: input, shape index: {}]   ;;  %s13547_s5 = inlined_call_operand.vmem [shape: bf16[128,384], index: 5, kind: input, shape index: {}]   ;;  %s13548_s6 = inlined_call_operand.vmem [shape: f32[1,384], index: 6, kind: input, shape index: {}]   ;;  %s13549_s7 = inlined_call_operand.vmem [shape: f32[1,128], index: 7, kind: input, shape index: {}]   ;;  %s13550_s8 = inlined_call_operand.vmem [shape: f32[1,128], index: 8, kind: input, shape index: {}]   ;;  %s13551_s9 = inlined_call_operand.hbm [shape: bf16[128,2048], index: 9, kind: input, shape index: {}]   ;;  %s13552_s10 = inlined_call_operand.vmem [shape: f32[1,2048], index: 10, kind: input, shape index: {}]   ;;  %s13553_s11 = inlined_call_operand.hbm [shape: bf16[2048,128], index: 11, kind: input, shape index: {}]   ;;  %s13554_s12 = inlined_call_operand.vmem [shape: f32[1,128], index: 12, kind: input, shape index: {}]   ;;  %s13555_s13 = inlined_call_operand.vmem [shape: f32[1,128], index: 13, kind: input, shape index: {}]   ;;  %s13556_s14 = inlined_call_operand.hbm [shape: f32[1,128], index: 14, kind: input, shape index: {}]   ;;  %s13557_s15 = inlined_call_operand.hbm [shape: bf16[128,128], index: 15, kind: input, shape index: {}]   ;;  %s13558_s16 = inlined_call_operand.hbm [shape: f32[1,128], index: 16, kind: input, shape index: {}]   ;;  %s13559_s17 = inlined_call_operand.hbm [shape: f32[2,1,128], index: 17, kind: output, shape index: {}]  }
   0x1   :  { %13808 = sst [smem:[#allocation142_spill]] %s13542_s0 }
   0x2   :  { %13809 = sst [smem:[#allocation143_spill]] %s13543_s1 }
   0x3   :  { %13810 = sst [smem:[#allocation144_spill]] %s13554_s12 }
   0x4   :  { %13811 = sst [smem:[#allocation145_spill]] %s13555_s13 }
   0x5   :  { %13812 = sst [smem:[#allocation146_spill]] %s13559_s17 }
   0x6   :  { %22 = vsyncpa [#allocation4], 0 }
   0x7   :  { %23 = vsyncpa [#allocation7], 0 }
   0x8   :  { %24 = vsyncpa [#allocation10], 0 }
   0x9   :  { %25 = vsyncpa [#allocation13], 0 }
   0xa   :  { %26 = vsyncpa [#allocation5], 0 }
   0xb   :  { %28 = vsyncpa [#allocation5 + $0x1], 0  ;;  %s11276_s24 = smov 0   ;;  %s11278_s25 = smov 0  }
   0xc   :  { %s11280_s26 = smov 0   ;;  %s11282_s27 = smov 0  }
   0xd LB: > { %13813 = sst [smem:[#allocation20_spill]] %s11151_s24  ;;  %s11297_s28 = sadd.s32 4294967295, %s11163_s27   ;;  %s11163_s27 = sphi %s11282_s27, %s14190_s27   ;;  %s11159_s26 = sphi %s11280_s26, %s14193_s26   ;;  %s11155_s25 = sphi %s11278_s25, %s14192_s25   ;;  %s11151_s24 = sphi %s11276_s24, %s14191_s24  }
   0xe   : > { %13814 = sst [smem:[#allocation21_spill]] %s11155_s25  ;;  %s8674_s29 = sadd.s32 4294967294, %s11163_s27  }
   0xf   : > { %13815 = sst [smem:[#allocation22_spill]] %s11159_s26  ;;  %s11301_s0 = sadd.s32 1, %s11163_s27  }
  0x10   : > { %13816 = sst [smem:[#allocation23_spill]] %s11163_s27  ;;  %s403_s30 = sadd.s32 1, %s11159_s26 }
  0x11   : > { %13817 = sst [smem:[#allocation24_spill]] %s11301_s0  ;;  %s400_s18 = ssub.s32 %s11163_s27, %s11301_s0 }
  0x12   : > { %p413_p0 = scmp.ne.s32.totalorder %s11159_s26, %s11155_s25  ;;  %p401_p1 = scmp.eq.s32.totalorder %s400_s18, 0 }
  0x13   : > { %p414_p2 = scmp.eq.s32.totalorder %s11297_s28, 1  ;;  %p419_p3 = scmp.ne.s32.totalorder %s11155_s25, %s11151_s24 }
  0x14   : > { %p420_p4 = scmp.eq.s32.totalorder %s8674_s29, 1  ;;  %p8675_p7 = scmp.ge.s32.totalorder %s11163_s27, 1 }
  0x15   : > { %s11312_s19 = scalar_select %p401_p1, %s11159_s26, %s403_s30  }
  0x16   : > { %p11314_p5 = por %p414_p2, %p413_p0  ;;  %p11318_p6 = por %p420_p4, %p419_p3 }
  0x17   : > { %13818 = sst [smem:[#allocation25_spill]] %s11312_s19  ;;  %p427_p8 = scmp.lt.s32.totalorder %s11163_s27, 3 }
  0x18   : > { %s13819_s1 = scalar_select %p11314_p5, 1, 0 }
  0x19   : > { %s13821_s20 = scalar_select %p11318_p6, 1, 0 }
  0x1a   : > { %13820 = sst [smem:[#allocation26_spill]] %s13819_s1  ;;  %p13567_p9 = scmp.eq.s32.totalorder %s11297_s28, 0 }
  0x1b   : > { %13822 = sst [smem:[#allocation27_spill]] %s13821_s20  ;;  %p11325_p10 = pnand %p8675_p7, %p427_p8 }
  0x1c   : > { %s11165_s22 = smov [#allocation6]   ;;  %s11166_s30 = smov [#allocation9]  }
  0x1d   : > { %s13823_s21 = scalar_select %p11325_p10, 1, 0 }
  0x1e   : > { %p10128_p11 = pneg %p11325_p10  ;;  %s473_s23 = sshll.u32 %s11165_s22, 4  ;;  %s11331_s23 = int_to_ptr.vmem [resolvable:$true] %s473_s23 }
  0x1f   : > { %s509_s18 = sshll.u32 %s11166_s30, 4  ;;  %s11167_s19 = smov [#allocation3]   ;;  %s11339_s18 = int_to_ptr.vmem [resolvable:$true] %s509_s18 }
  0x20   : > { %p11335_p12 = pnand %p13567_p9, %p10128_p11  ;;  %s11341_s26 = sshll.u32 %s11167_s19, 4  ;;  %s446_s26 = int_to_ptr.vmem [resolvable:$true] %s11341_s26 }
  0x21   : > { %s10917_s24 = scalar_lea.hbm %s13551_s9, 16384 }
  0x22   : > { %p10918_p13 = scmp.ne.s32.totalorder %s13551_s9, %s10917_s24  ;;  %p11351_p0 = pneg %p11335_p12 }
  0x23   : > { %p10924_p3 = scmp.lt.u32.totalorder %s10917_s24, %s13551_s9 }
  0x24   : > { %p10920_p1 = pnand %p11351_p0, %p10918_p13 }
  0x26   : > { %p10921_p2 = pneg %p10920_p1 }
  0x28   : > { %p10926_p4 = pnand %p10924_p3, %p10921_p2 }
  0x2a   : > { %10929 = shalt.err (!%p10926_p4)
}
  0x2b   : > { %s10930_s27 = scalar_lea.vmem %s11331_s23, 16384  ;;  %p10938_p9 = scmp.lt.s32.totalorder %s11331_s23, %s11331_s23 }
  0x2c   : > { %p10931_p7 = scmp.ne.s32.totalorder %s11331_s23, %s10930_s27  ;;  %p10939_p6 = scmp.lt.s32.totalorder %s10930_s27, %s10930_s27 }
  0x2e   : > { %p10933_p8 = pnand %p10931_p7, %p11351_p0  ;;  %p10940_p13 = por %p10939_p6, %p10938_p9 }
  0x30   : > { %p10934_p11 = pneg %p10933_p8 }
  0x32   : > { %p10941_p1 = pnand %p10940_p13, %p10934_p11 }
  0x34   : > { %10944 = shalt.err (!%p10941_p1)
}
  0x35   : > { %s11168_s0 = smov 1024   ;;  %s11169_s24 = smov 64  }
  0x36   : > { %10134 = dma.hbm_to_vmem [thread:$0]  (!%p11335_p12), %s13551_s9, 16384, %s11331_s23, [#allocation7], %s11168_s0, %s11168_s0, %s11169_s24  }
  0x37   : > { %s10945_s1 = scalar_lea.hbm %s13556_s14, 16 }
  0x38   : > { %p10946_p6 = scmp.ne.s32.totalorder %s13556_s14, %s10945_s1  ;;  %p10952_p3 = scmp.lt.u32.totalorder %s10945_s1, %s13556_s14 }
  0x3a   : > { %p10948_p9 = pnand %p10946_p6, %p11351_p0 }
  0x3c   : > { %p10949_p2 = pneg %p10948_p9 }
  0x3e   : > { %p10954_p4 = pnand %p10952_p3, %p10949_p2 }
  0x40   : > { %10957 = shalt.err (!%p10954_p4)
}
  0x41   : > { %s10958_s23 = scalar_lea.vmem %s11339_s18, 16  ;;  %s10965_s13 = scalar_lea.vmem %s11339_s18, 32 }
  0x42   : > { %p10959_p7 = scmp.ne.s32.totalorder %s11339_s18, %s10958_s23  ;;  %p10966_p13 = scmp.lt.s32.totalorder %s11339_s18, %s11339_s18 }
  0x43   : > { %p10967_p1 = scmp.lt.s32.totalorder %s10965_s13, %s10958_s23 }
  0x44   : > { %p10961_p8 = pnand %p10959_p7, %p11351_p0 }
  0x45   : > { %p10968_p6 = por %p10967_p1, %p10966_p13 }
  0x46   : > { %p10962_p11 = pneg %p10961_p8 }
  0x48   : > { %p10969_p9 = pnand %p10968_p6, %p10962_p11 }
  0x4a   : > { %10972 = shalt.err (!%p10969_p9)
}
  0x4b   : > { %10140 = dma.hbm_to_vmem [thread:$0]  (!%p11335_p12), %s13556_s14, 16, %s11339_s18, [#allocation10]  }
  0x4c   : > { %s10973_s20 = scalar_lea.hbm %s13545_s3, 2048 }
  0x4d   : > { %p10974_p2 = scmp.ne.s32.totalorder %s13545_s3, %s10973_s20  ;;  %p10980_p7 = scmp.lt.u32.totalorder %s10973_s20, %s13545_s3 }
  0x4f   : > { %p10976_p3 = pnand %p10974_p2, %p11351_p0 }
  0x51   : > { %p10977_p4 = pneg %p10976_p3 }
  0x53   : > { %p10982_p8 = pnand %p10980_p7, %p10977_p4 }
  0x55   : > { %10985 = shalt.err (!%p10982_p8)
}
  0x56   : > { %s10986_s23 = scalar_lea.vmem %s446_s26, 2048  ;;  %p10994_p6 = scmp.lt.s32.totalorder %s446_s26, %s446_s26 }
  0x57   : > { %p10987_p11 = scmp.ne.s32.totalorder %s446_s26, %s10986_s23  ;;  %p10995_p9 = scmp.lt.s32.totalorder %s10986_s23, %s10986_s23 }
  0x59   : > { %p10989_p13 = pnand %p10987_p11, %p11351_p0  ;;  %p10996_p5 = por %p10995_p9, %p10994_p6 }
  0x5b   : > { %p10990_p1 = pneg %p10989_p13 }
  0x5d   : > { %p10997_p10 = pnand %p10996_p5, %p10990_p1 }
  0x5f   : > { %11000 = shalt.err (!%p10997_p10)
}
  0x60   : > { %s11170_s18 = smov 4   ;;  %s11171_s25 = smov [#allocation8]  }
  0x61   : > { %10131 = dma.hbm_to_vmem [thread:$0]  (!%p11335_p12), %s13545_s3, 2048, %s446_s26, [#allocation4], %s11169_s24, %s11169_s24, %s11170_s18  }
  0x62   : > { %s489_s1 = sshll.u32 %s11171_s25, 4  ;;  %s11172_s0 = smov [#allocation11]   ;;  %s490_s1 = int_to_ptr.vmem [resolvable:$true] %s489_s1 }
  0x63   : > { %s519_s20 = sshll.u32 %s11172_s0, 4  ;;  %s11001_s19 = scalar_lea.hbm %s13553_s11, 16384  ;;  %s11419_s20 = int_to_ptr.vmem [resolvable:$true] %s519_s20 }
  0x64   : > { %p11002_p5 = scmp.ne.s32.totalorder %s13553_s11, %s11001_s19  ;;  %p11008_p3 = scmp.lt.u32.totalorder %s11001_s19, %s13553_s11 }
  0x66   : > { %p11004_p10 = pnand %p11002_p5, %p11351_p0 }
  0x68   : > { %p11005_p2 = pneg %p11004_p10 }
  0x6a   : > { %p11010_p4 = pnand %p11008_p3, %p11005_p2 }
  0x6c   : > { %11013 = shalt.err (!%p11010_p4)
}
  0x6d   : > { %s11014_s12 = scalar_lea.vmem %s490_s1, 16384  ;;  %p11022_p13 = scmp.lt.s32.totalorder %s490_s1, %s490_s1 }
  0x6e   : > { %p11015_p7 = scmp.ne.s32.totalorder %s490_s1, %s11014_s12  ;;  %p11023_p1 = scmp.lt.s32.totalorder %s11014_s12, %s11014_s12 }
  0x70   : > { %p11017_p8 = pnand %p11015_p7, %p11351_p0  ;;  %p11024_p6 = por %p11023_p1, %p11022_p13 }
  0x72   : > { %p11018_p11 = pneg %p11017_p8 }
  0x74   : > { %p11025_p9 = pnand %p11024_p6, %p11018_p11 }
  0x76   : > { %11028 = shalt.err (!%p11025_p9)
}
  0x77   : > { %10137 = dma.hbm_to_vmem [thread:$0]  (!%p11335_p12), %s13553_s11, 16384, %s490_s1, [#allocation7], %s11169_s24, %s11169_s24, %s11170_s18  }
  0x78   : > { %s11029_s19 = scalar_lea.hbm %s13557_s15, 1024 }
  0x79   : > { %p11030_p5 = scmp.ne.s32.totalorder %s13557_s15, %s11029_s19  ;;  %p11036_p3 = scmp.lt.u32.totalorder %s11029_s19, %s13557_s15 }
  0x7b   : > { %p11032_p10 = pnand %p11030_p5, %p11351_p0 }
  0x7d   : > { %p11033_p2 = pneg %p11032_p10 }
  0x7f   : > { %p11038_p4 = pnand %p11036_p3, %p11033_p2 }
  0x81   : > { %11041 = shalt.err (!%p11038_p4)
}
  0x82   : > { %s11042_s1 = scalar_lea.vmem %s11419_s20, 1024  ;;  %p11050_p13 = scmp.lt.s32.totalorder %s11419_s20, %s11419_s20 }
  0x83   : > { %p11043_p7 = scmp.ne.s32.totalorder %s11419_s20, %s11042_s1  ;;  %p11051_p1 = scmp.lt.s32.totalorder %s11042_s1, %s11042_s1 }
  0x85   : > { %p11045_p8 = pnand %p11043_p7, %p11351_p0  ;;  %p11052_p6 = por %p11051_p1, %p11050_p13 }
  0x87   : > { %p11046_p11 = pneg %p11045_p8 }
  0x89   : > { %p11053_p9 = pnand %p11052_p6, %p11046_p11 }
  0x8b   : > { %11056 = shalt.err (!%p11053_p9)
}
  0x8c   : > { %10143 = dma.hbm_to_vmem [thread:$0]  (!%p11335_p12), %s13557_s15, 1024, %s11419_s20, [#allocation10], %s11169_s24, %s11169_s24, %s11170_s18  }
  0x8d   : > { %s11173_s0 = smov [#allocation12]   ;;  %s11057_s27 = scalar_lea.hbm %s13558_s16, 16 }
  0x8e   : > { %s533_s22 = sshll.u32 %s11173_s0, 4  ;;  %p11058_p5 = scmp.ne.s32.totalorder %s13558_s16, %s11057_s27  ;;  %s534_s22 = int_to_ptr.vmem [resolvable:$true] %s533_s22 }
  0x8f   : > { %p11064_p3 = scmp.lt.u32.totalorder %s11057_s27, %s13558_s16 }
  0x90   : > { %p11060_p10 = pnand %p11058_p5, %p11351_p0 }
  0x92   : > { %p11061_p2 = pneg %p11060_p10 }
  0x94   : > { %p11066_p4 = pnand %p11064_p3, %p11061_p2 }
  0x96   : > { %11069 = shalt.err (!%p11066_p4)
}
  0x97   : > { %s11070_s24 = scalar_lea.vmem %s534_s22, 16  ;;  %s11077_s18 = scalar_lea.vmem %s534_s22, 32 }
  0x98   : > { %p11071_p7 = scmp.ne.s32.totalorder %s534_s22, %s11070_s24  ;;  %p11078_p13 = scmp.lt.s32.totalorder %s534_s22, %s534_s22 }
  0x99   : > { %p11079_p1 = scmp.lt.s32.totalorder %s11077_s18, %s11070_s24 }
  0x9a   : > { %p11073_p8 = pnand %p11071_p7, %p11351_p0 }
  0x9b   : > { %p11080_p6 = por %p11079_p1, %p11078_p13 }
  0x9c   : > { %p11074_p11 = pneg %p11073_p8 }
  0x9e   : > { %p11081_p9 = pnand %p11080_p6, %p11074_p11 }
  0xa0   : > { %11084 = shalt.err (!%p11081_p9)
}
  0xa1   : > { %10146 = dma.hbm_to_vmem [thread:$0]  (!%p11335_p12), %s13558_s16, 16, %s534_s22, [#allocation13]  }
  0xa2   : > { %p13826_p5 = scmp.ne.s32.totalorder %s13823_s21, 0 }
  0xa4   : > { %554 = sbr.rel (%p13826_p5) target bundleno = 9900 (0x26ac), region = 88 }
  0xab   : > { %p13827_p10 = scmp.eq.s32.totalorder %s11297_s28, 0 }
  0xad   : > { %11130 = dma.done.wait (%p13827_p10), [#allocation4], 2048   ;;  %p13828_p0 = pmov %p13827_p10 }
  0xaf   : > { %11132 = vsyncadd (%p13828_p0), [#allocation4], 4294965248  ;;  %p13829_p2 = pmov %p13828_p0 }
  0xb0   : > { %p13830_p3 = pmov %p13828_p0 }
  0xb1   : > { %11134 = dma.done.wait (%p13829_p2), [#allocation7], 32768  }
  0xb2   : > { %11136 = vsyncadd (%p13830_p3), [#allocation7], 4294934528  ;;  %p13831_p4 = pmov %p13828_p0 }
  0xb3   : > { %p13832_p12 = pmov %p13828_p0 }
  0xb4   : > { %11138 = dma.done.wait (%p13831_p4), [#allocation10], 1040  }
  0xb5   : > { %11140 = vsyncadd (%p13832_p12), [#allocation10], 4294966256  ;;  %p13833_p7 = pmov %p13828_p0 }
  0xb6   : > { %p13834_p8 = pmov %p13828_p0 }
  0xb7   : > { %11142 = dma.done.wait (%p13833_p7), [#allocation13], 16  }
  0xb8   : > { %11144 = vsyncadd (%p13834_p8), [#allocation13], 4294967280  ;;  %v10216_v0 = vld [vmem:[#allocation3 + $0x40] sm:$0xff]   ;;  %v10218_v2 = vld [vmem:[#allocation3 + $0x48] sm:$0xff]   ;;  %p625_p11 = scmp.lt.s32.totalorder %s11297_s28, 1  ;;  %s13835_s0 = sld [smem:[#allocation142_spill]] }
  0xb9   : > { %v10217_v1 = vld [vmem:[#allocation3] sm:$0xff]   ;;  %9052 = vmatprep.subr.bf16.mxu0 %v10216_v0  ;;  %v10219_v3 = vld [vmem:[#allocation3 + $0x8] sm:$0xff]   ;;  %v10220_v4 = vld [vmem:[#allocation3 + $0x50] sm:$0xff]   ;;  %s13836_s27 = sld [smem:[#allocation143_spill]]  ;;  %vm1240_vm0 = vcmask 1044480   ;;  %v13574_v34 = vmov 0.0  }
  0xba   : > { %9053 = vmatpush3.bf16.msra.mxu0 %v10217_v1  ;;  %s626_s17 = scalar_select %p625_p11, %s11297_s28, 1  ;;  %v10221_v5 = vld [vmem:[#allocation3 + $0x10] sm:$0xff]   ;;  %v10222_v6 = vld [vmem:[#allocation3 + $0x58] sm:$0xff]   ;;  %v10224_v8 = vld [vmem:[#allocation3 + $0x60] sm:$0xff]   ;;  %v13576_v57 = vmov 0   ;;  %vm11176_vm1 = vmmov 0  }
  0xbb   : > { %9054 = vmatprep.subr.bf16.mxu0 %v10218_v2  ;;  %v10223_v7 = vld [vmem:[#allocation3 + $0x18] sm:$0xff]   ;;  %v10225_v9 = vld [vmem:[#allocation3 + $0x20] sm:$0xff]   ;;  %v10226_v10 = vld [vmem:[#allocation3 + $0x68] sm:$0xff]   ;;  %1446 = vmatprep.mubr.bf16.mxu1 %v13576_v57  ;;  %vm1498_vm2 = vcmask 130048   ;;  %vm1562_vm3 = vcmask 1041408   ;;  %s11177_s12 = smov 112  }
  0xbc   : > { %s9051_s21 = sshll.u32 %s626_s17, 3  ;;  %v10227_v12 = vld [vmem:[#allocation3 + $0x28] sm:$0xff]   ;;  %v10228_v14 = vld [vmem:[#allocation3 + $0x70] sm:$0xff]   ;;  %v10230_v17 = vld [vmem:[#allocation3 + $0x78] sm:$0xff]   ;;  %vm1563_vm4 = vcmask 1042432   ;;  %vm1545_vm5 = vcmask 36864  }
  0xbd   : > { %v10229_v16 = vld [vmem:[#allocation3 + $0x30] sm:$0xff]   ;;  %v10231_v18 = vld [vmem:[#allocation3 + $0x38] sm:$0xff]   ;;  %v10236_v35 = vld [vmem:[%s13547_s5 + $0x8] ss:$12 sps:$4 sm:$0xff]   ;;  %vm1558_vm6 = vcmask 39936   ;;  %s11179_s17 = smov 96  }
  0xbe   : > { %9055 = vmatpush3.bf16.msra.mxu0 %v10219_v3  ;;  %s629_s22 = scalar_lea.vmem %s13835_s0, %s9051_s21  ;;  %v8692_v22 = vld [vmem:[%s13546_s4] ss:$0 sm:$0xff]  ;;  %v10233_v32 = vld [vmem:[%s13547_s5 + $0x4] ss:$12 sps:$4 sm:$0xff]   ;;  %v10237_v36 = vld [vmem:[%s13547_s5 + $0x1c] ss:$12 sps:$4 sm:$0xff]  }
  0xbf   : > { %9056 = vmatprep.subr.bf16.mxu0 %v10220_v4  ;;  %v631_v11 = vld [vmem:[%s629_s22] sm:$0xff]  ;;  %1414 = vmatprep.subr.bf16.mxu1 %v10233_v32  ;;  %v10243_v45 = vld [vmem:[%s13547_s5 + $0x30] ss:$12 sps:$4 sm:$0xff]   ;;  %v10245_v47 = vld [vmem:[%s13547_s5 + $0x4c] ss:$12 sps:$4 sm:$0xff]   ;;  %s11180_s21 = smov 80  }
  0xc0   : > { %v633_v13 = vcombine.high %v631_v11, %v631_v11  ;;  %v635_v19 = vpack.c.bf16 %v631_v11, %v631_v11  ;;  %v813_v20 = vld [vmem:[%s13836_s27] sm:$0x1]  ;;  %v10239_v37 = vld [vmem:[%s13547_s5 + $0x18] ss:$12 sps:$4 sm:$0xff]   ;;  %v10247_v48 = vld [vmem:[%s13547_s5 + $0x48] ss:$12 sps:$4 sm:$0xff]  }
  0xc1   : > { %814 = vst [vmem:[#allocation2 + $0x4] sm:$0x1] %v813_v20  ;;  %v816_v28 = vld [vmem:[%s13544_s2] sm:$0x1f]  ;;  %v10248_v49 = vld [vmem:[%s13547_s5 + $0x50] ss:$12 sps:$4 sm:$0xff]  }
  0xc2   : > { %9057 = vmatpush3.bf16.msra.mxu0 %v10221_v5  ;;  %v636_v15 = vpack.c.bf16 %v633_v13, %v633_v13  ;;  %v10235_v33 = vld [vmem:[%s13547_s5] ss:$12 sps:$4 sm:$0xff]   ;;  %v10244_v46 = vld [vmem:[%s13547_s5 + $0x38] ss:$12 sps:$4 sm:$0xff]   ;;  %v10252_v52 = vld [vmem:[%s13547_s5 + $0x68] ss:$12 sps:$4 sm:$0xff]  }
  0xc3   : > { %9058 = vmatprep.subr.bf16.mxu0 %v10222_v6  ;;  %1415 = vmatpush1.bf16.msra.mxu1 %v10235_v33  ;;  %v10240_v38 = vld [vmem:[%s13547_s5 + $0x20] ss:$12 sps:$4 sm:$0xff]   ;;  %v10249_v50 = vld [vmem:[%s13547_s5 + $0x64] ss:$12 sps:$4 sm:$0xff]   ;;  %v10253_v53 = vld [vmem:[%s13547_s5 + $0x7c] ss:$12 sps:$4 sm:$0xff]  }
  0xc4   : > { %804 = vmatprep.mubr.bf16.mxu0 %v636_v15  ;;  %1416 = vmatprep.subr.bf16.mxu1 %v10237_v36  ;;  %v10241_v39 = vld [vmem:[%s13547_s5 + $0x34] ss:$12 sps:$4 sm:$0xff]   ;;  %v10255_v54 = vld [vmem:[%s13547_s5 + $0x78] ss:$12 sps:$4 sm:$0xff]   ;;  %v10259_v58 = vld [vmem:[%s13547_s5 + $0x90] ss:$12 sps:$4 sm:$0xff]  }
  0xc5   : > { %v10251_v51 = vld [vmem:[%s13547_s5 + $0x60] ss:$12 sps:$4 sm:$0xff]   ;;  %v10260_v59 = vld [vmem:[%s13547_s5 + $0x98] ss:$12 sps:$4 sm:$0xff]   ;;  %v10263_v61 = vld [vmem:[%s13547_s5 + $0xa8] ss:$12 sps:$4 sm:$0xff]  }
  0xc6   : > { %9059 = vmatpush3.bf16.msra.mxu0 %v10223_v7  ;;  %v10256_v55 = vld [vmem:[%s13547_s5 + $0x80] ss:$12 sps:$4 sm:$0xff]   ;;  %v10264_v62 = vld [vmem:[%s13547_s5 + $0xb0] ss:$12 sps:$4 sm:$0xff]   ;;  %s11181_s29 = smov 64   ;;  %s11182_s25 = smov 48  }
  0xc7   : > { %9060 = vmatprep.subr.bf16.mxu0 %v10224_v8  ;;  %1417 = vmatpush1.bf16.msra.mxu1 %v10239_v37  ;;  %v10257_v56 = vld [vmem:[%s13547_s5 + $0x94] ss:$12 sps:$4 sm:$0xff]   ;;  %v10261_v60 = vld [vmem:[%s13547_s5 + $0xac] ss:$12 sps:$4 sm:$0xff]   ;;  %s11183_s0 = smov 32   ;;  %s11184_s22 = smov 16  }
  0xc8   : > { %1418 = vmatprep.subr.bf16.mxu1 %v10241_v39  ;;  %v11612_v3 = vld [vmem:[%s13549_s7] ss:$0 sm:$0xff]  ;;  %vm2411_vm7 = vcmask 261120   ;;  %vm2413_vm8 = vcmask 392192   ;;  %vm2415_vm9 = vcmask 523264   ;;  %vm2417_vm10 = vcmask 654336  }
  0xc9   : > { %v11617_v5 = vld [vmem:[%s13550_s8] ss:$0 sm:$0xff]  ;;  %vm2419_vm11 = vcmask 785408   ;;  %vm2421_vm12 = vcmask 916480   ;;  %s13958_s13 = sld [smem:[#allocation144_spill]]  ;;  %vm8423_vm13 = vcmask 1040384  }
  0xca   : > { %9061 = vmatpush3.bf16.msra.mxu0 %v10225_v9  ;;  %v1271_v9 = vlaneseq  ;;  %s14183_s20 = sld [smem:[#allocation26_spill]]  ;;  %s9048_s30 = sshll.u32 %s11297_s28, 4 }
  0xcb   : > { %9062 = vmatprep.subr.bf16.mxu0 %v10226_v10  ;;  %1419 = vmatpush1.bf16.msra.mxu1 %v10243_v45  ;;  %s14184_s1 = sld [smem:[#allocation146_spill]] }
  0xcc   : > { %1420 = vmatprep.subr.bf16.mxu1 %v10245_v47  ;;  %v11625_v10 = vshrl.u32 %v1271_v9, 7 }
  0xce   : > { %9063 = vmatpush3.bf16.msra.mxu0 %v10227_v12  ;;  %v11628_v11 = vsub.s32 1, %v11625_v10  ;;  %v852_v12 = vld [vmem:[%s13548_s6] sm:$0x7]  ;;  %v11634_v13 = vsub.s32 2, %v11625_v10  ;;  %v11640_v15 = vsub.s32 0, %v11625_v10 }
  0xcf   : > { %9064 = vmatprep.subr.bf16.mxu0 %v10228_v14  ;;  %1421 = vmatpush1.bf16.msra.mxu1 %v10247_v48 }
  0xd0   : > { %1422 = vmatprep.subr.bf16.mxu1 %v10249_v50  ;;  %v11637_v14 = vrot.slane %v852_v12, %v11628_v11  ;;  %p14185_p1 = scmp.ne.s32.totalorder %s14183_s20, 0 }
  0xd1   : > { %s13500_s24 = scalar_lea.hbm %s14184_s1, %s9048_s30 }
  0xd2   : > { %9065 = vmatpush3.bf16.msra.mxu0 %v10229_v16 }
  0xd3   : > { %9066 = vmatprep.subr.bf16.mxu0 %v10230_v17  ;;  %1423 = vmatpush1.bf16.msra.mxu1 %v10251_v51 }
  0xd4   : > { %1424 = vmatprep.subr.bf16.mxu1 %v10253_v53 }
  0xd6   : > { %9067 = vmatpush3.bf16.msra.mxu0 %v10231_v18  ;;  %v11643_v18 = vrot.slane %v852_v12, %v11634_v13 }
  0xd7   : > { %9734 = vmatprep.subr.bf16.mxu0 %v13574_v34  ;;  %1425 = vmatpush1.bf16.msra.mxu1 %v10255_v54 }
  0xd8   : > { %1426 = vmatprep.subr.bf16.mxu1 %v10257_v56 }
  0xd9   : > { %805 = vmatmul.mubr.bf16.vlgmr.msra.gmra.mrb[0].mxu0 %v635_v19 }
  0xda   : > { %9735 = vmatpush3.bf16.msra.mxu0 %v10236_v35  ;;  %9750 = vmatprep.mubr.msk.bf16.mxu0 %vm11176_vm1, %v13574_v34 }
  0xdb   : > { %9736 = vmatprep.subr.bf16.mxu0 %v13574_v34  ;;  %1427 = vmatpush1.bf16.msra.mxu1 %v10259_v58 }
  0xdc   : > { %1428 = vmatprep.subr.bf16.mxu1 %v10261_v60 }
  0xde   : > { %9737 = vmatpush3.bf16.msra.mxu0 %v10240_v38 }
  0xdf   : > { %9738 = vmatprep.subr.bf16.mxu0 %v13574_v34  ;;  %1429 = vmatpush1.bf16.msra.mxu1 %v10263_v61 }
  0xe0   : > { %9754 = vmatprep.subr.bf16.mxu1 %v13574_v34 }
  0xe2   : > { %9739 = vmatpush3.bf16.msra.mxu0 %v10244_v46 }
  0xe3   : > { %9740 = vmatprep.subr.bf16.mxu0 %v13574_v34 }
  0xe6   : > { %9741 = vmatpush3.bf16.msra.mxu0 %v10248_v49 }
  0xe7   : > { %9742 = vmatprep.subr.bf16.mxu0 %v13574_v34 }
  0xea   : > { %9743 = vmatpush3.bf16.msra.mxu0 %v10252_v52 }
  0xeb   : > { %9744 = vmatprep.subr.bf16.mxu0 %v13574_v34 }
  0xee   : > { %9745 = vmatpush3.bf16.msra.mxu0 %v10256_v55 }
  0xef   : > { %9746 = vmatprep.subr.bf16.mxu0 %v13574_v34 }
  0xf2   : > { %9747 = vmatpush3.bf16.msra.mxu0 %v10260_v59 }
  0xf3   : > { %9748 = vmatprep.subr.bf16.mxu0 %v13574_v34 }
  0xf6   : > { %9749 = vmatpush3.bf16.msra.mxu0 %v10264_v62 }
  0xf7   : > { %9802 = vmatprep.subr.bf16.mxu0 %v13574_v34 }
 0x1ac   : > { %v9068_v21 = vpop.f32.mrb[0].mxu0 }
 0x1ad   : > { %v9069_v23 = vpop.f32.mrb[1].mxu0 }
 0x1ae   : > { %v9070_v24 = vadd.f32 %v9069_v23, %v9068_v21  ;;  %v9071_v25 = vpop.f32.mrb[2].mxu0 }
 0x1af   : > { %v9072_v26 = vpop.f32.mrb[3].mxu0 }
 0x1b0   : > { %v807_v27 = vadd.f32 %v9070_v24, %v8692_v22  ;;  %v11647_v26 = vrot.slane %v852_v12, %v11640_v15 }
 0x1b2   : > { %812 = vst [vmem:[#allocation2] sm:$0xf] %v807_v27 }
 0x1b9   : > { %v815_v29 = vld [vmem:[#allocation2] sm:$0x1f] }
 0x1ba   : > { %v11518_v30 = vadd.f32 %v816_v28, %v815_v29 }
 0x1bc   : > { %v1241_v31 = vsel %vm1240_vm0, %v11518_v30, 0.0 }
 0x1bd   : > { %1242 = vadd.xlane.f32.xlu0 %v1241_v31  ;;  %v11178_v31 = vmov 65535  }
 0x1be   : > { %v1564_v32 = vsel %vm1562_vm3, 4294967295, %v11178_v31 }
 0x1bf   : > { %v11660_v36 = vsel %vm1563_vm4, %v1564_v32, 0 }
 0x24a   : > { %v1243_v40 = vpop.xlane.xlu0 %1242 }
 0x24b   : > { %v1245_v41 = vmul.f32 0.0078125, %v1243_v40 }
 0x24d   : > { %v1246_v42 = vsub.f32 %v11518_v30, %v1245_v41 }
 0x24f   : > { %v1247_v43 = vmul.f32 %v1246_v42, %v1246_v42 }
 0x251   : > { %v1248_v44 = vsel %vm1240_vm0, %v1247_v43, 0.0 }
 0x252   : > { %1249 = vadd.xlane.f32.xlu0 %v1248_v44 }
 0x2df   : > { %v1250_v63 = vpop.xlane.xlu0 %1249 }
 0x2e0   : > { %v1251_v0 = vmul.f32 0.0078125, %v1250_v63 }
 0x2e2   : > { %v1252_v1 = vadd.f32 1e-05, %v1251_v0 }
 0x2e4   : > { %10401 = vrsqrt.f32 %v1252_v1 }
 0x2ee   : > { %v10402_v2 = vpop.eup %10401 }
 0x2ef   : > { %v1254_v4 = vmul.f32 %v10402_v2, %v1246_v42 }
 0x2f1   : > { %v1261_v6 = vmul.f32 %v11612_v3, %v1254_v4 }
 0x2f3   : > { %v1268_v7 = vadd.f32 %v11617_v5, %v1261_v6 }
 0x2f5   : > { %v1269_v8 = vpack.c.bf16 %v1268_v7, %v1268_v7 }
 0x2f7   : > { %1447 = vmatmul.mubr.bf16.vlgmr.msra.gmra.mrb[0].mxu1 %v1269_v8  ;;  %9751 = vmatmul.mubr.bf16.vlgmr.msra.gmra.mrb[4].mxu0 %v1269_v8 }
 0x2f8   : > { %9756 = vmatprep.mubr.msk.bf16.mxu1 %vm11176_vm1, %v13574_v34  ;;  %9804 = vmatprep.mubr.msk.bf16.mxu0 %vm11176_vm1, %v13574_v34 }
 0x3ca   : > { %v1448_v16 = vpop.f32.mrb[0].mxu1  ;;  %v1489_v17 = vpop.f32.mrb[4].mxu0 }
 0x3cb   : > { %v1450_v19 = vpop.f32.mrb[1].mxu1  ;;  %v9752_v20 = vpop.f32.mrb[5].mxu0  ;;  %v1490_v28 = vadd.f32 %v1489_v17, %v11643_v18  ;;  %v1449_v33 = vadd.f32 %v1448_v16, %v11647_v26 }
 0x3cc   : > { %v1451_v21 = vadd.f32 %v1450_v19, %v11637_v14  ;;  %v1452_v22 = vpop.f32.mrb[2].mxu1  ;;  %v1492_v23 = vpop.f32.mrb[6].mxu0 }
 0x3cd   : > { %v1453_v24 = vpop.f32.mrb[3].mxu1  ;;  %v9753_v25 = vpop.f32.mrb[7].mxu0  ;;  %v11658_v35 = vpack.c.bf16 %v1490_v28, %v1490_v28  ;;  %v11662_v37 = vpack.c.bf16 %v1449_v33, %v1449_v33 }
 0x3ce   : > { %v11649_v27 = vpack.c.bf16 %v1451_v21, %v1451_v21 }
 0x3cf   : > { %v1567_v38 = vand.u32 %v11660_v36, %v11658_v35 }
 0x3d0   : > { %1613 = vrot.lane.b32.xlu0 %v11649_v27, %s11177_s12  ;;  %v1503_v29 = vsel %vm1498_vm2, %v11649_v27, 0 }
 0x3d1   : > { %9755 = vmatpush3.bf16.xpose.msra.mxu1 %v1503_v29 }
 0x3d2   : > { %9760 = vmatprep.subr.bf16.mxu1 %v13574_v34 }
 0x3d8   : > { %9757 = vmatmul.mubr.msk.bf16.vlgmr.msra.gmra.mrb[4].mxu1 %vm1498_vm2, %v11662_v37 }
 0x3d9   : > { %9761 = vmatpush3.bf16.msra.mxu1 %v1567_v38  ;;  %9762 = vmatprep.mubr.msk.bf16.mxu1 %vm11176_vm1, %v13574_v34 }
 0x3da   : > { %9766 = vmatprep.subr.bf16.mxu1 %v13574_v34 }
 0x442   : > { %v1614_v52 = vpop.permute.xlu0 %1613 }
 0x443   : > { %v1619_v54 = vsel %vm1498_vm2, %v1614_v52, 0 }
 0x4ab   : > { %v1539_v39 = vpop.f32.mrb[4].mxu1 }
 0x4ac   : > { %v9758_v40 = vpop.f32.mrb[5].mxu1  ;;  %v1546_v41 = vsel %vm1545_vm5, %v1539_v39, -inf }
 0x4ad   : > { %1547 = vmax.xlane.f32.xlu1 %v1546_v41  ;;  %v1542_v42 = vpop.f32.mrb[6].mxu1 }
 0x4ae   : > { %v9759_v43 = vpop.f32.mrb[7].mxu1 }
 0x53a   : > { %v1548_v44 = vpop.xlane.xlu1 %1547 }
 0x53b   : > { %v1549_v45 = vsub.f32 %v1539_v39, %v1548_v44 }
 0x53d   : > { %v1550_v46 = vmul.f32 1.442695, %v1549_v45 }
 0x53f   : > { %10403 = vpow2.f32 %v1550_v46 }
 0x549   : > { %v10404_v47 = vpop.eup %10403 }
 0x54a   : > { %v1552_v48 = vsel %vm1545_vm5, %v10404_v47, 0.0 }
 0x54b   : > { %1553 = vadd.xlane.f32.xlu1 %v1552_v48 }
 0x55c   : > { %1610 = vrot.lane.b32.xlu1 %v11662_v37, %s11177_s12 }
 0x5d8   : > { %v1554_v49 = vpop.xlane.xlu1 %1553 }
 0x5d9   : > { %10405 = vrcp.f32 %v1554_v49 }
 0x5dc   : > { %v1611_v55 = vpop.permute.xlu1 %1610 }
 0x5e3   : > { %v10406_v50 = vpop.eup %10405 }
 0x5e4   : > { %v1556_v51 = vmul.f32 %v10406_v50, %v10404_v47 }
 0x5e6   : > { %v1557_v53 = vpack.c.bf16 %v1556_v51, %v1556_v51 }
 0x5e8   : > { %9763 = vmatmul.mubr.msk.bf16.vlgmr.msra.gmra.mrb[8].mxu1 %vm1558_vm6, %v1557_v53 }
 0x5e9   : > { %9767 = vmatpush3.bf16.xpose.msra.mxu1 %v1619_v54  ;;  %9768 = vmatprep.mubr.msk.bf16.mxu1 %vm11176_vm1, %v13574_v34 }
 0x5ea   : > { %9772 = vmatprep.subr.bf16.mxu1 %v13574_v34 }
 0x5f0   : > { %9769 = vmatmul.mubr.msk.bf16.vlgmr.msra.gmra.mrb[12].mxu1 %vm1498_vm2, %v1611_v55 }
 0x5f1   : > { %9774 = vmatprep.mubr.msk.bf16.mxu1 %vm11176_vm1, %v13574_v34 }
 0x6bb   : > { %v11683_v56 = vpop.f32.mrb[8].mxu1 }
 0x6bc   : > { %v9764_v58 = vpop.f32.mrb[9].mxu1 }
 0x6bd   : > { %v1606_v59 = vpop.f32.mrb[10].mxu1 }
 0x6be   : > { %v9765_v60 = vpop.f32.mrb[11].mxu1 }
 0x6c3   : > { %v1655_v61 = vpop.f32.mrb[12].mxu1 }
 0x6c4   : > { %v9770_v62 = vpop.f32.mrb[13].mxu1  ;;  %v1661_v63 = vsel %vm1545_vm5, %v1655_v61, -inf }
 0x6c5   : > { %1662 = vmax.xlane.f32.xlu1 %v1661_v63  ;;  %v1658_v0 = vpop.f32.mrb[14].mxu1 }
 0x6c6   : > { %v9771_v1 = vpop.f32.mrb[15].mxu1 }
 0x6d6   : > { %1724 = vrot.lane.b32.xlu1 %v11649_v27, %s11179_s17 }
 0x6da   : > { %1722 = vrot.lane.b32.xlu1 %v11662_v37, %s11179_s17 }
 0x752   : > { %v1663_v2 = vpop.xlane.xlu1 %1662 }
 0x753   : > { %v1664_v4 = vsub.f32 %v1655_v61, %v1663_v2 }
 0x755   : > { %v1665_v6 = vmul.f32 1.442695, %v1664_v4 }
 0x756   : > { %v1725_v20 = vpop.permute.xlu1 %1724 }
 0x757   : > { %10407 = vpow2.f32 %v1665_v6  ;;  %v1730_v22 = vsel %vm1498_vm2, %v1725_v20, 0 }
 0x75a   : > { %v1723_v23 = vpop.permute.xlu1 %1722 }
 0x761   : > { %v10408_v7 = vpop.eup %10407 }
 0x762   : > { %v1667_v8 = vsel %vm1545_vm5, %v10408_v7, 0.0 }
 0x763   : > { %1668 = vadd.xlane.f32.xlu0 %v1667_v8 }
 0x779   : > { %1674 = vrot.lane.b32.xlu0 %v11658_v35, %s11177_s12 }
 0x7f0   : > { %v1669_v9 = vpop.xlane.xlu0 %1668 }
 0x7f1   : > { %10409 = vrcp.f32 %v1669_v9 }
 0x7f4   : > { %v1675_v12 = vpop.permute.xlu0 %1674 }
 0x7f5   : > { %v1680_v16 = vand.u32 %v1675_v12, %v11660_v36 }
 0x7f7   : > { %9773 = vmatpush3.bf16.msra.mxu1 %v1680_v16 }
 0x7f8   : > { %9778 = vmatprep.subr.bf16.mxu1 %v13574_v34 }
 0x7fb   : > { %v10410_v17 = vpop.eup %10409 }
 0x7fc   : > { %v1671_v19 = vmul.f32 %v10410_v17, %v10408_v7 }
 0x7fe   : > { %v1672_v21 = vpack.c.bf16 %v1671_v19, %v1671_v19 }
 0x800   : > { %9775 = vmatmul.mubr.msk.bf16.vlgmr.msra.gmra.mrb[16].mxu1 %vm1558_vm6, %v1672_v21 }
 0x801   : > { %9779 = vmatpush3.bf16.xpose.msra.mxu1 %v1730_v22  ;;  %9780 = vmatprep.mubr.msk.bf16.mxu1 %vm11176_vm1, %v13574_v34 }
 0x802   : > { %9784 = vmatprep.subr.bf16.mxu1 %v13574_v34 }
 0x808   : > { %9781 = vmatmul.mubr.msk.bf16.vlgmr.msra.gmra.mrb[20].mxu1 %vm1498_vm2, %v1723_v23 }
 0x809   : > { %9786 = vmatprep.mubr.msk.bf16.mxu1 %vm11176_vm1, %v13574_v34 }
 0x8d3   : > { %v11703_v24 = vpop.f32.mrb[16].mxu1 }
 0x8d4   : > { %v9776_v25 = vpop.f32.mrb[17].mxu1 }
 0x8d5   : > { %v1719_v28 = vpop.f32.mrb[18].mxu1 }
 0x8d6   : > { %v9777_v29 = vpop.f32.mrb[19].mxu1 }
 0x8db   : > { %v1766_v31 = vpop.f32.mrb[20].mxu1 }
 0x8dc   : > { %v9782_v32 = vpop.f32.mrb[21].mxu1  ;;  %v1772_v33 = vsel %vm1545_vm5, %v1766_v31, -inf }
 0x8dd   : > { %1773 = vmax.xlane.f32.xlu1 %v1772_v33  ;;  %v1769_v38 = vpop.f32.mrb[22].mxu1 }
 0x8de   : > { %v9783_v39 = vpop.f32.mrb[23].mxu1 }
 0x8ee   : > { %1834 = vrot.lane.b32.xlu1 %v11649_v27, %s11180_s21 }
 0x8f2   : > { %1832 = vrot.lane.b32.xlu1 %v11662_v37, %s11180_s21 }
 0x8f6   : > { %1942 = vrot.lane.b32.xlu1 %v11662_v37, %s11181_s29 }
 0x8fa   : > { %2052 = vrot.lane.b32.xlu1 %v11662_v37, %s11182_s25 }
 0x8fe   : > { %2162 = vrot.lane.b32.xlu1 %v11662_v37, %s11183_s0 }
 0x902   : > { %2272 = vrot.lane.b32.xlu1 %v11662_v37, %s11184_s22 }
 0x96a   : > { %v1774_v40 = vpop.xlane.xlu1 %1773 }
 0x96b   : > { %v1775_v41 = vsub.f32 %v1766_v31, %v1774_v40 }
 0x96d   : > { %v1776_v42 = vmul.f32 1.442695, %v1775_v41 }
 0x96e   : > { %v1835_v45 = vpop.permute.xlu1 %1834 }
 0x96f   : > { %10411 = vpow2.f32 %v1776_v42  ;;  %v1840_v54 = vsel %vm1498_vm2, %v1835_v45, 0 }
 0x972   : > { %v1833_v50 = vpop.permute.xlu1 %1832 }
 0x976   : > { %v1943_v55 = vpop.permute.xlu1 %1942 }
 0x979   : > { %v10412_v43 = vpop.eup %10411 }
 0x97a   : > { %v1778_v44 = vsel %vm1545_vm5, %v10412_v43, 0.0  ;;  %v2053_v60 = vpop.permute.xlu1 %2052 }
 0x97b   : > { %1779 = vadd.xlane.f32.xlu0 %v1778_v44 }
 0x97e   : > { %v2163_v63 = vpop.permute.xlu1 %2162 }
 0x982   : > { %v2273_v1 = vpop.permute.xlu1 %2272 }
 0x991   : > { %1784 = vrot.lane.b32.xlu0 %v11658_v35, %s11179_s17 }
 0x995   : > { %1944 = vrot.lane.b32.xlu0 %v11649_v27, %s11181_s29 }
 0x999   : > { %2054 = vrot.lane.b32.xlu0 %v11649_v27, %s11182_s25 }
 0x99d   : > { %2164 = vrot.lane.b32.xlu0 %v11649_v27, %s11183_s0 }
 0x9a1   : > { %2274 = vrot.lane.b32.xlu0 %v11649_v27, %s11184_s22 }
 0xa08   : > { %v1780_v37 = vpop.xlane.xlu0 %1779 }
 0xa09   : > { %10413 = vrcp.f32 %v1780_v37 }
 0xa0c   : > { %v1785_v46 = vpop.permute.xlu0 %1784 }
 0xa0d   : > { %v1790_v47 = vand.u32 %v1785_v46, %v11660_v36 }
 0xa0f   : > { %9785 = vmatpush3.bf16.msra.mxu1 %v1790_v47 }
 0xa10   : > { %v1945_v48 = vpop.permute.xlu0 %1944  ;;  %9790 = vmatprep.subr.bf16.mxu1 %v13574_v34 }
 0xa11   : > { %v1950_v49 = vsel %vm1498_vm2, %v1945_v48, 0 }
 0xa12   : > { %9803 = vmatpush3.bf16.xpose.msra.mxu0 %v1950_v49 }
 0xa13   : > { %v10414_v51 = vpop.eup %10413  ;;  %9814 = vmatprep.subr.bf16.mxu0 %v13574_v34 }
 0xa14   : > { %v1782_v52 = vmul.f32 %v10414_v51, %v10412_v43  ;;  %v2055_v53 = vpop.permute.xlu0 %2054 }
 0xa15   : > { %v2060_v58 = vsel %vm1498_vm2, %v2055_v53, 0 }
 0xa16   : > { %v1783_v27 = vpack.c.bf16 %v1782_v52, %v1782_v52 }
 0xa18   : > { %9787 = vmatmul.mubr.msk.bf16.vlgmr.msra.gmra.mrb[24].mxu1 %vm1558_vm6, %v1783_v27  ;;  %v2165_v59 = vpop.permute.xlu0 %2164 }
 0xa19   : > { %9791 = vmatpush3.bf16.xpose.msra.mxu1 %v1840_v54  ;;  %9805 = vmatmul.mubr.msk.bf16.vlgmr.msra.gmra.mrb[8].mxu0 %vm1498_vm2, %v1943_v55  ;;  %v2170_v61 = vsel %vm1498_vm2, %v2165_v59, 0 }
 0xa1a   : > { %9815 = vmatpush3.bf16.xpose.msra.mxu0 %v2060_v58  ;;  %9792 = vmatprep.mubr.msk.bf16.mxu1 %vm11176_vm1, %v13574_v34 }
 0xa1b   : > { %9816 = vmatprep.mubr.msk.bf16.mxu0 %vm11176_vm1, %v13574_v34  ;;  %9826 = vmatprep.subr.bf16.mxu0 %v13574_v34 }
 0xa1c   : > { %9796 = vmatprep.subr.bf16.mxu1 %v13574_v34  ;;  %v2275_v62 = vpop.permute.xlu0 %2274 }
 0xa1d   : > { %v2280_v0 = vsel %vm1498_vm2, %v2275_v62, 0 }
 0xa20   : > { %9793 = vmatmul.mubr.msk.bf16.vlgmr.msra.gmra.mrb[28].mxu1 %vm1498_vm2, %v1833_v50 }
 0xa21   : > { %9817 = vmatmul.mubr.msk.bf16.vlgmr.msra.gmra.mrb[12].mxu0 %vm1498_vm2, %v2053_v60  ;;  %9798 = vmatprep.mubr.msk.bf16.mxu1 %vm11176_vm1, %v13574_v34 }
 0xa22   : > { %9827 = vmatpush3.bf16.xpose.msra.mxu0 %v2170_v61  ;;  %9828 = vmatprep.mubr.msk.bf16.mxu0 %vm11176_vm1, %v13574_v34 }
 0xa23   : > { %9838 = vmatprep.subr.bf16.mxu0 %v13574_v34 }
 0xa29   : > { %9829 = vmatmul.mubr.msk.bf16.vlgmr.msra.gmra.mrb[16].mxu0 %vm1498_vm2, %v2163_v63 }
 0xa2a   : > { %9839 = vmatpush3.bf16.xpose.msra.mxu0 %v2280_v0  ;;  %9840 = vmatprep.mubr.msk.bf16.mxu0 %vm11176_vm1, %v13574_v34 }
 0xa31   : > { %9841 = vmatmul.mubr.msk.bf16.vlgmr.msra.gmra.mrb[20].mxu0 %vm1498_vm2, %v2273_v1 }
 0xa32   : > { %3194 = vmatprep.mubr.bf16.mxu0 %v13576_v57 }
 0xaeb   : > { %v11757_v2 = vpop.f32.mrb[24].mxu1 }
 0xaec   : > { %v9788_v4 = vpop.f32.mrb[25].mxu1  ;;  %v1986_v6 = vpop.f32.mrb[8].mxu0 }
 0xaed   : > { %v1829_v7 = vpop.f32.mrb[26].mxu1  ;;  %v9806_v8 = vpop.f32.mrb[9].mxu0  ;;  %v1992_v9 = vsel %vm1545_vm5, %v1986_v6, -inf }
 0xaee   : > { %1993 = vmax.xlane.f32.xlu1 %v1992_v9  ;;  %v9789_v12 = vpop.f32.mrb[27].mxu1  ;;  %v1989_v16 = vpop.f32.mrb[10].mxu0 }
 0xaef   : > { %v9807_v17 = vpop.f32.mrb[11].mxu0 }
 0xaf3   : > { %v1876_v19 = vpop.f32.mrb[28].mxu1 }
 0xaf4   : > { %v9794_v20 = vpop.f32.mrb[29].mxu1  ;;  %v2096_v21 = vpop.f32.mrb[12].mxu0  ;;  %v1882_v22 = vsel %vm1545_vm5, %v1876_v19, -inf }
 0xaf5   : > { %v9818_v23 = vpop.f32.mrb[13].mxu0  ;;  %1883 = vmax.xlane.f32.xlu0 %v1882_v22  ;;  %v1879_v25 = vpop.f32.mrb[30].mxu1  ;;  %v2102_v32 = vsel %vm1545_vm5, %v2096_v21, -inf }
 0xaf6   : > { %v9795_v28 = vpop.f32.mrb[31].mxu1  ;;  %v2099_v29 = vpop.f32.mrb[14].mxu0 }
 0xaf7   : > { %v9819_v31 = vpop.f32.mrb[15].mxu0 }
 0xaf9   : > { %2103 = vmax.xlane.f32.xlu0 %v2102_v32 }
 0xafc   : > { %v2206_v33 = vpop.f32.mrb[16].mxu0 }
 0xafd   : > { %v9830_v38 = vpop.f32.mrb[17].mxu0  ;;  %v2212_v39 = vsel %vm1545_vm5, %v2206_v33, -inf }
 0xafe   : > { %v2209_v40 = vpop.f32.mrb[18].mxu0  ;;  %2213 = vmax.xlane.f32.xlu0 %v2212_v39 }
 0xaff   : > { %v9831_v41 = vpop.f32.mrb[19].mxu0 }
 0xb04   : > { %v2316_v42 = vpop.f32.mrb[20].mxu0 }
 0xb05   : > { %v9842_v43 = vpop.f32.mrb[21].mxu0  ;;  %v2322_v44 = vsel %vm1545_vm5, %v2316_v42, -inf }
 0xb06   : > { %v2319_v37 = vpop.f32.mrb[22].mxu0  ;;  %2323 = vmax.xlane.f32.xlu0 %v2322_v44 }
 0xb07   : > { %v9843_v45 = vpop.f32.mrb[23].mxu0 }
 0xb7b   : > { %v1994_v46 = vpop.xlane.xlu1 %1993 }
 0xb7c   : > { %v1995_v47 = vsub.f32 %v1986_v6, %v1994_v46 }
 0xb7e   : > { %v1996_v48 = vmul.f32 1.442695, %v1995_v47 }
 0xb80   : > { %10415 = vpow2.f32 %v1996_v48 }
 0xb82   : > { %v1884_v49 = vpop.xlane.xlu0 %1883 }
 0xb83   : > { %v1885_v27 = vsub.f32 %v1876_v19, %v1884_v49 }
 0xb85   : > { %v1886_v59 = vmul.f32 1.442695, %v1885_v27 }
 0xb86   : > { %v2104_v50 = vpop.xlane.xlu0 %2103 }
 0xb87   : > { %v2105_v51 = vsub.f32 %v2096_v21, %v2104_v50 }
 0xb89   : > { %v2106_v52 = vmul.f32 1.442695, %v2105_v51 }
 0xb8a   : > { %v10416_v53 = vpop.eup %10415 }
 0xb8b   : > { %10417 = vpow2.f32 %v2106_v52  ;;  %v2214_v54 = vpop.xlane.xlu0 %2213  ;;  %v1998_v55 = vsel %vm1545_vm5, %v10416_v53, 0.0 }
 0xb8c   : > { %v2215_v58 = vsub.f32 %v2206_v33, %v2214_v54  ;;  %1999 = vadd.xlane.f32.xlu0 %v1998_v55 }
 0xb8e   : > { %v2216_v60 = vmul.f32 1.442695, %v2215_v58 }
 0xb90   : > { %10419 = vpow2.f32 %v2216_v60 }
 0xb91   : > { %10421 = vpow2.f32 %v1886_v59 }
 0xb93   : > { %v2324_v6 = vpop.xlane.xlu0 %2323 }
 0xb94   : > { %v2325_v7 = vsub.f32 %v2316_v42, %v2324_v6 }
 0xb95   : > { %v10418_v61 = vpop.eup %10417 }
 0xb96   : > { %v2108_v62 = vsel %vm1545_vm5, %v10418_v61, 0.0  ;;  %v2326_v8 = vmul.f32 1.442695, %v2325_v7 }
 0xb97   : > { %2109 = vadd.xlane.f32.xlu1 %v2108_v62 }
 0xb98   : > { %10423 = vpow2.f32 %v2326_v8 }
 0xb9a   : > { %v10420_v63 = vpop.eup %10419 }
 0xb9b   : > { %v2218_v0 = vsel %vm1545_vm5, %v10420_v63, 0.0  ;;  %v10422_v1 = vpop.eup %10421 }
 0xb9c   : > { %2219 = vadd.xlane.f32.xlu1 %v2218_v0  ;;  %v1888_v4 = vsel %vm1545_vm5, %v10422_v1, 0.0 }
 0xba0   : > { %1889 = vadd.xlane.f32.xlu1 %v1888_v4 }
 0xba2   : > { %1894 = vrot.lane.b32.xlu0 %v11658_v35, %s11180_s21  ;;  %v10424_v9 = vpop.eup %10423 }
 0xba3   : > { %v2328_v12 = vsel %vm1545_vm5, %v10424_v9, 0.0 }
 0xba6   : > { %2114 = vrot.lane.b32.xlu0 %v11658_v35, %s11182_s25 }
 0xbaa   : > { %2224 = vrot.lane.b32.xlu0 %v11658_v35, %s11183_s0 }
 0xbae   : > { %2334 = vrot.lane.b32.xlu0 %v11658_v35, %s11184_s22 }
 0xbb1   : > { %2004 = vrot.lane.b32.xlu1 %v11658_v35, %s11181_s29 }
 0xbb2   : > { %2383 = vrot.lane.b32.xlu0 %v11703_v24, %s11184_s22 }
 0xbb6   : > { %2387 = vrot.lane.b32.xlu0 %v11757_v2, %s11183_s0 }
 0xbd5   : > { %2329 = vadd.xlane.f32.xlu1 %v2328_v12 }
 0xc19   : > { %v2000_v16 = vpop.xlane.xlu0 %1999 }
 0xc1d   : > { %v1895_v17 = vpop.permute.xlu0 %1894 }
 0xc1e   : > { %v1900_v19 = vand.u32 %v1895_v17, %v11660_v36 }
 0xc20   : > { %9797 = vmatpush3.bf16.msra.mxu1 %v1900_v19 }
 0xc21   : > { %9808 = vmatprep.subr.bf16.mxu1 %v13574_v34  ;;  %v2115_v31 = vpop.permute.xlu0 %2114 }
 0xc22   : > { %v2120_v38 = vand.u32 %v2115_v31, %v11660_v36 }
 0xc24   : > { %v2110_v35 = vpop.xlane.xlu1 %2109 }
 0xc25   : > { %v2225_v40 = vpop.permute.xlu0 %2224 }
 0xc26   : > { %v2230_v43 = vand.u32 %v2225_v40, %v11660_v36 }
 0xc29   : > { %v2220_v24 = vpop.xlane.xlu1 %2219  ;;  %v2335_v37 = vpop.permute.xlu0 %2334 }
 0xc2a   : > { %v2340_v46 = vand.u32 %v2335_v37, %v11660_v36 }
 0xc2d   : > { %v1890_v20 = vpop.xlane.xlu1 %1889 }
 0xc2e   : > { %10425 = vrcp.f32 %v1890_v20 }
 0xc2f   : > { %10427 = vrcp.f32 %v2000_v16  ;;  %v2384_v16 = vpop.permute.xlu0 %2383 }
 0xc30   : > { %10429 = vrcp.f32 %v2110_v35  ;;  %v2410_v20 = vsel %vm1498_vm2, %v11683_v56, %v2384_v16 }
 0xc31   : > { %v2005_v21 = vpop.permute.xlu1 %2004  ;;  %10431 = vrcp.f32 %v2220_v24 }
 0xc32   : > { %v2010_v28 = vand.u32 %v2005_v21, %v11660_v36 }
 0xc33   : > { %v2388_v17 = vpop.permute.xlu0 %2387 }
 0xc38   : > { %v10426_v2 = vpop.eup %10425 }
 0xc39   : > { %v1892_v22 = vmul.f32 %v10426_v2, %v10422_v1  ;;  %v10428_v25 = vpop.eup %10427  ;;  %v2412_v2 = vsel %vm2411_vm7, %v2410_v20, %v2388_v17  ;;  %v917_v17 = vld [vmem:[#allocation6 + $0x200] sm:$0xff]  ;;  %v926_v20 = vld [vmem:[#allocation6 + $0x248] sm:$0xff] }
 0xc3a   : > { %v2002_v29 = vmul.f32 %v10428_v25, %v10416_v53  ;;  %v10430_v33 = vpop.eup %10429 }
 0xc3b   : > { %v1893_v23 = vpack.c.bf16 %v1892_v22, %v1892_v22  ;;  %v2112_v39 = vmul.f32 %v10430_v33, %v10418_v61  ;;  %v10432_v42 = vpop.eup %10431  ;;  %v853_v33 = vld [vmem:[#allocation6] sm:$0xff] }
 0xc3c   : > { %v2003_v32 = vpack.c.bf16 %v2002_v29, %v2002_v29  ;;  %v2222_v44 = vmul.f32 %v10432_v42, %v10420_v63  ;;  %v862_v42 = vld [vmem:[#allocation6 + $0x48] sm:$0xff] }
 0xc3d   : > { %9799 = vmatmul.mubr.msk.bf16.vlgmr.msra.gmra.mrb[32].mxu1 %vm1558_vm6, %v1893_v23  ;;  %v2113_v41 = vpack.c.bf16 %v2112_v39, %v2112_v39  ;;  %v854_v39 = vld [vmem:[#allocation6 + $0x8] sm:$0xff] }
 0xc3e   : > { %9809 = vmatpush3.bf16.msra.mxu1 %v2010_v28  ;;  %9810 = vmatprep.mubr.msk.bf16.mxu1 %vm11176_vm1, %v13574_v34  ;;  %v2223_v45 = vpack.c.bf16 %v2222_v44, %v2222_v44  ;;  %v877_v44 = vld [vmem:[#allocation6 + $0xc0] sm:$0xff]  ;;  %v11828_v37 = vcombine.low %v854_v39, %v862_v42 }
 0xc3f   : > { %9820 = vmatprep.subr.bf16.mxu1 %v13574_v34 }
 0xc45   : > { %9811 = vmatmul.mubr.msk.bf16.vlgmr.msra.gmra.mrb[36].mxu1 %vm1558_vm6, %v2003_v32 }
 0xc46   : > { %9821 = vmatpush3.bf16.msra.mxu1 %v2120_v38  ;;  %9822 = vmatprep.mubr.msk.bf16.mxu1 %vm11176_vm1, %v13574_v34  ;;  %v861_v38 = vld [vmem:[#allocation6 + $0x40] sm:$0xff] }
 0xc47   : > { %9832 = vmatprep.subr.bf16.mxu1 %v13574_v34  ;;  %v11824_v40 = vcombine.low %v853_v33, %v861_v38 }
 0xc4d   : > { %9823 = vmatmul.mubr.msk.bf16.vlgmr.msra.gmra.mrb[40].mxu1 %vm1558_vm6, %v2113_v41  ;;  %v11826_v41 = vcombine.high %v853_v33, %v861_v38 }
 0xc4e   : > { %9833 = vmatpush3.bf16.msra.mxu1 %v2230_v43  ;;  %9834 = vmatprep.mubr.msk.bf16.mxu1 %vm11176_vm1, %v13574_v34  ;;  %v869_v43 = vld [vmem:[#allocation6 + $0x80] sm:$0xff] }
 0xc4f   : > { %9844 = vmatprep.subr.bf16.mxu1 %v13574_v34  ;;  %3162 = vmatprep.subr.bf16.mxu0 %v11826_v41 }
 0xc50   : > { %3163 = vmatpush1.bf16.msra.mxu0 %v11824_v40 }
 0xc55   : > { %9835 = vmatmul.mubr.msk.bf16.vlgmr.msra.gmra.mrb[44].mxu1 %vm1558_vm6, %v2223_v45  ;;  %v11830_v45 = vcombine.high %v854_v39, %v862_v42  ;;  %v949_v39 = vld [vmem:[#allocation6 + $0x300] sm:$0xff] }
 0xc56   : > { %9845 = vmatpush3.bf16.msra.mxu1 %v2340_v46  ;;  %9846 = vmatprep.mubr.msk.bf16.mxu1 %vm11176_vm1, %v13574_v34  ;;  %v870_v46 = vld [vmem:[#allocation6 + $0x88] sm:$0xff]  ;;  %v957_v42 = vld [vmem:[#allocation6 + $0x340] sm:$0xff]  ;;  %v896_v34 = vld [vmem:[#allocation6 + $0x158] sm:$0xff] }
 0xc57   : > { %3203 = vmatprep.subr.bf16.mxu1 %v11830_v45 }
 0xc62   : > { %v2330_v47 = vpop.xlane.xlu1 %2329 }
 0xc63   : > { %10433 = vrcp.f32 %v2330_v47  ;;  %v878_v47 = vld [vmem:[#allocation6 + $0xc8] sm:$0xff] }
 0xc6d   : > { %v10434_v48 = vpop.eup %10433 }
 0xc6e   : > { %v2332_v49 = vmul.f32 %v10434_v48, %v10424_v9  ;;  %v885_v48 = vld [vmem:[#allocation6 + $0x100] sm:$0xff] }
 0xc70   : > { %v2333_v50 = vpack.c.bf16 %v2332_v49, %v2332_v49  ;;  %v11835_v49 = vcombine.high %v870_v46, %v878_v47 }
 0xc72   : > { %9847 = vmatmul.mubr.msk.bf16.vlgmr.msra.gmra.mrb[48].mxu1 %vm1558_vm6, %v2333_v50  ;;  %v893_v50 = vld [vmem:[#allocation6 + $0x140] sm:$0xff] }
 0xc73   : > { %3235 = vmatprep.mubr.bf16.mxu1 %v13576_v57  ;;  %3204 = vmatpush1.bf16.msra.mxu1 %v11828_v37  ;;  %v912_v57 = vld [vmem:[#allocation6 + $0x1d8] sm:$0xff] }
 0xc74   : > { %3205 = vmatprep.subr.bf16.mxu1 %v11835_v49 }
 0xd10   : > { %v1936_v51 = vpop.f32.mrb[32].mxu1 }
 0xd11   : > { %2391 = vrot.lane.b32.xlu0 %v1936_v51, %s11182_s25  ;;  %v9800_v52 = vpop.f32.mrb[33].mxu1  ;;  %v886_v51 = vld [vmem:[#allocation6 + $0x108] sm:$0xff] }
 0xd12   : > { %v1939_v53 = vpop.f32.mrb[34].mxu1  ;;  %v894_v52 = vld [vmem:[#allocation6 + $0x148] sm:$0xff] }
 0xd13   : > { %v9801_v27 = vpop.f32.mrb[35].mxu1  ;;  %v11839_v53 = vcombine.low %v869_v43, %v877_v44 }
 0xd14   : > { %v11843_v27 = vcombine.low %v870_v46, %v878_v47  ;;  %v958_v46 = vld [vmem:[#allocation6 + $0x348] sm:$0xff]  ;;  %v11904_v47 = vcombine.low %v949_v39, %v957_v42 }
 0xd16   : > { %3206 = vmatpush1.bf16.msra.mxu1 %v11843_v27 }
 0xd18   : > { %v2046_v54 = vpop.f32.mrb[36].mxu1 }
 0xd19   : > { %2395 = vrot.lane.b32.xlu0 %v2046_v54, %s11181_s29  ;;  %v9812_v55 = vpop.f32.mrb[37].mxu1  ;;  %v11845_v54 = vcombine.high %v885_v48, %v893_v50 }
 0xd1a   : > { %v2049_v58 = vpop.f32.mrb[38].mxu1  ;;  %v11848_v55 = vcombine.high %v886_v51, %v894_v52 }
 0xd1b   : > { %v9813_v59 = vpop.f32.mrb[39].mxu1  ;;  %v11851_v58 = vcombine.low %v885_v48, %v893_v50 }
 0xd1c   : > { %v11855_v59 = vcombine.low %v886_v51, %v894_v52  ;;  %3207 = vmatprep.subr.bf16.mxu1 %v11848_v55  ;;  %v965_v51 = vld [vmem:[#allocation6 + $0x380] sm:$0xff] }
 0xd1d   : > { %v973_v52 = vld [vmem:[#allocation6 + $0x3c0] sm:$0xff] }
 0xd1e   : > { %3208 = vmatpush1.bf16.msra.mxu1 %v11855_v59 }
 0xd20   : > { %v2156_v60 = vpop.f32.mrb[40].mxu1 }
 0xd21   : > { %2399 = vrot.lane.b32.xlu0 %v2156_v60, %s11180_s21  ;;  %v9824_v61 = vpop.f32.mrb[41].mxu1 }
 0xd22   : > { %v2159_v62 = vpop.f32.mrb[42].mxu1 }
 0xd23   : > { %v9825_v63 = vpop.f32.mrb[43].mxu1 }
 0xd28   : > { %v2266_v0 = vpop.f32.mrb[44].mxu1 }
 0xd29   : > { %2403 = vrot.lane.b32.xlu0 %v2266_v0, %s11179_s17  ;;  %v9836_v1 = vpop.f32.mrb[45].mxu1 }
 0xd2a   : > { %v2269_v4 = vpop.f32.mrb[46].mxu1  ;;  %v901_v1 = vld [vmem:[#allocation6 + $0x180] sm:$0xff] }
 0xd2b   : > { %v9837_v6 = vpop.f32.mrb[47].mxu1  ;;  %v909_v4 = vld [vmem:[#allocation6 + $0x1c0] sm:$0xff] }
 0xd2c   : > { %v902_v6 = vld [vmem:[#allocation6 + $0x188] sm:$0xff] }
 0xd45   : > { %v2376_v7 = vpop.f32.mrb[48].mxu1 }
 0xd46   : > { %2407 = vrot.lane.b32.xlu1 %v2376_v7, %s11177_s12  ;;  %v9848_v8 = vpop.f32.mrb[49].mxu1  ;;  %v11866_v7 = vcombine.high %v901_v1, %v909_v4 }
 0xd47   : > { %v2379_v9 = vpop.f32.mrb[50].mxu1  ;;  %v910_v8 = vld [vmem:[#allocation6 + $0x1c8] sm:$0xff] }
 0xd48   : > { %v9849_v12 = vpop.f32.mrb[51].mxu1  ;;  %v11868_v9 = vcombine.low %v901_v1, %v909_v4  ;;  %v11872_v16 = vcombine.high %v902_v6, %v910_v8 }
 0xd49   : > { %v11870_v12 = vcombine.low %v902_v6, %v910_v8  ;;  %v855_v6 = vld [vmem:[#allocation6 + $0x10] sm:$0xff] }
 0xd4a   : > { %3209 = vmatprep.subr.bf16.mxu1 %v11872_v16  ;;  %v863_v8 = vld [vmem:[#allocation6 + $0x50] sm:$0xff] }
 0xd4b   : > { %3210 = vmatpush1.bf16.msra.mxu1 %v11870_v12 }
 0xd83   : > { %v2392_v19 = vpop.permute.xlu0 %2391 }
 0xd84   : > { %v2414_v21 = vsel %vm2413_vm8, %v2412_v2, %v2392_v19  ;;  %v925_v19 = vld [vmem:[#allocation6 + $0x240] sm:$0xff] }
 0xd85   : > { %v11880_v2 = vcombine.low %v917_v17, %v925_v19 }
 0xd8b   : > { %v2396_v35 = vpop.permute.xlu0 %2395 }
 0xd8c   : > { %v2416_v23 = vsel %vm2415_vm9, %v2414_v21, %v2396_v35  ;;  %v918_v35 = vld [vmem:[#allocation6 + $0x208] sm:$0xff] }
 0xd8d   : > { %v11882_v21 = vcombine.low %v918_v35, %v926_v20 }
 0xd93   : > { %v2400_v24 = vpop.permute.xlu0 %2399 }
 0xd94   : > { %v2418_v25 = vsel %vm2417_vm10, %v2416_v23, %v2400_v24  ;;  %v11878_v24 = vcombine.high %v917_v17, %v925_v19  ;;  %v933_v23 = vld [vmem:[#allocation6 + $0x280] sm:$0xff]  ;;  %v856_v17 = vld [vmem:[#allocation6 + $0x18] sm:$0xff]  ;;  %v11926_v19 = vcombine.low %v855_v6, %v863_v8 }
 0xd96   : > { %13844 = vst [vmem:[#allocation35_spill] sm:$0xff] %v11926_v19 }
 0xd9b   : > { %v2404_v22 = vpop.permute.xlu0 %2403 }
 0xd9c   : > { %v2420_v28 = vsel %vm2419_vm11, %v2418_v25, %v2404_v22  ;;  %v11884_v22 = vcombine.high %v918_v35, %v926_v20  ;;  %v941_v25 = vld [vmem:[#allocation6 + $0x2c0] sm:$0xff]  ;;  %v11928_v35 = vcombine.high %v855_v6, %v863_v8  ;;  %v864_v20 = vld [vmem:[#allocation6 + $0x58] sm:$0xff] }
 0xd9e   : > { %3211 = vmatprep.subr.bf16.mxu1 %v11884_v22  ;;  %13845 = vst [vmem:[#allocation36_spill] sm:$0xff] %v11928_v35 }
 0xd9f   : > { %3212 = vmatpush1.bf16.msra.mxu1 %v11882_v21 }
 0xdb8   : > { %v2408_v29 = vpop.permute.xlu1 %2407 }
 0xdb9   : > { %v2422_v31 = vsel %vm2421_vm12, %v2420_v28, %v2408_v29  ;;  %v934_v28 = vld [vmem:[#allocation6 + $0x288] sm:$0xff]  ;;  %v11890_v29 = vcombine.high %v933_v23, %v941_v25 }
 0xdba   : > { %v11820_v56 = vadd.f32 %v2422_v31, %v11518_v30  ;;  %v11832_v30 = vcombine.high %v869_v43, %v877_v44  ;;  %v942_v31 = vld [vmem:[#allocation6 + $0x2c8] sm:$0xff]  ;;  %v11902_v44 = vcombine.high %v949_v39, %v957_v42 }
 0xdbb   : > { %v11894_v33 = vcombine.low %v934_v28, %v942_v31  ;;  %v11896_v38 = vcombine.high %v934_v28, %v942_v31  ;;  %v950_v43 = vld [vmem:[#allocation6 + $0x308] sm:$0xff] }
 0xdbc   : > { %v2424_v32 = vsel %vm1240_vm0, %v11820_v56, 0.0  ;;  %3164 = vmatprep.subr.bf16.mxu0 %v11832_v30  ;;  %v11906_v48 = vcombine.low %v950_v43, %v958_v46  ;;  %v11908_v50 = vcombine.high %v950_v43, %v958_v46 }
 0xdbd   : > { %2425 = vadd.xlane.f32.xlu0 %v2424_v32  ;;  %3165 = vmatpush1.bf16.msra.mxu0 %v11839_v53  ;;  %v11892_v32 = vcombine.low %v933_v23, %v941_v25  ;;  %13837 = vst [vmem:[#allocation28_spill] sm:$0xff] %v11894_v33  ;;  %13838 = vst [vmem:[#allocation29_spill] sm:$0xff] %v11896_v38  ;;  %v11930_v23 = vcombine.low %v856_v17, %v864_v20 }
 0xdbe   : > { %3166 = vmatprep.subr.bf16.mxu0 %v11845_v54  ;;  %3213 = vmatprep.subr.bf16.mxu1 %v11896_v38  ;;  %13839 = vst [vmem:[#allocation30_spill] sm:$0xff] %v11906_v48  ;;  %13840 = vst [vmem:[#allocation31_spill] sm:$0xff] %v11908_v50  ;;  %v11932_v25 = vcombine.high %v856_v17, %v864_v20 }
 0xdbf   : > { %3214 = vmatpush1.bf16.msra.mxu1 %v11894_v33  ;;  %13846 = vst [vmem:[#allocation37_spill] sm:$0xff] %v11930_v23 }
 0xdc0   : > { %3215 = vmatprep.subr.bf16.mxu1 %v11908_v50  ;;  %13847 = vst [vmem:[#allocation38_spill] sm:$0xff] %v11932_v25 }
 0xdc1   : > { %3167 = vmatpush1.bf16.msra.mxu0 %v11851_v58 }
 0xdc2   : > { %3168 = vmatprep.subr.bf16.mxu0 %v11866_v7 }
 0xdc3   : > { %3216 = vmatpush1.bf16.msra.mxu1 %v11906_v48 }
 0xdc5   : > { %3169 = vmatpush1.bf16.msra.mxu0 %v11868_v9 }
 0xdc6   : > { %3170 = vmatprep.subr.bf16.mxu0 %v11878_v24 }
 0xdc9   : > { %3171 = vmatpush1.bf16.msra.mxu0 %v11880_v2 }
 0xdca   : > { %3172 = vmatprep.subr.bf16.mxu0 %v11890_v29 }
 0xdcd   : > { %3173 = vmatpush1.bf16.msra.mxu0 %v11892_v32 }
 0xdce   : > { %3174 = vmatprep.subr.bf16.mxu0 %v11902_v44 }
 0xdd1   : > { %3175 = vmatpush1.bf16.msra.mxu0 %v11904_v47 }
 0xe4a   : > { %v2426_v60 = vpop.xlane.xlu0 %2425 }
 0xe4b   : > { %v2427_v61 = vmul.f32 0.0078125, %v2426_v60  ;;  %v966_v60 = vld [vmem:[#allocation6 + $0x388] sm:$0xff] }
 0xe4d   : > { %v11861_v62 = vsub.f32 %v11820_v56, %v2427_v61  ;;  %v11914_v61 = vcombine.high %v965_v51, %v973_v52 }
 0xe4f   : > { %v2429_v63 = vmul.f32 %v11861_v62, %v11861_v62  ;;  %3176 = vmatprep.subr.bf16.mxu0 %v11914_v61 }
 0xe51   : > { %v2430_v0 = vsel %vm1240_vm0, %v2429_v63, 0.0  ;;  %v974_v63 = vld [vmem:[#allocation6 + $0x3c8] sm:$0xff] }
 0xe52   : > { %2431 = vadd.xlane.f32.xlu1 %v2430_v0  ;;  %v11916_v0 = vcombine.low %v965_v51, %v973_v52  ;;  %v11918_v1 = vcombine.low %v966_v60, %v974_v63  ;;  %v11920_v4 = vcombine.high %v966_v60, %v974_v63  ;;  %v871_v51 = vld [vmem:[#allocation6 + $0x90] sm:$0xff]  ;;  %v872_v60 = vld [vmem:[#allocation6 + $0x98] sm:$0xff] }
 0xe53   : > { %v879_v52 = vld [vmem:[#allocation6 + $0xd0] sm:$0xff]  ;;  %v880_v63 = vld [vmem:[#allocation6 + $0xd8] sm:$0xff] }
 0xe54   : > { %13841 = vst [vmem:[#allocation32_spill] sm:$0xff] %v11916_v0  ;;  %13842 = vst [vmem:[#allocation33_spill] sm:$0xff] %v11918_v1  ;;  %3217 = vmatprep.subr.bf16.mxu1 %v11920_v4  ;;  %3177 = vmatpush1.bf16.msra.mxu0 %v11916_v0  ;;  %v11941_v17 = vcombine.high %v871_v51, %v879_v52  ;;  %v11943_v20 = vcombine.high %v872_v60, %v880_v63 }
 0xe55   : > { %13843 = vst [vmem:[#allocation34_spill] sm:$0xff] %v11920_v4  ;;  %3218 = vmatpush1.bf16.msra.mxu1 %v11918_v1  ;;  %3244 = vmatprep.subr.bf16.mxu0 %v11928_v35 }
 0xe56   : > { %3285 = vmatprep.subr.bf16.mxu1 %v11932_v25  ;;  %13848 = vst [vmem:[#allocation39_spill] sm:$0xff] %v11941_v17  ;;  %13849 = vst [vmem:[#allocation40_spill] sm:$0xff] %v11943_v20  ;;  %v13854_v25 = vmov 0  }
 0xedf   : > { %v2432_v28 = vpop.xlane.xlu1 %2431 }
 0xee0   : > { %v2433_v31 = vmul.f32 0.0078125, %v2432_v28  ;;  %v887_v28 = vld [vmem:[#allocation6 + $0x110] sm:$0xff] }
 0xee2   : > { %v2434_v39 = vadd.f32 1e-05, %v2433_v31  ;;  %v895_v31 = vld [vmem:[#allocation6 + $0x150] sm:$0xff] }
 0xee4   : > { %10435 = vrsqrt.f32 %v2434_v39  ;;  %v888_v39 = vld [vmem:[#allocation6 + $0x118] sm:$0xff] }
 0xeee   : > { %v10436_v42 = vpop.eup %10435 }
 0xeef   : > { %v2436_v43 = vmul.f32 %v10436_v42, %v11861_v62  ;;  %v11955_v62 = vcombine.high %v887_v28, %v895_v31  ;;  %v11957_v42 = vcombine.high %v888_v39, %v896_v34 }
 0xef1   : > { %v2437_v46 = vmul.f32 %v11612_v3, %v2436_v43  ;;  %v11949_v3 = vcombine.low %v871_v51, %v879_v52  ;;  %13852 = vst [vmem:[#allocation43_spill] sm:$0xff] %v11955_v62  ;;  %13853 = vst [vmem:[#allocation44_spill] sm:$0xff] %v11957_v42  ;;  %v903_v43 = vld [vmem:[#allocation6 + $0x190] sm:$0xff]  ;;  %v11963_v51 = vcombine.low %v887_v28, %v895_v31 }
 0xef2   : > { %v11965_v52 = vcombine.low %v888_v39, %v896_v34 }
 0xef3   : > { %v2438_v6 = vadd.f32 %v11617_v5, %v2437_v46  ;;  %13850 = vst [vmem:[#allocation41_spill] sm:$0xff] %v11949_v3  ;;  %v11951_v5 = vcombine.low %v872_v60, %v880_v63  ;;  %v911_v46 = vld [vmem:[#allocation6 + $0x1d0] sm:$0xff]  ;;  %13855 = vst [vmem:[#allocation45_spill] sm:$0xff] %v11963_v51 }
 0xef4   : > { %13856 = vst [vmem:[#allocation46_spill] sm:$0xff] %v11965_v52  ;;  %v11969_v60 = vcombine.high %v903_v43, %v911_v46  ;;  %v11975_v28 = vcombine.low %v903_v43, %v911_v46 }
 0xef5   : > { %v11939_v8 = vpack.c.bf16 %v2438_v6, %v2438_v6  ;;  %13851 = vst [vmem:[#allocation42_spill] sm:$0xff] %v11951_v5  ;;  %v904_v6 = vld [vmem:[#allocation6 + $0x198] sm:$0xff] }
 0xef6   : > { %13857 = vst [vmem:[#allocation47_spill] sm:$0xff] %v11969_v60  ;;  %v11971_v63 = vcombine.high %v904_v6, %v912_v57  ;;  %13859 = vst [vmem:[#allocation49_spill] sm:$0xff] %v11975_v28  ;;  %v11977_v34 = vcombine.low %v904_v6, %v912_v57 }
 0xef7   : > { %3195 = vmatmul.mubr.bf16.vlgmr.msra.gmra.mrb[24].mxu0 %v11939_v8  ;;  %3236 = vmatmul.mubr.bf16.vlgmr.msra.gmra.mrb[52].mxu1 %v11939_v8 }
 0xef8   : > { %3245 = vmatpush1.bf16.msra.mxu0 %v11926_v19  ;;  %3286 = vmatpush1.bf16.msra.mxu1 %v11930_v23  ;;  %13858 = vst [vmem:[#allocation48_spill] sm:$0xff] %v11971_v63  ;;  %v920_v23 = vld [vmem:[#allocation6 + $0x218] sm:$0xff]  ;;  %13860 = vst [vmem:[#allocation50_spill] sm:$0xff] %v11977_v34 }
 0xef9   : > { %3246 = vmatprep.subr.bf16.mxu0 %v11941_v17  ;;  %3287 = vmatprep.subr.bf16.mxu1 %v11943_v20  ;;  %v919_v20 = vld [vmem:[#allocation6 + $0x210] sm:$0xff]  ;;  %v928_v19 = vld [vmem:[#allocation6 + $0x258] sm:$0xff] }
 0xefa   : > { %3276 = vmatprep.mubr.bf16.mxu0 %v13854_v25  ;;  %3317 = vmatprep.mubr.bf16.mxu1 %v13854_v25  ;;  %v927_v17 = vld [vmem:[#allocation6 + $0x250] sm:$0xff]  ;;  %v11983_v39 = vcombine.high %v920_v23, %v928_v19  ;;  %v11989_v57 = vcombine.low %v920_v23, %v928_v19 }
 0xefb   : > { %v11981_v31 = vcombine.high %v919_v20, %v927_v17  ;;  %v11987_v43 = vcombine.low %v919_v20, %v927_v17 }
 0xefc   : > { %3247 = vmatpush1.bf16.msra.mxu0 %v11949_v3  ;;  %3288 = vmatpush1.bf16.msra.mxu1 %v11951_v5  ;;  %13862 = vst [vmem:[#allocation52_spill] sm:$0xff] %v11983_v39  ;;  %v936_v5 = vld [vmem:[#allocation6 + $0x298] sm:$0xff]  ;;  %13864 = vst [vmem:[#allocation54_spill] sm:$0xff] %v11989_v57 }
 0xefd   : > { %3248 = vmatprep.subr.bf16.mxu0 %v11955_v62  ;;  %3289 = vmatprep.subr.bf16.mxu1 %v11957_v42  ;;  %13861 = vst [vmem:[#allocation51_spill] sm:$0xff] %v11981_v31  ;;  %v935_v42 = vld [vmem:[#allocation6 + $0x290] sm:$0xff]  ;;  %v944_v3 = vld [vmem:[#allocation6 + $0x2d8] sm:$0xff]  ;;  %13863 = vst [vmem:[#allocation53_spill] sm:$0xff] %v11987_v43 }
 0xefe   : > { %v943_v62 = vld [vmem:[#allocation6 + $0x2d0] sm:$0xff]  ;;  %v11995_v6 = vcombine.high %v936_v5, %v944_v3  ;;  %v12001_v19 = vcombine.low %v936_v5, %v944_v3 }
 0xeff   : > { %v11993_v46 = vcombine.high %v935_v42, %v943_v62  ;;  %v11999_v17 = vcombine.low %v935_v42, %v943_v62 }
 0xf00   : > { %3249 = vmatpush1.bf16.msra.mxu0 %v11963_v51  ;;  %3290 = vmatpush1.bf16.msra.mxu1 %v11965_v52  ;;  %13866 = vst [vmem:[#allocation56_spill] sm:$0xff] %v11995_v6  ;;  %v952_v52 = vld [vmem:[#allocation6 + $0x318] sm:$0xff]  ;;  %13868 = vst [vmem:[#allocation58_spill] sm:$0xff] %v12001_v19 }
 0xf01   : > { %3250 = vmatprep.subr.bf16.mxu0 %v11969_v60  ;;  %3291 = vmatprep.subr.bf16.mxu1 %v11971_v63  ;;  %13865 = vst [vmem:[#allocation55_spill] sm:$0xff] %v11993_v46  ;;  %v951_v63 = vld [vmem:[#allocation6 + $0x310] sm:$0xff]  ;;  %v960_v51 = vld [vmem:[#allocation6 + $0x358] sm:$0xff]  ;;  %13867 = vst [vmem:[#allocation57_spill] sm:$0xff] %v11999_v17 }
 0xf02   : > { %v959_v60 = vld [vmem:[#allocation6 + $0x350] sm:$0xff]  ;;  %v12007_v20 = vcombine.high %v952_v52, %v960_v51  ;;  %v12013_v3 = vcombine.low %v952_v52, %v960_v51 }
 0xf03   : > { %v12005_v23 = vcombine.high %v951_v63, %v959_v60  ;;  %v12011_v62 = vcombine.low %v951_v63, %v959_v60 }
 0xf04   : > { %3251 = vmatpush1.bf16.msra.mxu0 %v11975_v28  ;;  %3292 = vmatpush1.bf16.msra.mxu1 %v11977_v34  ;;  %13870 = vst [vmem:[#allocation60_spill] sm:$0xff] %v12007_v20  ;;  %v968_v34 = vld [vmem:[#allocation6 + $0x398] sm:$0xff]  ;;  %13872 = vst [vmem:[#allocation62_spill] sm:$0xff] %v12013_v3 }
 0xf05   : > { %3252 = vmatprep.subr.bf16.mxu0 %v11981_v31  ;;  %3293 = vmatprep.subr.bf16.mxu1 %v11983_v39  ;;  %13869 = vst [vmem:[#allocation59_spill] sm:$0xff] %v12005_v23  ;;  %v967_v39 = vld [vmem:[#allocation6 + $0x390] sm:$0xff]  ;;  %v976_v28 = vld [vmem:[#allocation6 + $0x3d8] sm:$0xff]  ;;  %13871 = vst [vmem:[#allocation61_spill] sm:$0xff] %v12011_v62 }
 0xf06   : > { %v975_v31 = vld [vmem:[#allocation6 + $0x3d0] sm:$0xff]  ;;  %v12019_v42 = vcombine.high %v968_v34, %v976_v28  ;;  %v12025_v51 = vcombine.low %v968_v34, %v976_v28 }
 0xf07   : > { %v12017_v5 = vcombine.high %v967_v39, %v975_v31  ;;  %v12023_v60 = vcombine.low %v967_v39, %v975_v31 }
 0xf08   : > { %3253 = vmatpush1.bf16.msra.mxu0 %v11987_v43  ;;  %3294 = vmatpush1.bf16.msra.mxu1 %v11989_v57  ;;  %13874 = vst [vmem:[#allocation64_spill] sm:$0xff] %v12019_v42  ;;  %v858_v57 = vld [vmem:[#allocation6 + $0x28] sm:$0xff]  ;;  %13876 = vst [vmem:[#allocation66_spill] sm:$0xff] %v12025_v51 }
 0xf09   : > { %3254 = vmatprep.subr.bf16.mxu0 %v11993_v46  ;;  %3295 = vmatprep.subr.bf16.mxu1 %v11995_v6  ;;  %13873 = vst [vmem:[#allocation63_spill] sm:$0xff] %v12017_v5  ;;  %v857_v6 = vld [vmem:[#allocation6 + $0x20] sm:$0xff]  ;;  %v866_v43 = vld [vmem:[#allocation6 + $0x68] sm:$0xff]  ;;  %13875 = vst [vmem:[#allocation65_spill] sm:$0xff] %v12023_v60 }
 0xf0a   : > { %v865_v46 = vld [vmem:[#allocation6 + $0x60] sm:$0xff]  ;;  %v12031_v63 = vcombine.high %v858_v57, %v866_v43  ;;  %v12037_v28 = vcombine.low %v858_v57, %v866_v43 }
 0xf0b   : > { %v12029_v52 = vcombine.high %v857_v6, %v865_v46  ;;  %v12035_v31 = vcombine.low %v857_v6, %v865_v46 }
 0xf0c   : > { %3255 = vmatpush1.bf16.msra.mxu0 %v11999_v17  ;;  %3296 = vmatpush1.bf16.msra.mxu1 %v12001_v19  ;;  %13878 = vst [vmem:[#allocation68_spill] sm:$0xff] %v12031_v63  ;;  %v874_v19 = vld [vmem:[#allocation6 + $0xa8] sm:$0xff]  ;;  %13880 = vst [vmem:[#allocation70_spill] sm:$0xff] %v12037_v28 }
 0xf0d   : > { %3256 = vmatprep.subr.bf16.mxu0 %v12005_v23  ;;  %3297 = vmatprep.subr.bf16.mxu1 %v12007_v20  ;;  %13877 = vst [vmem:[#allocation67_spill] sm:$0xff] %v12029_v52  ;;  %v873_v20 = vld [vmem:[#allocation6 + $0xa0] sm:$0xff]  ;;  %v882_v17 = vld [vmem:[#allocation6 + $0xe8] sm:$0xff]  ;;  %13879 = vst [vmem:[#allocation69_spill] sm:$0xff] %v12035_v31 }
 0xf0e   : > { %v881_v23 = vld [vmem:[#allocation6 + $0xe0] sm:$0xff]  ;;  %v12043_v39 = vcombine.high %v874_v19, %v882_v17  ;;  %v12051_v57 = vcombine.low %v874_v19, %v882_v17 }
 0xf0f   : > { %v12041_v34 = vcombine.high %v873_v20, %v881_v23  ;;  %v12049_v43 = vcombine.low %v873_v20, %v881_v23 }
 0xf10   : > { %3257 = vmatpush1.bf16.msra.mxu0 %v12011_v62  ;;  %3298 = vmatpush1.bf16.msra.mxu1 %v12013_v3  ;;  %13882 = vst [vmem:[#allocation72_spill] sm:$0xff] %v12043_v39  ;;  %v890_v3 = vld [vmem:[#allocation6 + $0x128] sm:$0xff]  ;;  %13884 = vst [vmem:[#allocation74_spill] sm:$0xff] %v12051_v57 }
 0xf11   : > { %3258 = vmatprep.subr.bf16.mxu0 %v12017_v5  ;;  %3299 = vmatprep.subr.bf16.mxu1 %v12019_v42  ;;  %13881 = vst [vmem:[#allocation71_spill] sm:$0xff] %v12041_v34  ;;  %v889_v42 = vld [vmem:[#allocation6 + $0x120] sm:$0xff]  ;;  %v898_v62 = vld [vmem:[#allocation6 + $0x168] sm:$0xff]  ;;  %13883 = vst [vmem:[#allocation73_spill] sm:$0xff] %v12049_v43 }
 0xf12   : > { %v897_v5 = vld [vmem:[#allocation6 + $0x160] sm:$0xff]  ;;  %v12057_v6 = vcombine.high %v890_v3, %v898_v62  ;;  %v12065_v19 = vcombine.low %v890_v3, %v898_v62 }
 0xf13   : > { %v12055_v46 = vcombine.high %v889_v42, %v897_v5  ;;  %v12063_v17 = vcombine.low %v889_v42, %v897_v5 }
 0xf14   : > { %3259 = vmatpush1.bf16.msra.mxu0 %v12023_v60  ;;  %3300 = vmatpush1.bf16.msra.mxu1 %v12025_v51  ;;  %13886 = vst [vmem:[#allocation76_spill] sm:$0xff] %v12057_v6  ;;  %v906_v51 = vld [vmem:[#allocation6 + $0x1a8] sm:$0xff]  ;;  %13888 = vst [vmem:[#allocation78_spill] sm:$0xff] %v12065_v19 }
 0xf15   : > { %3326 = vmatprep.subr.bf16.mxu0 %v12029_v52  ;;  %3367 = vmatprep.subr.bf16.mxu1 %v12031_v63  ;;  %13885 = vst [vmem:[#allocation75_spill] sm:$0xff] %v12055_v46  ;;  %v905_v63 = vld [vmem:[#allocation6 + $0x1a0] sm:$0xff]  ;;  %v914_v60 = vld [vmem:[#allocation6 + $0x1e8] sm:$0xff]  ;;  %13887 = vst [vmem:[#allocation77_spill] sm:$0xff] %v12063_v17 }
 0xf16   : > { %v913_v52 = vld [vmem:[#allocation6 + $0x1e0] sm:$0xff]  ;;  %v12071_v20 = vcombine.high %v906_v51, %v914_v60  ;;  %v12077_v62 = vcombine.low %v906_v51, %v914_v60 }
 0xf17   : > { %3277 = vmatmul.mubr.bf16.vlgmr.msra.gmra.mrb[28].mxu0 %v11939_v8  ;;  %3318 = vmatmul.mubr.bf16.vlgmr.msra.gmra.mrb[56].mxu1 %v11939_v8  ;;  %v12069_v23 = vcombine.high %v905_v63, %v913_v52  ;;  %v12075_v5 = vcombine.low %v905_v63, %v913_v52 }
 0xf18   : > { %3327 = vmatpush1.bf16.msra.mxu0 %v12035_v31  ;;  %3368 = vmatpush1.bf16.msra.mxu1 %v12037_v28  ;;  %13890 = vst [vmem:[#allocation80_spill] sm:$0xff] %v12071_v20  ;;  %v922_v28 = vld [vmem:[#allocation6 + $0x228] sm:$0xff]  ;;  %13892 = vst [vmem:[#allocation82_spill] sm:$0xff] %v12077_v62 }
 0xf19   : > { %3328 = vmatprep.subr.bf16.mxu0 %v12041_v34  ;;  %3369 = vmatprep.subr.bf16.mxu1 %v12043_v39  ;;  %13889 = vst [vmem:[#allocation79_spill] sm:$0xff] %v12069_v23  ;;  %v921_v39 = vld [vmem:[#allocation6 + $0x220] sm:$0xff]  ;;  %v930_v31 = vld [vmem:[#allocation6 + $0x268] sm:$0xff]  ;;  %13891 = vst [vmem:[#allocation81_spill] sm:$0xff] %v12075_v5 }
 0xf1a   : > { %3358 = vmatprep.mubr.bf16.mxu0 %v13854_v25  ;;  %3399 = vmatprep.mubr.bf16.mxu1 %v13854_v25  ;;  %v929_v34 = vld [vmem:[#allocation6 + $0x260] sm:$0xff]  ;;  %v12083_v42 = vcombine.high %v922_v28, %v930_v31  ;;  %v12089_v60 = vcombine.low %v922_v28, %v930_v31 }
 0xf1b   : > { %v12081_v3 = vcombine.high %v921_v39, %v929_v34  ;;  %v12087_v52 = vcombine.low %v921_v39, %v929_v34 }
 0xf1c   : > { %3329 = vmatpush1.bf16.msra.mxu0 %v12049_v43  ;;  %3370 = vmatpush1.bf16.msra.mxu1 %v12051_v57  ;;  %13894 = vst [vmem:[#allocation84_spill] sm:$0xff] %v12083_v42  ;;  %v938_v57 = vld [vmem:[#allocation6 + $0x2a8] sm:$0xff]  ;;  %13896 = vst [vmem:[#allocation86_spill] sm:$0xff] %v12089_v60 }
 0xf1d   : > { %3330 = vmatprep.subr.bf16.mxu0 %v12055_v46  ;;  %3371 = vmatprep.subr.bf16.mxu1 %v12057_v6  ;;  %13893 = vst [vmem:[#allocation83_spill] sm:$0xff] %v12081_v3  ;;  %v937_v6 = vld [vmem:[#allocation6 + $0x2a0] sm:$0xff]  ;;  %v946_v43 = vld [vmem:[#allocation6 + $0x2e8] sm:$0xff]  ;;  %13895 = vst [vmem:[#allocation85_spill] sm:$0xff] %v12087_v52 }
 0xf1e   : > { %v945_v46 = vld [vmem:[#allocation6 + $0x2e0] sm:$0xff]  ;;  %v12095_v63 = vcombine.high %v938_v57, %v946_v43  ;;  %v12101_v31 = vcombine.low %v938_v57, %v946_v43 }
 0xf1f   : > { %v12093_v51 = vcombine.high %v937_v6, %v945_v46  ;;  %v12099_v34 = vcombine.low %v937_v6, %v945_v46 }
 0xf20   : > { %3331 = vmatpush1.bf16.msra.mxu0 %v12063_v17  ;;  %3372 = vmatpush1.bf16.msra.mxu1 %v12065_v19  ;;  %13898 = vst [vmem:[#allocation88_spill] sm:$0xff] %v12095_v63  ;;  %v954_v19 = vld [vmem:[#allocation6 + $0x328] sm:$0xff]  ;;  %13900 = vst [vmem:[#allocation90_spill] sm:$0xff] %v12101_v31 }
 0xf21   : > { %3332 = vmatprep.subr.bf16.mxu0 %v12069_v23  ;;  %3373 = vmatprep.subr.bf16.mxu1 %v12071_v20  ;;  %13897 = vst [vmem:[#allocation87_spill] sm:$0xff] %v12093_v51  ;;  %v953_v20 = vld [vmem:[#allocation6 + $0x320] sm:$0xff]  ;;  %v962_v17 = vld [vmem:[#allocation6 + $0x368] sm:$0xff]  ;;  %13899 = vst [vmem:[#allocation89_spill] sm:$0xff] %v12099_v34 }
 0xf22   : > { %v961_v23 = vld [vmem:[#allocation6 + $0x360] sm:$0xff]  ;;  %v12107_v39 = vcombine.high %v954_v19, %v962_v17  ;;  %v12113_v43 = vcombine.low %v954_v19, %v962_v17 }
 0xf23   : > { %v12105_v28 = vcombine.high %v953_v20, %v961_v23  ;;  %v12111_v46 = vcombine.low %v953_v20, %v961_v23 }
 0xf24   : > { %3333 = vmatpush1.bf16.msra.mxu0 %v12075_v5  ;;  %3374 = vmatpush1.bf16.msra.mxu1 %v12077_v62  ;;  %13902 = vst [vmem:[#allocation92_spill] sm:$0xff] %v12107_v39  ;;  %v970_v62 = vld [vmem:[#allocation6 + $0x3a8] sm:$0xff]  ;;  %13904 = vst [vmem:[#allocation94_spill] sm:$0xff] %v12113_v43 }
 0xf25   : > { %3334 = vmatprep.subr.bf16.mxu0 %v12081_v3  ;;  %3375 = vmatprep.subr.bf16.mxu1 %v12083_v42  ;;  %13901 = vst [vmem:[#allocation91_spill] sm:$0xff] %v12105_v28  ;;  %v969_v42 = vld [vmem:[#allocation6 + $0x3a0] sm:$0xff]  ;;  %v978_v5 = vld [vmem:[#allocation6 + $0x3e8] sm:$0xff]  ;;  %13903 = vst [vmem:[#allocation93_spill] sm:$0xff] %v12111_v46 }
 0xf26   : > { %v977_v3 = vld [vmem:[#allocation6 + $0x3e0] sm:$0xff]  ;;  %v12119_v6 = vcombine.high %v970_v62, %v978_v5  ;;  %v12125_v17 = vcombine.low %v970_v62, %v978_v5 }
 0xf27   : > { %v12117_v57 = vcombine.high %v969_v42, %v977_v3  ;;  %v12123_v23 = vcombine.low %v969_v42, %v977_v3 }
 0xf28   : > { %3335 = vmatpush1.bf16.msra.mxu0 %v12087_v52  ;;  %3376 = vmatpush1.bf16.msra.mxu1 %v12089_v60  ;;  %13906 = vst [vmem:[#allocation96_spill] sm:$0xff] %v12119_v6  ;;  %v860_v60 = vld [vmem:[#allocation6 + $0x38] sm:$0xff]  ;;  %13908 = vst [vmem:[#allocation98_spill] sm:$0xff] %v12125_v17 }
 0xf29   : > { %3336 = vmatprep.subr.bf16.mxu0 %v12093_v51  ;;  %3377 = vmatprep.subr.bf16.mxu1 %v12095_v63  ;;  %13905 = vst [vmem:[#allocation95_spill] sm:$0xff] %v12117_v57  ;;  %v859_v63 = vld [vmem:[#allocation6 + $0x30] sm:$0xff]  ;;  %v868_v52 = vld [vmem:[#allocation6 + $0x78] sm:$0xff]  ;;  %13907 = vst [vmem:[#allocation97_spill] sm:$0xff] %v12123_v23 }
 0xf2a   : > { %v867_v51 = vld [vmem:[#allocation6 + $0x70] sm:$0xff]  ;;  %v12131_v20 = vcombine.high %v860_v60, %v868_v52  ;;  %v12137_v5 = vcombine.low %v860_v60, %v868_v52 }
 0xf2b   : > { %v12129_v19 = vcombine.high %v859_v63, %v867_v51  ;;  %v12135_v3 = vcombine.low %v859_v63, %v867_v51 }
 0xf2c   : > { %3337 = vmatpush1.bf16.msra.mxu0 %v12099_v34  ;;  %3378 = vmatpush1.bf16.msra.mxu1 %v12101_v31  ;;  %13910 = vst [vmem:[#allocation100_spill] sm:$0xff] %v12131_v20  ;;  %v876_v31 = vld [vmem:[#allocation6 + $0xb8] sm:$0xff]  ;;  %13912 = vst [vmem:[#allocation102_spill] sm:$0xff] %v12137_v5 }
 0xf2d   : > { %3338 = vmatprep.subr.bf16.mxu0 %v12105_v28  ;;  %3379 = vmatprep.subr.bf16.mxu1 %v12107_v39  ;;  %13909 = vst [vmem:[#allocation99_spill] sm:$0xff] %v12129_v19  ;;  %v875_v39 = vld [vmem:[#allocation6 + $0xb0] sm:$0xff]  ;;  %v884_v34 = vld [vmem:[#allocation6 + $0xf8] sm:$0xff]  ;;  %13911 = vst [vmem:[#allocation101_spill] sm:$0xff] %v12135_v3 }
 0xf2e   : > { %v883_v28 = vld [vmem:[#allocation6 + $0xf0] sm:$0xff]  ;;  %v12143_v42 = vcombine.high %v876_v31, %v884_v34  ;;  %v12151_v60 = vcombine.low %v876_v31, %v884_v34 }
 0xf2f   : > { %v12141_v62 = vcombine.high %v875_v39, %v883_v28  ;;  %v12149_v52 = vcombine.low %v875_v39, %v883_v28 }
 0xf30   : > { %3339 = vmatpush1.bf16.msra.mxu0 %v12111_v46  ;;  %3380 = vmatpush1.bf16.msra.mxu1 %v12113_v43  ;;  %13914 = vst [vmem:[#allocation104_spill] sm:$0xff] %v12143_v42  ;;  %v892_v43 = vld [vmem:[#allocation6 + $0x138] sm:$0xff]  ;;  %13916 = vst [vmem:[#allocation106_spill] sm:$0xff] %v12151_v60 }
 0xf31   : > { %3340 = vmatprep.subr.bf16.mxu0 %v12117_v57  ;;  %3381 = vmatprep.subr.bf16.mxu1 %v12119_v6  ;;  %13913 = vst [vmem:[#allocation103_spill] sm:$0xff] %v12141_v62  ;;  %v891_v6 = vld [vmem:[#allocation6 + $0x130] sm:$0xff]  ;;  %v900_v46 = vld [vmem:[#allocation6 + $0x178] sm:$0xff]  ;;  %13915 = vst [vmem:[#allocation105_spill] sm:$0xff] %v12149_v52 }
 0xf32   : > { %v899_v57 = vld [vmem:[#allocation6 + $0x170] sm:$0xff]  ;;  %v12157_v63 = vcombine.high %v892_v43, %v900_v46  ;;  %v12165_v31 = vcombine.low %v892_v43, %v900_v46 }
 0xf33   : > { %v12155_v51 = vcombine.high %v891_v6, %v899_v57  ;;  %v12163_v34 = vcombine.low %v891_v6, %v899_v57 }
 0xf34   : > { %3341 = vmatpush1.bf16.msra.mxu0 %v12123_v23  ;;  %3382 = vmatpush1.bf16.msra.mxu1 %v12125_v17  ;;  %13918 = vst [vmem:[#allocation108_spill] sm:$0xff] %v12157_v63  ;;  %v908_v17 = vld [vmem:[#allocation6 + $0x1b8] sm:$0xff]  ;;  %13920 = vst [vmem:[#allocation110_spill] sm:$0xff] %v12165_v31 }
 0xf35   : > { %3408 = vmatprep.subr.bf16.mxu0 %v12129_v19  ;;  %3449 = vmatprep.subr.bf16.mxu1 %v12131_v20  ;;  %13917 = vst [vmem:[#allocation107_spill] sm:$0xff] %v12155_v51  ;;  %v907_v20 = vld [vmem:[#allocation6 + $0x1b0] sm:$0xff]  ;;  %v916_v23 = vld [vmem:[#allocation6 + $0x1f8] sm:$0xff]  ;;  %13919 = vst [vmem:[#allocation109_spill] sm:$0xff] %v12163_v34 }
 0xf36   : > { %v915_v19 = vld [vmem:[#allocation6 + $0x1f0] sm:$0xff]  ;;  %v12171_v39 = vcombine.high %v908_v17, %v916_v23  ;;  %v12177_v46 = vcombine.low %v908_v17, %v916_v23 }
 0xf37   : > { %3359 = vmatmul.mubr.bf16.vlgmr.msra.gmra.mrb[32].mxu0 %v11939_v8  ;;  %3400 = vmatmul.mubr.bf16.vlgmr.msra.gmra.mrb[60].mxu1 %v11939_v8  ;;  %v12169_v28 = vcombine.high %v907_v20, %v915_v19  ;;  %v12175_v57 = vcombine.low %v907_v20, %v915_v19 }
 0xf38   : > { %3409 = vmatpush1.bf16.msra.mxu0 %v12135_v3  ;;  %3450 = vmatpush1.bf16.msra.mxu1 %v12137_v5  ;;  %13922 = vst [vmem:[#allocation112_spill] sm:$0xff] %v12171_v39  ;;  %v924_v5 = vld [vmem:[#allocation6 + $0x238] sm:$0xff]  ;;  %13924 = vst [vmem:[#allocation114_spill] sm:$0xff] %v12177_v46 }
 0xf39   : > { %3410 = vmatprep.subr.bf16.mxu0 %v12141_v62  ;;  %3451 = vmatprep.subr.bf16.mxu1 %v12143_v42  ;;  %13921 = vst [vmem:[#allocation111_spill] sm:$0xff] %v12169_v28  ;;  %v923_v42 = vld [vmem:[#allocation6 + $0x230] sm:$0xff]  ;;  %v932_v3 = vld [vmem:[#allocation6 + $0x278] sm:$0xff]  ;;  %13923 = vst [vmem:[#allocation113_spill] sm:$0xff] %v12175_v57 }
 0xf3a   : > { %3440 = vmatprep.mubr.bf16.mxu0 %v13854_v25  ;;  %3481 = vmatprep.mubr.bf16.mxu1 %v13854_v25  ;;  %v931_v62 = vld [vmem:[#allocation6 + $0x270] sm:$0xff]  ;;  %v12183_v6 = vcombine.high %v924_v5, %v932_v3  ;;  %v12189_v23 = vcombine.low %v924_v5, %v932_v3 }
 0xf3b   : > { %v12181_v43 = vcombine.high %v923_v42, %v931_v62  ;;  %v12187_v19 = vcombine.low %v923_v42, %v931_v62 }
 0xf3c   : > { %3411 = vmatpush1.bf16.msra.mxu0 %v12149_v52  ;;  %3452 = vmatpush1.bf16.msra.mxu1 %v12151_v60  ;;  %13926 = vst [vmem:[#allocation116_spill] sm:$0xff] %v12183_v6  ;;  %v940_v60 = vld [vmem:[#allocation6 + $0x2b8] sm:$0xff]  ;;  %13928 = vst [vmem:[#allocation118_spill] sm:$0xff] %v12189_v23 }
 0xf3d   : > { %3412 = vmatprep.subr.bf16.mxu0 %v12155_v51  ;;  %3453 = vmatprep.subr.bf16.mxu1 %v12157_v63  ;;  %13925 = vst [vmem:[#allocation115_spill] sm:$0xff] %v12181_v43  ;;  %v939_v63 = vld [vmem:[#allocation6 + $0x2b0] sm:$0xff]  ;;  %v948_v52 = vld [vmem:[#allocation6 + $0x2f8] sm:$0xff]  ;;  %13927 = vst [vmem:[#allocation117_spill] sm:$0xff] %v12187_v19 }
 0xf3e   : > { %v947_v51 = vld [vmem:[#allocation6 + $0x2f0] sm:$0xff]  ;;  %v12195_v20 = vcombine.high %v940_v60, %v948_v52  ;;  %v12201_v3 = vcombine.low %v940_v60, %v948_v52 }
 0xf3f   : > { %v12193_v17 = vcombine.high %v939_v63, %v947_v51  ;;  %v12199_v62 = vcombine.low %v939_v63, %v947_v51 }
 0xf40   : > { %3413 = vmatpush1.bf16.msra.mxu0 %v12163_v34  ;;  %3454 = vmatpush1.bf16.msra.mxu1 %v12165_v31  ;;  %13930 = vst [vmem:[#allocation120_spill] sm:$0xff] %v12195_v20  ;;  %v956_v31 = vld [vmem:[#allocation6 + $0x338] sm:$0xff]  ;;  %13932 = vst [vmem:[#allocation122_spill] sm:$0xff] %v12201_v3 }
 0xf41   : > { %3414 = vmatprep.subr.bf16.mxu0 %v12169_v28  ;;  %3455 = vmatprep.subr.bf16.mxu1 %v12171_v39  ;;  %13929 = vst [vmem:[#allocation119_spill] sm:$0xff] %v12193_v17  ;;  %v955_v39 = vld [vmem:[#allocation6 + $0x330] sm:$0xff]  ;;  %v964_v34 = vld [vmem:[#allocation6 + $0x378] sm:$0xff]  ;;  %13931 = vst [vmem:[#allocation121_spill] sm:$0xff] %v12199_v62 }
 0xf42   : > { %v963_v28 = vld [vmem:[#allocation6 + $0x370] sm:$0xff]  ;;  %v12207_v42 = vcombine.high %v956_v31, %v964_v34  ;;  %v12213_v52 = vcombine.low %v956_v31, %v964_v34  ;;  %v10265_v34 = vld [vmem:[#allocation8 + $0x40] sm:$0xff]  }
 0xf43   : > { %v12205_v5 = vcombine.high %v955_v39, %v963_v28  ;;  %v12211_v51 = vcombine.low %v955_v39, %v963_v28  ;;  %v10266_v31 = vld [vmem:[#allocation8 + $0xc0] sm:$0xff]  }
 0xf44   : > { %3415 = vmatpush1.bf16.msra.mxu0 %v12175_v57  ;;  %3456 = vmatpush1.bf16.msra.mxu1 %v12177_v46  ;;  %13934 = vst [vmem:[#allocation124_spill] sm:$0xff] %v12207_v42  ;;  %v972_v46 = vld [vmem:[#allocation6 + $0x3b8] sm:$0xff]  ;;  %13936 = vst [vmem:[#allocation126_spill] sm:$0xff] %v12213_v52  ;;  %v10267_v28 = vld [vmem:[#allocation8] sm:$0xff]  }
 0xf45   : > { %3416 = vmatprep.subr.bf16.mxu0 %v12181_v43  ;;  %3457 = vmatprep.subr.bf16.mxu1 %v12183_v6  ;;  %13933 = vst [vmem:[#allocation123_spill] sm:$0xff] %v12205_v5  ;;  %v971_v6 = vld [vmem:[#allocation6 + $0x3b0] sm:$0xff]  ;;  %v980_v57 = vld [vmem:[#allocation6 + $0x3f8] sm:$0xff]  ;;  %13935 = vst [vmem:[#allocation125_spill] sm:$0xff] %v12211_v51 }
 0xf46   : > { %v979_v43 = vld [vmem:[#allocation6 + $0x3f0] sm:$0xff]  ;;  %v12219_v63 = vcombine.high %v972_v46, %v980_v57  ;;  %v10268_v39 = vld [vmem:[#allocation8 + $0x80] sm:$0xff]  }
 0xf47   : > { %v12217_v60 = vcombine.high %v971_v6, %v979_v43 }
 0xf48   : > { %3417 = vmatpush1.bf16.msra.mxu0 %v12187_v19  ;;  %3458 = vmatpush1.bf16.msra.mxu1 %v12189_v23  ;;  %13938 = vst [vmem:[#allocation128_spill] sm:$0xff] %v12219_v63 }
 0xf49   : > { %3418 = vmatprep.subr.bf16.mxu0 %v12193_v17  ;;  %3459 = vmatprep.subr.bf16.mxu1 %v12195_v20  ;;  %13937 = vst [vmem:[#allocation127_spill] sm:$0xff] %v12217_v60  ;;  %v12223_v20 = vcombine.low %v971_v6, %v979_v43  ;;  %v10273_v43 = vld [vmem:[#allocation8 + $0x50] sm:$0xff]  }
 0xf4a   : > { %v10274_v6 = vld [vmem:[#allocation8 + $0xd0] sm:$0xff]  }
 0xf4b   : > { %13939 = vst [vmem:[#allocation129_spill] sm:$0xff] %v12223_v20 }
 0xf4c   : > { %3419 = vmatpush1.bf16.msra.mxu0 %v12199_v62  ;;  %3460 = vmatpush1.bf16.msra.mxu1 %v12201_v3  ;;  %v12225_v62 = vcombine.low %v972_v46, %v980_v57  ;;  %v10271_v57 = vld [vmem:[#allocation8 + $0x8] sm:$0xff]  }
 0xf4d   : > { %3420 = vmatprep.subr.bf16.mxu0 %v12205_v5  ;;  %3461 = vmatprep.subr.bf16.mxu1 %v12207_v42  ;;  %v10272_v46 = vld [vmem:[#allocation8 + $0x88] sm:$0xff]  }
 0xf4e   : > { %13940 = vst [vmem:[#allocation130_spill] sm:$0xff] %v12225_v62 }
 0xf50   : > { %3421 = vmatpush1.bf16.msra.mxu0 %v12211_v51  ;;  %3462 = vmatpush1.bf16.msra.mxu1 %v12213_v52  ;;  %v10269_v51 = vld [vmem:[#allocation8 + $0x48] sm:$0xff]  }
 0xf51   : > { %3422 = vmatprep.subr.bf16.mxu0 %v12217_v60  ;;  %3463 = vmatprep.subr.bf16.mxu1 %v12219_v63  ;;  %v10270_v52 = vld [vmem:[#allocation8 + $0xc8] sm:$0xff]   ;;  %v10279_v63 = vld [vmem:[#allocation8 + $0x18] sm:$0xff]  }
 0xf54   : > { %3423 = vmatpush1.bf16.msra.mxu0 %v12223_v20  ;;  %3464 = vmatpush1.bf16.msra.mxu1 %v12225_v62  ;;  %v10275_v62 = vld [vmem:[#allocation8 + $0x10] sm:$0xff]  }
 0xf55   : > { %9115 = vmatprep.subr.bf16.mxu0 %v10265_v34  ;;  %9137 = vmatprep.subr.bf16.mxu1 %v10266_v31  ;;  %v10276_v20 = vld [vmem:[#allocation8 + $0x90] sm:$0xff]   ;;  %v10277_v34 = vld [vmem:[#allocation8 + $0x58] sm:$0xff]  }
 0xf56   : > { %v10278_v31 = vld [vmem:[#allocation8 + $0xd8] sm:$0xff]  }
 0xf57   : > { %3441 = vmatmul.mubr.bf16.vlgmr.msra.gmra.mrb[36].mxu0 %v11939_v8  ;;  %3482 = vmatmul.mubr.bf16.vlgmr.msra.gmra.mrb[64].mxu1 %v11939_v8  ;;  %v10280_v8 = vld [vmem:[#allocation8 + $0x98] sm:$0xff]  }
 0xf58   : > { %9116 = vmatpush3.bf16.msra.mxu0 %v10267_v28  ;;  %9138 = vmatpush3.bf16.msra.mxu1 %v10268_v39  ;;  %v10281_v28 = vld [vmem:[#allocation8 + $0x60] sm:$0xff]  }
 0xf59   : > { %9117 = vmatprep.subr.bf16.mxu0 %v10269_v51  ;;  %9139 = vmatprep.subr.bf16.mxu1 %v10270_v52  ;;  %v10282_v39 = vld [vmem:[#allocation8 + $0xe0] sm:$0xff]  }
 0xf5a   : > { %v10283_v51 = vld [vmem:[#allocation8 + $0x20] sm:$0xff]  }
 0xf5b   : > { %v10284_v52 = vld [vmem:[#allocation8 + $0xa0] sm:$0xff]  }
 0xf5c   : > { %9118 = vmatpush3.bf16.msra.mxu0 %v10271_v57  ;;  %9140 = vmatpush3.bf16.msra.mxu1 %v10272_v46  ;;  %v10285_v57 = vld [vmem:[#allocation8 + $0x68] sm:$0xff]  }
 0xf5d   : > { %9119 = vmatprep.subr.bf16.mxu0 %v10273_v43  ;;  %9141 = vmatprep.subr.bf16.mxu1 %v10274_v6  ;;  %v10286_v46 = vld [vmem:[#allocation8 + $0xe8] sm:$0xff]  }
 0xf5e   : > { %v10287_v43 = vld [vmem:[#allocation8 + $0x28] sm:$0xff]  }
 0xf5f   : > { %v10288_v6 = vld [vmem:[#allocation8 + $0xa8] sm:$0xff]  }
 0xf60   : > { %9120 = vmatpush3.bf16.msra.mxu0 %v10275_v62  ;;  %9142 = vmatpush3.bf16.msra.mxu1 %v10276_v20  ;;  %v10289_v20 = vld [vmem:[#allocation8 + $0x70] sm:$0xff]  }
 0xf61   : > { %9121 = vmatprep.subr.bf16.mxu0 %v10277_v34  ;;  %9143 = vmatprep.subr.bf16.mxu1 %v10278_v31  ;;  %v10290_v62 = vld [vmem:[#allocation8 + $0xf0] sm:$0xff]  }
 0xf62   : > { %v10291_v34 = vld [vmem:[#allocation8 + $0x30] sm:$0xff]  }
 0xf63   : > { %v10292_v31 = vld [vmem:[#allocation8 + $0xb0] sm:$0xff]  }
 0xf64   : > { %9122 = vmatpush3.bf16.msra.mxu0 %v10279_v63  ;;  %9144 = vmatpush3.bf16.msra.mxu1 %v10280_v8  ;;  %v10293_v63 = vld [vmem:[#allocation8 + $0x78] sm:$0xff]  }
 0xf65   : > { %9123 = vmatprep.subr.bf16.mxu0 %v10281_v28  ;;  %9145 = vmatprep.subr.bf16.mxu1 %v10282_v39  ;;  %v10294_v8 = vld [vmem:[#allocation8 + $0xf8] sm:$0xff]  }
 0xf66   : > { %v10295_v28 = vld [vmem:[#allocation8 + $0x38] sm:$0xff]  }
 0xf67   : > { %v10296_v39 = vld [vmem:[#allocation8 + $0xb8] sm:$0xff]  }
 0xf68   : > { %9124 = vmatpush3.bf16.msra.mxu0 %v10283_v51  ;;  %9146 = vmatpush3.bf16.msra.mxu1 %v10284_v52  ;;  %v10297_v51 = vld [vmem:[#allocation8 + $0x140] sm:$0xff]  }
 0xf69   : > { %9125 = vmatprep.subr.bf16.mxu0 %v10285_v57  ;;  %9147 = vmatprep.subr.bf16.mxu1 %v10286_v46  ;;  %v10298_v52 = vld [vmem:[#allocation8 + $0x1c0] sm:$0xff]   ;;  %v12236_v57 = vld [vmem:[%s13552_s10] sm:$0xff]  ;;  %v13766_v46 = vsub.s32 3, %v11625_v10 }
 0xf6c   : > { %9126 = vmatpush3.bf16.msra.mxu0 %v10287_v43  ;;  %9148 = vmatpush3.bf16.msra.mxu1 %v10288_v6  ;;  %v12241_v43 = vrot.slane %v12236_v57, %v11640_v15  ;;  %v12245_v6 = vrot.slane %v12236_v57, %v11634_v13 }
 0xf6d   : > { %9127 = vmatprep.subr.bf16.mxu0 %v10289_v20  ;;  %9149 = vmatprep.subr.bf16.mxu1 %v10290_v62  ;;  %v12249_v20 = vrot.slane %v12236_v57, %v11628_v11  ;;  %v12254_v62 = vrot.slane %v12236_v57, %v13766_v46 }
 0xf6e   : > { %13941 = vst [vmem:[#allocation131_spill] sm:$0xff] %v12241_v43  ;;  %13942 = vst [vmem:[#allocation132_spill] sm:$0xff] %v12245_v6 }
 0xf6f   : > { %13943 = vst [vmem:[#allocation133_spill] sm:$0xff] %v12249_v20  ;;  %13944 = vst [vmem:[#allocation134_spill] sm:$0xff] %v12254_v62 }
 0xf70   : > { %9128 = vmatpush3.bf16.msra.mxu0 %v10291_v34  ;;  %9150 = vmatpush3.bf16.msra.mxu1 %v10292_v31 }
 0xf71   : > { %9129 = vmatprep.subr.bf16.mxu0 %v10293_v63  ;;  %9151 = vmatprep.subr.bf16.mxu1 %v10294_v8 }
 0xf74   : > { %9130 = vmatpush3.bf16.msra.mxu0 %v10295_v28  ;;  %9152 = vmatpush3.bf16.msra.mxu1 %v10296_v39 }
 0xf75   : > { %9159 = vmatprep.subr.bf16.mxu0 %v10297_v51  ;;  %9181 = vmatprep.subr.bf16.mxu1 %v10298_v52 }
 0xfca   : > { %v3196_v34 = vpop.f32.mrb[24].mxu0  ;;  %v3237_v31 = vpop.f32.mrb[52].mxu1 }
 0xfcb   : > { %v3197_v63 = vadd.f32 %v3196_v34, %v12241_v43  ;;  %v3238_v8 = vadd.f32 %v3237_v31, %v12245_v6  ;;  %v3198_v28 = vpop.f32.mrb[25].mxu0  ;;  %v3239_v39 = vpop.f32.mrb[53].mxu1 }
 0xfcc   : > { %v3199_v51 = vadd.f32 %v3198_v28, %v12249_v20  ;;  %v3240_v52 = vadd.f32 %v3239_v39, %v12254_v62  ;;  %v3200_v60 = vpop.f32.mrb[26].mxu0  ;;  %v3241_v42 = vpop.f32.mrb[54].mxu1 }
 0xfcd   : > { %v3506_v5 = vmul.f32 0.044715, %v3197_v63  ;;  %v3508_v3 = vmul.f32 0.044715, %v3238_v8  ;;  %v3201_v17 = vpop.f32.mrb[27].mxu0  ;;  %v3242_v23 = vpop.f32.mrb[55].mxu1 }
 0xfce   : > { %v3507_v46 = vmul.f32 0.044715, %v3199_v51  ;;  %v3509_v19 = vmul.f32 0.044715, %v3240_v52 }
 0xfcf   : > { %v3522_v1 = vmul.f32 %v3506_v5, %v3197_v63  ;;  %v3524_v4 = vmul.f32 %v3508_v3, %v3238_v8  ;;  %v13791_v3 = vsub.s32 6, %v11625_v10  ;;  %v3491_v5 = vmul.f32 0.5, %v3199_v51 }
 0xfd0   : > { %v3523_v48 = vmul.f32 %v3507_v46, %v3199_v51  ;;  %v3525_v34 = vmul.f32 %v3509_v19, %v3240_v52  ;;  %v13792_v19 = vsub.s32 4, %v11625_v10 }
 0xfd1   : > { %v3538_v43 = vmul.f32 %v3522_v1, %v3197_v63  ;;  %v3540_v31 = vmul.f32 %v3524_v4, %v3238_v8  ;;  %v3490_v1 = vmul.f32 0.5, %v3197_v63 }
 0xfd2   : > { %v3539_v6 = vmul.f32 %v3523_v48, %v3199_v51  ;;  %v3541_v50 = vmul.f32 %v3525_v34, %v3240_v52  ;;  %v3492_v34 = vmul.f32 0.5, %v3238_v8 }
 0xfd3   : > { %v3554_v33 = vadd.f32 %v3538_v43, %v3197_v63  ;;  %v3556_v28 = vadd.f32 %v3540_v31, %v3238_v8  ;;  %v3493_v43 = vmul.f32 0.5, %v3240_v52  ;;  %v12267_v63 = vrot.slane %v12236_v57, %v13792_v19 }
 0xfd4   : > { %v3555_v20 = vadd.f32 %v3539_v6, %v3199_v51  ;;  %v3557_v39 = vadd.f32 %v3541_v50, %v3240_v52  ;;  %v12272_v51 = vrot.slane %v12236_v57, %v13791_v3  ;;  %v10310_v3 = vld [vmem:[#allocation8 + $0x1d8] sm:$0xff]  }
 0xfd5   : > { %v3570_v60 = vmul.f32 0.7978846, %v3554_v33  ;;  %v3572_v38 = vmul.f32 0.7978846, %v3556_v28  ;;  %v13790_v33 = vsub.s32 5, %v11625_v10 }
 0xfd6   : > { %v3571_v42 = vmul.f32 0.7978846, %v3555_v20  ;;  %v3573_v62 = vmul.f32 0.7978846, %v3557_v39  ;;  %v13789_v20 = vsub.s32 7, %v11625_v10 }
 0xfd7   : > { %10437 = vtanh.f32 %v3570_v60  ;;  %v10299_v60 = vld [vmem:[#allocation8 + $0x100] sm:$0xff]   ;;  %v12277_v8 = vrot.slane %v12236_v57, %v13790_v33  ;;  %v10308_v33 = vld [vmem:[#allocation8 + $0x190] sm:$0xff]  }
 0xfd8   : > { %10439 = vtanh.f32 %v3571_v42 }
 0xfd9   : > { %10441 = vtanh.f32 %v3573_v62 }
 0xfda   : > { %10443 = vtanh.f32 %v3572_v38 }
 0xfe1   : > { %v10438_v23 = vpop.eup %10437 }
 0xfe2   : > { %v10440_v17 = vpop.eup %10439  ;;  %v3602_v4 = vadd.f32 1.0, %v10438_v23  ;;  %v12282_v23 = vrot.slane %v12236_v57, %v13789_v20  ;;  %v10303_v57 = vld [vmem:[#allocation8 + $0x108] sm:$0xff]  }
 0xfe3   : > { %v10442_v48 = vpop.eup %10441  ;;  %v3603_v46 = vadd.f32 1.0, %v10440_v17 }
 0xfe4   : > { %v10444_v50 = vpop.eup %10443  ;;  %v3605_v6 = vadd.f32 1.0, %v10442_v48  ;;  %v3618_v62 = vmul.f32 %v3602_v4, %v3490_v1  ;;  %13945 = vst [vmem:[#allocation135_spill] sm:$0xff] %v12282_v23  ;;  %v10300_v1 = vld [vmem:[#allocation8 + $0x180] sm:$0xff]   ;;  %v10301_v4 = vld [vmem:[#allocation8 + $0x148] sm:$0xff]  }
 0xfe5   : > { %v3619_v38 = vmul.f32 %v3603_v46, %v3491_v5  ;;  %v3604_v31 = vadd.f32 1.0, %v10444_v50  ;;  %v10302_v5 = vld [vmem:[#allocation8 + $0x1c8] sm:$0xff]  }
 0xfe6   : > { %v3621_v28 = vmul.f32 %v3605_v6, %v3493_v43  ;;  %v3634_v17 = vpack.c.bf16 %v3618_v62, %v3618_v62 }
 0xfe7   : > { %v3635_v39 = vpack.c.bf16 %v3619_v38, %v3619_v38  ;;  %v3620_v52 = vmul.f32 %v3604_v31, %v3492_v34 }
 0xfe8   : > { %v3637_v42 = vpack.c.bf16 %v3621_v28, %v3621_v28 }
 0xfe9   : > { %4456 = vmatprep.mubr.bf16.mxu0 %v3635_v39  ;;  %v3636_v48 = vpack.c.bf16 %v3620_v52, %v3620_v52  ;;  %v10304_v52 = vld [vmem:[#allocation8 + $0x188] sm:$0xff]  }
 0xfea   : > { %v3278_v46 = vpop.f32.mrb[28].mxu0  ;;  %v3319_v50 = vpop.f32.mrb[56].mxu1  ;;  %4496 = vmatprep.mubr.bf16.mxu1 %v3637_v42  ;;  %4457 = vmatmul.mubr.bf16.vlgmr.msra.gmra.mrb[40].mxu0 %v3634_v17  ;;  %v10305_v42 = vld [vmem:[#allocation8 + $0x150] sm:$0xff]  }
 0xfeb   : > { %v12285_v43 = vadd.f32 %v3278_v46, %v12267_v63  ;;  %v12288_v6 = vadd.f32 %v3319_v50, %v12272_v51  ;;  %v3280_v38 = vpop.f32.mrb[29].mxu0  ;;  %v3321_v34 = vpop.f32.mrb[57].mxu1  ;;  %4497 = vmatmul.mubr.bf16.vlgmr.msra.gmra.mrb[68].mxu1 %v3636_v48  ;;  %9160 = vmatpush3.bf16.msra.mxu0 %v10299_v60  ;;  %v10306_v17 = vld [vmem:[#allocation8 + $0x1d0] sm:$0xff]  }
 0xfec   : > { %v12291_v62 = vadd.f32 %v3280_v38, %v12277_v8  ;;  %v12294_v31 = vadd.f32 %v3321_v34, %v12282_v23  ;;  %9182 = vmatpush3.bf16.msra.mxu1 %v10300_v1  ;;  %v3282_v28 = vpop.f32.mrb[30].mxu0  ;;  %v3323_v39 = vpop.f32.mrb[58].mxu1  ;;  %9161 = vmatprep.subr.bf16.mxu0 %v10301_v4  ;;  %v10307_v4 = vld [vmem:[#allocation8 + $0x110] sm:$0xff]  }
 0xfed   : > { %v3510_v46 = vmul.f32 0.044715, %v12285_v43  ;;  %v3512_v50 = vmul.f32 0.044715, %v12288_v6  ;;  %v3283_v48 = vpop.f32.mrb[31].mxu0  ;;  %v3324_v60 = vpop.f32.mrb[59].mxu1  ;;  %9183 = vmatprep.subr.bf16.mxu1 %v10302_v5 }
 0xfee   : > { %v3511_v38 = vmul.f32 0.044715, %v12291_v62  ;;  %v3513_v20 = vmul.f32 0.044715, %v12294_v31  ;;  %v10309_v48 = vld [vmem:[#allocation8 + $0x158] sm:$0xff]  }
 0xfef   : > { %v3526_v34 = vmul.f32 %v3510_v46, %v12285_v43  ;;  %v3528_v1 = vmul.f32 %v3512_v50, %v12288_v6  ;;  %9162 = vmatpush3.bf16.msra.mxu0 %v10303_v57 }
 0xff0   : > { %v3527_v28 = vmul.f32 %v3511_v38, %v12291_v62  ;;  %v3529_v39 = vmul.f32 %v3513_v20, %v12294_v31  ;;  %9184 = vmatpush3.bf16.msra.mxu1 %v10304_v52  ;;  %9163 = vmatprep.subr.bf16.mxu0 %v10305_v42  ;;  %v10311_v20 = vld [vmem:[#allocation8 + $0x118] sm:$0xff]   ;;  %v10313_v42 = vld [vmem:[#allocation8 + $0x160] sm:$0xff]  }
 0xff1   : > { %v3542_v5 = vmul.f32 %v3526_v34, %v12285_v43  ;;  %v3544_v60 = vmul.f32 %v3528_v1, %v12288_v6  ;;  %9185 = vmatprep.subr.bf16.mxu1 %v10306_v17  ;;  %v10312_v52 = vld [vmem:[#allocation8 + $0x198] sm:$0xff]   ;;  %v10314_v17 = vld [vmem:[#allocation8 + $0x1e0] sm:$0xff]  }
 0xff2   : > { %v3543_v46 = vmul.f32 %v3527_v28, %v12291_v62  ;;  %v3545_v50 = vmul.f32 %v3529_v39, %v12294_v31 }
 0xff3   : > { %v3558_v57 = vadd.f32 %v3542_v5, %v12285_v43  ;;  %v3560_v38 = vadd.f32 %v3544_v60, %v12288_v6  ;;  %9164 = vmatpush3.bf16.msra.mxu0 %v10307_v4  ;;  %v10315_v5 = vld [vmem:[#allocation8 + $0x120] sm:$0xff]   ;;  %v10319_v60 = vld [vmem:[#allocation8 + $0x128] sm:$0xff]  }
 0xff4   : > { %9186 = vmatpush3.bf16.msra.mxu1 %v10308_v33  ;;  %9165 = vmatprep.subr.bf16.mxu0 %v10309_v48  ;;  %v3559_v34 = vadd.f32 %v3543_v46, %v12291_v62  ;;  %v3561_v1 = vadd.f32 %v3545_v50, %v12294_v31  ;;  %v10316_v4 = vld [vmem:[#allocation8 + $0x1a0] sm:$0xff]   ;;  %v10317_v33 = vld [vmem:[#allocation8 + $0x168] sm:$0xff]   ;;  %v10321_v46 = vld [vmem:[#allocation8 + $0x170] sm:$0xff]  }
 0xff5   : > { %9187 = vmatprep.subr.bf16.mxu1 %v10310_v3  ;;  %v3574_v19 = vmul.f32 0.7978846, %v3558_v57  ;;  %v3576_v39 = vmul.f32 0.7978846, %v3560_v38  ;;  %v10318_v48 = vld [vmem:[#allocation8 + $0x1e8] sm:$0xff]   ;;  %v10322_v50 = vld [vmem:[#allocation8 + $0x1f0] sm:$0xff]  }
 0xff6   : > { %v3575_v28 = vmul.f32 0.7978846, %v3559_v34  ;;  %v3577_v23 = vmul.f32 0.7978846, %v3561_v1  ;;  %v10320_v3 = vld [vmem:[#allocation8 + $0x1a8] sm:$0xff]   ;;  %v10323_v57 = vld [vmem:[#allocation8 + $0x130] sm:$0xff]  }
 0xff7   : > { %9166 = vmatpush3.bf16.msra.mxu0 %v10311_v20  ;;  %10445 = vtanh.f32 %v3574_v19  ;;  %v10324_v19 = vld [vmem:[#allocation8 + $0x1b0] sm:$0xff]   ;;  %v10325_v38 = vld [vmem:[#allocation8 + $0x178] sm:$0xff]  }
 0xff8   : > { %9188 = vmatpush3.bf16.msra.mxu1 %v10312_v52  ;;  %9167 = vmatprep.subr.bf16.mxu0 %v10313_v42  ;;  %10447 = vtanh.f32 %v3575_v28  ;;  %v10326_v52 = vld [vmem:[#allocation8 + $0x1f8] sm:$0xff]   ;;  %v3495_v28 = vmul.f32 0.5, %v12291_v62 }
 0xff9   : > { %9189 = vmatprep.subr.bf16.mxu1 %v10314_v17  ;;  %10449 = vtanh.f32 %v3577_v23  ;;  %v3494_v23 = vmul.f32 0.5, %v12285_v43  ;;  %v10327_v17 = vld [vmem:[#allocation8 + $0x138] sm:$0xff]  }
 0xffa   : > { %10451 = vtanh.f32 %v3576_v39 }
 0xffb   : > { %9168 = vmatpush3.bf16.msra.mxu0 %v10315_v5  ;;  %v12317_v5 = vld [vmem:[%s13552_s10 + $0x8] sm:$0xff] }
 0xffc   : > { %9190 = vmatpush3.bf16.msra.mxu1 %v10316_v4  ;;  %9169 = vmatprep.subr.bf16.mxu0 %v10317_v33  ;;  %v10328_v33 = vld [vmem:[#allocation8 + $0x1b8] sm:$0xff]  }
 0xffd   : > { %9191 = vmatprep.subr.bf16.mxu1 %v10318_v48  ;;  %v3497_v48 = vmul.f32 0.5, %v12294_v31 }
 0xfff   : > { %9170 = vmatpush3.bf16.msra.mxu0 %v10319_v60 }
0x1000   : > { %9192 = vmatpush3.bf16.msra.mxu1 %v10320_v3  ;;  %9171 = vmatprep.subr.bf16.mxu0 %v10321_v46  ;;  %v10329_v3 = vld [vmem:[#allocation8 + $0x240] sm:$0xff]  }
0x1001   : > { %v10446_v20 = vpop.eup %10445  ;;  %9193 = vmatprep.subr.bf16.mxu1 %v10322_v50  ;;  %v3496_v50 = vmul.f32 0.5, %v12288_v6 }
0x1002   : > { %v10448_v42 = vpop.eup %10447  ;;  %v3606_v34 = vadd.f32 1.0, %v10446_v20 }
0x1003   : > { %v10450_v1 = vpop.eup %10449  ;;  %9172 = vmatpush3.bf16.msra.mxu0 %v10323_v57  ;;  %v3607_v39 = vadd.f32 1.0, %v10448_v42  ;;  %v10330_v57 = vld [vmem:[#allocation8 + $0x2c0] sm:$0xff]   ;;  %v12323_v42 = vrot.slane %v12317_v5, %v11640_v15 }
0x1004   : > { %v10452_v4 = vpop.eup %10451  ;;  %9194 = vmatpush3.bf16.msra.mxu1 %v10324_v19  ;;  %9173 = vmatprep.subr.bf16.mxu0 %v10325_v38  ;;  %v3609_v60 = vadd.f32 1.0, %v10450_v1  ;;  %v3622_v43 = vmul.f32 %v3606_v34, %v3494_v23  ;;  %v12327_v38 = vrot.slane %v12317_v5, %v11634_v13  ;;  %v10331_v23 = vld [vmem:[#allocation8 + $0x200] sm:$0xff]   ;;  %v13948_v1 = vsub.s32 3, %v11625_v10 }
0x1005   : > { %9195 = vmatprep.subr.bf16.mxu1 %v10326_v52  ;;  %v3623_v46 = vmul.f32 %v3607_v39, %v3495_v28  ;;  %v3608_v62 = vadd.f32 1.0, %v10452_v4  ;;  %v12331_v52 = vrot.slane %v12317_v5, %v11628_v11  ;;  %v10333_v28 = vld [vmem:[#allocation8 + $0x248] sm:$0xff]  }
0x1006   : > { %v3625_v20 = vmul.f32 %v3609_v60, %v3497_v48  ;;  %13946 = vst [vmem:[#allocation136_spill] sm:$0xff] %v12327_v38  ;;  %v3638_v34 = vpack.c.bf16 %v3622_v43, %v3622_v43  ;;  %v12336_v15 = vrot.slane %v12317_v5, %v13948_v1  ;;  %v10334_v39 = vld [vmem:[#allocation8 + $0x2c8] sm:$0xff]  }
0x1007   : > { %9174 = vmatpush3.bf16.msra.mxu0 %v10327_v17  ;;  %v3639_v19 = vpack.c.bf16 %v3623_v46, %v3623_v46  ;;  %v3624_v31 = vmul.f32 %v3608_v62, %v3496_v50  ;;  %13947 = vst [vmem:[#allocation137_spill] sm:$0xff] %v12331_v52  ;;  %v10332_v17 = vld [vmem:[#allocation8 + $0x280] sm:$0xff]  }
0x1008   : > { %9196 = vmatpush3.bf16.msra.mxu1 %v10328_v33  ;;  %v3641_v6 = vpack.c.bf16 %v3625_v20, %v3625_v20  ;;  %9203 = vmatprep.subr.bf16.mxu0 %v10329_v3  ;;  %13949 = vst [vmem:[#allocation138_spill] sm:$0xff] %v12336_v15  ;;  %v10335_v3 = vld [vmem:[#allocation8 + $0x208] sm:$0xff]  }
0x1009   : > { %4536 = vmatprep.mubr.bf16.mxu0 %v3639_v19  ;;  %v3640_v13 = vpack.c.bf16 %v3624_v31, %v3624_v31  ;;  %9225 = vmatprep.subr.bf16.mxu1 %v10330_v57  ;;  %v10336_v20 = vld [vmem:[#allocation8 + $0x288] sm:$0xff]   ;;  %v10337_v19 = vld [vmem:[#allocation8 + $0x250] sm:$0xff]  }
0x100a   : > { %4576 = vmatprep.mubr.bf16.mxu1 %v3641_v6  ;;  %v3360_v4 = vpop.f32.mrb[32].mxu0  ;;  %v3401_v11 = vpop.f32.mrb[60].mxu1  ;;  %4537 = vmatmul.mubr.bf16.vlgmr.msra.gmra.mrb[44].mxu0 %v3638_v34  ;;  %v10338_v31 = vld [vmem:[#allocation8 + $0x2d0] sm:$0xff]  }
0x100b   : > { %v12339_v33 = vadd.f32 %v3360_v4, %v12323_v42  ;;  %v12342_v48 = vadd.f32 %v3401_v11, %v12327_v38  ;;  %4577 = vmatmul.mubr.bf16.vlgmr.msra.gmra.mrb[72].mxu1 %v3640_v13  ;;  %v3362_v60 = vpop.f32.mrb[33].mxu0  ;;  %v3403_v43 = vpop.f32.mrb[61].mxu1  ;;  %9204 = vmatpush3.bf16.msra.mxu0 %v10331_v23  ;;  %v13950_v38 = vsub.s32 4, %v11625_v10 }
0x100c   : > { %v12345_v46 = vadd.f32 %v3362_v60, %v12331_v52  ;;  %v12348_v50 = vadd.f32 %v3403_v43, %v12336_v15  ;;  %9226 = vmatpush3.bf16.msra.mxu1 %v10332_v17  ;;  %v3364_v62 = vpop.f32.mrb[34].mxu0  ;;  %v3405_v57 = vpop.f32.mrb[62].mxu1  ;;  %9205 = vmatprep.subr.bf16.mxu0 %v10333_v28  ;;  %v10339_v28 = vld [vmem:[#allocation8 + $0x210] sm:$0xff]  }
0x100d   : > { %v3514_v6 = vmul.f32 0.044715, %v12339_v33  ;;  %v3516_v34 = vmul.f32 0.044715, %v12342_v48  ;;  %v3365_v1 = vpop.f32.mrb[35].mxu0  ;;  %v3406_v23 = vpop.f32.mrb[63].mxu1  ;;  %9227 = vmatprep.subr.bf16.mxu1 %v10334_v39 }
0x100e   : > { %v3515_v13 = vmul.f32 0.044715, %v12345_v46  ;;  %v3517_v4 = vmul.f32 0.044715, %v12348_v50  ;;  %v10340_v62 = vld [vmem:[#allocation8 + $0x290] sm:$0xff]   ;;  %v10341_v57 = vld [vmem:[#allocation8 + $0x258] sm:$0xff]  }
0x100f   : > { %v3530_v11 = vmul.f32 %v3514_v6, %v12339_v33  ;;  %v3532_v17 = vmul.f32 %v3516_v34, %v12342_v48  ;;  %9206 = vmatpush3.bf16.msra.mxu0 %v10335_v3  ;;  %v10342_v23 = vld [vmem:[#allocation8 + $0x2d8] sm:$0xff]  }
0x1010   : > { %v3531_v60 = vmul.f32 %v3515_v13, %v12345_v46  ;;  %v3533_v43 = vmul.f32 %v3517_v4, %v12348_v50  ;;  %9228 = vmatpush3.bf16.msra.mxu1 %v10336_v20  ;;  %9207 = vmatprep.subr.bf16.mxu0 %v10337_v19  ;;  %v10343_v4 = vld [vmem:[#allocation8 + $0x218] sm:$0xff]   ;;  %v10345_v19 = vld [vmem:[#allocation8 + $0x260] sm:$0xff]  }
0x1011   : > { %v3546_v39 = vmul.f32 %v3530_v11, %v12339_v33  ;;  %v3548_v1 = vmul.f32 %v3532_v17, %v12342_v48  ;;  %9229 = vmatprep.subr.bf16.mxu1 %v10338_v31  ;;  %v10344_v20 = vld [vmem:[#allocation8 + $0x298] sm:$0xff]   ;;  %v10346_v31 = vld [vmem:[#allocation8 + $0x2e0] sm:$0xff]  }
0x1012   : > { %v3547_v6 = vmul.f32 %v3531_v60, %v12345_v46  ;;  %v3549_v34 = vmul.f32 %v3533_v43, %v12348_v50 }
0x1013   : > { %v3562_v3 = vadd.f32 %v3546_v39, %v12339_v33  ;;  %v3564_v13 = vadd.f32 %v3548_v1, %v12342_v48  ;;  %9208 = vmatpush3.bf16.msra.mxu0 %v10339_v28  ;;  %v10347_v39 = vld [vmem:[#allocation8 + $0x220] sm:$0xff]   ;;  %v10351_v1 = vld [vmem:[#allocation8 + $0x228] sm:$0xff]  }
0x1014   : > { %9230 = vmatpush3.bf16.msra.mxu1 %v10340_v62  ;;  %9209 = vmatprep.subr.bf16.mxu0 %v10341_v57  ;;  %v3563_v11 = vadd.f32 %v3547_v6, %v12345_v46  ;;  %v3565_v17 = vadd.f32 %v3549_v34, %v12348_v50  ;;  %v10348_v28 = vld [vmem:[#allocation8 + $0x2a0] sm:$0xff]   ;;  %v10349_v62 = vld [vmem:[#allocation8 + $0x268] sm:$0xff]   ;;  %v10353_v6 = vld [vmem:[#allocation8 + $0x270] sm:$0xff]  }
0x1015   : > { %9231 = vmatprep.subr.bf16.mxu1 %v10342_v23  ;;  %v3578_v15 = vmul.f32 0.7978846, %v3562_v3  ;;  %v3580_v43 = vmul.f32 0.7978846, %v3564_v13  ;;  %v10350_v57 = vld [vmem:[#allocation8 + $0x2e8] sm:$0xff]   ;;  %v10354_v34 = vld [vmem:[#allocation8 + $0x2f0] sm:$0xff]  }
0x1016   : > { %v3579_v60 = vmul.f32 0.7978846, %v3563_v11  ;;  %v3581_v52 = vmul.f32 0.7978846, %v3565_v17  ;;  %v10352_v23 = vld [vmem:[#allocation8 + $0x2a8] sm:$0xff]   ;;  %v10355_v3 = vld [vmem:[#allocation8 + $0x230] sm:$0xff]  }
0x1017   : > { %9210 = vmatpush3.bf16.msra.mxu0 %v10343_v4  ;;  %10453 = vtanh.f32 %v3578_v15  ;;  %v10356_v15 = vld [vmem:[#allocation8 + $0x2b0] sm:$0xff]   ;;  %v10357_v13 = vld [vmem:[#allocation8 + $0x278] sm:$0xff]  }
0x1018   : > { %9232 = vmatpush3.bf16.msra.mxu1 %v10344_v20  ;;  %9211 = vmatprep.subr.bf16.mxu0 %v10345_v19  ;;  %10455 = vtanh.f32 %v3579_v60  ;;  %v10358_v20 = vld [vmem:[#allocation8 + $0x2f8] sm:$0xff]   ;;  %v3499_v60 = vmul.f32 0.5, %v12345_v46  ;;  %v12373_v46 = vrot.slane %v12317_v5, %v13950_v38  ;;  %v13955_v38 = vsub.s32 7, %v11625_v10 }
0x1019   : > { %9233 = vmatprep.subr.bf16.mxu1 %v10346_v31  ;;  %10457 = vtanh.f32 %v3581_v52  ;;  %v3498_v52 = vmul.f32 0.5, %v12339_v33  ;;  %v10359_v31 = vld [vmem:[#allocation8 + $0x238] sm:$0xff]   ;;  %v3500_v33 = vmul.f32 0.5, %v12342_v48 }
0x101a   : > { %10459 = vtanh.f32 %v3580_v43 }
0x101b   : > { %9212 = vmatpush3.bf16.msra.mxu0 %v10347_v39 }
0x101c   : > { %9234 = vmatpush3.bf16.msra.mxu1 %v10348_v28  ;;  %9213 = vmatprep.subr.bf16.mxu0 %v10349_v62  ;;  %v10360_v28 = vld [vmem:[#allocation8 + $0x2b8] sm:$0xff]   ;;  %v3501_v62 = vmul.f32 0.5, %v12348_v50 }
0x101d   : > { %9235 = vmatprep.subr.bf16.mxu1 %v10350_v57 }
0x101f   : > { %9214 = vmatpush3.bf16.msra.mxu0 %v10351_v1 }
0x1020   : > { %9236 = vmatpush3.bf16.msra.mxu1 %v10352_v23  ;;  %9215 = vmatprep.subr.bf16.mxu0 %v10353_v6  ;;  %v10361_v23 = vld [vmem:[#allocation8 + $0x340] sm:$0xff]  }
0x1021   : > { %v10454_v4 = vpop.eup %10453  ;;  %9237 = vmatprep.subr.bf16.mxu1 %v10354_v34 }
0x1022   : > { %v10456_v19 = vpop.eup %10455  ;;  %v3610_v11 = vadd.f32 1.0, %v10454_v4  ;;  %v10362_v4 = vld [vmem:[#allocation8 + $0x3c0] sm:$0xff]  }
0x1023   : > { %v10458_v17 = vpop.eup %10457  ;;  %9216 = vmatpush3.bf16.msra.mxu0 %v10355_v3  ;;  %v3611_v43 = vadd.f32 1.0, %v10456_v19 }
0x1024   : > { %v10460_v39 = vpop.eup %10459  ;;  %9238 = vmatpush3.bf16.msra.mxu1 %v10356_v15  ;;  %9217 = vmatprep.subr.bf16.mxu0 %v10357_v13  ;;  %v3613_v57 = vadd.f32 1.0, %v10458_v17  ;;  %v3626_v1 = vmul.f32 %v3610_v11, %v3498_v52  ;;  %v13951_v13 = vsub.s32 6, %v11625_v10  ;;  %v10363_v52 = vld [vmem:[#allocation8 + $0x300] sm:$0xff]  }
0x1025   : > { %9239 = vmatprep.subr.bf16.mxu1 %v10358_v20  ;;  %v3627_v6 = vmul.f32 %v3611_v43, %v3499_v60  ;;  %v3612_v34 = vadd.f32 1.0, %v10460_v39  ;;  %v13953_v20 = vsub.s32 5, %v11625_v10  ;;  %v10364_v60 = vld [vmem:[#allocation8 + $0x380] sm:$0xff]   ;;  %v10365_v43 = vld [vmem:[#allocation8 + $0x348] sm:$0xff]  }
0x1026   : > { %v3629_v3 = vmul.f32 %v3613_v57, %v3501_v62  ;;  %v12378_v50 = vrot.slane %v12317_v5, %v13951_v13  ;;  %v3642_v17 = vpack.c.bf16 %v3626_v1, %v3626_v1  ;;  %v10366_v62 = vld [vmem:[#allocation8 + $0x3c8] sm:$0xff]   ;;  %v10369_v13 = vld [vmem:[#allocation8 + $0x350] sm:$0xff]  }
0x1027   : > { %9218 = vmatpush3.bf16.msra.mxu0 %v10359_v31  ;;  %v3643_v15 = vpack.c.bf16 %v3627_v6, %v3627_v6  ;;  %v3628_v19 = vmul.f32 %v3612_v34, %v3500_v33  ;;  %v12383_v48 = vrot.slane %v12317_v5, %v13953_v20  ;;  %v12388_v31 = vrot.slane %v12317_v5, %v13955_v38 }
0x1028   : > { %13952 = vst [vmem:[#allocation139_spill] sm:$0xff] %v12378_v50  ;;  %9240 = vmatpush3.bf16.msra.mxu1 %v10360_v28  ;;  %v3645_v11 = vpack.c.bf16 %v3629_v3, %v3629_v3  ;;  %9247 = vmatprep.subr.bf16.mxu0 %v10361_v23  ;;  %v10367_v23 = vld [vmem:[#allocation8 + $0x308] sm:$0xff]  }
0x1029   : > { %13954 = vst [vmem:[#allocation140_spill] sm:$0xff] %v12383_v48  ;;  %13956 = vst [vmem:[#allocation141_spill] sm:$0xff] %v12388_v31  ;;  %4616 = vmatprep.mubr.bf16.mxu0 %v3643_v15  ;;  %v3644_v39 = vpack.c.bf16 %v3628_v19, %v3628_v19  ;;  %9269 = vmatprep.subr.bf16.mxu1 %v10362_v4  ;;  %v10368_v15 = vld [vmem:[#allocation8 + $0x388] sm:$0xff]   ;;  %v10370_v19 = vld [vmem:[#allocation8 + $0x3d0] sm:$0xff]  }
0x102a   : > { %4656 = vmatprep.mubr.bf16.mxu1 %v3645_v11  ;;  %v3442_v57 = vpop.f32.mrb[36].mxu0  ;;  %v3483_v6 = vpop.f32.mrb[64].mxu1  ;;  %4617 = vmatmul.mubr.bf16.vlgmr.msra.gmra.mrb[48].mxu0 %v3642_v17 }
0x102b   : > { %v12391_v28 = vadd.f32 %v3442_v57, %v12373_v46  ;;  %v12394_v1 = vadd.f32 %v3483_v6, %v12378_v50  ;;  %4657 = vmatmul.mubr.bf16.vlgmr.msra.gmra.mrb[76].mxu1 %v3644_v39  ;;  %v3444_v10 = vpop.f32.mrb[37].mxu0  ;;  %v3485_v5 = vpop.f32.mrb[65].mxu1  ;;  %9248 = vmatpush3.bf16.msra.mxu0 %v10363_v52 }
0x102c   : > { %v12397_v33 = vadd.f32 %v3444_v10, %v12383_v48  ;;  %v12400_v34 = vadd.f32 %v3485_v5, %v12388_v31  ;;  %9270 = vmatpush3.bf16.msra.mxu1 %v10364_v60  ;;  %v3446_v4 = vpop.f32.mrb[38].mxu0  ;;  %v3487_v3 = vpop.f32.mrb[66].mxu1  ;;  %9249 = vmatprep.subr.bf16.mxu0 %v10365_v43  ;;  %v10371_v43 = vld [vmem:[#allocation8 + $0x310] sm:$0xff]  }
0x102d   : > { %v3518_v20 = vmul.f32 0.044715, %v12391_v28  ;;  %v3520_v11 = vmul.f32 0.044715, %v12394_v1  ;;  %v3447_v17 = vpop.f32.mrb[39].mxu0  ;;  %v3488_v52 = vpop.f32.mrb[67].mxu1  ;;  %9271 = vmatprep.subr.bf16.mxu1 %v10366_v62 }
0x102e   : > { %v3519_v38 = vmul.f32 0.044715, %v12397_v33  ;;  %v3521_v39 = vmul.f32 0.044715, %v12400_v34  ;;  %v10372_v5 = vld [vmem:[#allocation8 + $0x390] sm:$0xff]   ;;  %v10373_v4 = vld [vmem:[#allocation8 + $0x358] sm:$0xff]  }
0x102f   : > { %v3534_v57 = vmul.f32 %v3518_v20, %v12391_v28  ;;  %v3536_v60 = vmul.f32 %v3520_v11, %v12394_v1  ;;  %9250 = vmatpush3.bf16.msra.mxu0 %v10367_v23  ;;  %v10374_v17 = vld [vmem:[#allocation8 + $0x3d8] sm:$0xff]  }
0x1030   : > { %v3535_v6 = vmul.f32 %v3519_v38, %v12397_v33  ;;  %v3537_v10 = vmul.f32 %v3521_v39, %v12400_v34  ;;  %9272 = vmatpush3.bf16.msra.mxu1 %v10368_v15  ;;  %9251 = vmatprep.subr.bf16.mxu0 %v10369_v13  ;;  %v10375_v38 = vld [vmem:[#allocation8 + $0x318] sm:$0xff]   ;;  %v10377_v13 = vld [vmem:[#allocation8 + $0x360] sm:$0xff]  }
0x1031   : > { %v3550_v62 = vmul.f32 %v3534_v57, %v12391_v28  ;;  %v3552_v3 = vmul.f32 %v3536_v60, %v12394_v1  ;;  %9273 = vmatprep.subr.bf16.mxu1 %v10370_v19  ;;  %v10376_v15 = vld [vmem:[#allocation8 + $0x398] sm:$0xff]   ;;  %v10378_v19 = vld [vmem:[#allocation8 + $0x3e0] sm:$0xff]  }
0x1032   : > { %v3551_v20 = vmul.f32 %v3535_v6, %v12397_v33  ;;  %v3553_v11 = vmul.f32 %v3537_v10, %v12400_v34 }
0x1033   : > { %v3566_v23 = vadd.f32 %v3550_v62, %v12391_v28  ;;  %v3568_v52 = vadd.f32 %v3552_v3, %v12394_v1  ;;  %9252 = vmatpush3.bf16.msra.mxu0 %v10371_v43  ;;  %v10379_v62 = vld [vmem:[#allocation8 + $0x320] sm:$0xff]   ;;  %v10383_v3 = vld [vmem:[#allocation8 + $0x328] sm:$0xff]  }
0x1034   : > { %9274 = vmatpush3.bf16.msra.mxu1 %v10372_v5  ;;  %9253 = vmatprep.subr.bf16.mxu0 %v10373_v4  ;;  %v3567_v39 = vadd.f32 %v3551_v20, %v12397_v33  ;;  %v3569_v57 = vadd.f32 %v3553_v11, %v12400_v34  ;;  %v10380_v43 = vld [vmem:[#allocation8 + $0x3a0] sm:$0xff]   ;;  %v10381_v5 = vld [vmem:[#allocation8 + $0x368] sm:$0xff]   ;;  %v10385_v20 = vld [vmem:[#allocation8 + $0x370] sm:$0xff]  }
0x1035   : > { %9275 = vmatprep.subr.bf16.mxu1 %v10374_v17  ;;  %v3582_v60 = vmul.f32 0.7978846, %v3566_v23  ;;  %v3584_v10 = vmul.f32 0.7978846, %v3568_v52  ;;  %v10382_v4 = vld [vmem:[#allocation8 + $0x3e8] sm:$0xff]   ;;  %v10386_v11 = vld [vmem:[#allocation8 + $0x3f0] sm:$0xff]  }
0x1036   : > { %v3583_v6 = vmul.f32 0.7978846, %v3567_v39  ;;  %v3585_v31 = vmul.f32 0.7978846, %v3569_v57  ;;  %v10384_v17 = vld [vmem:[#allocation8 + $0x3a8] sm:$0xff]   ;;  %v10387_v23 = vld [vmem:[#allocation8 + $0x330] sm:$0xff]  }
0x1037   : > { %9254 = vmatpush3.bf16.msra.mxu0 %v10375_v38  ;;  %10461 = vtanh.f32 %v3582_v60  ;;  %v10388_v52 = vld [vmem:[#allocation8 + $0x3b0] sm:$0xff]   ;;  %v10389_v38 = vld [vmem:[#allocation8 + $0x378] sm:$0xff]  }
0x1038   : > { %9276 = vmatpush3.bf16.msra.mxu1 %v10376_v15  ;;  %9255 = vmatprep.subr.bf16.mxu0 %v10377_v13  ;;  %10463 = vtanh.f32 %v3583_v6  ;;  %v10390_v13 = vld [vmem:[#allocation8 + $0x3f8] sm:$0xff]   ;;  %v3503_v6 = vmul.f32 0.5, %v12397_v33 }
0x1039   : > { %9277 = vmatprep.subr.bf16.mxu1 %v10378_v19  ;;  %10465 = vtanh.f32 %v3585_v31  ;;  %v3502_v31 = vmul.f32 0.5, %v12391_v28  ;;  %v10391_v60 = vld [vmem:[#allocation8 + $0x338] sm:$0xff]  }
0x103a   : > { %10467 = vtanh.f32 %v3584_v10 }
0x103b   : > { %9256 = vmatpush3.bf16.msra.mxu0 %v10379_v62 }
0x103c   : > { %9278 = vmatpush3.bf16.msra.mxu1 %v10380_v43  ;;  %9257 = vmatprep.subr.bf16.mxu0 %v10381_v5  ;;  %v10392_v43 = vld [vmem:[#allocation8 + $0x3b8] sm:$0xff]   ;;  %v3505_v5 = vmul.f32 0.5, %v12400_v34 }
0x103d   : > { %9279 = vmatprep.subr.bf16.mxu1 %v10382_v4 }
0x103f   : > { %9258 = vmatpush3.bf16.msra.mxu0 %v10383_v3 }
0x1040   : > { %9280 = vmatpush3.bf16.msra.mxu1 %v10384_v17  ;;  %9259 = vmatprep.subr.bf16.mxu0 %v10385_v20  ;;  %v3504_v20 = vmul.f32 0.5, %v12394_v1  ;;  %v10608_v1 = vld [vmem:[%s13547_s5] ss:$12 sps:$4 sm:$0xff]  }
0x1041   : > { %v10462_v15 = vpop.eup %10461  ;;  %9281 = vmatprep.subr.bf16.mxu1 %v10386_v11 }
0x1042   : > { %v10464_v39 = vpop.eup %10463  ;;  %v3614_v57 = vadd.f32 1.0, %v10462_v15 }
0x1043   : > { %v10466_v19 = vpop.eup %10465  ;;  %9260 = vmatpush3.bf16.msra.mxu0 %v10387_v23  ;;  %v3615_v10 = vadd.f32 1.0, %v10464_v39 }
0x1044   : > { %v10468_v62 = vpop.eup %10467  ;;  %9282 = vmatpush3.bf16.msra.mxu1 %v10388_v52  ;;  %9261 = vmatprep.subr.bf16.mxu0 %v10389_v38  ;;  %v3617_v4 = vadd.f32 1.0, %v10466_v19  ;;  %v3630_v3 = vmul.f32 %v3614_v57, %v3502_v31  ;;  %v10607_v52 = vld [vmem:[%s13547_s5 + $0x4] ss:$12 sps:$4 sm:$0xff]   ;;  %v13957_v38 = vmov 0.0   ;;  %v10610_v31 = vld [vmem:[%s13547_s5 + $0x1c] ss:$12 sps:$4 sm:$0xff]  }
0x1045   : > { %9283 = vmatprep.subr.bf16.mxu1 %v10390_v13  ;;  %v3631_v17 = vmul.f32 %v3615_v10, %v3503_v6  ;;  %v3616_v28 = vadd.f32 1.0, %v10468_v62  ;;  %v10609_v13 = vld [vmem:[%s13547_s5 + $0x8] ss:$12 sps:$4 sm:$0xff]   ;;  %v10611_v57 = vld [vmem:[%s13547_s5 + $0x18] ss:$12 sps:$4 sm:$0xff]  }
0x1046   : > { %v3633_v11 = vmul.f32 %v3617_v4, %v3505_v5  ;;  %v3646_v39 = vpack.c.bf16 %v3630_v3, %v3630_v3  ;;  %v10612_v19 = vld [vmem:[%s13547_s5 + $0x20] ss:$12 sps:$4 sm:$0xff]   ;;  %v10614_v6 = vld [vmem:[%s13547_s5 + $0x30] ss:$12 sps:$4 sm:$0xff]   ;;  %v10615_v10 = vld [vmem:[%s13547_s5 + $0x38] ss:$12 sps:$4 sm:$0xff]  }
0x1047   : > { %9262 = vmatpush3.bf16.msra.mxu0 %v10391_v60  ;;  %v3647_v23 = vpack.c.bf16 %v3631_v17, %v3631_v17  ;;  %v3632_v15 = vmul.f32 %v3616_v28, %v3504_v20  ;;  %v10613_v60 = vld [vmem:[%s13547_s5 + $0x34] ss:$12 sps:$4 sm:$0xff]   ;;  %v10616_v62 = vld [vmem:[%s13547_s5 + $0x4c] ss:$12 sps:$4 sm:$0xff]   ;;  %v10618_v5 = vld [vmem:[%s13547_s5 + $0x50] ss:$12 sps:$4 sm:$0xff]  }
0x1048   : > { %9284 = vmatpush3.bf16.msra.mxu1 %v10392_v43  ;;  %v3649_v33 = vpack.c.bf16 %v3633_v11, %v3633_v11  ;;  %4761 = vmatprep.subr.bf16.mxu0 %v10607_v52  ;;  %v10617_v43 = vld [vmem:[%s13547_s5 + $0x48] ss:$12 sps:$4 sm:$0xff]   ;;  %v10619_v4 = vld [vmem:[%s13547_s5 + $0x64] ss:$12 sps:$4 sm:$0xff]   ;;  %v10620_v3 = vld [vmem:[%s13547_s5 + $0x60] ss:$12 sps:$4 sm:$0xff]  }
0x1049   : > { %4696 = vmatprep.mubr.bf16.mxu0 %v3647_v23  ;;  %v3648_v34 = vpack.c.bf16 %v3632_v15, %v3632_v15  ;;  %9850 = vmatprep.subr.bf16.mxu1 %v13957_v38  ;;  %v10621_v17 = vld [vmem:[%s13547_s5 + $0x68] ss:$12 sps:$4 sm:$0xff]   ;;  %v10623_v28 = vld [vmem:[%s13547_s5 + $0x78] ss:$12 sps:$4 sm:$0xff]   ;;  %v10624_v11 = vld [vmem:[%s13547_s5 + $0x80] ss:$12 sps:$4 sm:$0xff]  }
0x104a   : > { %4736 = vmatprep.mubr.bf16.mxu1 %v3649_v33  ;;  %4697 = vmatmul.mubr.bf16.vlgmr.msra.gmra.mrb[52].mxu0 %v3646_v39  ;;  %v10622_v20 = vld [vmem:[%s13547_s5 + $0x7c] ss:$12 sps:$4 sm:$0xff]   ;;  %v10625_v23 = vld [vmem:[%s13547_s5 + $0x94] ss:$12 sps:$4 sm:$0xff]   ;;  %v10627_v33 = vld [vmem:[%s13547_s5 + $0x98] ss:$12 sps:$4 sm:$0xff]  }
0x104b   : > { %4737 = vmatmul.mubr.bf16.vlgmr.msra.gmra.mrb[80].mxu1 %v3648_v34  ;;  %4762 = vmatpush1.bf16.msra.mxu0 %v10608_v1  ;;  %v10626_v15 = vld [vmem:[%s13547_s5 + $0x90] ss:$12 sps:$4 sm:$0xff]   ;;  %v10628_v39 = vld [vmem:[%s13547_s5 + $0xac] ss:$12 sps:$4 sm:$0xff]   ;;  %v10629_v52 = vld [vmem:[%s13547_s5 + $0xa8] ss:$12 sps:$4 sm:$0xff]  }
0x104c   : > { %9851 = vmatpush3.bf16.msra.mxu1 %v10609_v13  ;;  %4763 = vmatprep.subr.bf16.mxu0 %v10610_v31  ;;  %v10630_v34 = vld [vmem:[%s13547_s5 + $0xb0] ss:$12 sps:$4 sm:$0xff]   ;;  %v8879_v31 = vld [vmem:[%s13958_s13] ss:$0 sm:$0xff] }
0x104d   : > { %9852 = vmatprep.subr.bf16.mxu1 %v13957_v38  ;;  %4793 = vmatprep.mubr.bf16.mxu0 %v13854_v25 }
0x104e   : > { %9866 = vmatprep.mubr.msk.bf16.mxu1 %vm11176_vm1, %v13957_v38 }
0x104f   : > { %4764 = vmatpush1.bf16.msra.mxu0 %v10611_v57 }
0x1050   : > { %9853 = vmatpush3.bf16.msra.mxu1 %v10612_v19  ;;  %4765 = vmatprep.subr.bf16.mxu0 %v10613_v60 }
0x1051   : > { %9854 = vmatprep.subr.bf16.mxu1 %v13957_v38 }
0x1053   : > { %4766 = vmatpush1.bf16.msra.mxu0 %v10614_v6 }
0x1054   : > { %9855 = vmatpush3.bf16.msra.mxu1 %v10615_v10  ;;  %4767 = vmatprep.subr.bf16.mxu0 %v10616_v62 }
0x1055   : > { %9856 = vmatprep.subr.bf16.mxu1 %v13957_v38 }
0x1057   : > { %4768 = vmatpush1.bf16.msra.mxu0 %v10617_v43 }
0x1058   : > { %9857 = vmatpush3.bf16.msra.mxu1 %v10618_v5  ;;  %4769 = vmatprep.subr.bf16.mxu0 %v10619_v4 }
0x1059   : > { %9858 = vmatprep.subr.bf16.mxu1 %v13957_v38 }
0x105b   : > { %4770 = vmatpush1.bf16.msra.mxu0 %v10620_v3 }
0x105c   : > { %9859 = vmatpush3.bf16.msra.mxu1 %v10621_v17  ;;  %4771 = vmatprep.subr.bf16.mxu0 %v10622_v20 }
0x105d   : > { %9860 = vmatprep.subr.bf16.mxu1 %v13957_v38 }
0x105f   : > { %4772 = vmatpush1.bf16.msra.mxu0 %v10623_v28 }
0x1060   : > { %9861 = vmatpush3.bf16.msra.mxu1 %v10624_v11  ;;  %4773 = vmatprep.subr.bf16.mxu0 %v10625_v23 }
0x1061   : > { %9862 = vmatprep.subr.bf16.mxu1 %v13957_v38 }
0x1063   : > { %4774 = vmatpush1.bf16.msra.mxu0 %v10626_v15 }
0x1064   : > { %9863 = vmatpush3.bf16.msra.mxu1 %v10627_v33  ;;  %4775 = vmatprep.subr.bf16.mxu0 %v10628_v39 }
0x1065   : > { %9864 = vmatprep.subr.bf16.mxu1 %v13957_v38 }
0x1067   : > { %4776 = vmatpush1.bf16.msra.mxu0 %v10629_v52 }
0x1068   : > { %9865 = vmatpush3.bf16.msra.mxu1 %v10630_v34  ;;  %9870 = vmatprep.subr.bf16.mxu0 %v13957_v38 }
0x1069   : > { %9876 = vmatprep.subr.bf16.mxu1 %v13957_v38 }
0x10bd   : > { %v9131_v1 = vpop.f32.mrb[40].mxu0 }
0x10be   : > { %v9153_v13 = vpop.f32.mrb[68].mxu1  ;;  %v9132_v57 = vpop.f32.mrb[41].mxu0 }
0x10bf   : > { %v9133_v19 = vadd.f32 %v9132_v57, %v9131_v1  ;;  %v9154_v60 = vpop.f32.mrb[69].mxu1  ;;  %v9134_v6 = vpop.f32.mrb[42].mxu0 }
0x10c0   : > { %v9155_v10 = vadd.f32 %v9154_v60, %v9153_v13  ;;  %v9156_v62 = vpop.f32.mrb[70].mxu1  ;;  %v9135_v43 = vpop.f32.mrb[43].mxu0 }
0x10c1   : > { %v4459_v5 = vadd.f32 %v9133_v19, %v8879_v31  ;;  %v9157_v4 = vpop.f32.mrb[71].mxu1 }
0x10c3   : > { %v4499_v3 = vadd.f32 %v9155_v10, %v4459_v5 }
0x10dd   : > { %v9175_v17 = vpop.f32.mrb[44].mxu0 }
0x10de   : > { %v9197_v20 = vpop.f32.mrb[72].mxu1  ;;  %v9176_v28 = vpop.f32.mrb[45].mxu0 }
0x10df   : > { %v9177_v11 = vadd.f32 %v9176_v28, %v9175_v17  ;;  %v9198_v23 = vpop.f32.mrb[73].mxu1  ;;  %v9178_v15 = vpop.f32.mrb[46].mxu0 }
0x10e0   : > { %v9199_v33 = vadd.f32 %v9198_v23, %v9197_v20  ;;  %v9200_v39 = vpop.f32.mrb[74].mxu1  ;;  %v9179_v52 = vpop.f32.mrb[47].mxu0 }
0x10e1   : > { %v4539_v34 = vadd.f32 %v9177_v11, %v4499_v3  ;;  %v9201_v48 = vpop.f32.mrb[75].mxu1 }
0x10e3   : > { %v4579_v1 = vadd.f32 %v9199_v33, %v4539_v34 }
0x10fd   : > { %v9219_v57 = vpop.f32.mrb[48].mxu0 }
0x10fe   : > { %v9241_v6 = vpop.f32.mrb[76].mxu1  ;;  %v9220_v13 = vpop.f32.mrb[49].mxu0 }
0x10ff   : > { %v9221_v60 = vadd.f32 %v9220_v13, %v9219_v57  ;;  %v9242_v62 = vpop.f32.mrb[77].mxu1  ;;  %v9222_v31 = vpop.f32.mrb[50].mxu0 }
0x1100   : > { %v9243_v19 = vadd.f32 %v9242_v62, %v9241_v6  ;;  %v9244_v10 = vpop.f32.mrb[78].mxu1  ;;  %v9223_v43 = vpop.f32.mrb[51].mxu0 }
0x1101   : > { %v4619_v5 = vadd.f32 %v9221_v60, %v4579_v1  ;;  %v9245_v4 = vpop.f32.mrb[79].mxu1 }
0x1103   : > { %v4659_v17 = vadd.f32 %v9243_v19, %v4619_v5 }
0x111d   : > { %v9263_v28 = vpop.f32.mrb[52].mxu0 }
0x111e   : > { %v9285_v15 = vpop.f32.mrb[80].mxu1  ;;  %v9264_v20 = vpop.f32.mrb[53].mxu0 }
0x111f   : > { %v9265_v23 = vadd.f32 %v9264_v20, %v9263_v28  ;;  %v9286_v39 = vpop.f32.mrb[81].mxu1  ;;  %v9266_v3 = vpop.f32.mrb[54].mxu0 }
0x1120   : > { %v9287_v48 = vadd.f32 %v9286_v39, %v9285_v15  ;;  %v9288_v11 = vpop.f32.mrb[82].mxu1  ;;  %v9267_v33 = vpop.f32.mrb[55].mxu0  ;;  %v12526_v15 = vld [vmem:[%s13550_s8] ss:$0 sm:$0xff] }
0x1121   : > { %v4699_v52 = vadd.f32 %v9265_v23, %v4659_v17  ;;  %v9289_v34 = vpop.f32.mrb[83].mxu1 }
0x1123   : > { %v4739_v57 = vadd.f32 %v9287_v48, %v4699_v52 }
0x1125   : > { %v12511_v13 = vadd.f32 %v4739_v57, %v11820_v56  ;;  %v12520_v56 = vld [vmem:[%s13549_s7] ss:$0 sm:$0xff] }
0x1127   : > { %v4745_v1 = vsel %vm1240_vm0, %v12511_v13, 0.0 }
0x1128   : > { %4746 = vadd.xlane.f32.xlu0 %v4745_v1 }
0x11b5   : > { %v4747_v6 = vpop.xlane.xlu0 %4746 }
0x11b6   : > { %v4748_v60 = vmul.f32 0.0078125, %v4747_v6 }
0x11b8   : > { %v4749_v62 = vsub.f32 %v12511_v13, %v4748_v60 }
0x11ba   : > { %v4750_v31 = vmul.f32 %v4749_v62, %v4749_v62 }
0x11bc   : > { %v4751_v19 = vsel %vm1240_vm0, %v4750_v31, 0.0 }
0x11bd   : > { %4752 = vadd.xlane.f32.xlu0 %v4751_v19 }
0x124a   : > { %v4753_v10 = vpop.xlane.xlu0 %4752 }
0x124b   : > { %v4754_v43 = vmul.f32 0.0078125, %v4753_v10 }
0x124d   : > { %v4755_v5 = vadd.f32 1e-05, %v4754_v43 }
0x124f   : > { %10469 = vrsqrt.f32 %v4755_v5 }
0x1259   : > { %v10470_v4 = vpop.eup %10469 }
0x125a   : > { %v4757_v17 = vmul.f32 %v10470_v4, %v4749_v62 }
0x125c   : > { %v4758_v28 = vmul.f32 %v12520_v56, %v4757_v17 }
0x125e   : > { %v4759_v20 = vadd.f32 %v12526_v15, %v4758_v28 }
0x1260   : > { %v4760_v23 = vpack.c.bf16 %v4759_v20, %v4759_v20 }
0x1262   : > { %4794 = vmatmul.mubr.bf16.vlgmr.msra.gmra.mrb[56].mxu0 %v4760_v23  ;;  %9867 = vmatmul.mubr.bf16.vlgmr.msra.gmra.mrb[84].mxu1 %v4760_v23 }
0x1263   : > { %9872 = vmatprep.mubr.msk.bf16.mxu0 %vm11176_vm1, %v13957_v38  ;;  %9878 = vmatprep.mubr.msk.bf16.mxu1 %vm11176_vm1, %v13957_v38 }
0x1335   : > { %v4795_v39 = vpop.f32.mrb[56].mxu0  ;;  %v4836_v3 = vpop.f32.mrb[84].mxu1 }
0x1336   : > { %v4796_v48 = vadd.f32 %v4795_v39, %v11647_v26  ;;  %v4837_v11 = vadd.f32 %v4836_v3, %v11643_v18  ;;  %v4797_v33 = vpop.f32.mrb[57].mxu0  ;;  %v9868_v52 = vpop.f32.mrb[85].mxu1 }
0x1337   : > { %v4798_v34 = vadd.f32 %v4797_v33, %v11637_v14  ;;  %v4799_v57 = vpop.f32.mrb[58].mxu0  ;;  %v4839_v1 = vpop.f32.mrb[86].mxu1 }
0x1338   : > { %v4842_v6 = vpack.c.bf16 %v4796_v48, %v4796_v48  ;;  %v12536_v60 = vpack.c.bf16 %v4837_v11, %v4837_v11  ;;  %v4800_v62 = vpop.f32.mrb[59].mxu0  ;;  %v9869_v31 = vpop.f32.mrb[87].mxu1 }
0x1339   : > { %v4843_v19 = vpack.c.bf16 %v4798_v34, %v4798_v34 }
0x133a   : > { %4950 = vrot.lane.b32.xlu1 %v4842_v6, %s11177_s12  ;;  %v4907_v10 = vand.u32 %v12536_v60, %v11660_v36 }
0x133b   : > { %4953 = vrot.lane.b32.xlu0 %v4843_v19, %s11177_s12  ;;  %v4849_v43 = vsel %vm1498_vm2, %v4843_v19, 0 }
0x133c   : > { %9871 = vmatpush3.bf16.xpose.msra.mxu0 %v4849_v43  ;;  %9877 = vmatpush3.bf16.msra.mxu1 %v4907_v10 }
0x133d   : > { %9882 = vmatprep.subr.bf16.mxu0 %v13957_v38  ;;  %9888 = vmatprep.subr.bf16.mxu1 %v13957_v38 }
0x133e   : > { %5172 = vrot.lane.b32.xlu1 %v4842_v6, %s11180_s21 }
0x133f   : > { %5064 = vrot.lane.b32.xlu0 %v4843_v19, %s11179_s17 }
0x1342   : > { %5282 = vrot.lane.b32.xlu1 %v4842_v6, %s11181_s29 }
0x1343   : > { %5062 = vrot.lane.b32.xlu0 %v4842_v6, %s11179_s17  ;;  %9873 = vmatmul.mubr.msk.bf16.vlgmr.msra.gmra.mrb[60].mxu0 %vm1498_vm2, %v4842_v6 }
0x1344   : > { %9884 = vmatprep.mubr.msk.bf16.mxu0 %vm11176_vm1, %v13957_v38 }
0x1346   : > { %5392 = vrot.lane.b32.xlu1 %v4842_v6, %s11182_s25 }
0x1347   : > { %5174 = vrot.lane.b32.xlu0 %v4843_v19, %s11180_s21 }
0x134a   : > { %5502 = vrot.lane.b32.xlu1 %v4842_v6, %s11183_s0 }
0x134b   : > { %5284 = vrot.lane.b32.xlu0 %v4843_v19, %s11181_s29 }
0x134e   : > { %5612 = vrot.lane.b32.xlu1 %v4842_v6, %s11184_s22 }
0x134f   : > { %5394 = vrot.lane.b32.xlu0 %v4843_v19, %s11182_s25 }
0x1353   : > { %5504 = vrot.lane.b32.xlu0 %v4843_v19, %s11183_s0 }
0x1357   : > { %5614 = vrot.lane.b32.xlu0 %v4843_v19, %s11184_s22 }
0x13ac   : > { %v4951_v28 = vpop.permute.xlu1 %4950 }
0x13ad   : > { %v4954_v5 = vpop.permute.xlu0 %4953 }
0x13ae   : > { %v4959_v4 = vsel %vm1498_vm2, %v4954_v5, 0 }
0x13af   : > { %9883 = vmatpush3.bf16.xpose.msra.mxu0 %v4959_v4 }
0x13b0   : > { %9894 = vmatprep.subr.bf16.mxu0 %v13957_v38  ;;  %v5173_v11 = vpop.permute.xlu1 %5172 }
0x13b1   : > { %v5065_v17 = vpop.permute.xlu0 %5064 }
0x13b2   : > { %v5070_v23 = vsel %vm1498_vm2, %v5065_v17, 0 }
0x13b4   : > { %v5283_v34 = vpop.permute.xlu1 %5282 }
0x13b5   : > { %v5063_v20 = vpop.permute.xlu0 %5062 }
0x13b6   : > { %9885 = vmatmul.mubr.msk.bf16.vlgmr.msra.gmra.mrb[64].mxu0 %vm1498_vm2, %v4951_v28 }
0x13b7   : > { %9895 = vmatpush3.bf16.xpose.msra.mxu0 %v5070_v23  ;;  %9896 = vmatprep.mubr.msk.bf16.mxu0 %vm11176_vm1, %v13957_v38 }
0x13b8   : > { %9906 = vmatprep.subr.bf16.mxu0 %v13957_v38  ;;  %v5393_v6 = vpop.permute.xlu1 %5392 }
0x13b9   : > { %v5175_v39 = vpop.permute.xlu0 %5174 }
0x13ba   : > { %v5180_v3 = vsel %vm1498_vm2, %v5175_v39, 0 }
0x13bc   : > { %v5503_v19 = vpop.permute.xlu1 %5502 }
0x13bd   : > { %v5285_v48 = vpop.permute.xlu0 %5284 }
0x13be   : > { %9897 = vmatmul.mubr.msk.bf16.vlgmr.msra.gmra.mrb[68].mxu0 %vm1498_vm2, %v5063_v20  ;;  %v5290_v33 = vsel %vm1498_vm2, %v5285_v48, 0 }
0x13bf   : > { %9907 = vmatpush3.bf16.xpose.msra.mxu0 %v5180_v3  ;;  %9908 = vmatprep.mubr.msk.bf16.mxu0 %vm11176_vm1, %v13957_v38 }
0x13c0   : > { %9918 = vmatprep.subr.bf16.mxu0 %v13957_v38  ;;  %v5613_v43 = vpop.permute.xlu1 %5612 }
0x13c1   : > { %v5395_v52 = vpop.permute.xlu0 %5394 }
0x13c2   : > { %v5400_v57 = vsel %vm1498_vm2, %v5395_v52, 0 }
0x13c5   : > { %v5505_v1 = vpop.permute.xlu0 %5504 }
0x13c6   : > { %9909 = vmatmul.mubr.msk.bf16.vlgmr.msra.gmra.mrb[72].mxu0 %vm1498_vm2, %v5173_v11  ;;  %v5510_v62 = vsel %vm1498_vm2, %v5505_v1, 0 }
0x13c7   : > { %9919 = vmatpush3.bf16.xpose.msra.mxu0 %v5290_v33  ;;  %9920 = vmatprep.mubr.msk.bf16.mxu0 %vm11176_vm1, %v13957_v38 }
0x13c8   : > { %9930 = vmatprep.subr.bf16.mxu0 %v13957_v38 }
0x13c9   : > { %v5615_v31 = vpop.permute.xlu0 %5614 }
0x13ca   : > { %v5620_v10 = vsel %vm1498_vm2, %v5615_v31, 0 }
0x13ce   : > { %9921 = vmatmul.mubr.msk.bf16.vlgmr.msra.gmra.mrb[76].mxu0 %vm1498_vm2, %v5283_v34 }
0x13cf   : > { %9931 = vmatpush3.bf16.xpose.msra.mxu0 %v5400_v57  ;;  %9932 = vmatprep.mubr.msk.bf16.mxu0 %vm11176_vm1, %v13957_v38 }
0x13d0   : > { %9942 = vmatprep.subr.bf16.mxu0 %v13957_v38 }
0x13d6   : > { %9933 = vmatmul.mubr.msk.bf16.vlgmr.msra.gmra.mrb[80].mxu0 %vm1498_vm2, %v5393_v6 }
0x13d7   : > { %9943 = vmatpush3.bf16.xpose.msra.mxu0 %v5510_v62  ;;  %9944 = vmatprep.mubr.msk.bf16.mxu0 %vm11176_vm1, %v13957_v38 }
0x13d8   : > { %9954 = vmatprep.subr.bf16.mxu0 %v13957_v38 }
0x13de   : > { %9945 = vmatmul.mubr.msk.bf16.vlgmr.msra.gmra.mrb[84].mxu0 %vm1498_vm2, %v5503_v19 }
0x13df   : > { %9955 = vmatpush3.bf16.xpose.msra.mxu0 %v5620_v10  ;;  %9956 = vmatprep.mubr.msk.bf16.mxu0 %vm11176_vm1, %v13957_v38 }
0x13e0   : > { %5774 = vmatprep.subr.bf16.mxu0 %v11826_v41 }
0x13e6   : > { %9957 = vmatmul.mubr.msk.bf16.vlgmr.msra.gmra.mrb[88].mxu0 %vm1498_vm2, %v5613_v43 }
0x13e7   : > { %5775 = vmatpush1.bf16.msra.mxu0 %v11824_v40  ;;  %5806 = vmatprep.mubr.bf16.mxu0 %v13854_v25 }
0x13e8   : > { %5776 = vmatprep.subr.bf16.mxu0 %v11832_v30 }
0x13eb   : > { %5777 = vmatpush1.bf16.msra.mxu0 %v11839_v53 }
0x13ec   : > { %5778 = vmatprep.subr.bf16.mxu0 %v11845_v54 }
0x13ef   : > { %5779 = vmatpush1.bf16.msra.mxu0 %v11851_v58 }
0x13f0   : > { %5780 = vmatprep.subr.bf16.mxu0 %v11866_v7 }
0x13f3   : > { %5781 = vmatpush1.bf16.msra.mxu0 %v11868_v9 }
0x13f4   : > { %5782 = vmatprep.subr.bf16.mxu0 %v11878_v24 }
0x13f7   : > { %5783 = vmatpush1.bf16.msra.mxu0 %v11880_v2 }
0x13f8   : > { %5784 = vmatprep.subr.bf16.mxu0 %v11890_v29 }
0x13fb   : > { %5785 = vmatpush1.bf16.msra.mxu0 %v11892_v32 }
0x13fc   : > { %5786 = vmatprep.subr.bf16.mxu0 %v11902_v44 }
0x13ff   : > { %5787 = vmatpush1.bf16.msra.mxu0 %v11904_v47 }
0x1400   : > { %5788 = vmatprep.subr.bf16.mxu0 %v11914_v61 }
0x1403   : > { %5789 = vmatpush1.bf16.msra.mxu0 %v11916_v0 }
0x1404   : > { %5856 = vmatprep.subr.bf16.mxu0 %v11928_v35 }
0x1416   : > { %v4885_v5 = vpop.f32.mrb[60].mxu0 }
0x1417   : > { %v9874_v4 = vpop.f32.mrb[61].mxu0  ;;  %v4891_v17 = vsel %vm1545_vm5, %v4885_v5, -inf }
0x1418   : > { %4892 = vmax.xlane.f32.xlu0 %v4891_v17  ;;  %v4888_v28 = vpop.f32.mrb[62].mxu0 }
0x1419   : > { %v9875_v20 = vpop.f32.mrb[63].mxu0 }
0x1489   : > { %v4995_v23 = vpop.f32.mrb[64].mxu0 }
0x148a   : > { %v9886_v39 = vpop.f32.mrb[65].mxu0  ;;  %v5001_v3 = vsel %vm1545_vm5, %v4995_v23, -inf }
0x148b   : > { %5002 = vmax.xlane.f32.xlu1 %v5001_v3  ;;  %v4998_v48 = vpop.f32.mrb[66].mxu0 }
0x148c   : > { %v9887_v11 = vpop.f32.mrb[67].mxu0 }
0x1491   : > { %v5106_v33 = vpop.f32.mrb[68].mxu0 }
0x1492   : > { %v9898_v52 = vpop.f32.mrb[69].mxu0  ;;  %v5112_v34 = vsel %vm1545_vm5, %v5106_v33, -inf }
0x1493   : > { %5113 = vmax.xlane.f32.xlu0 %v5112_v34  ;;  %v5109_v57 = vpop.f32.mrb[70].mxu0 }
0x1494   : > { %v9899_v1 = vpop.f32.mrb[71].mxu0 }
0x1499   : > { %v5216_v6 = vpop.f32.mrb[72].mxu0 }
0x149a   : > { %v9910_v62 = vpop.f32.mrb[73].mxu0  ;;  %v5222_v31 = vsel %vm1545_vm5, %v5216_v6, -inf }
0x149b   : > { %5223 = vmax.xlane.f32.xlu0 %v5222_v31  ;;  %v5219_v19 = vpop.f32.mrb[74].mxu0 }
0x149c   : > { %v9911_v10 = vpop.f32.mrb[75].mxu0 }
0x14a1   : > { %v5326_v43 = vpop.f32.mrb[76].mxu0 }
0x14a2   : > { %v9922_v4 = vpop.f32.mrb[77].mxu0  ;;  %v5332_v17 = vsel %vm1545_vm5, %v5326_v43, -inf }
0x14a3   : > { %5333 = vmax.xlane.f32.xlu1 %v5332_v17  ;;  %v5329_v28 = vpop.f32.mrb[78].mxu0 }
0x14a4   : > { %v9923_v20 = vpop.f32.mrb[79].mxu0 }
0x14a5   : > { %v4893_v28 = vpop.xlane.xlu0 %4892 }
0x14a6   : > { %v4894_v20 = vsub.f32 %v4885_v5, %v4893_v28 }
0x14a9   : > { %v5436_v39 = vpop.f32.mrb[80].mxu0 }
0x14aa   : > { %v9934_v3 = vpop.f32.mrb[81].mxu0  ;;  %v5442_v48 = vsel %vm1545_vm5, %v5436_v39, -inf }
0x14ab   : > { %5443 = vmax.xlane.f32.xlu0 %v5442_v48  ;;  %v5439_v11 = vpop.f32.mrb[82].mxu0  ;;  %v4895_v3 = vmul.f32 1.442695, %v4894_v20 }
0x14ac   : > { %v9935_v52 = vpop.f32.mrb[83].mxu0 }
0x14ad   : > { %10471 = vpow2.f32 %v4895_v3 }
0x14b1   : > { %v5546_v34 = vpop.f32.mrb[84].mxu0 }
0x14b2   : > { %v9946_v57 = vpop.f32.mrb[85].mxu0  ;;  %v5552_v1 = vsel %vm1545_vm5, %v5546_v34, -inf }
0x14b3   : > { %5553 = vmax.xlane.f32.xlu1 %v5552_v1  ;;  %v5549_v62 = vpop.f32.mrb[86].mxu0 }
0x14b4   : > { %v9947_v31 = vpop.f32.mrb[87].mxu0 }
0x14b7   : > { %v10472_v11 = vpop.eup %10471 }
0x14b8   : > { %v4897_v52 = vsel %vm1545_vm5, %v10472_v11, 0.0 }
0x14b9   : > { %v5656_v19 = vpop.f32.mrb[88].mxu0 }
0x14ba   : > { %v9958_v10 = vpop.f32.mrb[89].mxu0  ;;  %v5662_v48 = vsel %vm1545_vm5, %v5656_v19, -inf }
0x14bb   : > { %v5659_v4 = vpop.f32.mrb[90].mxu0 }
0x14bc   : > { %v9959_v17 = vpop.f32.mrb[91].mxu0 }
0x14c1   : > { %5124 = vrot.lane.b32.xlu0 %v12536_v60, %s11179_s17 }
0x14c4   : > { %5014 = vrot.lane.b32.xlu1 %v12536_v60, %s11177_s12 }
0x14e0   : > { %5663 = vmax.xlane.f32.xlu0 %v5662_v48 }
0x14e8   : > { %4898 = vadd.xlane.f32.xlu1 %v4897_v52 }
0x1518   : > { %v5003_v57 = vpop.xlane.xlu1 %5002 }
0x1519   : > { %v5004_v1 = vsub.f32 %v4995_v23, %v5003_v57 }
0x151b   : > { %v5005_v62 = vmul.f32 1.442695, %v5004_v1 }
0x151d   : > { %10473 = vpow2.f32 %v5005_v62 }
0x1520   : > { %v5114_v31 = vpop.xlane.xlu0 %5113 }
0x1521   : > { %v5115_v10 = vsub.f32 %v5106_v33, %v5114_v31 }
0x1523   : > { %v5116_v4 = vmul.f32 1.442695, %v5115_v10 }
0x1525   : > { %10475 = vpow2.f32 %v5116_v4 }
0x1527   : > { %v12623_v17 = vpop.eup %10473 }
0x1528   : > { %v5007_v5 = vsel %vm1545_vm5, %v12623_v17, 0.0  ;;  %v5224_v23 = vpop.xlane.xlu0 %5223 }
0x1529   : > { %5008 = vadd.xlane.f32.xlu0 %v5007_v5  ;;  %v5225_v33 = vsub.f32 %v5216_v6, %v5224_v23 }
0x152b   : > { %v5226_v48 = vmul.f32 1.442695, %v5225_v33 }
0x152d   : > { %10477 = vpow2.f32 %v5226_v48 }
0x152f   : > { %v12627_v28 = vpop.eup %10475 }
0x1530   : > { %v5118_v20 = vsel %vm1545_vm5, %v12627_v28, 0.0  ;;  %v5334_v3 = vpop.xlane.xlu1 %5333 }
0x1531   : > { %5119 = vadd.xlane.f32.xlu1 %v5118_v20  ;;  %v5335_v52 = vsub.f32 %v5326_v43, %v5334_v3 }
0x1533   : > { %v5336_v31 = vmul.f32 1.442695, %v5335_v52 }
0x1535   : > { %10479 = vpow2.f32 %v5336_v31 }
0x1537   : > { %v10478_v20 = vpop.eup %10477 }
0x1538   : > { %v5444_v57 = vpop.xlane.xlu0 %5443  ;;  %v5228_v35 = vsel %vm1545_vm5, %v10478_v20, 0.0 }
0x1539   : > { %v5445_v62 = vsub.f32 %v5436_v39, %v5444_v57 }
0x153b   : > { %v5446_v4 = vmul.f32 1.442695, %v5445_v62 }
0x153c   : > { %v5125_v33 = vpop.permute.xlu0 %5124 }
0x153d   : > { %10481 = vpow2.f32 %v5446_v4 }
0x153f   : > { %5234 = vrot.lane.b32.xlu0 %v12536_v60, %s11180_s21  ;;  %v12636_v0 = vpop.eup %10479 }
0x1540   : > { %v5554_v1 = vpop.xlane.xlu1 %5553  ;;  %v5338_v43 = vsel %vm1545_vm5, %v12636_v0, 0.0 }
0x1541   : > { %v5555_v10 = vsub.f32 %v5546_v34, %v5554_v1 }
0x1542   : > { %5344 = vrot.lane.b32.xlu1 %v12536_v60, %s11181_s29 }
0x1543   : > { %v5556_v5 = vmul.f32 1.442695, %v5555_v10 }
0x1544   : > { %v5015_v52 = vpop.permute.xlu1 %5014 }
0x1545   : > { %10483 = vpow2.f32 %v5556_v5  ;;  %v5020_v4 = vand.u32 %v5015_v52, %v11660_v36 }
0x1547   : > { %v12638_v6 = vpop.eup %10481 }
0x1548   : > { %v5448_v34 = vsel %vm1545_vm5, %v12638_v6, 0.0 }
0x154f   : > { %v12642_v39 = vpop.eup %10483 }
0x1550   : > { %v5558_v23 = vsel %vm1545_vm5, %v12642_v39, 0.0 }
0x155e   : > { %5229 = vadd.xlane.f32.xlu0 %v5228_v35 }
0x1562   : > { %5339 = vadd.xlane.f32.xlu0 %v5338_v43 }
0x1566   : > { %5449 = vadd.xlane.f32.xlu1 %v5448_v34  ;;  %5559 = vadd.xlane.f32.xlu0 %v5558_v23 }
0x156d   : > { %v5664_v3 = vpop.xlane.xlu0 %5663 }
0x156e   : > { %v5665_v48 = vsub.f32 %v5656_v19, %v5664_v3  ;;  %v5130_v3 = vand.u32 %v5125_v33, %v11660_v36 }
0x1570   : > { %v5666_v35 = vmul.f32 1.442695, %v5665_v48 }
0x1572   : > { %10485 = vpow2.f32 %v5666_v35 }
0x1575   : > { %v4899_v57 = vpop.xlane.xlu1 %4898 }
0x1576   : > { %10487 = vrcp.f32 %v4899_v57 }
0x1577   : > { %5564 = vrot.lane.b32.xlu1 %v12536_v60, %s11183_s0 }
0x157b   : > { %5674 = vrot.lane.b32.xlu1 %v12536_v60, %s11184_s22 }
0x157c   : > { %v12652_v1 = vpop.eup %10485 }
0x157d   : > { %v5668_v62 = vsel %vm1545_vm5, %v12652_v1, 0.0 }
0x157e   : > { %5669 = vadd.xlane.f32.xlu0 %v5668_v62 }
0x1580   : > { %v10488_v31 = vpop.eup %10487 }
0x1581   : > { %v4901_v10 = vmul.f32 %v10488_v31, %v10472_v11 }
0x1583   : > { %v4902_v19 = vpack.c.bf16 %v4901_v10, %v4901_v10 }
0x1585   : > { %9879 = vmatmul.mubr.msk.bf16.vlgmr.msra.gmra.mrb[88].mxu1 %vm1558_vm6, %v4902_v19 }
0x1586   : > { %9889 = vmatpush3.bf16.msra.mxu1 %v5020_v4  ;;  %9890 = vmatprep.mubr.msk.bf16.mxu1 %vm11176_vm1, %v13957_v38 }
0x1587   : > { %9900 = vmatprep.subr.bf16.mxu1 %v13957_v38 }
0x1594   : > { %5454 = vrot.lane.b32.xlu0 %v12536_v60, %s11182_s25 }
0x15b6   : > { %v5009_v5 = vpop.xlane.xlu0 %5008 }
0x15b7   : > { %10489 = vrcp.f32 %v5009_v5 }
0x15ba   : > { %v5235_v60 = vpop.permute.xlu0 %5234 }
0x15bb   : > { %v5240_v57 = vand.u32 %v5235_v60, %v11660_v36 }
0x15be   : > { %v5120_v43 = vpop.xlane.xlu1 %5119 }
0x15bf   : > { %10491 = vrcp.f32 %v5120_v43 }
0x15c1   : > { %v10490_v34 = vpop.eup %10489 }
0x15c2   : > { %v5011_v11 = vmul.f32 %v10490_v34, %v12623_v17  ;;  %v5345_v31 = vpop.permute.xlu1 %5344 }
0x15c3   : > { %v5350_v4 = vand.u32 %v5345_v31, %v11660_v36 }
0x15c4   : > { %v5012_v23 = vpack.c.bf16 %v5011_v11, %v5011_v11 }
0x15c6   : > { %9891 = vmatmul.mubr.msk.bf16.vlgmr.msra.gmra.mrb[92].mxu1 %vm1558_vm6, %v5012_v23 }
0x15c7   : > { %9901 = vmatpush3.bf16.msra.mxu1 %v5130_v3  ;;  %9902 = vmatprep.mubr.msk.bf16.mxu1 %vm11176_vm1, %v13957_v38 }
0x15c8   : > { %9912 = vmatprep.subr.bf16.mxu1 %v13957_v38 }
0x15c9   : > { %v10492_v48 = vpop.eup %10491 }
0x15ca   : > { %v5122_v35 = vmul.f32 %v10492_v48, %v12627_v28 }
0x15cc   : > { %v5123_v52 = vpack.c.bf16 %v5122_v35, %v5122_v35 }
0x15ce   : > { %9903 = vmatmul.mubr.msk.bf16.vlgmr.msra.gmra.mrb[96].mxu1 %vm1558_vm6, %v5123_v52 }
0x15cf   : > { %9913 = vmatpush3.bf16.msra.mxu1 %v5240_v57  ;;  %9914 = vmatprep.mubr.msk.bf16.mxu1 %vm11176_vm1, %v13957_v38 }
0x15d0   : > { %9924 = vmatprep.subr.bf16.mxu1 %v13957_v38 }
0x15eb   : > { %v5230_v17 = vpop.xlane.xlu0 %5229 }
0x15ec   : > { %10493 = vrcp.f32 %v5230_v17 }
0x15ef   : > { %v5340_v33 = vpop.xlane.xlu0 %5339 }
0x15f0   : > { %10495 = vrcp.f32 %v5340_v33 }
0x15f3   : > { %v5450_v43 = vpop.xlane.xlu1 %5449 }
0x15f4   : > { %10497 = vrcp.f32 %v5450_v43  ;;  %v13964_v43 = vld [vmem:[#allocation33_spill] sm:$0xff] }
0x15f6   : > { %v10494_v62 = vpop.eup %10493 }
0x15f7   : > { %v5232_v10 = vmul.f32 %v10494_v62, %v10478_v20  ;;  %v5560_v20 = vpop.xlane.xlu0 %5559 }
0x15f8   : > { %10499 = vrcp.f32 %v5560_v20 }
0x15f9   : > { %v5233_v19 = vpack.c.bf16 %v5232_v10, %v5232_v10 }
0x15fa   : > { %v10496_v28 = vpop.eup %10495 }
0x15fb   : > { %9915 = vmatmul.mubr.msk.bf16.vlgmr.msra.gmra.mrb[100].mxu1 %vm1558_vm6, %v5233_v19  ;;  %v5342_v5 = vmul.f32 %v10496_v28, %v12636_v0  ;;  %v5565_v0 = vpop.permute.xlu1 %5564  ;;  %v13961_v28 = vld [vmem:[#allocation31_spill] sm:$0xff] }
0x15fc   : > { %9925 = vmatpush3.bf16.msra.mxu1 %v5350_v4  ;;  %9926 = vmatprep.mubr.msk.bf16.mxu1 %vm11176_vm1, %v13957_v38  ;;  %v5570_v57 = vand.u32 %v5565_v0, %v11660_v36  ;;  %v13962_v4 = vld [vmem:[#allocation30_spill] sm:$0xff] }
0x15fd   : > { %9936 = vmatprep.subr.bf16.mxu1 %v13957_v38  ;;  %v5343_v34 = vpack.c.bf16 %v5342_v5, %v5342_v5  ;;  %v13963_v5 = vld [vmem:[#allocation34_spill] sm:$0xff] }
0x15fe   : > { %v10498_v23 = vpop.eup %10497 }
0x15ff   : > { %v5452_v3 = vmul.f32 %v10498_v23, %v12638_v6  ;;  %v5675_v17 = vpop.permute.xlu1 %5674 }
0x1600   : > { %v5680_v31 = vand.u32 %v5675_v17, %v11660_v36 }
0x1601   : > { %v5453_v35 = vpack.c.bf16 %v5452_v3, %v5452_v3 }
0x1602   : > { %v10500_v52 = vpop.eup %10499 }
0x1603   : > { %9927 = vmatmul.mubr.msk.bf16.vlgmr.msra.gmra.mrb[104].mxu1 %vm1558_vm6, %v5343_v34  ;;  %v5562_v6 = vmul.f32 %v10500_v52, %v12642_v39  ;;  %v13959_v39 = vld [vmem:[#allocation29_spill] sm:$0xff]  ;;  %v13965_v34 = vld [vmem:[#allocation38_spill] sm:$0xff] }
0x1604   : > { %9938 = vmatprep.mubr.msk.bf16.mxu1 %vm11176_vm1, %v13957_v38 }
0x1605   : > { %v5563_v33 = vpack.c.bf16 %v5562_v6, %v5562_v6 }
0x160b   : > { %v5670_v11 = vpop.xlane.xlu0 %5669 }
0x160c   : > { %10501 = vrcp.f32 %v5670_v11 }
0x160f   : > { %v5455_v48 = vpop.permute.xlu0 %5454 }
0x1610   : > { %v5460_v60 = vand.u32 %v5455_v48, %v11660_v36 }
0x1612   : > { %9937 = vmatpush3.bf16.msra.mxu1 %v5460_v60 }
0x1613   : > { %9948 = vmatprep.subr.bf16.mxu1 %v13957_v38 }
0x1615   : > { %9939 = vmatmul.mubr.msk.bf16.vlgmr.msra.gmra.mrb[108].mxu1 %vm1558_vm6, %v5453_v35 }
0x1616   : > { %9949 = vmatpush3.bf16.msra.mxu1 %v5570_v57  ;;  %9950 = vmatprep.mubr.msk.bf16.mxu1 %vm11176_vm1, %v13957_v38  ;;  %v10502_v62 = vpop.eup %10501 }
0x1617   : > { %9960 = vmatprep.subr.bf16.mxu1 %v13957_v38  ;;  %v5672_v10 = vmul.f32 %v10502_v62, %v12652_v1  ;;  %v13960_v1 = vld [vmem:[#allocation28_spill] sm:$0xff] }
0x1619   : > { %v5673_v19 = vpack.c.bf16 %v5672_v10, %v5672_v10 }
0x161d   : > { %9951 = vmatmul.mubr.msk.bf16.vlgmr.msra.gmra.mrb[112].mxu1 %vm1558_vm6, %v5563_v33 }
0x161e   : > { %9961 = vmatpush3.bf16.msra.mxu1 %v5680_v31  ;;  %9962 = vmatprep.mubr.msk.bf16.mxu1 %vm11176_vm1, %v13957_v38 }
0x161f   : > { %5815 = vmatprep.subr.bf16.mxu1 %v11830_v45 }
0x1625   : > { %9963 = vmatmul.mubr.msk.bf16.vlgmr.msra.gmra.mrb[116].mxu1 %vm1558_vm6, %v5673_v19 }
0x1626   : > { %5816 = vmatpush1.bf16.msra.mxu1 %v11828_v37  ;;  %5847 = vmatprep.mubr.bf16.mxu1 %v13854_v25 }
0x1627   : > { %5817 = vmatprep.subr.bf16.mxu1 %v11835_v49 }
0x162a   : > { %5818 = vmatpush1.bf16.msra.mxu1 %v11843_v27 }
0x162b   : > { %5819 = vmatprep.subr.bf16.mxu1 %v11848_v55 }
0x162e   : > { %5820 = vmatpush1.bf16.msra.mxu1 %v11855_v59 }
0x162f   : > { %5821 = vmatprep.subr.bf16.mxu1 %v11872_v16 }
0x1632   : > { %5822 = vmatpush1.bf16.msra.mxu1 %v11870_v12 }
0x1633   : > { %5823 = vmatprep.subr.bf16.mxu1 %v11884_v22 }
0x1636   : > { %5824 = vmatpush1.bf16.msra.mxu1 %v11882_v21 }
0x1637   : > { %5825 = vmatprep.subr.bf16.mxu1 %v13959_v39 }
0x163a   : > { %5826 = vmatpush1.bf16.msra.mxu1 %v13960_v1 }
0x163b   : > { %5827 = vmatprep.subr.bf16.mxu1 %v13961_v28 }
0x163e   : > { %5828 = vmatpush1.bf16.msra.mxu1 %v13962_v4 }
0x163f   : > { %5829 = vmatprep.subr.bf16.mxu1 %v13963_v5 }
0x1642   : > { %5830 = vmatpush1.bf16.msra.mxu1 %v13964_v43 }
0x1643   : > { %5897 = vmatprep.subr.bf16.mxu1 %v13965_v34 }
0x1658   : > { %v4943_v20 = vpop.f32.mrb[88].mxu1 }
0x1659   : > { %v9880_v11 = vpop.f32.mrb[89].mxu1 }
0x165a   : > { %v4946_v23 = vpop.f32.mrb[90].mxu1 }
0x165b   : > { %v9881_v3 = vpop.f32.mrb[91].mxu1 }
0x1699   : > { %v5056_v48 = vpop.f32.mrb[92].mxu1 }
0x169a   : > { %5723 = vrot.lane.b32.xlu1 %v5056_v48, %s11184_s22  ;;  %v9892_v60 = vpop.f32.mrb[93].mxu1 }
0x169b   : > { %v5059_v0 = vpop.f32.mrb[94].mxu1 }
0x169c   : > { %v9893_v35 = vpop.f32.mrb[95].mxu1 }
0x16a1   : > { %v5166_v52 = vpop.f32.mrb[96].mxu1 }
0x16a2   : > { %5727 = vrot.lane.b32.xlu1 %v5166_v52, %s11183_s0  ;;  %v9904_v57 = vpop.f32.mrb[97].mxu1 }
0x16a3   : > { %v5169_v6 = vpop.f32.mrb[98].mxu1 }
0x16a4   : > { %v9905_v17 = vpop.f32.mrb[99].mxu1 }
0x16ce   : > { %v5276_v33 = vpop.f32.mrb[100].mxu1 }
0x16cf   : > { %5731 = vrot.lane.b32.xlu1 %v5276_v33, %s11182_s25  ;;  %v9916_v62 = vpop.f32.mrb[101].mxu1 }
0x16d0   : > { %v5279_v31 = vpop.f32.mrb[102].mxu1 }
0x16d1   : > { %v9917_v10 = vpop.f32.mrb[103].mxu1 }
0x16d6   : > { %v5386_v19 = vpop.f32.mrb[104].mxu1 }
0x16d7   : > { %5735 = vrot.lane.b32.xlu0 %v5386_v19, %s11181_s29  ;;  %v9928_v11 = vpop.f32.mrb[105].mxu1 }
0x16d8   : > { %v5389_v23 = vpop.f32.mrb[106].mxu1 }
0x16d9   : > { %v9929_v3 = vpop.f32.mrb[107].mxu1 }
0x16e8   : > { %v5496_v48 = vpop.f32.mrb[108].mxu1 }
0x16e9   : > { %5739 = vrot.lane.b32.xlu1 %v5496_v48, %s11180_s21  ;;  %v9940_v60 = vpop.f32.mrb[109].mxu1 }
0x16ea   : > { %v5499_v0 = vpop.f32.mrb[110].mxu1 }
0x16eb   : > { %v9941_v35 = vpop.f32.mrb[111].mxu1 }
0x16f0   : > { %v5606_v52 = vpop.f32.mrb[112].mxu1 }
0x16f1   : > { %5743 = vrot.lane.b32.xlu0 %v5606_v52, %s11179_s17  ;;  %v9952_v57 = vpop.f32.mrb[113].mxu1 }
0x16f2   : > { %v5609_v6 = vpop.f32.mrb[114].mxu1 }
0x16f3   : > { %v9953_v17 = vpop.f32.mrb[115].mxu1 }
0x16f8   : > { %v5716_v33 = vpop.f32.mrb[116].mxu1 }
0x16f9   : > { %5747 = vrot.lane.b32.xlu1 %v5716_v33, %s11177_s12  ;;  %v9964_v62 = vpop.f32.mrb[117].mxu1 }
0x16fa   : > { %v5719_v31 = vpop.f32.mrb[118].mxu1 }
0x16fb   : > { %v9965_v10 = vpop.f32.mrb[119].mxu1 }
0x170c   : > { %v5724_v19 = vpop.permute.xlu1 %5723 }
0x170d   : > { %v5750_v48 = vsel %vm1498_vm2, %v4943_v20, %v5724_v19 }
0x1714   : > { %v5728_v11 = vpop.permute.xlu1 %5727 }
0x1715   : > { %v5751_v60 = vsel %vm2411_vm7, %v5750_v48, %v5728_v11 }
0x1741   : > { %v5732_v23 = vpop.permute.xlu1 %5731 }
0x1742   : > { %v5752_v35 = vsel %vm2413_vm8, %v5751_v60, %v5732_v23 }
0x1749   : > { %v5736_v3 = vpop.permute.xlu0 %5735 }
0x174a   : > { %v5753_v57 = vsel %vm2415_vm9, %v5752_v35, %v5736_v3 }
0x175b   : > { %v5740_v0 = vpop.permute.xlu1 %5739 }
0x175c   : > { %v5754_v6 = vsel %vm2417_vm10, %v5753_v57, %v5740_v0 }
0x1763   : > { %v5744_v52 = vpop.permute.xlu0 %5743 }
0x1764   : > { %v5755_v17 = vsel %vm2419_vm11, %v5754_v6, %v5744_v52 }
0x176b   : > { %v5748_v33 = vpop.permute.xlu1 %5747 }
0x176c   : > { %v5756_v62 = vsel %vm2421_vm12, %v5755_v17, %v5748_v33  ;;  %v13966_v17 = vld [vmem:[#allocation35_spill] sm:$0xff]  ;;  %v13967_v33 = vld [vmem:[#allocation37_spill] sm:$0xff] }
0x176d   : > { %v12732_v31 = vadd.f32 %v5756_v62, %v12511_v13  ;;  %v13968_v62 = vld [vmem:[#allocation39_spill] sm:$0xff] }
0x176f   : > { %v5758_v20 = vsel %vm1240_vm0, %v12732_v31, 0.0 }
0x1770   : > { %5759 = vadd.xlane.f32.xlu0 %v5758_v20  ;;  %v13969_v20 = vld [vmem:[#allocation40_spill] sm:$0xff] }
0x17fd   : > { %v5760_v10 = vpop.xlane.xlu0 %5759 }
0x17fe   : > { %v5761_v19 = vmul.f32 0.0078125, %v5760_v10  ;;  %v13972_v10 = vld [vmem:[#allocation43_spill] sm:$0xff] }
0x1800   : > { %v5762_v11 = vsub.f32 %v12732_v31, %v5761_v19  ;;  %v13973_v19 = vld [vmem:[#allocation44_spill] sm:$0xff] }
0x1802   : > { %v5763_v23 = vmul.f32 %v5762_v11, %v5762_v11 }
0x1804   : > { %v5764_v3 = vsel %vm1240_vm0, %v5763_v23, 0.0  ;;  %v13975_v23 = vld [vmem:[#allocation46_spill] sm:$0xff] }
0x1805   : > { %5765 = vadd.xlane.f32.xlu1 %v5764_v3  ;;  %v13976_v3 = vld [vmem:[#allocation47_spill] sm:$0xff] }
0x1892   : > { %v5766_v48 = vpop.xlane.xlu1 %5765 }
0x1893   : > { %v5767_v60 = vmul.f32 0.0078125, %v5766_v48  ;;  %v13977_v48 = vld [vmem:[#allocation48_spill] sm:$0xff] }
0x1895   : > { %v5768_v0 = vadd.f32 1e-05, %v5767_v60  ;;  %v13978_v60 = vld [vmem:[#allocation49_spill] sm:$0xff] }
0x1897   : > { %10503 = vrsqrt.f32 %v5768_v0  ;;  %v13979_v0 = vld [vmem:[#allocation50_spill] sm:$0xff] }
0x18a1   : > { %v10504_v35 = vpop.eup %10503 }
0x18a2   : > { %v5770_v52 = vmul.f32 %v10504_v35, %v5762_v11  ;;  %v13974_v11 = vld [vmem:[#allocation45_spill] sm:$0xff]  ;;  %v13980_v35 = vld [vmem:[#allocation51_spill] sm:$0xff] }
0x18a4   : > { %v5771_v13 = vmul.f32 %v12520_v56, %v5770_v52  ;;  %v13970_v56 = vld [vmem:[#allocation41_spill] sm:$0xff]  ;;  %v13981_v52 = vld [vmem:[#allocation52_spill] sm:$0xff] }
0x18a6   : > { %v5772_v57 = vadd.f32 %v12526_v15, %v5771_v13  ;;  %v13971_v15 = vld [vmem:[#allocation42_spill] sm:$0xff]  ;;  %v13982_v13 = vld [vmem:[#allocation53_spill] sm:$0xff] }
0x18a8   : > { %v12740_v6 = vpack.c.bf16 %v5772_v57, %v5772_v57  ;;  %v13983_v57 = vld [vmem:[#allocation54_spill] sm:$0xff] }
0x18aa   : > { %5807 = vmatmul.mubr.bf16.vlgmr.msra.gmra.mrb[92].mxu0 %v12740_v6  ;;  %5848 = vmatmul.mubr.bf16.vlgmr.msra.gmra.mrb[120].mxu1 %v12740_v6 }
0x18ab   : > { %5857 = vmatpush1.bf16.msra.mxu0 %v13966_v17  ;;  %5898 = vmatpush1.bf16.msra.mxu1 %v13967_v33 }
0x18ac   : > { %5858 = vmatprep.subr.bf16.mxu0 %v13968_v62  ;;  %5899 = vmatprep.subr.bf16.mxu1 %v13969_v20  ;;  %v14063_v20 = vld [vmem:[#allocation134_spill] sm:$0xff] }
0x18ad   : > { %5888 = vmatprep.mubr.bf16.mxu0 %v13854_v25  ;;  %5929 = vmatprep.mubr.bf16.mxu1 %v13854_v25 }
0x18af   : > { %5859 = vmatpush1.bf16.msra.mxu0 %v13970_v56  ;;  %5900 = vmatpush1.bf16.msra.mxu1 %v13971_v15  ;;  %v14062_v56 = vld [vmem:[#allocation133_spill] sm:$0xff] }
0x18b0   : > { %5860 = vmatprep.subr.bf16.mxu0 %v13972_v10  ;;  %5901 = vmatprep.subr.bf16.mxu1 %v13973_v19  ;;  %v13984_v19 = vld [vmem:[#allocation55_spill] sm:$0xff]  ;;  %v14061_v10 = vld [vmem:[#allocation132_spill] sm:$0xff] }
0x18b3   : > { %5861 = vmatpush1.bf16.msra.mxu0 %v13974_v11  ;;  %5902 = vmatpush1.bf16.msra.mxu1 %v13975_v23  ;;  %v13985_v11 = vld [vmem:[#allocation56_spill] sm:$0xff]  ;;  %v13986_v23 = vld [vmem:[#allocation57_spill] sm:$0xff] }
0x18b4   : > { %5862 = vmatprep.subr.bf16.mxu0 %v13976_v3  ;;  %5903 = vmatprep.subr.bf16.mxu1 %v13977_v48  ;;  %v13987_v3 = vld [vmem:[#allocation58_spill] sm:$0xff]  ;;  %v13988_v48 = vld [vmem:[#allocation59_spill] sm:$0xff] }
0x18b7   : > { %5863 = vmatpush1.bf16.msra.mxu0 %v13978_v60  ;;  %5904 = vmatpush1.bf16.msra.mxu1 %v13979_v0  ;;  %v13989_v60 = vld [vmem:[#allocation60_spill] sm:$0xff]  ;;  %v13990_v0 = vld [vmem:[#allocation61_spill] sm:$0xff] }
0x18b8   : > { %5864 = vmatprep.subr.bf16.mxu0 %v13980_v35  ;;  %5905 = vmatprep.subr.bf16.mxu1 %v13981_v52  ;;  %v13991_v35 = vld [vmem:[#allocation62_spill] sm:$0xff]  ;;  %v13992_v52 = vld [vmem:[#allocation63_spill] sm:$0xff] }
0x18bb   : > { %5865 = vmatpush1.bf16.msra.mxu0 %v13982_v13  ;;  %5906 = vmatpush1.bf16.msra.mxu1 %v13983_v57  ;;  %v13993_v13 = vld [vmem:[#allocation64_spill] sm:$0xff]  ;;  %v13994_v57 = vld [vmem:[#allocation65_spill] sm:$0xff] }
0x18bc   : > { %5866 = vmatprep.subr.bf16.mxu0 %v13984_v19  ;;  %5907 = vmatprep.subr.bf16.mxu1 %v13985_v11  ;;  %v13995_v19 = vld [vmem:[#allocation66_spill] sm:$0xff]  ;;  %v13996_v11 = vld [vmem:[#allocation67_spill] sm:$0xff] }
0x18bf   : > { %5867 = vmatpush1.bf16.msra.mxu0 %v13986_v23  ;;  %5908 = vmatpush1.bf16.msra.mxu1 %v13987_v3  ;;  %v13997_v23 = vld [vmem:[#allocation68_spill] sm:$0xff]  ;;  %v14012_v3 = vld [vmem:[#allocation83_spill] sm:$0xff] }
0x18c0   : > { %5868 = vmatprep.subr.bf16.mxu0 %v13988_v48  ;;  %5909 = vmatprep.subr.bf16.mxu1 %v13989_v60  ;;  %v13998_v60 = vld [vmem:[#allocation69_spill] sm:$0xff]  ;;  %v14011_v48 = vld [vmem:[#allocation82_spill] sm:$0xff] }
0x18c3   : > { %5869 = vmatpush1.bf16.msra.mxu0 %v13990_v0  ;;  %5910 = vmatpush1.bf16.msra.mxu1 %v13991_v35  ;;  %v13999_v0 = vld [vmem:[#allocation70_spill] sm:$0xff]  ;;  %v14000_v35 = vld [vmem:[#allocation71_spill] sm:$0xff] }
0x18c4   : > { %5870 = vmatprep.subr.bf16.mxu0 %v13992_v52  ;;  %5911 = vmatprep.subr.bf16.mxu1 %v13993_v13  ;;  %v14001_v52 = vld [vmem:[#allocation72_spill] sm:$0xff]  ;;  %v14006_v13 = vld [vmem:[#allocation77_spill] sm:$0xff] }
0x18c7   : > { %5871 = vmatpush1.bf16.msra.mxu0 %v13994_v57  ;;  %5912 = vmatpush1.bf16.msra.mxu1 %v13995_v19  ;;  %v14002_v19 = vld [vmem:[#allocation73_spill] sm:$0xff]  ;;  %v14005_v57 = vld [vmem:[#allocation76_spill] sm:$0xff] }
0x18c8   : > { %5938 = vmatprep.subr.bf16.mxu0 %v13996_v11  ;;  %5979 = vmatprep.subr.bf16.mxu1 %v13997_v23  ;;  %v14003_v11 = vld [vmem:[#allocation74_spill] sm:$0xff]  ;;  %v14004_v23 = vld [vmem:[#allocation75_spill] sm:$0xff] }
0x18ca   : > { %5889 = vmatmul.mubr.bf16.vlgmr.msra.gmra.mrb[96].mxu0 %v12740_v6  ;;  %5930 = vmatmul.mubr.bf16.vlgmr.msra.gmra.mrb[124].mxu1 %v12740_v6 }
0x18cb   : > { %5939 = vmatpush1.bf16.msra.mxu0 %v13998_v60  ;;  %5980 = vmatpush1.bf16.msra.mxu1 %v13999_v0  ;;  %v14007_v60 = vld [vmem:[#allocation78_spill] sm:$0xff]  ;;  %v14008_v0 = vld [vmem:[#allocation79_spill] sm:$0xff] }
0x18cc   : > { %5940 = vmatprep.subr.bf16.mxu0 %v14000_v35  ;;  %5981 = vmatprep.subr.bf16.mxu1 %v14001_v52  ;;  %v14009_v35 = vld [vmem:[#allocation80_spill] sm:$0xff]  ;;  %v14010_v52 = vld [vmem:[#allocation81_spill] sm:$0xff] }
0x18cd   : > { %5970 = vmatprep.mubr.bf16.mxu0 %v13854_v25  ;;  %6011 = vmatprep.mubr.bf16.mxu1 %v13854_v25 }
0x18cf   : > { %5941 = vmatpush1.bf16.msra.mxu0 %v14002_v19  ;;  %5982 = vmatpush1.bf16.msra.mxu1 %v14003_v11  ;;  %v14013_v19 = vld [vmem:[#allocation84_spill] sm:$0xff]  ;;  %v14014_v11 = vld [vmem:[#allocation85_spill] sm:$0xff] }
0x18d0   : > { %5942 = vmatprep.subr.bf16.mxu0 %v14004_v23  ;;  %5983 = vmatprep.subr.bf16.mxu1 %v14005_v57  ;;  %v14015_v23 = vld [vmem:[#allocation86_spill] sm:$0xff]  ;;  %v14016_v57 = vld [vmem:[#allocation87_spill] sm:$0xff] }
0x18d3   : > { %5943 = vmatpush1.bf16.msra.mxu0 %v14006_v13  ;;  %5984 = vmatpush1.bf16.msra.mxu1 %v14007_v60  ;;  %v14017_v13 = vld [vmem:[#allocation88_spill] sm:$0xff]  ;;  %v14018_v60 = vld [vmem:[#allocation89_spill] sm:$0xff] }
0x18d4   : > { %5944 = vmatprep.subr.bf16.mxu0 %v14008_v0  ;;  %5985 = vmatprep.subr.bf16.mxu1 %v14009_v35  ;;  %v14019_v0 = vld [vmem:[#allocation90_spill] sm:$0xff]  ;;  %v14020_v35 = vld [vmem:[#allocation91_spill] sm:$0xff] }
0x18d7   : > { %5945 = vmatpush1.bf16.msra.mxu0 %v14010_v52  ;;  %5986 = vmatpush1.bf16.msra.mxu1 %v14011_v48  ;;  %v14021_v52 = vld [vmem:[#allocation92_spill] sm:$0xff]  ;;  %v14022_v48 = vld [vmem:[#allocation93_spill] sm:$0xff] }
0x18d8   : > { %5946 = vmatprep.subr.bf16.mxu0 %v14012_v3  ;;  %5987 = vmatprep.subr.bf16.mxu1 %v14013_v19  ;;  %v14023_v3 = vld [vmem:[#allocation94_spill] sm:$0xff]  ;;  %v14024_v19 = vld [vmem:[#allocation95_spill] sm:$0xff] }
0x18db   : > { %5947 = vmatpush1.bf16.msra.mxu0 %v14014_v11  ;;  %5988 = vmatpush1.bf16.msra.mxu1 %v14015_v23  ;;  %v14025_v11 = vld [vmem:[#allocation96_spill] sm:$0xff]  ;;  %v14026_v23 = vld [vmem:[#allocation97_spill] sm:$0xff] }
0x18dc   : > { %5948 = vmatprep.subr.bf16.mxu0 %v14016_v57  ;;  %5989 = vmatprep.subr.bf16.mxu1 %v14017_v13  ;;  %v14027_v57 = vld [vmem:[#allocation98_spill] sm:$0xff]  ;;  %v14028_v13 = vld [vmem:[#allocation99_spill] sm:$0xff] }
0x18df   : > { %5949 = vmatpush1.bf16.msra.mxu0 %v14018_v60  ;;  %5990 = vmatpush1.bf16.msra.mxu1 %v14019_v0  ;;  %v14029_v60 = vld [vmem:[#allocation100_spill] sm:$0xff]  ;;  %v14044_v0 = vld [vmem:[#allocation115_spill] sm:$0xff] }
0x18e0   : > { %5950 = vmatprep.subr.bf16.mxu0 %v14020_v35  ;;  %5991 = vmatprep.subr.bf16.mxu1 %v14021_v52  ;;  %v14030_v52 = vld [vmem:[#allocation101_spill] sm:$0xff]  ;;  %v14043_v35 = vld [vmem:[#allocation114_spill] sm:$0xff] }
0x18e3   : > { %5951 = vmatpush1.bf16.msra.mxu0 %v14022_v48  ;;  %5992 = vmatpush1.bf16.msra.mxu1 %v14023_v3  ;;  %v14031_v48 = vld [vmem:[#allocation102_spill] sm:$0xff]  ;;  %v14032_v3 = vld [vmem:[#allocation103_spill] sm:$0xff] }
0x18e4   : > { %5952 = vmatprep.subr.bf16.mxu0 %v14024_v19  ;;  %5993 = vmatprep.subr.bf16.mxu1 %v14025_v11  ;;  %v14033_v19 = vld [vmem:[#allocation104_spill] sm:$0xff]  ;;  %v14038_v11 = vld [vmem:[#allocation109_spill] sm:$0xff] }
0x18e7   : > { %5953 = vmatpush1.bf16.msra.mxu0 %v14026_v23  ;;  %5994 = vmatpush1.bf16.msra.mxu1 %v14027_v57  ;;  %v14034_v57 = vld [vmem:[#allocation105_spill] sm:$0xff]  ;;  %v14037_v23 = vld [vmem:[#allocation108_spill] sm:$0xff] }
0x18e8   : > { %6020 = vmatprep.subr.bf16.mxu0 %v14028_v13  ;;  %6061 = vmatprep.subr.bf16.mxu1 %v14029_v60  ;;  %v14035_v13 = vld [vmem:[#allocation106_spill] sm:$0xff]  ;;  %v14036_v60 = vld [vmem:[#allocation107_spill] sm:$0xff] }
0x18ea   : > { %5971 = vmatmul.mubr.bf16.vlgmr.msra.gmra.mrb[100].mxu0 %v12740_v6  ;;  %6012 = vmatmul.mubr.bf16.vlgmr.msra.gmra.mrb[128].mxu1 %v12740_v6 }
0x18eb   : > { %6021 = vmatpush1.bf16.msra.mxu0 %v14030_v52  ;;  %6062 = vmatpush1.bf16.msra.mxu1 %v14031_v48  ;;  %v14039_v52 = vld [vmem:[#allocation110_spill] sm:$0xff]  ;;  %v14040_v48 = vld [vmem:[#allocation111_spill] sm:$0xff] }
0x18ec   : > { %6022 = vmatprep.subr.bf16.mxu0 %v14032_v3  ;;  %6063 = vmatprep.subr.bf16.mxu1 %v14033_v19  ;;  %v14041_v3 = vld [vmem:[#allocation112_spill] sm:$0xff]  ;;  %v14042_v19 = vld [vmem:[#allocation113_spill] sm:$0xff] }
0x18ed   : > { %6052 = vmatprep.mubr.bf16.mxu0 %v13854_v25  ;;  %6093 = vmatprep.mubr.bf16.mxu1 %v13854_v25 }
0x18ef   : > { %6023 = vmatpush1.bf16.msra.mxu0 %v14034_v57  ;;  %6064 = vmatpush1.bf16.msra.mxu1 %v14035_v13  ;;  %v14045_v57 = vld [vmem:[#allocation116_spill] sm:$0xff]  ;;  %v14046_v13 = vld [vmem:[#allocation117_spill] sm:$0xff] }
0x18f0   : > { %6024 = vmatprep.subr.bf16.mxu0 %v14036_v60  ;;  %6065 = vmatprep.subr.bf16.mxu1 %v14037_v23  ;;  %v14047_v60 = vld [vmem:[#allocation118_spill] sm:$0xff]  ;;  %v14048_v23 = vld [vmem:[#allocation119_spill] sm:$0xff] }
0x18f3   : > { %6025 = vmatpush1.bf16.msra.mxu0 %v14038_v11  ;;  %6066 = vmatpush1.bf16.msra.mxu1 %v14039_v52  ;;  %v14049_v11 = vld [vmem:[#allocation120_spill] sm:$0xff]  ;;  %v14050_v52 = vld [vmem:[#allocation121_spill] sm:$0xff] }
0x18f4   : > { %6026 = vmatprep.subr.bf16.mxu0 %v14040_v48  ;;  %6067 = vmatprep.subr.bf16.mxu1 %v14041_v3  ;;  %v14051_v48 = vld [vmem:[#allocation122_spill] sm:$0xff]  ;;  %v14052_v3 = vld [vmem:[#allocation123_spill] sm:$0xff] }
0x18f7   : > { %6027 = vmatpush1.bf16.msra.mxu0 %v14042_v19  ;;  %6068 = vmatpush1.bf16.msra.mxu1 %v14043_v35  ;;  %v14053_v19 = vld [vmem:[#allocation124_spill] sm:$0xff]  ;;  %v14054_v35 = vld [vmem:[#allocation125_spill] sm:$0xff] }
0x18f8   : > { %6028 = vmatprep.subr.bf16.mxu0 %v14044_v0  ;;  %6069 = vmatprep.subr.bf16.mxu1 %v14045_v57  ;;  %v14055_v0 = vld [vmem:[#allocation126_spill] sm:$0xff]  ;;  %v14056_v57 = vld [vmem:[#allocation127_spill] sm:$0xff] }
0x18fb   : > { %6029 = vmatpush1.bf16.msra.mxu0 %v14046_v13  ;;  %6070 = vmatpush1.bf16.msra.mxu1 %v14047_v60  ;;  %v14057_v13 = vld [vmem:[#allocation128_spill] sm:$0xff]  ;;  %v14058_v60 = vld [vmem:[#allocation129_spill] sm:$0xff] }
0x18fc   : > { %6030 = vmatprep.subr.bf16.mxu0 %v14048_v23  ;;  %6071 = vmatprep.subr.bf16.mxu1 %v14049_v11  ;;  %v14059_v23 = vld [vmem:[#allocation130_spill] sm:$0xff]  ;;  %v10633_v11 = vld [vmem:[#allocation8 + $0x40] sm:$0xff]  }
0x18ff   : > { %6031 = vmatpush1.bf16.msra.mxu0 %v14050_v52  ;;  %6072 = vmatpush1.bf16.msra.mxu1 %v14051_v48  ;;  %v10634_v52 = vld [vmem:[#allocation8 + $0xc0] sm:$0xff]  }
0x1900   : > { %6032 = vmatprep.subr.bf16.mxu0 %v14052_v3  ;;  %6073 = vmatprep.subr.bf16.mxu1 %v14053_v19  ;;  %v10635_v19 = vld [vmem:[#allocation8] sm:$0xff]   ;;  %v10644_v3 = vld [vmem:[#allocation8 + $0x90] sm:$0xff]  }
0x1901   : > { %v14060_v48 = vld [vmem:[#allocation131_spill] sm:$0xff] }
0x1903   : > { %6033 = vmatpush1.bf16.msra.mxu0 %v14054_v35  ;;  %6074 = vmatpush1.bf16.msra.mxu1 %v14055_v0  ;;  %v10636_v35 = vld [vmem:[#allocation8 + $0x80] sm:$0xff]   ;;  %v10637_v0 = vld [vmem:[#allocation8 + $0x48] sm:$0xff]  }
0x1904   : > { %6034 = vmatprep.subr.bf16.mxu0 %v14056_v57  ;;  %6075 = vmatprep.subr.bf16.mxu1 %v14057_v13  ;;  %v10638_v57 = vld [vmem:[#allocation8 + $0xc8] sm:$0xff]  }
0x1905   : > { %v10639_v13 = vld [vmem:[#allocation8 + $0x8] sm:$0xff]  }
0x1907   : > { %6035 = vmatpush1.bf16.msra.mxu0 %v14058_v60  ;;  %6076 = vmatpush1.bf16.msra.mxu1 %v14059_v23  ;;  %v10640_v60 = vld [vmem:[#allocation8 + $0x88] sm:$0xff]   ;;  %v10641_v23 = vld [vmem:[#allocation8 + $0x50] sm:$0xff]  }
0x1908   : > { %9332 = vmatprep.subr.bf16.mxu0 %v10633_v11  ;;  %9354 = vmatprep.subr.bf16.mxu1 %v10634_v52  ;;  %v10642_v11 = vld [vmem:[#allocation8 + $0xd0] sm:$0xff]  }
0x1909   : > { %v10643_v52 = vld [vmem:[#allocation8 + $0x10] sm:$0xff]  }
0x190a   : > { %6053 = vmatmul.mubr.bf16.vlgmr.msra.gmra.mrb[104].mxu0 %v12740_v6  ;;  %6094 = vmatmul.mubr.bf16.vlgmr.msra.gmra.mrb[132].mxu1 %v12740_v6  ;;  %v10645_v6 = vld [vmem:[#allocation8 + $0x58] sm:$0xff]  }
0x190b   : > { %9333 = vmatpush3.bf16.msra.mxu0 %v10635_v19  ;;  %9355 = vmatpush3.bf16.msra.mxu1 %v10636_v35  ;;  %v10646_v19 = vld [vmem:[#allocation8 + $0xd8] sm:$0xff]  }
0x190c   : > { %9334 = vmatprep.subr.bf16.mxu0 %v10637_v0  ;;  %9356 = vmatprep.subr.bf16.mxu1 %v10638_v57  ;;  %v10647_v35 = vld [vmem:[#allocation8 + $0x18] sm:$0xff]   ;;  %v10649_v57 = vld [vmem:[#allocation8 + $0x60] sm:$0xff]  }
0x190d   : > { %v10648_v0 = vld [vmem:[#allocation8 + $0x98] sm:$0xff]  }
0x190f   : > { %9335 = vmatpush3.bf16.msra.mxu0 %v10639_v13  ;;  %9357 = vmatpush3.bf16.msra.mxu1 %v10640_v60  ;;  %v10650_v13 = vld [vmem:[#allocation8 + $0xe0] sm:$0xff]  }
0x1910   : > { %9336 = vmatprep.subr.bf16.mxu0 %v10641_v23  ;;  %9358 = vmatprep.subr.bf16.mxu1 %v10642_v11  ;;  %v10651_v60 = vld [vmem:[#allocation8 + $0x20] sm:$0xff]   ;;  %v10653_v11 = vld [vmem:[#allocation8 + $0x68] sm:$0xff]  }
0x1911   : > { %v10652_v23 = vld [vmem:[#allocation8 + $0xa0] sm:$0xff]  }
0x1913   : > { %9337 = vmatpush3.bf16.msra.mxu0 %v10643_v52  ;;  %9359 = vmatpush3.bf16.msra.mxu1 %v10644_v3  ;;  %v10654_v52 = vld [vmem:[#allocation8 + $0xe8] sm:$0xff]  }
0x1914   : > { %9338 = vmatprep.subr.bf16.mxu0 %v10645_v6  ;;  %9360 = vmatprep.subr.bf16.mxu1 %v10646_v19  ;;  %v10655_v3 = vld [vmem:[#allocation8 + $0x28] sm:$0xff]   ;;  %v10657_v19 = vld [vmem:[#allocation8 + $0x70] sm:$0xff]  }
0x1915   : > { %v10656_v6 = vld [vmem:[#allocation8 + $0xa8] sm:$0xff]  }
0x1917   : > { %9339 = vmatpush3.bf16.msra.mxu0 %v10647_v35  ;;  %9361 = vmatpush3.bf16.msra.mxu1 %v10648_v0  ;;  %v10658_v35 = vld [vmem:[#allocation8 + $0xf0] sm:$0xff]  }
0x1918   : > { %9340 = vmatprep.subr.bf16.mxu0 %v10649_v57  ;;  %9362 = vmatprep.subr.bf16.mxu1 %v10650_v13  ;;  %v10659_v0 = vld [vmem:[#allocation8 + $0x30] sm:$0xff]   ;;  %v10661_v13 = vld [vmem:[#allocation8 + $0x78] sm:$0xff]  }
0x1919   : > { %v10660_v57 = vld [vmem:[#allocation8 + $0xb0] sm:$0xff]  }
0x191b   : > { %9341 = vmatpush3.bf16.msra.mxu0 %v10651_v60  ;;  %9363 = vmatpush3.bf16.msra.mxu1 %v10652_v23  ;;  %v10662_v60 = vld [vmem:[#allocation8 + $0xf8] sm:$0xff]  }
0x191c   : > { %9342 = vmatprep.subr.bf16.mxu0 %v10653_v11  ;;  %9364 = vmatprep.subr.bf16.mxu1 %v10654_v52  ;;  %v10663_v23 = vld [vmem:[#allocation8 + $0x38] sm:$0xff]   ;;  %v10665_v52 = vld [vmem:[#allocation8 + $0x140] sm:$0xff]  }
0x191d   : > { %v10664_v11 = vld [vmem:[#allocation8 + $0xb8] sm:$0xff]  }
0x191f   : > { %9343 = vmatpush3.bf16.msra.mxu0 %v10655_v3  ;;  %9365 = vmatpush3.bf16.msra.mxu1 %v10656_v6  ;;  %v10666_v3 = vld [vmem:[#allocation8 + $0x1c0] sm:$0xff]  }
0x1920   : > { %9344 = vmatprep.subr.bf16.mxu0 %v10657_v19  ;;  %9366 = vmatprep.subr.bf16.mxu1 %v10658_v35 }
0x1923   : > { %9345 = vmatpush3.bf16.msra.mxu0 %v10659_v0  ;;  %9367 = vmatpush3.bf16.msra.mxu1 %v10660_v57 }
0x1924   : > { %9346 = vmatprep.subr.bf16.mxu0 %v10661_v13  ;;  %9368 = vmatprep.subr.bf16.mxu1 %v10662_v60 }
0x1927   : > { %9347 = vmatpush3.bf16.msra.mxu0 %v10663_v23  ;;  %9369 = vmatpush3.bf16.msra.mxu1 %v10664_v11 }
0x1928   : > { %9376 = vmatprep.subr.bf16.mxu0 %v10665_v52  ;;  %9398 = vmatprep.subr.bf16.mxu1 %v10666_v3 }
0x197d   : > { %v5808_v6 = vpop.f32.mrb[92].mxu0  ;;  %v5849_v19 = vpop.f32.mrb[120].mxu1 }
0x197e   : > { %v5809_v35 = vadd.f32 %v5808_v6, %v14060_v48  ;;  %v5850_v0 = vadd.f32 %v5849_v19, %v14061_v10  ;;  %v5810_v15 = vpop.f32.mrb[93].mxu0  ;;  %v5851_v57 = vpop.f32.mrb[121].mxu1 }
0x197f   : > { %v5811_v13 = vadd.f32 %v5810_v15, %v14062_v56  ;;  %v5852_v60 = vadd.f32 %v5851_v57, %v14063_v20  ;;  %v5812_v62 = vpop.f32.mrb[94].mxu0  ;;  %v5853_v23 = vpop.f32.mrb[122].mxu1 }
0x1980   : > { %v6118_v33 = vmul.f32 0.044715, %v5809_v35  ;;  %v6120_v11 = vmul.f32 0.044715, %v5850_v0  ;;  %v5813_v17 = vpop.f32.mrb[95].mxu0  ;;  %v5854_v52 = vpop.f32.mrb[123].mxu1 }
0x1981   : > { %v6119_v34 = vmul.f32 0.044715, %v5811_v13  ;;  %v6121_v3 = vmul.f32 0.044715, %v5852_v60 }
0x1982   : > { %v6134_v43 = vmul.f32 %v6118_v33, %v5809_v35  ;;  %v6136_v5 = vmul.f32 %v6120_v11, %v5850_v0 }
0x1983   : > { %v6135_v4 = vmul.f32 %v6119_v34, %v5811_v13  ;;  %v6137_v6 = vmul.f32 %v6121_v3, %v5852_v60  ;;  %v6102_v34 = vmul.f32 0.5, %v5809_v35 }
0x1984   : > { %v6150_v48 = vmul.f32 %v6134_v43, %v5809_v35  ;;  %v6152_v19 = vmul.f32 %v6136_v5, %v5850_v0  ;;  %v6103_v5 = vmul.f32 0.5, %v5811_v13 }
0x1985   : > { %v6151_v10 = vmul.f32 %v6135_v4, %v5811_v13  ;;  %v6153_v28 = vmul.f32 %v6137_v6, %v5852_v60 }
0x1986   : > { %v6166_v1 = vadd.f32 %v6150_v48, %v5809_v35  ;;  %v6168_v15 = vadd.f32 %v6152_v19, %v5850_v0  ;;  %v6105_v48 = vmul.f32 0.5, %v5852_v60 }
0x1987   : > { %v6167_v56 = vadd.f32 %v6151_v10, %v5811_v13  ;;  %v6169_v57 = vadd.f32 %v6153_v28, %v5852_v60 }
0x1988   : > { %v6182_v62 = vmul.f32 0.7978846, %v6166_v1  ;;  %v6184_v39 = vmul.f32 0.7978846, %v6168_v15  ;;  %v6104_v1 = vmul.f32 0.5, %v5850_v0 }
0x1989   : > { %v6183_v23 = vmul.f32 0.7978846, %v6167_v56  ;;  %v6185_v20 = vmul.f32 0.7978846, %v6169_v57 }
0x198a   : > { %10505 = vtanh.f32 %v6182_v62 }
0x198b   : > { %10507 = vtanh.f32 %v6183_v23 }
0x198c   : > { %10509 = vtanh.f32 %v6185_v20 }
0x198d   : > { %10511 = vtanh.f32 %v6184_v39 }
0x1994   : > { %v10506_v17 = vpop.eup %10505 }
0x1995   : > { %v10508_v33 = vpop.eup %10507  ;;  %v6214_v11 = vadd.f32 1.0, %v10506_v17  ;;  %v10667_v17 = vld [vmem:[#allocation8 + $0x100] sm:$0xff]  }
0x1996   : > { %v10510_v43 = vpop.eup %10509  ;;  %v6215_v4 = vadd.f32 1.0, %v10508_v33 }
0x1997   : > { %v10512_v52 = vpop.eup %10511  ;;  %v6217_v3 = vadd.f32 1.0, %v10510_v43  ;;  %v6230_v10 = vmul.f32 %v6214_v11, %v6102_v34  ;;  %v14064_v34 = vld [vmem:[#allocation135_spill] sm:$0xff] }
0x1998   : > { %v6231_v28 = vmul.f32 %v6215_v4, %v6103_v5  ;;  %v6216_v56 = vadd.f32 1.0, %v10512_v52  ;;  %v10668_v43 = vld [vmem:[#allocation8 + $0x180] sm:$0xff]   ;;  %v10669_v52 = vld [vmem:[#allocation8 + $0x148] sm:$0xff]  }
0x1999   : > { %v6233_v6 = vmul.f32 %v6217_v3, %v6105_v48  ;;  %v6246_v20 = vpack.c.bf16 %v6230_v10, %v6230_v10 }
0x199a   : > { %v6247_v19 = vpack.c.bf16 %v6231_v28, %v6231_v28  ;;  %v6232_v15 = vmul.f32 %v6216_v56, %v6104_v1  ;;  %v10670_v1 = vld [vmem:[#allocation8 + $0x1c8] sm:$0xff]  }
0x199b   : > { %v6249_v57 = vpack.c.bf16 %v6233_v6, %v6233_v6 }
0x199c   : > { %6294 = vmatprep.mubr.bf16.mxu0 %v6247_v19  ;;  %v6248_v39 = vpack.c.bf16 %v6232_v15, %v6232_v15 }
0x199d   : > { %v5890_v62 = vpop.f32.mrb[96].mxu0  ;;  %v5931_v35 = vpop.f32.mrb[124].mxu1  ;;  %6334 = vmatprep.mubr.bf16.mxu1 %v6249_v57  ;;  %6295 = vmatmul.mubr.bf16.vlgmr.msra.gmra.mrb[108].mxu0 %v6246_v20  ;;  %v10671_v57 = vld [vmem:[#allocation8 + $0x108] sm:$0xff]  }
0x199e   : > { %v12855_v13 = vadd.f32 %v5890_v62, %v12267_v63  ;;  %v12858_v60 = vadd.f32 %v5931_v35, %v12272_v51  ;;  %v5892_v23 = vpop.f32.mrb[97].mxu0  ;;  %v5933_v0 = vpop.f32.mrb[125].mxu1  ;;  %6335 = vmatmul.mubr.bf16.vlgmr.msra.gmra.mrb[136].mxu1 %v6248_v39  ;;  %9377 = vmatpush3.bf16.msra.mxu0 %v10667_v17  ;;  %v10672_v62 = vld [vmem:[#allocation8 + $0x188] sm:$0xff]   ;;  %v10673_v35 = vld [vmem:[#allocation8 + $0x150] sm:$0xff]  }
0x199f   : > { %v12861_v33 = vadd.f32 %v5892_v23, %v12277_v8  ;;  %v12864_v11 = vadd.f32 %v5933_v0, %v14064_v34  ;;  %9399 = vmatpush3.bf16.msra.mxu1 %v10668_v43  ;;  %v5894_v5 = vpop.f32.mrb[98].mxu0  ;;  %v5935_v4 = vpop.f32.mrb[126].mxu1  ;;  %9378 = vmatprep.subr.bf16.mxu0 %v10669_v52  ;;  %v10674_v17 = vld [vmem:[#allocation8 + $0x1d0] sm:$0xff]  }
0x19a0   : > { %v6122_v48 = vmul.f32 0.044715, %v12855_v13  ;;  %v6124_v3 = vmul.f32 0.044715, %v12858_v60  ;;  %v5895_v10 = vpop.f32.mrb[99].mxu0  ;;  %v5936_v28 = vpop.f32.mrb[127].mxu1  ;;  %9400 = vmatprep.subr.bf16.mxu1 %v10670_v1 }
0x19a1   : > { %v6123_v56 = vmul.f32 0.044715, %v12861_v33  ;;  %v6125_v6 = vmul.f32 0.044715, %v12864_v11  ;;  %v10677_v10 = vld [vmem:[#allocation8 + $0x158] sm:$0xff]  }
0x19a2   : > { %v6138_v19 = vmul.f32 %v6122_v48, %v12855_v13  ;;  %v6140_v15 = vmul.f32 %v6124_v3, %v12858_v60  ;;  %9379 = vmatpush3.bf16.msra.mxu0 %v10671_v57  ;;  %v10675_v48 = vld [vmem:[#allocation8 + $0x110] sm:$0xff]  }
0x19a3   : > { %v6139_v20 = vmul.f32 %v6123_v56, %v12861_v33  ;;  %v6141_v39 = vmul.f32 %v6125_v6, %v12864_v11  ;;  %9401 = vmatpush3.bf16.msra.mxu1 %v10672_v62  ;;  %9380 = vmatprep.subr.bf16.mxu0 %v10673_v35  ;;  %v10676_v3 = vld [vmem:[#allocation8 + $0x190] sm:$0xff]   ;;  %v10678_v56 = vld [vmem:[#allocation8 + $0x1d8] sm:$0xff]   ;;  %v10681_v62 = vld [vmem:[#allocation8 + $0x160] sm:$0xff]  }
0x19a4   : > { %v6154_v23 = vmul.f32 %v6138_v19, %v12855_v13  ;;  %v6156_v0 = vmul.f32 %v6140_v15, %v12858_v60  ;;  %9402 = vmatprep.subr.bf16.mxu1 %v10674_v17  ;;  %v10682_v35 = vld [vmem:[#allocation8 + $0x1e0] sm:$0xff]   ;;  %v10685_v17 = vld [vmem:[#allocation8 + $0x168] sm:$0xff]  }
0x19a5   : > { %v6155_v43 = vmul.f32 %v6139_v20, %v12861_v33  ;;  %v6157_v5 = vmul.f32 %v6141_v39, %v12864_v11  ;;  %v10679_v20 = vld [vmem:[#allocation8 + $0x118] sm:$0xff]  }
0x19a6   : > { %v6170_v4 = vadd.f32 %v6154_v23, %v12855_v13  ;;  %v6172_v52 = vadd.f32 %v6156_v0, %v12858_v60  ;;  %9381 = vmatpush3.bf16.msra.mxu0 %v10675_v48  ;;  %v10680_v39 = vld [vmem:[#allocation8 + $0x198] sm:$0xff]   ;;  %v10683_v23 = vld [vmem:[#allocation8 + $0x120] sm:$0xff]  }
0x19a7   : > { %9403 = vmatpush3.bf16.msra.mxu1 %v10676_v3  ;;  %9382 = vmatprep.subr.bf16.mxu0 %v10677_v10  ;;  %v6171_v28 = vadd.f32 %v6155_v43, %v12861_v33  ;;  %v6173_v1 = vadd.f32 %v6157_v5, %v12864_v11  ;;  %v10684_v0 = vld [vmem:[#allocation8 + $0x1a0] sm:$0xff]   ;;  %v10686_v43 = vld [vmem:[#allocation8 + $0x1e8] sm:$0xff]   ;;  %v10690_v3 = vld [vmem:[#allocation8 + $0x1f0] sm:$0xff]  }
0x19a8   : > { %9404 = vmatprep.subr.bf16.mxu1 %v10678_v56  ;;  %v6186_v6 = vmul.f32 0.7978846, %v6170_v4  ;;  %v6188_v57 = vmul.f32 0.7978846, %v6172_v52  ;;  %v10687_v5 = vld [vmem:[#allocation8 + $0x128] sm:$0xff]   ;;  %v10689_v52 = vld [vmem:[#allocation8 + $0x170] sm:$0xff]  }
0x19a9   : > { %v6187_v19 = vmul.f32 0.7978846, %v6171_v28  ;;  %v6189_v15 = vmul.f32 0.7978846, %v6173_v1  ;;  %v10688_v4 = vld [vmem:[#allocation8 + $0x1a8] sm:$0xff]   ;;  %v6106_v28 = vmul.f32 0.5, %v12855_v13 }
0x19aa   : > { %9383 = vmatpush3.bf16.msra.mxu0 %v10679_v20  ;;  %10513 = vtanh.f32 %v6186_v6  ;;  %v10691_v6 = vld [vmem:[#allocation8 + $0x130] sm:$0xff]   ;;  %v6108_v13 = vmul.f32 0.5, %v12858_v60 }
0x19ab   : > { %9405 = vmatpush3.bf16.msra.mxu1 %v10680_v39  ;;  %9384 = vmatprep.subr.bf16.mxu0 %v10681_v62  ;;  %10515 = vtanh.f32 %v6187_v19  ;;  %v6107_v19 = vmul.f32 0.5, %v12861_v33  ;;  %v10692_v20 = vld [vmem:[#allocation8 + $0x1b0] sm:$0xff]   ;;  %v10693_v39 = vld [vmem:[#allocation8 + $0x178] sm:$0xff]   ;;  %v6109_v62 = vmul.f32 0.5, %v12864_v11 }
0x19ac   : > { %9406 = vmatprep.subr.bf16.mxu1 %v10682_v35  ;;  %10517 = vtanh.f32 %v6189_v15 }
0x19ad   : > { %10519 = vtanh.f32 %v6188_v57 }
0x19ae   : > { %9385 = vmatpush3.bf16.msra.mxu0 %v10683_v23 }
0x19af   : > { %9407 = vmatpush3.bf16.msra.mxu1 %v10684_v0  ;;  %9386 = vmatprep.subr.bf16.mxu0 %v10685_v17  ;;  %v10694_v0 = vld [vmem:[#allocation8 + $0x1f8] sm:$0xff]  }
0x19b0   : > { %9408 = vmatprep.subr.bf16.mxu1 %v10686_v43 }
0x19b2   : > { %9387 = vmatpush3.bf16.msra.mxu0 %v10687_v5 }
0x19b3   : > { %9409 = vmatpush3.bf16.msra.mxu1 %v10688_v4  ;;  %9388 = vmatprep.subr.bf16.mxu0 %v10689_v52  ;;  %v10695_v4 = vld [vmem:[#allocation8 + $0x138] sm:$0xff]  }
0x19b4   : > { %v10514_v48 = vpop.eup %10513  ;;  %9410 = vmatprep.subr.bf16.mxu1 %v10690_v3 }
0x19b5   : > { %v10516_v10 = vpop.eup %10515  ;;  %v6218_v1 = vadd.f32 1.0, %v10514_v48  ;;  %v10696_v48 = vld [vmem:[#allocation8 + $0x1b8] sm:$0xff]  }
0x19b6   : > { %v10518_v56 = vpop.eup %10517  ;;  %9389 = vmatpush3.bf16.msra.mxu0 %v10691_v6  ;;  %v6219_v15 = vadd.f32 1.0, %v10516_v10  ;;  %v10697_v6 = vld [vmem:[#allocation8 + $0x240] sm:$0xff]  }
0x19b7   : > { %v10520_v57 = vpop.eup %10519  ;;  %9411 = vmatpush3.bf16.msra.mxu1 %v10692_v20  ;;  %9390 = vmatprep.subr.bf16.mxu0 %v10693_v39  ;;  %v6221_v35 = vadd.f32 1.0, %v10518_v56  ;;  %v6234_v23 = vmul.f32 %v6218_v1, %v6106_v28  ;;  %v10698_v28 = vld [vmem:[#allocation8 + $0x2c0] sm:$0xff]  }
0x19b8   : > { %9412 = vmatprep.subr.bf16.mxu1 %v10694_v0  ;;  %v6235_v17 = vmul.f32 %v6219_v15, %v6107_v19  ;;  %v6220_v43 = vadd.f32 1.0, %v10520_v57  ;;  %v14065_v19 = vld [vmem:[#allocation136_spill] sm:$0xff] }
0x19b9   : > { %v6237_v5 = vmul.f32 %v6221_v35, %v6109_v62  ;;  %v6250_v10 = vpack.c.bf16 %v6234_v23, %v6234_v23  ;;  %v10699_v39 = vld [vmem:[#allocation8 + $0x200] sm:$0xff]   ;;  %v14066_v62 = vld [vmem:[#allocation137_spill] sm:$0xff]  ;;  %v14067_v23 = vld [vmem:[#allocation138_spill] sm:$0xff] }
0x19ba   : > { %9391 = vmatpush3.bf16.msra.mxu0 %v10695_v4  ;;  %v6251_v33 = vpack.c.bf16 %v6235_v17, %v6235_v17  ;;  %v6236_v52 = vmul.f32 %v6220_v43, %v6108_v13  ;;  %v10700_v17 = vld [vmem:[#allocation8 + $0x280] sm:$0xff]  }
0x19bb   : > { %9413 = vmatpush3.bf16.msra.mxu1 %v10696_v48  ;;  %v6253_v3 = vpack.c.bf16 %v6237_v5, %v6237_v5  ;;  %9420 = vmatprep.subr.bf16.mxu0 %v10697_v6  ;;  %v10701_v5 = vld [vmem:[#allocation8 + $0x248] sm:$0xff]  }
0x19bc   : > { %6374 = vmatprep.mubr.bf16.mxu0 %v6251_v33  ;;  %v6252_v11 = vpack.c.bf16 %v6236_v52, %v6236_v52  ;;  %9442 = vmatprep.subr.bf16.mxu1 %v10698_v28 }
0x19bd   : > { %6414 = vmatprep.mubr.bf16.mxu1 %v6253_v3  ;;  %v5972_v1 = vpop.f32.mrb[100].mxu0  ;;  %v6013_v56 = vpop.f32.mrb[128].mxu1  ;;  %6375 = vmatmul.mubr.bf16.vlgmr.msra.gmra.mrb[112].mxu0 %v6250_v10  ;;  %v10702_v3 = vld [vmem:[#allocation8 + $0x2c8] sm:$0xff]  }
0x19be   : > { %v12887_v60 = vadd.f32 %v5972_v1, %v12323_v42  ;;  %v12890_v15 = vadd.f32 %v6013_v56, %v14065_v19  ;;  %6415 = vmatmul.mubr.bf16.vlgmr.msra.gmra.mrb[140].mxu1 %v6252_v11  ;;  %v5974_v57 = vpop.f32.mrb[101].mxu0  ;;  %v6015_v20 = vpop.f32.mrb[129].mxu1  ;;  %9421 = vmatpush3.bf16.msra.mxu0 %v10699_v39  ;;  %v10703_v1 = vld [vmem:[#allocation8 + $0x208] sm:$0xff]   ;;  %v10705_v39 = vld [vmem:[#allocation8 + $0x250] sm:$0xff]  }
0x19bf   : > { %v12893_v35 = vadd.f32 %v5974_v57, %v14066_v62  ;;  %v12896_v0 = vadd.f32 %v6015_v20, %v14067_v23  ;;  %9443 = vmatpush3.bf16.msra.mxu1 %v10700_v17  ;;  %v5976_v13 = vpop.f32.mrb[102].mxu0  ;;  %v6017_v43 = vpop.f32.mrb[130].mxu1  ;;  %9422 = vmatprep.subr.bf16.mxu0 %v10701_v5  ;;  %v10704_v20 = vld [vmem:[#allocation8 + $0x288] sm:$0xff]  }
0x19c0   : > { %v6126_v4 = vmul.f32 0.044715, %v12887_v60  ;;  %v6128_v33 = vmul.f32 0.044715, %v12890_v15  ;;  %v5977_v52 = vpop.f32.mrb[103].mxu0  ;;  %v6018_v48 = vpop.f32.mrb[131].mxu1  ;;  %9444 = vmatprep.subr.bf16.mxu1 %v10702_v3 }
0x19c1   : > { %v6127_v10 = vmul.f32 0.044715, %v12893_v35  ;;  %v6129_v6 = vmul.f32 0.044715, %v12896_v0  ;;  %v10706_v43 = vld [vmem:[#allocation8 + $0x2d0] sm:$0xff]  }
0x19c2   : > { %v6142_v11 = vmul.f32 %v6126_v4, %v12887_v60  ;;  %v6144_v28 = vmul.f32 %v6128_v33, %v12890_v15  ;;  %9423 = vmatpush3.bf16.msra.mxu0 %v10703_v1  ;;  %v10707_v48 = vld [vmem:[#allocation8 + $0x210] sm:$0xff]  }
0x19c3   : > { %v6143_v56 = vmul.f32 %v6127_v10, %v12893_v35  ;;  %v6145_v57 = vmul.f32 %v6129_v6, %v12896_v0  ;;  %9445 = vmatpush3.bf16.msra.mxu1 %v10704_v20  ;;  %9424 = vmatprep.subr.bf16.mxu0 %v10705_v39  ;;  %v10708_v3 = vld [vmem:[#allocation8 + $0x290] sm:$0xff]   ;;  %v10709_v10 = vld [vmem:[#allocation8 + $0x258] sm:$0xff]  }
0x19c4   : > { %v6158_v17 = vmul.f32 %v6142_v11, %v12887_v60  ;;  %v6160_v13 = vmul.f32 %v6144_v28, %v12890_v15  ;;  %9446 = vmatprep.subr.bf16.mxu1 %v10706_v43  ;;  %v10710_v28 = vld [vmem:[#allocation8 + $0x2d8] sm:$0xff]   ;;  %v10714_v43 = vld [vmem:[#allocation8 + $0x2e0] sm:$0xff]  }
0x19c5   : > { %v6159_v5 = vmul.f32 %v6143_v56, %v12893_v35  ;;  %v6161_v4 = vmul.f32 %v6145_v57, %v12896_v0  ;;  %v10711_v39 = vld [vmem:[#allocation8 + $0x218] sm:$0xff]  }
0x19c6   : > { %v6174_v33 = vadd.f32 %v6158_v17, %v12887_v60  ;;  %v6176_v52 = vadd.f32 %v6160_v13, %v12890_v15  ;;  %9425 = vmatpush3.bf16.msra.mxu0 %v10707_v48  ;;  %v10712_v17 = vld [vmem:[#allocation8 + $0x298] sm:$0xff]   ;;  %v10713_v13 = vld [vmem:[#allocation8 + $0x260] sm:$0xff]   ;;  %v10718_v48 = vld [vmem:[#allocation8 + $0x2e8] sm:$0xff]  }
0x19c7   : > { %9447 = vmatpush3.bf16.msra.mxu1 %v10708_v3  ;;  %9426 = vmatprep.subr.bf16.mxu0 %v10709_v10  ;;  %v6175_v6 = vadd.f32 %v6159_v5, %v12893_v35  ;;  %v6177_v11 = vadd.f32 %v6161_v4, %v12896_v0  ;;  %v10715_v5 = vld [vmem:[#allocation8 + $0x220] sm:$0xff]   ;;  %v10720_v3 = vld [vmem:[#allocation8 + $0x2a8] sm:$0xff]   ;;  %v10721_v10 = vld [vmem:[#allocation8 + $0x270] sm:$0xff]  }
0x19c8   : > { %9448 = vmatprep.subr.bf16.mxu1 %v10710_v28  ;;  %v6190_v1 = vmul.f32 0.7978846, %v6174_v33  ;;  %v6192_v57 = vmul.f32 0.7978846, %v6176_v52  ;;  %v10716_v4 = vld [vmem:[#allocation8 + $0x2a0] sm:$0xff]   ;;  %v10717_v33 = vld [vmem:[#allocation8 + $0x268] sm:$0xff]  }
0x19c9   : > { %v6191_v56 = vmul.f32 0.7978846, %v6175_v6  ;;  %v6193_v20 = vmul.f32 0.7978846, %v6177_v11  ;;  %v10719_v52 = vld [vmem:[#allocation8 + $0x228] sm:$0xff]   ;;  %v10722_v11 = vld [vmem:[#allocation8 + $0x2f0] sm:$0xff]  }
0x19ca   : > { %9427 = vmatpush3.bf16.msra.mxu0 %v10711_v39  ;;  %10521 = vtanh.f32 %v6190_v1  ;;  %v6110_v1 = vmul.f32 0.5, %v12887_v60  ;;  %v6111_v39 = vmul.f32 0.5, %v12893_v35  ;;  %v6112_v60 = vmul.f32 0.5, %v12890_v15 }
0x19cb   : > { %9449 = vmatpush3.bf16.msra.mxu1 %v10712_v17  ;;  %9428 = vmatprep.subr.bf16.mxu0 %v10713_v13  ;;  %10523 = vtanh.f32 %v6191_v56 }
0x19cc   : > { %9450 = vmatprep.subr.bf16.mxu1 %v10714_v43  ;;  %10525 = vtanh.f32 %v6193_v20  ;;  %v10724_v43 = vld [vmem:[#allocation8 + $0x2b0] sm:$0xff]  }
0x19cd   : > { %10527 = vtanh.f32 %v6192_v57  ;;  %v10723_v57 = vld [vmem:[#allocation8 + $0x230] sm:$0xff]  }
0x19ce   : > { %9429 = vmatpush3.bf16.msra.mxu0 %v10715_v5  ;;  %v10725_v5 = vld [vmem:[#allocation8 + $0x278] sm:$0xff]  }
0x19cf   : > { %9451 = vmatpush3.bf16.msra.mxu1 %v10716_v4  ;;  %9430 = vmatprep.subr.bf16.mxu0 %v10717_v33  ;;  %v6113_v4 = vmul.f32 0.5, %v12896_v0 }
0x19d0   : > { %9452 = vmatprep.subr.bf16.mxu1 %v10718_v48 }
0x19d2   : > { %9431 = vmatpush3.bf16.msra.mxu0 %v10719_v52  ;;  %v10726_v52 = vld [vmem:[#allocation8 + $0x2f8] sm:$0xff]  }
0x19d3   : > { %9453 = vmatpush3.bf16.msra.mxu1 %v10720_v3  ;;  %9432 = vmatprep.subr.bf16.mxu0 %v10721_v10 }
0x19d4   : > { %v10522_v6 = vpop.eup %10521  ;;  %9454 = vmatprep.subr.bf16.mxu1 %v10722_v11  ;;  %v10727_v11 = vld [vmem:[#allocation8 + $0x238] sm:$0xff]  }
0x19d5   : > { %v10524_v28 = vpop.eup %10523  ;;  %v6222_v56 = vadd.f32 1.0, %v10522_v6 }
0x19d6   : > { %v10526_v20 = vpop.eup %10525  ;;  %9433 = vmatpush3.bf16.msra.mxu0 %v10723_v57  ;;  %v6223_v17 = vadd.f32 1.0, %v10524_v28  ;;  %v10728_v57 = vld [vmem:[#allocation8 + $0x2b8] sm:$0xff]  }
0x19d7   : > { %v10528_v13 = vpop.eup %10527  ;;  %9455 = vmatpush3.bf16.msra.mxu1 %v10724_v43  ;;  %9434 = vmatprep.subr.bf16.mxu0 %v10725_v5  ;;  %v6225_v33 = vadd.f32 1.0, %v10526_v20  ;;  %v6238_v48 = vmul.f32 %v6222_v56, %v6110_v1  ;;  %v10729_v5 = vld [vmem:[#allocation8 + $0x340] sm:$0xff]  }
0x19d8   : > { %9456 = vmatprep.subr.bf16.mxu1 %v10726_v52  ;;  %v6239_v3 = vmul.f32 %v6223_v17, %v6111_v39  ;;  %v6224_v10 = vadd.f32 1.0, %v10528_v13  ;;  %v10730_v1 = vld [vmem:[#allocation8 + $0x3c0] sm:$0xff]   ;;  %v14069_v52 = vld [vmem:[#allocation141_spill] sm:$0xff] }
0x19d9   : > { %v6241_v6 = vmul.f32 %v6225_v33, %v6113_v4  ;;  %v6254_v23 = vpack.c.bf16 %v6238_v48, %v6238_v48  ;;  %v10731_v4 = vld [vmem:[#allocation8 + $0x300] sm:$0xff]  }
0x19da   : > { %9435 = vmatpush3.bf16.msra.mxu0 %v10727_v11  ;;  %v6255_v35 = vpack.c.bf16 %v6239_v3, %v6239_v3  ;;  %v6240_v28 = vmul.f32 %v6224_v10, %v6112_v60  ;;  %v14068_v33 = vld [vmem:[#allocation140_spill] sm:$0xff] }
0x19db   : > { %9457 = vmatpush3.bf16.msra.mxu1 %v10728_v57  ;;  %v6257_v43 = vpack.c.bf16 %v6241_v6, %v6241_v6  ;;  %9464 = vmatprep.subr.bf16.mxu0 %v10729_v5  ;;  %v10732_v60 = vld [vmem:[#allocation8 + $0x380] sm:$0xff]   ;;  %v10733_v6 = vld [vmem:[#allocation8 + $0x348] sm:$0xff]  }
0x19dc   : > { %6454 = vmatprep.mubr.bf16.mxu0 %v6255_v35  ;;  %v6256_v0 = vpack.c.bf16 %v6240_v28, %v6240_v28  ;;  %9486 = vmatprep.subr.bf16.mxu1 %v10730_v1 }
0x19dd   : > { %6494 = vmatprep.mubr.bf16.mxu1 %v6257_v43  ;;  %v6054_v56 = vpop.f32.mrb[104].mxu0  ;;  %v6095_v20 = vpop.f32.mrb[132].mxu1  ;;  %6455 = vmatmul.mubr.bf16.vlgmr.msra.gmra.mrb[116].mxu0 %v6254_v23  ;;  %v10734_v43 = vld [vmem:[#allocation8 + $0x3c8] sm:$0xff]  }
0x19de   : > { %v12919_v15 = vadd.f32 %v6054_v56, %v12373_v46  ;;  %v12922_v39 = vadd.f32 %v6095_v20, %v12378_v50  ;;  %6495 = vmatmul.mubr.bf16.vlgmr.msra.gmra.mrb[144].mxu1 %v6256_v0  ;;  %v6056_v17 = vpop.f32.mrb[105].mxu0  ;;  %v6097_v13 = vpop.f32.mrb[133].mxu1  ;;  %9465 = vmatpush3.bf16.msra.mxu0 %v10731_v4  ;;  %v10735_v20 = vld [vmem:[#allocation8 + $0x308] sm:$0xff]  }
0x19df   : > { %v12925_v48 = vadd.f32 %v6056_v17, %v14068_v33  ;;  %v12928_v3 = vadd.f32 %v6097_v13, %v14069_v52  ;;  %9487 = vmatpush3.bf16.msra.mxu1 %v10732_v60  ;;  %v6058_v23 = vpop.f32.mrb[106].mxu0  ;;  %v6099_v10 = vpop.f32.mrb[134].mxu1  ;;  %9466 = vmatprep.subr.bf16.mxu0 %v10733_v6  ;;  %v10736_v4 = vld [vmem:[#allocation8 + $0x388] sm:$0xff]   ;;  %v10737_v60 = vld [vmem:[#allocation8 + $0x350] sm:$0xff]   ;;  %v10760_v52 = vld [vmem:[#allocation8 + $0x3b8] sm:$0xff]  }
0x19e0   : > { %v6130_v11 = vmul.f32 0.044715, %v12919_v15  ;;  %v6132_v35 = vmul.f32 0.044715, %v12922_v39  ;;  %v6059_v28 = vpop.f32.mrb[107].mxu0  ;;  %v6100_v57 = vpop.f32.mrb[135].mxu1  ;;  %9488 = vmatprep.subr.bf16.mxu1 %v10734_v43 }
0x19e1   : > { %v6131_v5 = vmul.f32 0.044715, %v12925_v48  ;;  %v6133_v0 = vmul.f32 0.044715, %v12928_v3  ;;  %v10738_v6 = vld [vmem:[#allocation8 + $0x3d0] sm:$0xff]  }
0x19e2   : > { %v6146_v1 = vmul.f32 %v6130_v11, %v12919_v15  ;;  %v6148_v56 = vmul.f32 %v6132_v35, %v12922_v39  ;;  %9467 = vmatpush3.bf16.msra.mxu0 %v10735_v20  ;;  %v10739_v43 = vld [vmem:[#allocation8 + $0x310] sm:$0xff]   ;;  %v10742_v20 = vld [vmem:[#allocation8 + $0x3d8] sm:$0xff]  }
0x19e3   : > { %v6147_v17 = vmul.f32 %v6131_v5, %v12925_v48  ;;  %v6149_v13 = vmul.f32 %v6133_v0, %v12928_v3  ;;  %9489 = vmatpush3.bf16.msra.mxu1 %v10736_v4  ;;  %9468 = vmatprep.subr.bf16.mxu0 %v10737_v60  ;;  %v10740_v5 = vld [vmem:[#allocation8 + $0x390] sm:$0xff]   ;;  %v10741_v0 = vld [vmem:[#allocation8 + $0x358] sm:$0xff]  }
0x19e4   : > { %v6162_v23 = vmul.f32 %v6146_v1, %v12919_v15  ;;  %v6164_v10 = vmul.f32 %v6148_v56, %v12922_v39  ;;  %9490 = vmatprep.subr.bf16.mxu1 %v10738_v6  ;;  %v10743_v6 = vld [vmem:[#allocation8 + $0x318] sm:$0xff]  }
0x19e5   : > { %v6163_v11 = vmul.f32 %v6147_v17, %v12925_v48  ;;  %v6165_v35 = vmul.f32 %v6149_v13, %v12928_v3 }
0x19e6   : > { %v6178_v28 = vadd.f32 %v6162_v23, %v12919_v15  ;;  %v6180_v57 = vadd.f32 %v6164_v10, %v12922_v39  ;;  %9469 = vmatpush3.bf16.msra.mxu0 %v10739_v43  ;;  %v10744_v23 = vld [vmem:[#allocation8 + $0x398] sm:$0xff]   ;;  %v10745_v10 = vld [vmem:[#allocation8 + $0x360] sm:$0xff]  }
0x19e7   : > { %9491 = vmatpush3.bf16.msra.mxu1 %v10740_v5  ;;  %9470 = vmatprep.subr.bf16.mxu0 %v10741_v0  ;;  %v6179_v1 = vadd.f32 %v6163_v11, %v12925_v48  ;;  %v6181_v56 = vadd.f32 %v6165_v35, %v12928_v3  ;;  %v10746_v43 = vld [vmem:[#allocation8 + $0x3e0] sm:$0xff]   ;;  %v10750_v5 = vld [vmem:[#allocation8 + $0x3e8] sm:$0xff]  }
0x19e8   : > { %9492 = vmatprep.subr.bf16.mxu1 %v10742_v20  ;;  %v6194_v4 = vmul.f32 0.7978846, %v6178_v28  ;;  %v6196_v13 = vmul.f32 0.7978846, %v6180_v57  ;;  %v10747_v11 = vld [vmem:[#allocation8 + $0x320] sm:$0xff]   ;;  %v10749_v28 = vld [vmem:[#allocation8 + $0x368] sm:$0xff]  }
0x19e9   : > { %v6195_v17 = vmul.f32 0.7978846, %v6179_v1  ;;  %v6197_v60 = vmul.f32 0.7978846, %v6181_v56  ;;  %v10748_v35 = vld [vmem:[#allocation8 + $0x3a0] sm:$0xff]   ;;  %v10751_v57 = vld [vmem:[#allocation8 + $0x328] sm:$0xff]  }
0x19ea   : > { %9471 = vmatpush3.bf16.msra.mxu0 %v10743_v6  ;;  %10529 = vtanh.f32 %v6194_v4  ;;  %v10752_v0 = vld [vmem:[#allocation8 + $0x3a8] sm:$0xff]   ;;  %v10753_v1 = vld [vmem:[#allocation8 + $0x370] sm:$0xff]  }
0x19eb   : > { %9493 = vmatpush3.bf16.msra.mxu1 %v10744_v23  ;;  %9472 = vmatprep.subr.bf16.mxu0 %v10745_v10  ;;  %10531 = vtanh.f32 %v6195_v17  ;;  %v10754_v20 = vld [vmem:[#allocation8 + $0x3f0] sm:$0xff]   ;;  %v6114_v17 = vmul.f32 0.5, %v12919_v15  ;;  %v6115_v23 = vmul.f32 0.5, %v12925_v48  ;;  %v6116_v15 = vmul.f32 0.5, %v12922_v39  ;;  %v10762_v39 = vld [vmem:[%s13547_s5] ss:$12 sps:$4 sm:$0xff]  }
0x19ec   : > { %9494 = vmatprep.subr.bf16.mxu1 %v10746_v43  ;;  %10533 = vtanh.f32 %v6197_v60  ;;  %v10755_v6 = vld [vmem:[#allocation8 + $0x330] sm:$0xff]  }
0x19ed   : > { %10535 = vtanh.f32 %v6196_v13 }
0x19ee   : > { %9473 = vmatpush3.bf16.msra.mxu0 %v10747_v11  ;;  %v10756_v11 = vld [vmem:[#allocation8 + $0x3b0] sm:$0xff]  }
0x19ef   : > { %9495 = vmatpush3.bf16.msra.mxu1 %v10748_v35  ;;  %9474 = vmatprep.subr.bf16.mxu0 %v10749_v28  ;;  %v10757_v35 = vld [vmem:[#allocation8 + $0x378] sm:$0xff]   ;;  %v6117_v28 = vmul.f32 0.5, %v12928_v3 }
0x19f0   : > { %9496 = vmatprep.subr.bf16.mxu1 %v10750_v5  ;;  %v10761_v3 = vld [vmem:[%s13547_s5 + $0x4] ss:$12 sps:$4 sm:$0xff]  }
0x19f2   : > { %9475 = vmatpush3.bf16.msra.mxu0 %v10751_v57 }
0x19f3   : > { %9497 = vmatpush3.bf16.msra.mxu1 %v10752_v0  ;;  %9476 = vmatprep.subr.bf16.mxu0 %v10753_v1  ;;  %v10758_v0 = vld [vmem:[#allocation8 + $0x3f8] sm:$0xff]  }
0x19f4   : > { %v10530_v56 = vpop.eup %10529  ;;  %9498 = vmatprep.subr.bf16.mxu1 %v10754_v20 }
0x19f5   : > { %v10532_v4 = vpop.eup %10531  ;;  %v6226_v60 = vadd.f32 1.0, %v10530_v56 }
0x19f6   : > { %v10534_v13 = vpop.eup %10533  ;;  %9477 = vmatpush3.bf16.msra.mxu0 %v10755_v6  ;;  %v6227_v10 = vadd.f32 1.0, %v10532_v4  ;;  %v10759_v6 = vld [vmem:[#allocation8 + $0x338] sm:$0xff]  }
0x19f7   : > { %v10536_v43 = vpop.eup %10535  ;;  %9499 = vmatpush3.bf16.msra.mxu1 %v10756_v11  ;;  %9478 = vmatprep.subr.bf16.mxu0 %v10757_v35  ;;  %v6229_v5 = vadd.f32 1.0, %v10534_v13  ;;  %v6242_v57 = vmul.f32 %v6226_v60, %v6114_v17  ;;  %v10764_v60 = vld [vmem:[%s13547_s5 + $0x1c] ss:$12 sps:$4 sm:$0xff]   ;;  %v10766_v13 = vld [vmem:[%s13547_s5 + $0x20] ss:$12 sps:$4 sm:$0xff]  }
0x19f8   : > { %9500 = vmatprep.subr.bf16.mxu1 %v10758_v0  ;;  %v6243_v1 = vmul.f32 %v6227_v10, %v6115_v23  ;;  %v6228_v56 = vadd.f32 1.0, %v10536_v43  ;;  %v10767_v23 = vld [vmem:[%s13547_s5 + $0x34] ss:$12 sps:$4 sm:$0xff]   ;;  %v10768_v10 = vld [vmem:[%s13547_s5 + $0x30] ss:$12 sps:$4 sm:$0xff]  }
0x19f9   : > { %v6245_v20 = vmul.f32 %v6229_v5, %v6117_v28  ;;  %v6258_v33 = vpack.c.bf16 %v6242_v57, %v6242_v57  ;;  %v10769_v43 = vld [vmem:[%s13547_s5 + $0x38] ss:$12 sps:$4 sm:$0xff]   ;;  %v10771_v28 = vld [vmem:[%s13547_s5 + $0x48] ss:$12 sps:$4 sm:$0xff]   ;;  %v10772_v5 = vld [vmem:[%s13547_s5 + $0x50] ss:$12 sps:$4 sm:$0xff]  }
0x19fa   : > { %9479 = vmatpush3.bf16.msra.mxu0 %v10759_v6  ;;  %v6259_v48 = vpack.c.bf16 %v6243_v1, %v6243_v1  ;;  %v6244_v4 = vmul.f32 %v6228_v56, %v6116_v15  ;;  %v10770_v35 = vld [vmem:[%s13547_s5 + $0x4c] ss:$12 sps:$4 sm:$0xff]   ;;  %v10773_v57 = vld [vmem:[%s13547_s5 + $0x64] ss:$12 sps:$4 sm:$0xff]   ;;  %v10775_v1 = vld [vmem:[%s13547_s5 + $0x68] ss:$12 sps:$4 sm:$0xff]  }
0x19fb   : > { %9501 = vmatpush3.bf16.msra.mxu1 %v10760_v52  ;;  %v6261_v11 = vpack.c.bf16 %v6245_v20, %v6245_v20  ;;  %6599 = vmatprep.subr.bf16.mxu0 %v10761_v3  ;;  %v10763_v52 = vld [vmem:[%s13547_s5 + $0x8] ss:$12 sps:$4 sm:$0xff]   ;;  %v10774_v0 = vld [vmem:[%s13547_s5 + $0x60] ss:$12 sps:$4 sm:$0xff]   ;;  %v10777_v56 = vld [vmem:[%s13547_s5 + $0x78] ss:$12 sps:$4 sm:$0xff]  }
0x19fc   : > { %6534 = vmatprep.mubr.bf16.mxu0 %v6259_v48  ;;  %v6260_v17 = vpack.c.bf16 %v6244_v4, %v6244_v4  ;;  %9966 = vmatprep.subr.bf16.mxu1 %v13957_v38  ;;  %v10776_v15 = vld [vmem:[%s13547_s5 + $0x7c] ss:$12 sps:$4 sm:$0xff]   ;;  %v10778_v20 = vld [vmem:[%s13547_s5 + $0x80] ss:$12 sps:$4 sm:$0xff]   ;;  %v10781_v4 = vld [vmem:[%s13547_s5 + $0x98] ss:$12 sps:$4 sm:$0xff]  }
0x19fd   : > { %6574 = vmatprep.mubr.bf16.mxu1 %v6261_v11  ;;  %6535 = vmatmul.mubr.bf16.vlgmr.msra.gmra.mrb[120].mxu0 %v6258_v33  ;;  %v10765_v33 = vld [vmem:[%s13547_s5 + $0x18] ss:$12 sps:$4 sm:$0xff]   ;;  %v10779_v6 = vld [vmem:[%s13547_s5 + $0x94] ss:$12 sps:$4 sm:$0xff]   ;;  %v10780_v48 = vld [vmem:[%s13547_s5 + $0x90] ss:$12 sps:$4 sm:$0xff]  }
0x19fe   : > { %6575 = vmatmul.mubr.bf16.vlgmr.msra.gmra.mrb[148].mxu1 %v6260_v17  ;;  %6600 = vmatpush1.bf16.msra.mxu0 %v10762_v39  ;;  %v10782_v11 = vld [vmem:[%s13547_s5 + $0xac] ss:$12 sps:$4 sm:$0xff]   ;;  %v10783_v3 = vld [vmem:[%s13547_s5 + $0xa8] ss:$12 sps:$4 sm:$0xff]   ;;  %v10784_v17 = vld [vmem:[%s13547_s5 + $0xb0] ss:$12 sps:$4 sm:$0xff]  }
0x19ff   : > { %9967 = vmatpush3.bf16.msra.mxu1 %v10763_v52  ;;  %6601 = vmatprep.subr.bf16.mxu0 %v10764_v60 }
0x1a00   : > { %9968 = vmatprep.subr.bf16.mxu1 %v13957_v38  ;;  %6631 = vmatprep.mubr.bf16.mxu0 %v13854_v25 }
0x1a01   : > { %9982 = vmatprep.mubr.msk.bf16.mxu1 %vm11176_vm1, %v13957_v38 }
0x1a02   : > { %6602 = vmatpush1.bf16.msra.mxu0 %v10765_v33 }
0x1a03   : > { %9969 = vmatpush3.bf16.msra.mxu1 %v10766_v13  ;;  %6603 = vmatprep.subr.bf16.mxu0 %v10767_v23 }
0x1a04   : > { %9970 = vmatprep.subr.bf16.mxu1 %v13957_v38 }
0x1a06   : > { %6604 = vmatpush1.bf16.msra.mxu0 %v10768_v10 }
0x1a07   : > { %9971 = vmatpush3.bf16.msra.mxu1 %v10769_v43  ;;  %6605 = vmatprep.subr.bf16.mxu0 %v10770_v35 }
0x1a08   : > { %9972 = vmatprep.subr.bf16.mxu1 %v13957_v38 }
0x1a0a   : > { %6606 = vmatpush1.bf16.msra.mxu0 %v10771_v28  ;;  %v10785_v28 = vld [vmem:[%s13958_s13] ss:$0 sm:$0xff] }
0x1a0b   : > { %9973 = vmatpush3.bf16.msra.mxu1 %v10772_v5  ;;  %6607 = vmatprep.subr.bf16.mxu0 %v10773_v57 }
0x1a0c   : > { %9974 = vmatprep.subr.bf16.mxu1 %v13957_v38 }
0x1a0e   : > { %6608 = vmatpush1.bf16.msra.mxu0 %v10774_v0 }
0x1a0f   : > { %9975 = vmatpush3.bf16.msra.mxu1 %v10775_v1  ;;  %6609 = vmatprep.subr.bf16.mxu0 %v10776_v15 }
0x1a10   : > { %9976 = vmatprep.subr.bf16.mxu1 %v13957_v38 }
0x1a12   : > { %6610 = vmatpush1.bf16.msra.mxu0 %v10777_v56 }
0x1a13   : > { %9977 = vmatpush3.bf16.msra.mxu1 %v10778_v20  ;;  %6611 = vmatprep.subr.bf16.mxu0 %v10779_v6 }
0x1a14   : > { %9978 = vmatprep.subr.bf16.mxu1 %v13957_v38 }
0x1a16   : > { %6612 = vmatpush1.bf16.msra.mxu0 %v10780_v48 }
0x1a17   : > { %9979 = vmatpush3.bf16.msra.mxu1 %v10781_v4  ;;  %6613 = vmatprep.subr.bf16.mxu0 %v10782_v11 }
0x1a18   : > { %9980 = vmatprep.subr.bf16.mxu1 %v13957_v38 }
0x1a1a   : > { %6614 = vmatpush1.bf16.msra.mxu0 %v10783_v3 }
0x1a1b   : > { %9981 = vmatpush3.bf16.msra.mxu1 %v10784_v17  ;;  %9986 = vmatprep.subr.bf16.mxu0 %v13957_v38 }
0x1a1c   : > { %9992 = vmatprep.subr.bf16.mxu1 %v13957_v38 }
0x1a70   : > { %v9348_v39 = vpop.f32.mrb[108].mxu0 }
0x1a71   : > { %v9370_v52 = vpop.f32.mrb[136].mxu1  ;;  %v9349_v60 = vpop.f32.mrb[109].mxu0 }
0x1a72   : > { %v9350_v33 = vadd.f32 %v9349_v60, %v9348_v39  ;;  %v9371_v13 = vpop.f32.mrb[137].mxu1  ;;  %v9351_v23 = vpop.f32.mrb[110].mxu0 }
0x1a73   : > { %v9372_v10 = vadd.f32 %v9371_v13, %v9370_v52  ;;  %v9373_v43 = vpop.f32.mrb[138].mxu1  ;;  %v9352_v35 = vpop.f32.mrb[111].mxu0 }
0x1a74   : > { %v6297_v5 = vadd.f32 %v10785_v28, %v9350_v33  ;;  %v9374_v57 = vpop.f32.mrb[139].mxu1 }
0x1a76   : > { %v6337_v0 = vadd.f32 %v9372_v10, %v6297_v5 }
0x1a90   : > { %v9392_v1 = vpop.f32.mrb[112].mxu0 }
0x1a91   : > { %v9414_v15 = vpop.f32.mrb[140].mxu1  ;;  %v9393_v56 = vpop.f32.mrb[113].mxu0 }
0x1a92   : > { %v9394_v20 = vadd.f32 %v9393_v56, %v9392_v1  ;;  %v9415_v6 = vpop.f32.mrb[141].mxu1  ;;  %v9395_v48 = vpop.f32.mrb[114].mxu0 }
0x1a93   : > { %v9416_v4 = vadd.f32 %v9415_v6, %v9414_v15  ;;  %v9417_v11 = vpop.f32.mrb[142].mxu1  ;;  %v9396_v3 = vpop.f32.mrb[115].mxu0 }
0x1a94   : > { %v6377_v17 = vadd.f32 %v9394_v20, %v6337_v0  ;;  %v9418_v39 = vpop.f32.mrb[143].mxu1 }
0x1a96   : > { %v6417_v52 = vadd.f32 %v9416_v4, %v6377_v17 }
0x1ab0   : > { %v9436_v60 = vpop.f32.mrb[116].mxu0 }
0x1ab1   : > { %v9458_v13 = vpop.f32.mrb[144].mxu1  ;;  %v9437_v23 = vpop.f32.mrb[117].mxu0 }
0x1ab2   : > { %v9438_v43 = vadd.f32 %v9437_v23, %v9436_v60  ;;  %v9459_v35 = vpop.f32.mrb[145].mxu1  ;;  %v9439_v33 = vpop.f32.mrb[118].mxu0 }
0x1ab3   : > { %v9460_v28 = vadd.f32 %v9459_v35, %v9458_v13  ;;  %v9461_v10 = vpop.f32.mrb[146].mxu1  ;;  %v9440_v5 = vpop.f32.mrb[119].mxu0 }
0x1ab4   : > { %v6457_v57 = vadd.f32 %v9438_v43, %v6417_v52  ;;  %v9462_v50 = vpop.f32.mrb[147].mxu1 }
0x1ab6   : > { %v6497_v1 = vadd.f32 %v9460_v28, %v6457_v57 }
0x1ad0   : > { %v9480_v56 = vpop.f32.mrb[120].mxu0 }
0x1ad1   : > { %v9502_v48 = vpop.f32.mrb[148].mxu1  ;;  %v9481_v15 = vpop.f32.mrb[121].mxu0 }
0x1ad2   : > { %v9482_v6 = vadd.f32 %v9481_v15, %v9480_v56  ;;  %v9503_v11 = vpop.f32.mrb[149].mxu1  ;;  %v9483_v0 = vpop.f32.mrb[122].mxu0 }
0x1ad3   : > { %v9504_v20 = vadd.f32 %v9503_v11, %v9502_v48  ;;  %v9505_v4 = vpop.f32.mrb[150].mxu1  ;;  %v9484_v3 = vpop.f32.mrb[123].mxu0  ;;  %v13054_v48 = vld [vmem:[%s13550_s8] ss:$0 sm:$0xff] }
0x1ad4   : > { %v6537_v17 = vadd.f32 %v9482_v6, %v6497_v1  ;;  %v9506_v39 = vpop.f32.mrb[151].mxu1 }
0x1ad6   : > { %v6577_v60 = vadd.f32 %v9504_v20, %v6537_v17 }
0x1ad8   : > { %v13039_v23 = vadd.f32 %v6577_v60, %v12732_v31  ;;  %v13048_v31 = vld [vmem:[%s13549_s7] ss:$0 sm:$0xff] }
0x1ada   : > { %v6583_v52 = vsel %vm1240_vm0, %v13039_v23, 0.0 }
0x1adb   : > { %6584 = vadd.xlane.f32.xlu0 %v6583_v52 }
0x1b68   : > { %v6585_v50 = vpop.xlane.xlu0 %6584 }
0x1b69   : > { %v6586_v13 = vmul.f32 0.0078125, %v6585_v50 }
0x1b6b   : > { %v6587_v43 = vsub.f32 %v13039_v23, %v6586_v13 }
0x1b6d   : > { %v6588_v35 = vmul.f32 %v6587_v43, %v6587_v43 }
0x1b6f   : > { %v6589_v33 = vsel %vm1240_vm0, %v6588_v35, 0.0 }
0x1b70   : > { %6590 = vadd.xlane.f32.xlu0 %v6589_v33 }
0x1bfd   : > { %v6591_v28 = vpop.xlane.xlu0 %6590 }
0x1bfe   : > { %v6592_v10 = vmul.f32 0.0078125, %v6591_v28 }
0x1c00   : > { %v6593_v5 = vadd.f32 1e-05, %v6592_v10 }
0x1c02   : > { %10537 = vrsqrt.f32 %v6593_v5 }
0x1c0c   : > { %v10538_v57 = vpop.eup %10537 }
0x1c0d   : > { %v6595_v1 = vmul.f32 %v10538_v57, %v6587_v43 }
0x1c0f   : > { %v6596_v56 = vmul.f32 %v13048_v31, %v6595_v1 }
0x1c11   : > { %v6597_v15 = vadd.f32 %v13054_v48, %v6596_v56 }
0x1c13   : > { %v6598_v6 = vpack.c.bf16 %v6597_v15, %v6597_v15 }
0x1c15   : > { %6632 = vmatmul.mubr.bf16.vlgmr.msra.gmra.mrb[124].mxu0 %v6598_v6  ;;  %9983 = vmatmul.mubr.bf16.vlgmr.msra.gmra.mrb[152].mxu1 %v6598_v6 }
0x1c16   : > { %9988 = vmatprep.mubr.msk.bf16.mxu0 %vm11176_vm1, %v13957_v38  ;;  %9994 = vmatprep.mubr.msk.bf16.mxu1 %vm11176_vm1, %v13957_v38 }
0x1ce8   : > { %v6633_v11 = vpop.f32.mrb[124].mxu0  ;;  %v6674_v0 = vpop.f32.mrb[152].mxu1 }
0x1ce9   : > { %v6634_v20 = vadd.f32 %v6633_v11, %v11647_v26  ;;  %v6675_v4 = vadd.f32 %v6674_v0, %v11643_v18  ;;  %v6635_v3 = vpop.f32.mrb[125].mxu0  ;;  %v9984_v17 = vpop.f32.mrb[153].mxu1 }
0x1cea   : > { %v6636_v39 = vadd.f32 %v6635_v3, %v11637_v14  ;;  %v6637_v60 = vpop.f32.mrb[126].mxu0  ;;  %v6677_v52 = vpop.f32.mrb[154].mxu1 }
0x1ceb   : > { %v6680_v50 = vpack.c.bf16 %v6634_v20, %v6634_v20  ;;  %v13064_v13 = vpack.c.bf16 %v6675_v4, %v6675_v4  ;;  %v6638_v43 = vpop.f32.mrb[127].mxu0  ;;  %v9985_v35 = vpop.f32.mrb[155].mxu1 }
0x1cec   : > { %v6681_v33 = vpack.c.bf16 %v6636_v39, %v6636_v39 }
0x1ced   : > { %6788 = vrot.lane.b32.xlu0 %v6680_v50, %s11177_s12  ;;  %v6745_v28 = vand.u32 %v13064_v13, %v11660_v36 }
0x1cee   : > { %6791 = vrot.lane.b32.xlu1 %v6681_v33, %s11177_s12  ;;  %v6687_v18 = vsel %vm1498_vm2, %v6681_v33, 0 }
0x1cef   : > { %9987 = vmatpush3.bf16.xpose.msra.mxu0 %v6687_v18  ;;  %9993 = vmatpush3.bf16.msra.mxu1 %v6745_v28 }
0x1cf0   : > { %9998 = vmatprep.subr.bf16.mxu0 %v13957_v38  ;;  %10004 = vmatprep.subr.bf16.mxu1 %v13957_v38 }
0x1cf1   : > { %7012 = vrot.lane.b32.xlu0 %v6681_v33, %s11180_s21 }
0x1cf2   : > { %6902 = vrot.lane.b32.xlu1 %v6681_v33, %s11179_s17 }
0x1cf5   : > { %7122 = vrot.lane.b32.xlu0 %v6681_v33, %s11181_s29 }
0x1cf6   : > { %6900 = vrot.lane.b32.xlu1 %v6680_v50, %s11179_s17  ;;  %9989 = vmatmul.mubr.msk.bf16.vlgmr.msra.gmra.mrb[128].mxu0 %vm1498_vm2, %v6680_v50 }
0x1cf7   : > { %10000 = vmatprep.mubr.msk.bf16.mxu0 %vm11176_vm1, %v13957_v38 }
0x1cf9   : > { %7232 = vrot.lane.b32.xlu0 %v6681_v33, %s11182_s25 }
0x1cfa   : > { %7010 = vrot.lane.b32.xlu1 %v6680_v50, %s11180_s21 }
0x1cfd   : > { %7342 = vrot.lane.b32.xlu0 %v6681_v33, %s11183_s0 }
0x1cfe   : > { %7120 = vrot.lane.b32.xlu1 %v6680_v50, %s11181_s29 }
0x1d01   : > { %7452 = vrot.lane.b32.xlu0 %v6681_v33, %s11184_s22 }
0x1d02   : > { %7230 = vrot.lane.b32.xlu1 %v6680_v50, %s11182_s25 }
0x1d06   : > { %7340 = vrot.lane.b32.xlu1 %v6680_v50, %s11183_s0 }
0x1d0a   : > { %7450 = vrot.lane.b32.xlu1 %v6680_v50, %s11184_s22 }
0x1d5f   : > { %v6789_v5 = vpop.permute.xlu0 %6788 }
0x1d60   : > { %v6792_v14 = vpop.permute.xlu1 %6791 }
0x1d61   : > { %v6797_v26 = vsel %vm1498_vm2, %v6792_v14, 0 }
0x1d62   : > { %9999 = vmatpush3.bf16.xpose.msra.mxu0 %v6797_v26 }
0x1d63   : > { %10010 = vmatprep.subr.bf16.mxu0 %v13957_v38  ;;  %v7013_v1 = vpop.permute.xlu0 %7012 }
0x1d64   : > { %v6903_v10 = vpop.permute.xlu1 %6902  ;;  %v7018_v15 = vsel %vm1498_vm2, %v7013_v1, 0 }
0x1d65   : > { %v6908_v57 = vsel %vm1498_vm2, %v6903_v10, 0 }
0x1d67   : > { %v7123_v6 = vpop.permute.xlu0 %7122 }
0x1d68   : > { %v6901_v56 = vpop.permute.xlu1 %6900  ;;  %v7128_v0 = vsel %vm1498_vm2, %v7123_v6, 0 }
0x1d69   : > { %10001 = vmatmul.mubr.msk.bf16.vlgmr.msra.gmra.mrb[132].mxu0 %vm1498_vm2, %v6789_v5 }
0x1d6a   : > { %10011 = vmatpush3.bf16.xpose.msra.mxu0 %v6908_v57  ;;  %10012 = vmatprep.mubr.msk.bf16.mxu0 %vm11176_vm1, %v13957_v38 }
0x1d6b   : > { %10022 = vmatprep.subr.bf16.mxu0 %v13957_v38  ;;  %v7233_v20 = vpop.permute.xlu0 %7232 }
0x1d6c   : > { %v7011_v11 = vpop.permute.xlu1 %7010  ;;  %v7238_v3 = vsel %vm1498_vm2, %v7233_v20, 0 }
0x1d6f   : > { %v7343_v17 = vpop.permute.xlu0 %7342 }
0x1d70   : > { %v7121_v4 = vpop.permute.xlu1 %7120  ;;  %v7348_v60 = vsel %vm1498_vm2, %v7343_v17, 0 }
0x1d71   : > { %10013 = vmatmul.mubr.msk.bf16.vlgmr.msra.gmra.mrb[136].mxu0 %vm1498_vm2, %v6901_v56 }
0x1d72   : > { %10023 = vmatpush3.bf16.xpose.msra.mxu0 %v7018_v15  ;;  %10024 = vmatprep.mubr.msk.bf16.mxu0 %vm11176_vm1, %v13957_v38 }
0x1d73   : > { %10034 = vmatprep.subr.bf16.mxu0 %v13957_v38  ;;  %v7453_v52 = vpop.permute.xlu0 %7452 }
0x1d74   : > { %v7231_v39 = vpop.permute.xlu1 %7230  ;;  %v7458_v43 = vsel %vm1498_vm2, %v7453_v52, 0 }
0x1d78   : > { %v7341_v50 = vpop.permute.xlu1 %7340 }
0x1d79   : > { %10025 = vmatmul.mubr.msk.bf16.vlgmr.msra.gmra.mrb[140].mxu0 %vm1498_vm2, %v7011_v11 }
0x1d7a   : > { %10035 = vmatpush3.bf16.xpose.msra.mxu0 %v7128_v0  ;;  %10036 = vmatprep.mubr.msk.bf16.mxu0 %vm11176_vm1, %v13957_v38 }
0x1d7b   : > { %10046 = vmatprep.subr.bf16.mxu0 %v13957_v38 }
0x1d7c   : > { %v7451_v35 = vpop.permute.xlu1 %7450 }
0x1d81   : > { %10037 = vmatmul.mubr.msk.bf16.vlgmr.msra.gmra.mrb[144].mxu0 %vm1498_vm2, %v7121_v4 }
0x1d82   : > { %10047 = vmatpush3.bf16.xpose.msra.mxu0 %v7238_v3  ;;  %10048 = vmatprep.mubr.msk.bf16.mxu0 %vm11176_vm1, %v13957_v38 }
0x1d83   : > { %10058 = vmatprep.subr.bf16.mxu0 %v13957_v38 }
0x1d89   : > { %10049 = vmatmul.mubr.msk.bf16.vlgmr.msra.gmra.mrb[148].mxu0 %vm1498_vm2, %v7231_v39 }
0x1d8a   : > { %10059 = vmatpush3.bf16.xpose.msra.mxu0 %v7348_v60  ;;  %10060 = vmatprep.mubr.msk.bf16.mxu0 %vm11176_vm1, %v13957_v38 }
0x1d8b   : > { %10070 = vmatprep.subr.bf16.mxu0 %v13957_v38 }
0x1d91   : > { %10061 = vmatmul.mubr.msk.bf16.vlgmr.msra.gmra.mrb[152].mxu0 %vm1498_vm2, %v7341_v50 }
0x1d92   : > { %10071 = vmatpush3.bf16.xpose.msra.mxu0 %v7458_v43  ;;  %10072 = vmatprep.mubr.msk.bf16.mxu0 %vm11176_vm1, %v13957_v38 }
0x1d93   : > { %7612 = vmatprep.subr.bf16.mxu0 %v11826_v41  ;;  %v14071_v41 = vld [vmem:[#allocation36_spill] sm:$0xff] }
0x1d99   : > { %10073 = vmatmul.mubr.msk.bf16.vlgmr.msra.gmra.mrb[156].mxu0 %vm1498_vm2, %v7451_v35 }
0x1d9a   : > { %7613 = vmatpush1.bf16.msra.mxu0 %v11824_v40  ;;  %7644 = vmatprep.mubr.bf16.mxu0 %v13854_v25  ;;  %v14070_v40 = vld [vmem:[#allocation32_spill] sm:$0xff] }
0x1d9b   : > { %7614 = vmatprep.subr.bf16.mxu0 %v11832_v30 }
0x1d9e   : > { %7615 = vmatpush1.bf16.msra.mxu0 %v11839_v53 }
0x1d9f   : > { %7616 = vmatprep.subr.bf16.mxu0 %v11845_v54 }
0x1da2   : > { %7617 = vmatpush1.bf16.msra.mxu0 %v11851_v58 }
0x1da3   : > { %7618 = vmatprep.subr.bf16.mxu0 %v11866_v7 }
0x1da6   : > { %7619 = vmatpush1.bf16.msra.mxu0 %v11868_v9 }
0x1da7   : > { %7620 = vmatprep.subr.bf16.mxu0 %v11878_v24 }
0x1daa   : > { %7621 = vmatpush1.bf16.msra.mxu0 %v11880_v2 }
0x1dab   : > { %7622 = vmatprep.subr.bf16.mxu0 %v11890_v29 }
0x1dae   : > { %7623 = vmatpush1.bf16.msra.mxu0 %v11892_v32 }
0x1daf   : > { %7624 = vmatprep.subr.bf16.mxu0 %v11902_v44 }
0x1db2   : > { %7625 = vmatpush1.bf16.msra.mxu0 %v11904_v47 }
0x1db3   : > { %7626 = vmatprep.subr.bf16.mxu0 %v11914_v61 }
0x1db6   : > { %7627 = vmatpush1.bf16.msra.mxu0 %v14070_v40 }
0x1db7   : > { %7694 = vmatprep.subr.bf16.mxu0 %v14071_v41 }
0x1dc9   : > { %v6723_v30 = vpop.f32.mrb[128].mxu0 }
0x1dca   : > { %v9990_v53 = vpop.f32.mrb[129].mxu0  ;;  %v6729_v54 = vsel %vm1545_vm5, %v6723_v30, -inf }
0x1dcb   : > { %6730 = vmax.xlane.f32.xlu0 %v6729_v54  ;;  %v6726_v58 = vpop.f32.mrb[130].mxu0 }
0x1dcc   : > { %v9991_v7 = vpop.f32.mrb[131].mxu0 }
0x1e3c   : > { %v6833_v9 = vpop.f32.mrb[132].mxu0 }
0x1e3d   : > { %v10002_v24 = vpop.f32.mrb[133].mxu0  ;;  %v6839_v2 = vsel %vm1545_vm5, %v6833_v9, -inf }
0x1e3e   : > { %6840 = vmax.xlane.f32.xlu1 %v6839_v2  ;;  %v6836_v29 = vpop.f32.mrb[134].mxu0 }
0x1e3f   : > { %v10003_v32 = vpop.f32.mrb[135].mxu0 }
0x1e44   : > { %v6944_v44 = vpop.f32.mrb[136].mxu0 }
0x1e45   : > { %v10014_v47 = vpop.f32.mrb[137].mxu0  ;;  %v6950_v61 = vsel %vm1545_vm5, %v6944_v44, -inf }
0x1e46   : > { %6951 = vmax.xlane.f32.xlu0 %v6950_v61  ;;  %v6947_v33 = vpop.f32.mrb[138].mxu0 }
0x1e47   : > { %v10015_v28 = vpop.f32.mrb[139].mxu0 }
0x1e4c   : > { %v7054_v18 = vpop.f32.mrb[140].mxu0 }
0x1e4d   : > { %v10026_v14 = vpop.f32.mrb[141].mxu0  ;;  %v7060_v26 = vsel %vm1545_vm5, %v7054_v18, -inf }
0x1e4e   : > { %7061 = vmax.xlane.f32.xlu0 %v7060_v26  ;;  %v7057_v10 = vpop.f32.mrb[142].mxu0 }
0x1e4f   : > { %v10027_v5 = vpop.f32.mrb[143].mxu0 }
0x1e54   : > { %v7164_v57 = vpop.f32.mrb[144].mxu0 }
0x1e55   : > { %v10038_v1 = vpop.f32.mrb[145].mxu0  ;;  %v7170_v56 = vsel %vm1545_vm5, %v7164_v57, -inf }
0x1e56   : > { %7171 = vmax.xlane.f32.xlu1 %v7170_v56  ;;  %v7167_v15 = vpop.f32.mrb[146].mxu0 }
0x1e57   : > { %v10039_v6 = vpop.f32.mrb[147].mxu0 }
0x1e58   : > { %v6731_v53 = vpop.xlane.xlu0 %6730 }
0x1e59   : > { %v6732_v54 = vsub.f32 %v6723_v30, %v6731_v53 }
0x1e5b   : > { %v6733_v58 = vmul.f32 1.442695, %v6732_v54 }
0x1e5c   : > { %v7274_v11 = vpop.f32.mrb[148].mxu0 }
0x1e5d   : > { %v10050_v0 = vpop.f32.mrb[149].mxu0  ;;  %v7280_v20 = vsel %vm1545_vm5, %v7274_v11, -inf  ;;  %10539 = vpow2.f32 %v6733_v58 }
0x1e5e   : > { %7281 = vmax.xlane.f32.xlu0 %v7280_v20  ;;  %v7277_v4 = vpop.f32.mrb[150].mxu0 }
0x1e5f   : > { %v10051_v3 = vpop.f32.mrb[151].mxu0 }
0x1e64   : > { %v7384_v17 = vpop.f32.mrb[152].mxu0 }
0x1e65   : > { %v10062_v39 = vpop.f32.mrb[153].mxu0  ;;  %v7390_v60 = vsel %vm1545_vm5, %v7384_v17, -inf }
0x1e66   : > { %7391 = vmax.xlane.f32.xlu1 %v7390_v60  ;;  %v7387_v52 = vpop.f32.mrb[154].mxu0 }
0x1e67   : > { %v10063_v50 = vpop.f32.mrb[155].mxu0  ;;  %v10540_v24 = vpop.eup %10539 }
0x1e68   : > { %v6735_v2 = vsel %vm1545_vm5, %v10540_v24, 0.0 }
0x1e6c   : > { %v7494_v43 = vpop.f32.mrb[156].mxu0 }
0x1e6d   : > { %v10074_v35 = vpop.f32.mrb[157].mxu0  ;;  %v7500_v7 = vsel %vm1545_vm5, %v7494_v43, -inf }
0x1e6e   : > { %v7497_v40 = vpop.f32.mrb[158].mxu0 }
0x1e6f   : > { %v10075_v41 = vpop.f32.mrb[159].mxu0 }
0x1e74   : > { %6962 = vrot.lane.b32.xlu0 %v13064_v13, %s11179_s17 }
0x1e77   : > { %6852 = vrot.lane.b32.xlu1 %v13064_v13, %s11177_s12 }
0x1e93   : > { %7501 = vmax.xlane.f32.xlu0 %v7500_v7 }
0x1e9b   : > { %6736 = vadd.xlane.f32.xlu1 %v6735_v2 }
0x1ecb   : > { %v6841_v29 = vpop.xlane.xlu1 %6840 }
0x1ecc   : > { %v6842_v32 = vsub.f32 %v6833_v9, %v6841_v29 }
0x1ece   : > { %v6843_v47 = vmul.f32 1.442695, %v6842_v32 }
0x1ed0   : > { %10541 = vpow2.f32 %v6843_v47 }
0x1ed3   : > { %v6952_v61 = vpop.xlane.xlu0 %6951 }
0x1ed4   : > { %v6953_v33 = vsub.f32 %v6944_v44, %v6952_v61 }
0x1ed6   : > { %v6954_v28 = vmul.f32 1.442695, %v6953_v33 }
0x1ed8   : > { %10543 = vpow2.f32 %v6954_v28 }
0x1eda   : > { %v13151_v14 = vpop.eup %10541 }
0x1edb   : > { %v6845_v30 = vsel %vm1545_vm5, %v13151_v14, 0.0  ;;  %v7062_v9 = vpop.xlane.xlu0 %7061 }
0x1edc   : > { %6846 = vadd.xlane.f32.xlu0 %v6845_v30  ;;  %v7063_v44 = vsub.f32 %v7054_v18, %v7062_v9 }
0x1ede   : > { %v7064_v1 = vmul.f32 1.442695, %v7063_v44 }
0x1ee0   : > { %10545 = vpow2.f32 %v7064_v1 }
0x1ee2   : > { %v13155_v26 = vpop.eup %10543 }
0x1ee3   : > { %v6956_v10 = vsel %vm1545_vm5, %v13155_v26, 0.0  ;;  %v7172_v5 = vpop.xlane.xlu1 %7171 }
0x1ee4   : > { %6957 = vadd.xlane.f32.xlu1 %v6956_v10  ;;  %v7173_v56 = vsub.f32 %v7164_v57, %v7172_v5 }
0x1ee6   : > { %v7174_v20 = vmul.f32 1.442695, %v7173_v56 }
0x1ee8   : > { %10547 = vpow2.f32 %v7174_v20 }
0x1eea   : > { %v10546_v60 = vpop.eup %10545 }
0x1eeb   : > { %v7282_v15 = vpop.xlane.xlu0 %7281  ;;  %v7066_v52 = vsel %vm1545_vm5, %v10546_v60, 0.0 }
0x1eec   : > { %v7283_v0 = vsub.f32 %v7274_v11, %v7282_v15 }
0x1eee   : > { %v7284_v3 = vmul.f32 1.442695, %v7283_v0 }
0x1eef   : > { %v6963_v40 = vpop.permute.xlu0 %6962 }
0x1ef0   : > { %10549 = vpow2.f32 %v7284_v3  ;;  %v6968_v9 = vand.u32 %v6963_v40, %v11660_v36 }
0x1ef2   : > { %7072 = vrot.lane.b32.xlu0 %v13064_v13, %s11180_s21  ;;  %v13164_v50 = vpop.eup %10547 }
0x1ef3   : > { %v7392_v6 = vpop.xlane.xlu1 %7391  ;;  %v7176_v57 = vsel %vm1545_vm5, %v13164_v50, 0.0 }
0x1ef4   : > { %v7393_v4 = vsub.f32 %v7384_v17, %v7392_v6 }
0x1ef5   : > { %7182 = vrot.lane.b32.xlu1 %v13064_v13, %s11181_s29 }
0x1ef6   : > { %v7394_v39 = vmul.f32 1.442695, %v7393_v4 }
0x1ef7   : > { %v6853_v58 = vpop.permute.xlu1 %6852 }
0x1ef8   : > { %10551 = vpow2.f32 %v7394_v39  ;;  %v6858_v61 = vand.u32 %v6853_v58, %v11660_v36 }
0x1efa   : > { %v13166_v18 = vpop.eup %10549 }
0x1efb   : > { %v7286_v17 = vsel %vm1545_vm5, %v13166_v18, 0.0 }
0x1f02   : > { %v13170_v11 = vpop.eup %10551 }
0x1f03   : > { %v7396_v35 = vsel %vm1545_vm5, %v13170_v11, 0.0 }
0x1f11   : > { %7067 = vadd.xlane.f32.xlu0 %v7066_v52 }
0x1f15   : > { %7177 = vadd.xlane.f32.xlu0 %v7176_v57 }
0x1f19   : > { %7287 = vadd.xlane.f32.xlu1 %v7286_v17  ;;  %7397 = vadd.xlane.f32.xlu0 %v7396_v35 }
0x1f20   : > { %v7502_v41 = vpop.xlane.xlu0 %7501 }
0x1f21   : > { %v7503_v53 = vsub.f32 %v7494_v43, %v7502_v41 }
0x1f23   : > { %v7504_v54 = vmul.f32 1.442695, %v7503_v53 }
0x1f25   : > { %10553 = vpow2.f32 %v7504_v54 }
0x1f28   : > { %v6737_v7 = vpop.xlane.xlu1 %6736 }
0x1f29   : > { %10555 = vrcp.f32 %v6737_v7 }
0x1f2a   : > { %7402 = vrot.lane.b32.xlu1 %v13064_v13, %s11183_s0 }
0x1f2e   : > { %7512 = vrot.lane.b32.xlu1 %v13064_v13, %s11184_s22 }
0x1f2f   : > { %v13180_v2 = vpop.eup %10553 }
0x1f30   : > { %v7506_v29 = vsel %vm1545_vm5, %v13180_v2, 0.0 }
0x1f31   : > { %7507 = vadd.xlane.f32.xlu0 %v7506_v29 }
0x1f33   : > { %v10556_v32 = vpop.eup %10555 }
0x1f34   : > { %v6739_v47 = vmul.f32 %v10556_v32, %v10540_v24 }
0x1f36   : > { %v6740_v43 = vpack.c.bf16 %v6739_v47, %v6739_v47 }
0x1f38   : > { %9995 = vmatmul.mubr.msk.bf16.vlgmr.msra.gmra.mrb[156].mxu1 %vm1558_vm6, %v6740_v43 }
0x1f39   : > { %10005 = vmatpush3.bf16.msra.mxu1 %v6858_v61  ;;  %10006 = vmatprep.mubr.msk.bf16.mxu1 %vm11176_vm1, %v13957_v38 }
0x1f3a   : > { %10016 = vmatprep.subr.bf16.mxu1 %v13957_v38 }
0x1f47   : > { %7292 = vrot.lane.b32.xlu0 %v13064_v13, %s11182_s25 }
0x1f69   : > { %v6847_v33 = vpop.xlane.xlu0 %6846 }
0x1f6a   : > { %10557 = vrcp.f32 %v6847_v33 }
0x1f6d   : > { %v7073_v13 = vpop.permute.xlu0 %7072 }
0x1f6e   : > { %v7078_v56 = vand.u32 %v7073_v13, %v11660_v36 }
0x1f71   : > { %v6958_v28 = vpop.xlane.xlu1 %6957 }
0x1f72   : > { %10559 = vrcp.f32 %v6958_v28 }
0x1f74   : > { %v10558_v30 = vpop.eup %10557 }
0x1f75   : > { %v6849_v24 = vmul.f32 %v10558_v30, %v13151_v14  ;;  %v7183_v0 = vpop.permute.xlu1 %7182 }
0x1f76   : > { %v7188_v3 = vand.u32 %v7183_v0, %v11660_v36 }
0x1f77   : > { %v6850_v10 = vpack.c.bf16 %v6849_v24, %v6849_v24 }
0x1f79   : > { %10007 = vmatmul.mubr.msk.bf16.vlgmr.msra.gmra.mrb[160].mxu1 %vm1558_vm6, %v6850_v10 }
0x1f7a   : > { %10017 = vmatpush3.bf16.msra.mxu1 %v6968_v9  ;;  %10018 = vmatprep.mubr.msk.bf16.mxu1 %vm11176_vm1, %v13957_v38 }
0x1f7b   : > { %10028 = vmatprep.subr.bf16.mxu1 %v13957_v38 }
0x1f7c   : > { %v10560_v44 = vpop.eup %10559 }
0x1f7d   : > { %v6960_v5 = vmul.f32 %v10560_v44, %v13155_v26 }
0x1f7f   : > { %v6961_v1 = vpack.c.bf16 %v6960_v5, %v6960_v5 }
0x1f81   : > { %10019 = vmatmul.mubr.msk.bf16.vlgmr.msra.gmra.mrb[164].mxu1 %vm1558_vm6, %v6961_v1 }
0x1f82   : > { %10029 = vmatpush3.bf16.msra.mxu1 %v7078_v56  ;;  %10030 = vmatprep.mubr.msk.bf16.mxu1 %vm11176_vm1, %v13957_v38 }
0x1f83   : > { %10040 = vmatprep.subr.bf16.mxu1 %v13957_v38 }
0x1f9e   : > { %v7068_v14 = vpop.xlane.xlu0 %7067 }
0x1f9f   : > { %10561 = vrcp.f32 %v7068_v14 }
0x1fa2   : > { %v7178_v15 = vpop.xlane.xlu0 %7177 }
0x1fa3   : > { %10563 = vrcp.f32 %v7178_v15 }
0x1fa6   : > { %v7288_v52 = vpop.xlane.xlu1 %7287 }
0x1fa7   : > { %10565 = vrcp.f32 %v7288_v52 }
0x1fa9   : > { %v10562_v6 = vpop.eup %10561 }
0x1faa   : > { %v7070_v20 = vmul.f32 %v10562_v6, %v10546_v60  ;;  %v7398_v60 = vpop.xlane.xlu0 %7397 }
0x1fab   : > { %10567 = vrcp.f32 %v7398_v60 }
0x1fac   : > { %v7071_v4 = vpack.c.bf16 %v7070_v20, %v7070_v20 }
0x1fad   : > { %v10564_v26 = vpop.eup %10563 }
0x1fae   : > { %10031 = vmatmul.mubr.msk.bf16.vlgmr.msra.gmra.mrb[168].mxu1 %vm1558_vm6, %v7071_v4  ;;  %v7180_v39 = vmul.f32 %v10564_v26, %v13164_v50  ;;  %v7403_v50 = vpop.permute.xlu1 %7402 }
0x1faf   : > { %10041 = vmatpush3.bf16.msra.mxu1 %v7188_v3  ;;  %10042 = vmatprep.mubr.msk.bf16.mxu1 %vm11176_vm1, %v13957_v38  ;;  %v7408_v7 = vand.u32 %v7403_v50, %v11660_v36 }
0x1fb0   : > { %10052 = vmatprep.subr.bf16.mxu1 %v13957_v38  ;;  %v7181_v57 = vpack.c.bf16 %v7180_v39, %v7180_v39 }
0x1fb1   : > { %v10566_v35 = vpop.eup %10565 }
0x1fb2   : > { %v7290_v40 = vmul.f32 %v10566_v35, %v13166_v18  ;;  %v7513_v29 = vpop.permute.xlu1 %7512 }
0x1fb3   : > { %v7518_v43 = vand.u32 %v7513_v29, %v11660_v36 }
0x1fb4   : > { %v7291_v54 = vpack.c.bf16 %v7290_v40, %v7290_v40 }
0x1fb5   : > { %v10568_v58 = vpop.eup %10567 }
0x1fb6   : > { %10043 = vmatmul.mubr.msk.bf16.vlgmr.msra.gmra.mrb[172].mxu1 %vm1558_vm6, %v7181_v57  ;;  %v7400_v18 = vmul.f32 %v10568_v58, %v13170_v11 }
0x1fb7   : > { %10054 = vmatprep.mubr.msk.bf16.mxu1 %vm11176_vm1, %v13957_v38 }
0x1fb8   : > { %v7401_v32 = vpack.c.bf16 %v7400_v18, %v7400_v18 }
0x1fbe   : > { %v7508_v17 = vpop.xlane.xlu0 %7507 }
0x1fbf   : > { %10569 = vrcp.f32 %v7508_v17 }
0x1fc2   : > { %v7293_v41 = vpop.permute.xlu0 %7292 }
0x1fc3   : > { %v7298_v53 = vand.u32 %v7293_v41, %v11660_v36  ;;  %v14072_v36 = vld [vmem:[#allocation29_spill] sm:$0xff] }
0x1fc5   : > { %10053 = vmatpush3.bf16.msra.mxu1 %v7298_v53 }
0x1fc6   : > { %10064 = vmatprep.subr.bf16.mxu1 %v13957_v38 }
0x1fc8   : > { %10055 = vmatmul.mubr.msk.bf16.vlgmr.msra.gmra.mrb[176].mxu1 %vm1558_vm6, %v7291_v54 }
0x1fc9   : > { %10065 = vmatpush3.bf16.msra.mxu1 %v7408_v7  ;;  %10066 = vmatprep.mubr.msk.bf16.mxu1 %vm11176_vm1, %v13957_v38  ;;  %v10570_v47 = vpop.eup %10569 }
0x1fca   : > { %10076 = vmatprep.subr.bf16.mxu1 %v13957_v38  ;;  %v7510_v61 = vmul.f32 %v10570_v47, %v13180_v2 }
0x1fcc   : > { %v7511_v33 = vpack.c.bf16 %v7510_v61, %v7510_v61 }
0x1fd0   : > { %10067 = vmatmul.mubr.msk.bf16.vlgmr.msra.gmra.mrb[180].mxu1 %vm1558_vm6, %v7401_v32 }
0x1fd1   : > { %10077 = vmatpush3.bf16.msra.mxu1 %v7518_v43  ;;  %10078 = vmatprep.mubr.msk.bf16.mxu1 %vm11176_vm1, %v13957_v38 }
0x1fd2   : > { %7653 = vmatprep.subr.bf16.mxu1 %v11830_v45  ;;  %v14074_v45 = vld [vmem:[#allocation31_spill] sm:$0xff] }
0x1fd8   : > { %10079 = vmatmul.mubr.msk.bf16.vlgmr.msra.gmra.mrb[184].mxu1 %vm1558_vm6, %v7511_v33 }
0x1fd9   : > { %7654 = vmatpush1.bf16.msra.mxu1 %v11828_v37  ;;  %7685 = vmatprep.mubr.bf16.mxu1 %v13854_v25  ;;  %v14073_v37 = vld [vmem:[#allocation28_spill] sm:$0xff] }
0x1fda   : > { %7655 = vmatprep.subr.bf16.mxu1 %v11835_v49  ;;  %v14075_v49 = vld [vmem:[#allocation30_spill] sm:$0xff] }
0x1fdd   : > { %7656 = vmatpush1.bf16.msra.mxu1 %v11843_v27  ;;  %v14076_v27 = vld [vmem:[#allocation34_spill] sm:$0xff] }
0x1fde   : > { %7657 = vmatprep.subr.bf16.mxu1 %v11848_v55  ;;  %v14077_v55 = vld [vmem:[#allocation33_spill] sm:$0xff] }
0x1fe1   : > { %7658 = vmatpush1.bf16.msra.mxu1 %v11855_v59  ;;  %v14078_v59 = vld [vmem:[#allocation38_spill] sm:$0xff] }
0x1fe2   : > { %7659 = vmatprep.subr.bf16.mxu1 %v11872_v16 }
0x1fe5   : > { %7660 = vmatpush1.bf16.msra.mxu1 %v11870_v12 }
0x1fe6   : > { %7661 = vmatprep.subr.bf16.mxu1 %v11884_v22 }
0x1fe9   : > { %7662 = vmatpush1.bf16.msra.mxu1 %v11882_v21 }
0x1fea   : > { %7663 = vmatprep.subr.bf16.mxu1 %v14072_v36 }
0x1fed   : > { %7664 = vmatpush1.bf16.msra.mxu1 %v14073_v37 }
0x1fee   : > { %7665 = vmatprep.subr.bf16.mxu1 %v14074_v45 }
0x1ff1   : > { %7666 = vmatpush1.bf16.msra.mxu1 %v14075_v49 }
0x1ff2   : > { %7667 = vmatprep.subr.bf16.mxu1 %v14076_v27 }
0x1ff5   : > { %7668 = vmatpush1.bf16.msra.mxu1 %v14077_v55 }
0x1ff6   : > { %7735 = vmatprep.subr.bf16.mxu1 %v14078_v59 }
0x200b   : > { %v6781_v16 = vpop.f32.mrb[156].mxu1 }
0x200c   : > { %v9996_v12 = vpop.f32.mrb[157].mxu1 }
0x200d   : > { %v6784_v11 = vpop.f32.mrb[158].mxu1 }
0x200e   : > { %v9997_v22 = vpop.f32.mrb[159].mxu1 }
0x204c   : > { %v6894_v2 = vpop.f32.mrb[160].mxu1 }
0x204d   : > { %7561 = vrot.lane.b32.xlu1 %v6894_v2, %s11184_s22  ;;  %v10008_v21 = vpop.f32.mrb[161].mxu1 }
0x204e   : > { %v6897_v28 = vpop.f32.mrb[162].mxu1 }
0x204f   : > { %v10009_v30 = vpop.f32.mrb[163].mxu1 }
0x2054   : > { %v7004_v24 = vpop.f32.mrb[164].mxu1 }
0x2055   : > { %7565 = vrot.lane.b32.xlu1 %v7004_v24, %s11183_s0  ;;  %v10020_v10 = vpop.f32.mrb[165].mxu1  ;;  %s14182_s0 = sld [smem:[#allocation145_spill]] }
0x2056   : > { %v7007_v9 = vpop.f32.mrb[166].mxu1  ;;  %v14079_v10 = vld [vmem:[#allocation35_spill] sm:$0xff] }
0x2057   : > { %v10021_v44 = vpop.f32.mrb[167].mxu1  ;;  %v14080_v9 = vld [vmem:[#allocation37_spill] sm:$0xff] }
0x2058   : > { %v14081_v44 = vld [vmem:[#allocation39_spill] sm:$0xff] }
0x2081   : > { %v7114_v13 = vpop.f32.mrb[168].mxu1 }
0x2082   : > { %7569 = vrot.lane.b32.xlu1 %v7114_v13, %s11182_s25  ;;  %v10032_v5 = vpop.f32.mrb[169].mxu1  ;;  %v14082_v13 = vld [vmem:[#allocation40_spill] sm:$0xff] }
0x2083   : > { %v7117_v1 = vpop.f32.mrb[170].mxu1  ;;  %v14085_v5 = vld [vmem:[#allocation43_spill] sm:$0xff] }
0x2084   : > { %v10033_v56 = vpop.f32.mrb[171].mxu1  ;;  %v14086_v1 = vld [vmem:[#allocation44_spill] sm:$0xff] }
0x2085   : > { %v14087_v56 = vld [vmem:[#allocation45_spill] sm:$0xff] }
0x2089   : > { %v7224_v14 = vpop.f32.mrb[172].mxu1 }
0x208a   : > { %7573 = vrot.lane.b32.xlu0 %v7224_v14, %s11181_s29  ;;  %v10044_v15 = vpop.f32.mrb[173].mxu1  ;;  %v14088_v14 = vld [vmem:[#allocation46_spill] sm:$0xff] }
0x208b   : > { %v7227_v6 = vpop.f32.mrb[174].mxu1  ;;  %v14089_v15 = vld [vmem:[#allocation47_spill] sm:$0xff] }
0x208c   : > { %v10045_v0 = vpop.f32.mrb[175].mxu1  ;;  %v14090_v6 = vld [vmem:[#allocation48_spill] sm:$0xff] }
0x208d   : > { %v14091_v0 = vld [vmem:[#allocation49_spill] sm:$0xff] }
0x209b   : > { %v7334_v20 = vpop.f32.mrb[176].mxu1 }
0x209c   : > { %7577 = vrot.lane.b32.xlu1 %v7334_v20, %s11180_s21  ;;  %v10056_v4 = vpop.f32.mrb[177].mxu1  ;;  %v14092_v20 = vld [vmem:[#allocation50_spill] sm:$0xff]  ;;  %s14181_s21 = sld [smem:[#allocation21_spill]] }
0x209d   : > { %v7337_v26 = vpop.f32.mrb[178].mxu1  ;;  %v14093_v4 = vld [vmem:[#allocation51_spill] sm:$0xff] }
0x209e   : > { %v10057_v3 = vpop.f32.mrb[179].mxu1  ;;  %v14094_v26 = vld [vmem:[#allocation52_spill] sm:$0xff] }
0x209f   : > { %v14095_v3 = vld [vmem:[#allocation53_spill] sm:$0xff] }
0x20a2   : > { %s623_s22 = sand.u32 1, %s14181_s21  }
0x20a3   : > { %v7444_v39 = vpop.f32.mrb[180].mxu1  ;;  %s624_s19 = scalar_lea.vmem [#allocation14], %s623_s22  ;;  %s8547_s18 = scalar_lea.sflag [#allocation5], %s623_s22 }
0x20a4   : > { %7581 = vrot.lane.b32.xlu0 %v7444_v39, %s11179_s17  ;;  %v10068_v52 = vpop.f32.mrb[181].mxu1  ;;  %v14096_v39 = vld [vmem:[#allocation54_spill] sm:$0xff]  ;;  %s8559_s27 = sshll.u32 %s624_s19, 4  ;;  %s13502_s27 = int_to_ptr.vmem [resolvable:$true] %s8559_s27 }
0x20a5   : > { %v7447_v57 = vpop.f32.mrb[182].mxu1  ;;  %v14097_v52 = vld [vmem:[#allocation55_spill] sm:$0xff]  ;;  %s11085_s28 = scalar_lea.vmem %s13502_s27, 16 }
0x20a6   : > { %v10069_v60 = vpop.f32.mrb[183].mxu1  ;;  %v14098_v57 = vld [vmem:[#allocation56_spill] sm:$0xff]  ;;  %p11086_p13 = scmp.ne.s32.totalorder %s13502_s27, %s11085_s28 }
0x20a7   : > { %v14099_v60 = vld [vmem:[#allocation57_spill] sm:$0xff] }
0x20a8   : > { %p11087_p6 = pnand %p11086_p13, %p14185_p1 }
0x20aa   : > { %p11088_p9 = pneg %p11087_p6 }
0x20ab   : > { %v7554_v17 = vpop.f32.mrb[184].mxu1 }
0x20ac   : > { %7585 = vrot.lane.b32.xlu1 %v7554_v17, %s11177_s12  ;;  %v10080_v35 = vpop.f32.mrb[185].mxu1  ;;  %v14100_v17 = vld [vmem:[#allocation58_spill] sm:$0xff]  ;;  %s11185_s12 = smov [#allocation14]  }
0x20ad   : > { %v7557_v40 = vpop.f32.mrb[186].mxu1  ;;  %v14101_v35 = vld [vmem:[#allocation59_spill] sm:$0xff]  ;;  %s11089_s17 = sshll.u32 %s11185_s12, 4  ;;  %s11090_s17 = int_to_ptr.vmem [resolvable:$false] %s11089_s17 }
0x20ae   : > { %v10081_v41 = vpop.f32.mrb[187].mxu1  ;;  %v14102_v40 = vld [vmem:[#allocation60_spill] sm:$0xff]  ;;  %s11091_s21 = scalar_lea.vmem %s11090_s17, 32  ;;  %p11092_p5 = scmp.lt.s32.totalorder %s13502_s27, %s11090_s17 }
0x20af   : > { %v14103_v41 = vld [vmem:[#allocation61_spill] sm:$0xff]  ;;  %p11093_p10 = scmp.lt.s32.totalorder %s11091_s21, %s11085_s28 }
0x20b1   : > { %p11094_p0 = por %p11093_p10, %p11092_p5 }
0x20b3   : > { %p11095_p2 = pnand %p11094_p0, %p11088_p9 }
0x20bf   : > { %v7562_v53 = vpop.permute.xlu1 %7561 }
0x20c0   : > { %v7588_v7 = vsel %vm1498_vm2, %v6781_v16, %v7562_v53  ;;  %v14104_v53 = vld [vmem:[#allocation62_spill] sm:$0xff] }
0x20c7   : > { %v7566_v50 = vpop.permute.xlu1 %7565 }
0x20c8   : > { %v7589_v18 = vsel %vm2411_vm7, %v7588_v7, %v7566_v50  ;;  %v14105_v50 = vld [vmem:[#allocation63_spill] sm:$0xff]  ;;  %v14108_v7 = vld [vmem:[#allocation66_spill] sm:$0xff] }
0x20f4   : > { %v7570_v54 = vpop.permute.xlu1 %7569 }
0x20f5   : > { %v7590_v32 = vsel %vm2413_vm8, %v7589_v18, %v7570_v54  ;;  %v14106_v54 = vld [vmem:[#allocation64_spill] sm:$0xff]  ;;  %v14109_v18 = vld [vmem:[#allocation67_spill] sm:$0xff] }
0x20fc   : > { %v7574_v58 = vpop.permute.xlu0 %7573 }
0x20fd   : > { %v7591_v43 = vsel %vm2415_vm9, %v7590_v32, %v7574_v58  ;;  %v14107_v58 = vld [vmem:[#allocation65_spill] sm:$0xff] }
0x20fe   : > { %v14111_v32 = vld [vmem:[#allocation69_spill] sm:$0xff] }
0x210e   : > { %v7578_v29 = vpop.permute.xlu1 %7577 }
0x210f   : > { %v7592_v61 = vsel %vm2417_vm10, %v7591_v43, %v7578_v29  ;;  %v14110_v29 = vld [vmem:[#allocation68_spill] sm:$0xff]  ;;  %v14113_v43 = vld [vmem:[#allocation71_spill] sm:$0xff] }
0x2116   : > { %v7582_v47 = vpop.permute.xlu0 %7581 }
0x2117   : > { %v7593_v33 = vsel %vm2419_vm11, %v7592_v61, %v7582_v47  ;;  %v14112_v47 = vld [vmem:[#allocation70_spill] sm:$0xff]  ;;  %v14114_v61 = vld [vmem:[#allocation72_spill] sm:$0xff] }
0x211e   : > { %v7586_v36 = vpop.permute.xlu1 %7585 }
0x211f   : > { %v7594_v37 = vsel %vm2421_vm12, %v7593_v33, %v7586_v36  ;;  %v14115_v33 = vld [vmem:[#allocation73_spill] sm:$0xff]  ;;  %v14116_v36 = vld [vmem:[#allocation74_spill] sm:$0xff] }
0x2120   : > { %v13260_v45 = vadd.f32 %v7594_v37, %v13039_v23  ;;  %v14117_v37 = vld [vmem:[#allocation75_spill] sm:$0xff] }
0x2122   : > { %v7596_v49 = vsel %vm1240_vm0, %v13260_v45, 0.0 }
0x2123   : > { %7597 = vadd.xlane.f32.xlu0 %v7596_v49  ;;  %v14118_v49 = vld [vmem:[#allocation76_spill] sm:$0xff] }
0x21b0   : > { %v7598_v27 = vpop.xlane.xlu0 %7597 }
0x21b1   : > { %v7599_v55 = vmul.f32 0.0078125, %v7598_v27  ;;  %v14119_v27 = vld [vmem:[#allocation77_spill] sm:$0xff] }
0x21b3   : > { %v7600_v59 = vsub.f32 %v13260_v45, %v7599_v55  ;;  %v14120_v55 = vld [vmem:[#allocation78_spill] sm:$0xff] }
0x21b5   : > { %v7601_v16 = vmul.f32 %v7600_v59, %v7600_v59 }
0x21b7   : > { %v7602_v12 = vsel %vm1240_vm0, %v7601_v16, 0.0  ;;  %v14122_v16 = vld [vmem:[#allocation80_spill] sm:$0xff] }
0x21b8   : > { %7603 = vadd.xlane.f32.xlu1 %v7602_v12  ;;  %v14123_v12 = vld [vmem:[#allocation81_spill] sm:$0xff] }
0x2245   : > { %v7604_v11 = vpop.xlane.xlu1 %7603 }
0x2246   : > { %v7605_v22 = vmul.f32 0.0078125, %v7604_v11  ;;  %v14124_v11 = vld [vmem:[#allocation82_spill] sm:$0xff] }
0x2248   : > { %v7606_v2 = vadd.f32 1e-05, %v7605_v22  ;;  %v14125_v22 = vld [vmem:[#allocation83_spill] sm:$0xff] }
0x224a   : > { %10571 = vrsqrt.f32 %v7606_v2  ;;  %v14126_v2 = vld [vmem:[#allocation84_spill] sm:$0xff] }
0x2254   : > { %v10572_v21 = vpop.eup %10571 }
0x2255   : > { %v7608_v28 = vmul.f32 %v10572_v21, %v7600_v59  ;;  %v14121_v59 = vld [vmem:[#allocation79_spill] sm:$0xff]  ;;  %v14127_v21 = vld [vmem:[#allocation85_spill] sm:$0xff] }
0x2257   : > { %v7609_v23 = vmul.f32 %v13048_v31, %v7608_v28  ;;  %v14083_v31 = vld [vmem:[#allocation41_spill] sm:$0xff]  ;;  %v14128_v28 = vld [vmem:[#allocation86_spill] sm:$0xff] }
0x2259   : > { %v7610_v30 = vadd.f32 %v13054_v48, %v7609_v23  ;;  %v14084_v48 = vld [vmem:[#allocation42_spill] sm:$0xff]  ;;  %v14129_v23 = vld [vmem:[#allocation87_spill] sm:$0xff] }
0x225b   : > { %v13268_v24 = vpack.c.bf16 %v7610_v30, %v7610_v30  ;;  %v14130_v30 = vld [vmem:[#allocation88_spill] sm:$0xff] }
0x225d   : > { %7645 = vmatmul.mubr.bf16.vlgmr.msra.gmra.mrb[160].mxu0 %v13268_v24  ;;  %7686 = vmatmul.mubr.bf16.vlgmr.msra.gmra.mrb[188].mxu1 %v13268_v24 }
0x225e   : > { %7695 = vmatpush1.bf16.msra.mxu0 %v14079_v10  ;;  %7736 = vmatpush1.bf16.msra.mxu1 %v14080_v9  ;;  %v14131_v10 = vld [vmem:[#allocation89_spill] sm:$0xff]  ;;  %v14132_v9 = vld [vmem:[#allocation90_spill] sm:$0xff] }
0x225f   : > { %7696 = vmatprep.subr.bf16.mxu0 %v14081_v44  ;;  %7737 = vmatprep.subr.bf16.mxu1 %v14082_v13  ;;  %v14133_v44 = vld [vmem:[#allocation91_spill] sm:$0xff]  ;;  %v14134_v13 = vld [vmem:[#allocation92_spill] sm:$0xff] }
0x2260   : > { %7726 = vmatprep.mubr.bf16.mxu0 %v13854_v25  ;;  %7767 = vmatprep.mubr.bf16.mxu1 %v13854_v25 }
0x2262   : > { %7697 = vmatpush1.bf16.msra.mxu0 %v14083_v31  ;;  %7738 = vmatpush1.bf16.msra.mxu1 %v14084_v48  ;;  %v14135_v31 = vld [vmem:[#allocation93_spill] sm:$0xff]  ;;  %v14136_v48 = vld [vmem:[#allocation94_spill] sm:$0xff] }
0x2263   : > { %7698 = vmatprep.subr.bf16.mxu0 %v14085_v5  ;;  %7739 = vmatprep.subr.bf16.mxu1 %v14086_v1  ;;  %v14137_v5 = vld [vmem:[#allocation95_spill] sm:$0xff]  ;;  %v14138_v1 = vld [vmem:[#allocation96_spill] sm:$0xff] }
0x2266   : > { %7699 = vmatpush1.bf16.msra.mxu0 %v14087_v56  ;;  %7740 = vmatpush1.bf16.msra.mxu1 %v14088_v14  ;;  %v14139_v56 = vld [vmem:[#allocation97_spill] sm:$0xff]  ;;  %v14140_v14 = vld [vmem:[#allocation98_spill] sm:$0xff] }
0x2267   : > { %7700 = vmatprep.subr.bf16.mxu0 %v14089_v15  ;;  %7741 = vmatprep.subr.bf16.mxu1 %v14090_v6  ;;  %v14141_v15 = vld [vmem:[#allocation99_spill] sm:$0xff]  ;;  %v14142_v6 = vld [vmem:[#allocation100_spill] sm:$0xff] }
0x226a   : > { %7701 = vmatpush1.bf16.msra.mxu0 %v14091_v0  ;;  %7742 = vmatpush1.bf16.msra.mxu1 %v14092_v20  ;;  %v14143_v0 = vld [vmem:[#allocation101_spill] sm:$0xff]  ;;  %v14144_v20 = vld [vmem:[#allocation102_spill] sm:$0xff] }
0x226b   : > { %7702 = vmatprep.subr.bf16.mxu0 %v14093_v4  ;;  %7743 = vmatprep.subr.bf16.mxu1 %v14094_v26  ;;  %v14145_v4 = vld [vmem:[#allocation103_spill] sm:$0xff]  ;;  %v14146_v26 = vld [vmem:[#allocation104_spill] sm:$0xff] }
0x226e   : > { %7703 = vmatpush1.bf16.msra.mxu0 %v14095_v3  ;;  %7744 = vmatpush1.bf16.msra.mxu1 %v14096_v39  ;;  %v14147_v3 = vld [vmem:[#allocation105_spill] sm:$0xff]  ;;  %v14148_v39 = vld [vmem:[#allocation106_spill] sm:$0xff] }
0x226f   : > { %7704 = vmatprep.subr.bf16.mxu0 %v14097_v52  ;;  %7745 = vmatprep.subr.bf16.mxu1 %v14098_v57  ;;  %v14149_v52 = vld [vmem:[#allocation107_spill] sm:$0xff]  ;;  %v14150_v57 = vld [vmem:[#allocation108_spill] sm:$0xff] }
0x2272   : > { %7705 = vmatpush1.bf16.msra.mxu0 %v14099_v60  ;;  %7746 = vmatpush1.bf16.msra.mxu1 %v14100_v17  ;;  %v14151_v60 = vld [vmem:[#allocation109_spill] sm:$0xff]  ;;  %v14152_v17 = vld [vmem:[#allocation110_spill] sm:$0xff] }
0x2273   : > { %7706 = vmatprep.subr.bf16.mxu0 %v14101_v35  ;;  %7747 = vmatprep.subr.bf16.mxu1 %v14102_v40  ;;  %v14153_v35 = vld [vmem:[#allocation111_spill] sm:$0xff]  ;;  %v14154_v40 = vld [vmem:[#allocation112_spill] sm:$0xff] }
0x2276   : > { %7707 = vmatpush1.bf16.msra.mxu0 %v14103_v41  ;;  %7748 = vmatpush1.bf16.msra.mxu1 %v14104_v53  ;;  %v14155_v41 = vld [vmem:[#allocation113_spill] sm:$0xff]  ;;  %v14156_v53 = vld [vmem:[#allocation114_spill] sm:$0xff] }
0x2277   : > { %7708 = vmatprep.subr.bf16.mxu0 %v14105_v50  ;;  %7749 = vmatprep.subr.bf16.mxu1 %v14106_v54  ;;  %v14158_v50 = vld [vmem:[#allocation116_spill] sm:$0xff]  ;;  %v14159_v54 = vld [vmem:[#allocation117_spill] sm:$0xff] }
0x227a   : > { %7709 = vmatpush1.bf16.msra.mxu0 %v14107_v58  ;;  %7750 = vmatpush1.bf16.msra.mxu1 %v14108_v7  ;;  %v14160_v58 = vld [vmem:[#allocation118_spill] sm:$0xff]  ;;  %v14161_v7 = vld [vmem:[#allocation119_spill] sm:$0xff] }
0x227b   : > { %7776 = vmatprep.subr.bf16.mxu0 %v14109_v18  ;;  %7817 = vmatprep.subr.bf16.mxu1 %v14110_v29  ;;  %v14162_v18 = vld [vmem:[#allocation120_spill] sm:$0xff]  ;;  %v14163_v29 = vld [vmem:[#allocation121_spill] sm:$0xff] }
0x227d   : > { %7727 = vmatmul.mubr.bf16.vlgmr.msra.gmra.mrb[164].mxu0 %v13268_v24  ;;  %7768 = vmatmul.mubr.bf16.vlgmr.msra.gmra.mrb[192].mxu1 %v13268_v24 }
0x227e   : > { %7777 = vmatpush1.bf16.msra.mxu0 %v14111_v32  ;;  %7818 = vmatpush1.bf16.msra.mxu1 %v14112_v47  ;;  %v14164_v32 = vld [vmem:[#allocation122_spill] sm:$0xff]  ;;  %v14165_v47 = vld [vmem:[#allocation123_spill] sm:$0xff] }
0x227f   : > { %7778 = vmatprep.subr.bf16.mxu0 %v14113_v43  ;;  %7819 = vmatprep.subr.bf16.mxu1 %v14114_v61  ;;  %v14166_v43 = vld [vmem:[#allocation124_spill] sm:$0xff]  ;;  %v14167_v61 = vld [vmem:[#allocation125_spill] sm:$0xff] }
0x2280   : > { %7808 = vmatprep.mubr.bf16.mxu0 %v13854_v25  ;;  %7849 = vmatprep.mubr.bf16.mxu1 %v13854_v25 }
0x2282   : > { %7779 = vmatpush1.bf16.msra.mxu0 %v14115_v33  ;;  %7820 = vmatpush1.bf16.msra.mxu1 %v14116_v36  ;;  %v14168_v33 = vld [vmem:[#allocation126_spill] sm:$0xff]  ;;  %v14169_v36 = vld [vmem:[#allocation127_spill] sm:$0xff] }
0x2283   : > { %7780 = vmatprep.subr.bf16.mxu0 %v14117_v37  ;;  %7821 = vmatprep.subr.bf16.mxu1 %v14118_v49  ;;  %v14170_v37 = vld [vmem:[#allocation128_spill] sm:$0xff]  ;;  %v14171_v49 = vld [vmem:[#allocation129_spill] sm:$0xff] }
0x2286   : > { %7781 = vmatpush1.bf16.msra.mxu0 %v14119_v27  ;;  %7822 = vmatpush1.bf16.msra.mxu1 %v14120_v55  ;;  %v14172_v27 = vld [vmem:[#allocation130_spill] sm:$0xff]  ;;  %v10788_v55 = vld [vmem:[#allocation8 + $0x40] sm:$0xff]  }
0x2287   : > { %7782 = vmatprep.subr.bf16.mxu0 %v14121_v59  ;;  %7823 = vmatprep.subr.bf16.mxu1 %v14122_v16  ;;  %v10789_v59 = vld [vmem:[#allocation8 + $0xc0] sm:$0xff]  }
0x2288   : > { %v10790_v16 = vld [vmem:[#allocation8] sm:$0xff]  }
0x228a   : > { %7783 = vmatpush1.bf16.msra.mxu0 %v14123_v12  ;;  %7824 = vmatpush1.bf16.msra.mxu1 %v14124_v11  ;;  %v10791_v12 = vld [vmem:[#allocation8 + $0x80] sm:$0xff]   ;;  %v10792_v11 = vld [vmem:[#allocation8 + $0x48] sm:$0xff]  }
0x228b   : > { %7784 = vmatprep.subr.bf16.mxu0 %v14125_v22  ;;  %7825 = vmatprep.subr.bf16.mxu1 %v14126_v2  ;;  %v10793_v22 = vld [vmem:[#allocation8 + $0xc8] sm:$0xff]  }
0x228c   : > { %v10794_v2 = vld [vmem:[#allocation8 + $0x8] sm:$0xff]  }
0x228e   : > { %7785 = vmatpush1.bf16.msra.mxu0 %v14127_v21  ;;  %7826 = vmatpush1.bf16.msra.mxu1 %v14128_v28  ;;  %v10795_v21 = vld [vmem:[#allocation8 + $0x88] sm:$0xff]   ;;  %v10796_v28 = vld [vmem:[#allocation8 + $0x50] sm:$0xff]  }
0x228f   : > { %7786 = vmatprep.subr.bf16.mxu0 %v14129_v23  ;;  %7827 = vmatprep.subr.bf16.mxu1 %v14130_v30  ;;  %v10797_v23 = vld [vmem:[#allocation8 + $0xd0] sm:$0xff]  }
0x2290   : > { %v10798_v30 = vld [vmem:[#allocation8 + $0x10] sm:$0xff]  }
0x2292   : > { %7787 = vmatpush1.bf16.msra.mxu0 %v14131_v10  ;;  %7828 = vmatpush1.bf16.msra.mxu1 %v14132_v9  ;;  %v10799_v10 = vld [vmem:[#allocation8 + $0x90] sm:$0xff]   ;;  %v10801_v9 = vld [vmem:[#allocation8 + $0xd8] sm:$0xff]  }
0x2293   : > { %7788 = vmatprep.subr.bf16.mxu0 %v14133_v44  ;;  %7829 = vmatprep.subr.bf16.mxu1 %v14134_v13  ;;  %v10802_v44 = vld [vmem:[#allocation8 + $0x18] sm:$0xff]  }
0x2294   : > { %v10803_v13 = vld [vmem:[#allocation8 + $0x98] sm:$0xff]  }
0x2296   : > { %7789 = vmatpush1.bf16.msra.mxu0 %v14135_v31  ;;  %7830 = vmatpush1.bf16.msra.mxu1 %v14136_v48  ;;  %v10804_v31 = vld [vmem:[#allocation8 + $0x60] sm:$0xff]  }
0x2297   : > { %7790 = vmatprep.subr.bf16.mxu0 %v14137_v5  ;;  %7831 = vmatprep.subr.bf16.mxu1 %v14138_v1  ;;  %v10805_v48 = vld [vmem:[#allocation8 + $0xe0] sm:$0xff]  }
0x2298   : > { %v10806_v5 = vld [vmem:[#allocation8 + $0x20] sm:$0xff]  }
0x2299   : > { %v10807_v1 = vld [vmem:[#allocation8 + $0xa0] sm:$0xff]  }
0x229a   : > { %7791 = vmatpush1.bf16.msra.mxu0 %v14139_v56  ;;  %7832 = vmatpush1.bf16.msra.mxu1 %v14140_v14  ;;  %v10808_v56 = vld [vmem:[#allocation8 + $0x68] sm:$0xff]  }
0x229b   : > { %7858 = vmatprep.subr.bf16.mxu0 %v14141_v15  ;;  %7899 = vmatprep.subr.bf16.mxu1 %v14142_v6  ;;  %v10809_v14 = vld [vmem:[#allocation8 + $0xe8] sm:$0xff]  }
0x229c   : > { %v10810_v15 = vld [vmem:[#allocation8 + $0x28] sm:$0xff]  }
0x229d   : > { %7809 = vmatmul.mubr.bf16.vlgmr.msra.gmra.mrb[168].mxu0 %v13268_v24  ;;  %7850 = vmatmul.mubr.bf16.vlgmr.msra.gmra.mrb[196].mxu1 %v13268_v24  ;;  %v10811_v6 = vld [vmem:[#allocation8 + $0xa8] sm:$0xff]  }
0x229e   : > { %7859 = vmatpush1.bf16.msra.mxu0 %v14143_v0  ;;  %7900 = vmatpush1.bf16.msra.mxu1 %v14144_v20  ;;  %v10812_v0 = vld [vmem:[#allocation8 + $0x70] sm:$0xff]  }
0x229f   : > { %7860 = vmatprep.subr.bf16.mxu0 %v14145_v4  ;;  %7901 = vmatprep.subr.bf16.mxu1 %v14146_v26  ;;  %v10813_v20 = vld [vmem:[#allocation8 + $0xf0] sm:$0xff]  }
0x22a0   : > { %7890 = vmatprep.mubr.bf16.mxu0 %v13854_v25  ;;  %7931 = vmatprep.mubr.bf16.mxu1 %v13854_v25  ;;  %v14157_v25 = vld [vmem:[#allocation115_spill] sm:$0xff]  ;;  %v10814_v4 = vld [vmem:[#allocation8 + $0x30] sm:$0xff]  }
0x22a1   : > { %v10815_v26 = vld [vmem:[#allocation8 + $0xb0] sm:$0xff]  }
0x22a2   : > { %7861 = vmatpush1.bf16.msra.mxu0 %v14147_v3  ;;  %7902 = vmatpush1.bf16.msra.mxu1 %v14148_v39  ;;  %v10816_v3 = vld [vmem:[#allocation8 + $0x78] sm:$0xff]  }
0x22a3   : > { %7862 = vmatprep.subr.bf16.mxu0 %v14149_v52  ;;  %7903 = vmatprep.subr.bf16.mxu1 %v14150_v57  ;;  %v10817_v39 = vld [vmem:[#allocation8 + $0xf8] sm:$0xff]  }
0x22a4   : > { %v10818_v52 = vld [vmem:[#allocation8 + $0x38] sm:$0xff]  }
0x22a5   : > { %v10819_v57 = vld [vmem:[#allocation8 + $0xb8] sm:$0xff]  }
0x22a6   : > { %7863 = vmatpush1.bf16.msra.mxu0 %v14151_v60  ;;  %7904 = vmatpush1.bf16.msra.mxu1 %v14152_v17  ;;  %v10820_v60 = vld [vmem:[#allocation8 + $0x140] sm:$0xff]  }
0x22a7   : > { %7864 = vmatprep.subr.bf16.mxu0 %v14153_v35  ;;  %7905 = vmatprep.subr.bf16.mxu1 %v14154_v40  ;;  %v10821_v17 = vld [vmem:[#allocation8 + $0x1c0] sm:$0xff]  }
0x22aa   : > { %7865 = vmatpush1.bf16.msra.mxu0 %v14155_v41  ;;  %7906 = vmatpush1.bf16.msra.mxu1 %v14156_v53  ;;  %v14173_v41 = vld [vmem:[#allocation131_spill] sm:$0xff] }
0x22ab   : > { %7866 = vmatprep.subr.bf16.mxu0 %v14157_v25  ;;  %7907 = vmatprep.subr.bf16.mxu1 %v14158_v50  ;;  %v14174_v25 = vld [vmem:[#allocation132_spill] sm:$0xff] }
0x22ae   : > { %7867 = vmatpush1.bf16.msra.mxu0 %v14159_v54  ;;  %7908 = vmatpush1.bf16.msra.mxu1 %v14160_v58 }
0x22af   : > { %7868 = vmatprep.subr.bf16.mxu0 %v14161_v7  ;;  %7909 = vmatprep.subr.bf16.mxu1 %v14162_v18  ;;  %v14175_v7 = vld [vmem:[#allocation133_spill] sm:$0xff] }
0x22b2   : > { %7869 = vmatpush1.bf16.msra.mxu0 %v14163_v29  ;;  %7910 = vmatpush1.bf16.msra.mxu1 %v14164_v32  ;;  %v14176_v29 = vld [vmem:[#allocation134_spill] sm:$0xff] }
0x22b3   : > { %7870 = vmatprep.subr.bf16.mxu0 %v14165_v47  ;;  %7911 = vmatprep.subr.bf16.mxu1 %v14166_v43 }
0x22b6   : > { %7871 = vmatpush1.bf16.msra.mxu0 %v14167_v61  ;;  %7912 = vmatpush1.bf16.msra.mxu1 %v14168_v33 }
0x22b7   : > { %7872 = vmatprep.subr.bf16.mxu0 %v14169_v36  ;;  %7913 = vmatprep.subr.bf16.mxu1 %v14170_v37 }
0x22ba   : > { %7873 = vmatpush1.bf16.msra.mxu0 %v14171_v49  ;;  %7914 = vmatpush1.bf16.msra.mxu1 %v14172_v27 }
0x22bb   : > { %9549 = vmatprep.subr.bf16.mxu0 %v10788_v55  ;;  %9571 = vmatprep.subr.bf16.mxu1 %v10789_v59 }
0x22bd   : > { %7891 = vmatmul.mubr.bf16.vlgmr.msra.gmra.mrb[172].mxu0 %v13268_v24  ;;  %7932 = vmatmul.mubr.bf16.vlgmr.msra.gmra.mrb[200].mxu1 %v13268_v24  ;;  %v10800_v24 = vld [vmem:[#allocation8 + $0x58] sm:$0xff]  }
0x22be   : > { %9550 = vmatpush3.bf16.msra.mxu0 %v10790_v16  ;;  %9572 = vmatpush3.bf16.msra.mxu1 %v10791_v12 }
0x22bf   : > { %9551 = vmatprep.subr.bf16.mxu0 %v10792_v11  ;;  %9573 = vmatprep.subr.bf16.mxu1 %v10793_v22 }
0x22c2   : > { %9552 = vmatpush3.bf16.msra.mxu0 %v10794_v2  ;;  %9574 = vmatpush3.bf16.msra.mxu1 %v10795_v21 }
0x22c3   : > { %9553 = vmatprep.subr.bf16.mxu0 %v10796_v28  ;;  %9575 = vmatprep.subr.bf16.mxu1 %v10797_v23 }
0x22c6   : > { %9554 = vmatpush3.bf16.msra.mxu0 %v10798_v30  ;;  %9576 = vmatpush3.bf16.msra.mxu1 %v10799_v10 }
0x22c7   : > { %9555 = vmatprep.subr.bf16.mxu0 %v10800_v24  ;;  %9577 = vmatprep.subr.bf16.mxu1 %v10801_v9 }
0x22ca   : > { %9556 = vmatpush3.bf16.msra.mxu0 %v10802_v44  ;;  %9578 = vmatpush3.bf16.msra.mxu1 %v10803_v13 }
0x22cb   : > { %9557 = vmatprep.subr.bf16.mxu0 %v10804_v31  ;;  %9579 = vmatprep.subr.bf16.mxu1 %v10805_v48 }
0x22ce   : > { %9558 = vmatpush3.bf16.msra.mxu0 %v10806_v5  ;;  %9580 = vmatpush3.bf16.msra.mxu1 %v10807_v1 }
0x22cf   : > { %9559 = vmatprep.subr.bf16.mxu0 %v10808_v56  ;;  %9581 = vmatprep.subr.bf16.mxu1 %v10809_v14 }
0x22d2   : > { %9560 = vmatpush3.bf16.msra.mxu0 %v10810_v15  ;;  %9582 = vmatpush3.bf16.msra.mxu1 %v10811_v6 }
0x22d3   : > { %9561 = vmatprep.subr.bf16.mxu0 %v10812_v0  ;;  %9583 = vmatprep.subr.bf16.mxu1 %v10813_v20 }
0x22d6   : > { %9562 = vmatpush3.bf16.msra.mxu0 %v10814_v4  ;;  %9584 = vmatpush3.bf16.msra.mxu1 %v10815_v26 }
0x22d7   : > { %9563 = vmatprep.subr.bf16.mxu0 %v10816_v3  ;;  %9585 = vmatprep.subr.bf16.mxu1 %v10817_v39 }
0x22da   : > { %9564 = vmatpush3.bf16.msra.mxu0 %v10818_v52  ;;  %9586 = vmatpush3.bf16.msra.mxu1 %v10819_v57 }
0x22db   : > { %9593 = vmatprep.subr.bf16.mxu0 %v10820_v60  ;;  %9615 = vmatprep.subr.bf16.mxu1 %v10821_v17 }
0x2330   : > { %v7646_v35 = vpop.f32.mrb[160].mxu0  ;;  %v7687_v40 = vpop.f32.mrb[188].mxu1 }
0x2331   : > { %v7647_v53 = vadd.f32 %v7646_v35, %v14173_v41  ;;  %v7688_v50 = vadd.f32 %v7687_v40, %v14174_v25  ;;  %v7648_v54 = vpop.f32.mrb[161].mxu0  ;;  %v7689_v58 = vpop.f32.mrb[189].mxu1 }
0x2332   : > { %v7649_v18 = vadd.f32 %v7648_v54, %v14175_v7  ;;  %v7690_v32 = vadd.f32 %v7689_v58, %v14176_v29  ;;  %v7650_v47 = vpop.f32.mrb[162].mxu0  ;;  %v7691_v43 = vpop.f32.mrb[190].mxu1  ;;  %v10822_v7 = vld [vmem:[#allocation8 + $0x100] sm:$0xff]  }
0x2333   : > { %v7956_v61 = vmul.f32 0.044715, %v7647_v53  ;;  %v7958_v33 = vmul.f32 0.044715, %v7688_v50  ;;  %v7651_v36 = vpop.f32.mrb[163].mxu0  ;;  %v7692_v37 = vpop.f32.mrb[191].mxu1 }
0x2334   : > { %v7957_v49 = vmul.f32 0.044715, %v7649_v18  ;;  %v7959_v27 = vmul.f32 0.044715, %v7690_v32  ;;  %v7940_v5 = vmul.f32 0.5, %v7647_v53  ;;  %v7941_v14 = vmul.f32 0.5, %v7649_v18 }
0x2335   : > { %v7972_v55 = vmul.f32 %v7956_v61, %v7647_v53  ;;  %v7974_v59 = vmul.f32 %v7958_v33, %v7688_v50  ;;  %v7943_v0 = vmul.f32 0.5, %v7690_v32  ;;  %v7942_v3 = vmul.f32 0.5, %v7688_v50  ;;  %v10825_v37 = vld [vmem:[#allocation8 + $0x1c8] sm:$0xff]  }
0x2336   : > { %v7973_v16 = vmul.f32 %v7957_v49, %v7649_v18  ;;  %v7975_v12 = vmul.f32 %v7959_v27, %v7690_v32 }
0x2337   : > { %v7988_v11 = vmul.f32 %v7972_v55, %v7647_v53  ;;  %v7990_v22 = vmul.f32 %v7974_v59, %v7688_v50  ;;  %v10826_v55 = vld [vmem:[#allocation8 + $0x108] sm:$0xff]  }
0x2338   : > { %v7989_v2 = vmul.f32 %v7973_v16, %v7649_v18  ;;  %v7991_v21 = vmul.f32 %v7975_v12, %v7690_v32  ;;  %v10827_v12 = vld [vmem:[#allocation8 + $0x188] sm:$0xff]  }
0x2339   : > { %v8004_v28 = vadd.f32 %v7988_v11, %v7647_v53  ;;  %v8006_v23 = vadd.f32 %v7990_v22, %v7688_v50  ;;  %v10828_v11 = vld [vmem:[#allocation8 + $0x150] sm:$0xff]  }
0x233a   : > { %v8005_v30 = vadd.f32 %v7989_v2, %v7649_v18  ;;  %v8007_v10 = vadd.f32 %v7991_v21, %v7690_v32  ;;  %v10823_v32 = vld [vmem:[#allocation8 + $0x180] sm:$0xff]   ;;  %v10829_v21 = vld [vmem:[#allocation8 + $0x1d0] sm:$0xff]  }
0x233b   : > { %v8020_v24 = vmul.f32 0.7978846, %v8004_v28  ;;  %v8022_v13 = vmul.f32 0.7978846, %v8006_v23 }
0x233c   : > { %v8021_v9 = vmul.f32 0.7978846, %v8005_v30  ;;  %v8023_v44 = vmul.f32 0.7978846, %v8007_v10 }
0x233d   : > { %10573 = vtanh.f32 %v8020_v24  ;;  %v10830_v24 = vld [vmem:[#allocation8 + $0x110] sm:$0xff]  }
0x233e   : > { %10575 = vtanh.f32 %v8021_v9  ;;  %v10831_v9 = vld [vmem:[#allocation8 + $0x190] sm:$0xff]  }
0x233f   : > { %10577 = vtanh.f32 %v8023_v44  ;;  %v10832_v44 = vld [vmem:[#allocation8 + $0x158] sm:$0xff]  }
0x2340   : > { %10579 = vtanh.f32 %v8022_v13 }
0x2347   : > { %v10574_v31 = vpop.eup %10573 }
0x2348   : > { %v10576_v48 = vpop.eup %10575  ;;  %v8052_v1 = vadd.f32 1.0, %v10574_v31 }
0x2349   : > { %v10578_v56 = vpop.eup %10577  ;;  %v8053_v15 = vadd.f32 1.0, %v10576_v48  ;;  %v10833_v48 = vld [vmem:[#allocation8 + $0x1d8] sm:$0xff]  }
0x234a   : > { %v10580_v6 = vpop.eup %10579  ;;  %v8055_v20 = vadd.f32 1.0, %v10578_v56  ;;  %v8068_v4 = vmul.f32 %v8052_v1, %v7940_v5 }
0x234b   : > { %v8069_v26 = vmul.f32 %v8053_v15, %v7941_v14  ;;  %v8054_v39 = vadd.f32 1.0, %v10580_v6  ;;  %v10834_v15 = vld [vmem:[#allocation8 + $0x118] sm:$0xff]  }
0x234c   : > { %v8071_v52 = vmul.f32 %v8055_v20, %v7943_v0  ;;  %v8084_v35 = vpack.c.bf16 %v8068_v4, %v8068_v4  ;;  %v10835_v6 = vld [vmem:[#allocation8 + $0x198] sm:$0xff]   ;;  %v10836_v0 = vld [vmem:[#allocation8 + $0x160] sm:$0xff]  }
0x234d   : > { %v8085_v57 = vpack.c.bf16 %v8069_v26, %v8069_v26  ;;  %v8070_v60 = vmul.f32 %v8054_v39, %v7942_v3  ;;  %v10837_v20 = vld [vmem:[#allocation8 + $0x1e0] sm:$0xff]   ;;  %v10840_v3 = vld [vmem:[#allocation8 + $0x168] sm:$0xff]  }
0x234e   : > { %v8087_v17 = vpack.c.bf16 %v8071_v52, %v8071_v52  ;;  %v10838_v4 = vld [vmem:[#allocation8 + $0x120] sm:$0xff]   ;;  %v10841_v39 = vld [vmem:[#allocation8 + $0x1e8] sm:$0xff]  }
0x234f   : > { %8132 = vmatprep.mubr.bf16.mxu0 %v8085_v57  ;;  %v8086_v40 = vpack.c.bf16 %v8070_v60, %v8070_v60  ;;  %v10839_v26 = vld [vmem:[#allocation8 + $0x1a0] sm:$0xff]   ;;  %v10842_v52 = vld [vmem:[#allocation8 + $0x128] sm:$0xff]   ;;  %v10844_v60 = vld [vmem:[#allocation8 + $0x170] sm:$0xff]  }
0x2350   : > { %v7728_v41 = vpop.f32.mrb[164].mxu0  ;;  %v7769_v53 = vpop.f32.mrb[192].mxu1  ;;  %8172 = vmatprep.mubr.bf16.mxu1 %v8087_v17  ;;  %8133 = vmatmul.mubr.bf16.vlgmr.msra.gmra.mrb[176].mxu0 %v8084_v35  ;;  %v10843_v57 = vld [vmem:[#allocation8 + $0x1a8] sm:$0xff]   ;;  %v10845_v35 = vld [vmem:[#allocation8 + $0x1f0] sm:$0xff]  }
0x2351   : > { %v13383_v25 = vadd.f32 %v7728_v41, %v12267_v63  ;;  %v13386_v54 = vadd.f32 %v7769_v53, %v12272_v51  ;;  %v7730_v58 = vpop.f32.mrb[165].mxu0  ;;  %v7771_v50 = vpop.f32.mrb[193].mxu1  ;;  %8173 = vmatmul.mubr.bf16.vlgmr.msra.gmra.mrb[204].mxu1 %v8086_v40  ;;  %9594 = vmatpush3.bf16.msra.mxu0 %v10822_v7  ;;  %v10824_v63 = vld [vmem:[#allocation8 + $0x148] sm:$0xff]  }
0x2352   : > { %v13389_v18 = vadd.f32 %v7730_v58, %v12277_v8  ;;  %v13392_v29 = vadd.f32 %v7771_v50, %v14064_v34  ;;  %9616 = vmatpush3.bf16.msra.mxu1 %v10823_v32  ;;  %v7732_v47 = vpop.f32.mrb[166].mxu0  ;;  %v7773_v43 = vpop.f32.mrb[194].mxu1  ;;  %9595 = vmatprep.subr.bf16.mxu0 %v10824_v63  ;;  %v10846_v50 = vld [vmem:[#allocation8 + $0x130] sm:$0xff]   ;;  %v10848_v63 = vld [vmem:[#allocation8 + $0x178] sm:$0xff]  }
0x2353   : > { %v7960_v51 = vmul.f32 0.044715, %v13383_v25  ;;  %v7962_v61 = vmul.f32 0.044715, %v13386_v54  ;;  %v7733_v33 = vpop.f32.mrb[167].mxu0  ;;  %v7774_v36 = vpop.f32.mrb[195].mxu1  ;;  %9617 = vmatprep.subr.bf16.mxu1 %v10825_v37 }
0x2354   : > { %v7961_v8 = vmul.f32 0.044715, %v13389_v18  ;;  %v7963_v49 = vmul.f32 0.044715, %v13392_v29  ;;  %v7944_v41 = vmul.f32 0.5, %v13383_v25  ;;  %v7945_v7 = vmul.f32 0.5, %v13389_v18 }
0x2355   : > { %v7976_v34 = vmul.f32 %v7960_v51, %v13383_v25  ;;  %v7978_v27 = vmul.f32 %v7962_v61, %v13386_v54  ;;  %9596 = vmatpush3.bf16.msra.mxu0 %v10826_v55  ;;  %v10847_v43 = vld [vmem:[#allocation8 + $0x1b0] sm:$0xff]   ;;  %v7947_v51 = vmul.f32 0.5, %v13392_v29  ;;  %v10849_v36 = vld [vmem:[#allocation8 + $0x1f8] sm:$0xff]  }
0x2356   : > { %v7977_v59 = vmul.f32 %v7961_v8, %v13389_v18  ;;  %v7979_v16 = vmul.f32 %v7963_v49, %v13392_v29  ;;  %9618 = vmatpush3.bf16.msra.mxu1 %v10827_v12  ;;  %9597 = vmatprep.subr.bf16.mxu0 %v10828_v11  ;;  %v10851_v55 = vld [vmem:[#allocation8 + $0x1b8] sm:$0xff]   ;;  %v10852_v12 = vld [vmem:[#allocation8 + $0x240] sm:$0xff]  }
0x2357   : > { %v7992_v22 = vmul.f32 %v7976_v34, %v13383_v25  ;;  %v7994_v2 = vmul.f32 %v7978_v27, %v13386_v54  ;;  %9619 = vmatprep.subr.bf16.mxu1 %v10829_v21  ;;  %v10850_v34 = vld [vmem:[#allocation8 + $0x138] sm:$0xff]   ;;  %v10853_v11 = vld [vmem:[#allocation8 + $0x2c0] sm:$0xff]  }
0x2358   : > { %v7993_v28 = vmul.f32 %v7977_v59, %v13389_v18  ;;  %v7995_v23 = vmul.f32 %v7979_v16, %v13392_v29 }
0x2359   : > { %v8008_v30 = vadd.f32 %v7992_v22, %v13383_v25  ;;  %v8010_v10 = vadd.f32 %v7994_v2, %v13386_v54  ;;  %9598 = vmatpush3.bf16.msra.mxu0 %v10830_v24  ;;  %v7946_v25 = vmul.f32 0.5, %v13386_v54  ;;  %v14177_v24 = vld [vmem:[#allocation138_spill] sm:$0xff] }
0x235a   : > { %9620 = vmatpush3.bf16.msra.mxu1 %v10831_v9  ;;  %9599 = vmatprep.subr.bf16.mxu0 %v10832_v44  ;;  %v8009_v13 = vadd.f32 %v7993_v28, %v13389_v18  ;;  %v8011_v31 = vadd.f32 %v7995_v23, %v13392_v29  ;;  %v10855_v44 = vld [vmem:[#allocation8 + $0x280] sm:$0xff]  }
0x235b   : > { %9621 = vmatprep.subr.bf16.mxu1 %v10833_v48  ;;  %v8024_v5 = vmul.f32 0.7978846, %v8008_v30  ;;  %v8026_v14 = vmul.f32 0.7978846, %v8010_v10  ;;  %v10854_v30 = vld [vmem:[#allocation8 + $0x200] sm:$0xff]  }
0x235c   : > { %v8025_v1 = vmul.f32 0.7978846, %v8009_v13  ;;  %v8027_v56 = vmul.f32 0.7978846, %v8011_v31 }
0x235d   : > { %9600 = vmatpush3.bf16.msra.mxu0 %v10834_v15  ;;  %10581 = vtanh.f32 %v8024_v5 }
0x235e   : > { %9622 = vmatpush3.bf16.msra.mxu1 %v10835_v6  ;;  %9601 = vmatprep.subr.bf16.mxu0 %v10836_v0  ;;  %10583 = vtanh.f32 %v8025_v1  ;;  %v10858_v0 = vld [vmem:[#allocation8 + $0x208] sm:$0xff]  }
0x235f   : > { %9623 = vmatprep.subr.bf16.mxu1 %v10837_v20  ;;  %10585 = vtanh.f32 %v8027_v56  ;;  %v10857_v56 = vld [vmem:[#allocation8 + $0x2c8] sm:$0xff]  }
0x2360   : > { %10587 = vtanh.f32 %v8026_v14 }
0x2361   : > { %9602 = vmatpush3.bf16.msra.mxu0 %v10838_v4 }
0x2362   : > { %9624 = vmatpush3.bf16.msra.mxu1 %v10839_v26  ;;  %9603 = vmatprep.subr.bf16.mxu0 %v10840_v3  ;;  %v10859_v26 = vld [vmem:[#allocation8 + $0x288] sm:$0xff]   ;;  %v10860_v3 = vld [vmem:[#allocation8 + $0x250] sm:$0xff]  }
0x2363   : > { %9625 = vmatprep.subr.bf16.mxu1 %v10841_v39 }
0x2365   : > { %9604 = vmatpush3.bf16.msra.mxu0 %v10842_v52 }
0x2366   : > { %9626 = vmatpush3.bf16.msra.mxu1 %v10843_v57  ;;  %9605 = vmatprep.subr.bf16.mxu0 %v10844_v60  ;;  %v10861_v57 = vld [vmem:[#allocation8 + $0x2d0] sm:$0xff]  }
0x2367   : > { %v10582_v17 = vpop.eup %10581  ;;  %9627 = vmatprep.subr.bf16.mxu1 %v10845_v35 }
0x2368   : > { %v10584_v40 = vpop.eup %10583  ;;  %v8056_v53 = vadd.f32 1.0, %v10582_v17 }
0x2369   : > { %v10586_v58 = vpop.eup %10585  ;;  %9606 = vmatpush3.bf16.msra.mxu0 %v10846_v50  ;;  %v8057_v32 = vadd.f32 1.0, %v10584_v40 }
0x236a   : > { %v10588_v47 = vpop.eup %10587  ;;  %9628 = vmatpush3.bf16.msra.mxu1 %v10847_v43  ;;  %9607 = vmatprep.subr.bf16.mxu0 %v10848_v63  ;;  %v8059_v61 = vadd.f32 1.0, %v10586_v58  ;;  %v8072_v33 = vmul.f32 %v8056_v53, %v7944_v41  ;;  %v10862_v41 = vld [vmem:[#allocation8 + $0x210] sm:$0xff]   ;;  %v10864_v58 = vld [vmem:[#allocation8 + $0x258] sm:$0xff]  }
0x236b   : > { %9629 = vmatprep.subr.bf16.mxu1 %v10849_v36  ;;  %v8073_v37 = vmul.f32 %v8057_v32, %v7945_v7  ;;  %v8058_v8 = vadd.f32 1.0, %v10588_v47  ;;  %v10863_v53 = vld [vmem:[#allocation8 + $0x290] sm:$0xff]   ;;  %v10865_v32 = vld [vmem:[#allocation8 + $0x2d8] sm:$0xff]   ;;  %v10868_v36 = vld [vmem:[#allocation8 + $0x260] sm:$0xff]  }
0x236c   : > { %v8075_v49 = vmul.f32 %v8059_v61, %v7947_v51  ;;  %v8088_v16 = vpack.c.bf16 %v8072_v33, %v8072_v33  ;;  %v10866_v61 = vld [vmem:[#allocation8 + $0x218] sm:$0xff]  }
0x236d   : > { %9608 = vmatpush3.bf16.msra.mxu0 %v10850_v34  ;;  %v8089_v18 = vpack.c.bf16 %v8073_v37, %v8073_v37  ;;  %v8074_v27 = vmul.f32 %v8058_v8, %v7946_v25  ;;  %v10867_v33 = vld [vmem:[#allocation8 + $0x298] sm:$0xff]   ;;  %v10869_v37 = vld [vmem:[#allocation8 + $0x2e0] sm:$0xff]   ;;  %v10873_v34 = vld [vmem:[#allocation8 + $0x2e8] sm:$0xff]  }
0x236e   : > { %9630 = vmatpush3.bf16.msra.mxu1 %v10851_v55  ;;  %v8091_v59 = vpack.c.bf16 %v8075_v49, %v8075_v49  ;;  %9637 = vmatprep.subr.bf16.mxu0 %v10852_v12  ;;  %v10870_v25 = vld [vmem:[#allocation8 + $0x220] sm:$0xff]   ;;  %v10872_v49 = vld [vmem:[#allocation8 + $0x268] sm:$0xff]   ;;  %v10876_v55 = vld [vmem:[#allocation8 + $0x270] sm:$0xff]  }
0x236f   : > { %8212 = vmatprep.mubr.bf16.mxu0 %v8089_v18  ;;  %v8090_v29 = vpack.c.bf16 %v8074_v27, %v8074_v27  ;;  %9659 = vmatprep.subr.bf16.mxu1 %v10853_v11  ;;  %v10871_v8 = vld [vmem:[#allocation8 + $0x2a0] sm:$0xff]   ;;  %v10874_v18 = vld [vmem:[#allocation8 + $0x228] sm:$0xff]  }
0x2370   : > { %8252 = vmatprep.mubr.bf16.mxu1 %v8091_v59  ;;  %v7810_v22 = vpop.f32.mrb[168].mxu0  ;;  %v7851_v2 = vpop.f32.mrb[196].mxu1  ;;  %8213 = vmatmul.mubr.bf16.vlgmr.msra.gmra.mrb[180].mxu0 %v8088_v16  ;;  %v10875_v27 = vld [vmem:[#allocation8 + $0x2a8] sm:$0xff]   ;;  %v10877_v16 = vld [vmem:[#allocation8 + $0x2f0] sm:$0xff]  }
0x2371   : > { %v13415_v54 = vadd.f32 %v7810_v22, %v12323_v42  ;;  %v13418_v21 = vadd.f32 %v7851_v2, %v14065_v19  ;;  %8253 = vmatmul.mubr.bf16.vlgmr.msra.gmra.mrb[208].mxu1 %v8090_v29  ;;  %v7812_v28 = vpop.f32.mrb[169].mxu0  ;;  %v7853_v23 = vpop.f32.mrb[197].mxu1  ;;  %9638 = vmatpush3.bf16.msra.mxu0 %v10854_v30  ;;  %v10856_v42 = vld [vmem:[#allocation8 + $0x248] sm:$0xff]   ;;  %v10878_v2 = vld [vmem:[#allocation8 + $0x230] sm:$0xff]  }
0x2372   : > { %v13421_v10 = vadd.f32 %v7812_v28, %v14066_v62  ;;  %v13424_v9 = vadd.f32 %v7853_v23, %v14177_v24  ;;  %9660 = vmatpush3.bf16.msra.mxu1 %v10855_v44  ;;  %v7814_v13 = vpop.f32.mrb[170].mxu0  ;;  %v7855_v31 = vpop.f32.mrb[198].mxu1  ;;  %9639 = vmatprep.subr.bf16.mxu0 %v10856_v42  ;;  %v10879_v24 = vld [vmem:[#allocation8 + $0x2b0] sm:$0xff]   ;;  %v10880_v44 = vld [vmem:[#allocation8 + $0x278] sm:$0xff]  }
0x2373   : > { %v7964_v19 = vmul.f32 0.044715, %v13415_v54  ;;  %v7966_v48 = vmul.f32 0.044715, %v13418_v21  ;;  %v7815_v5 = vpop.f32.mrb[171].mxu0  ;;  %v7856_v1 = vpop.f32.mrb[199].mxu1  ;;  %9661 = vmatprep.subr.bf16.mxu1 %v10857_v56 }
0x2374   : > { %v7965_v62 = vmul.f32 0.044715, %v13421_v10  ;;  %v7967_v14 = vmul.f32 0.044715, %v13424_v9  ;;  %v7948_v29 = vmul.f32 0.5, %v13415_v54  ;;  %v7949_v28 = vmul.f32 0.5, %v13421_v10 }
0x2375   : > { %v7980_v15 = vmul.f32 %v7964_v19, %v13415_v54  ;;  %v7982_v6 = vmul.f32 %v7966_v48, %v13418_v21  ;;  %9640 = vmatpush3.bf16.msra.mxu0 %v10858_v0  ;;  %v7951_v13 = vmul.f32 0.5, %v13424_v9  ;;  %v10881_v19 = vld [vmem:[#allocation8 + $0x2f8] sm:$0xff]   ;;  %v10884_v0 = vld [vmem:[#allocation8 + $0x340] sm:$0xff]  }
0x2376   : > { %v7981_v20 = vmul.f32 %v7965_v62, %v13421_v10  ;;  %v7983_v4 = vmul.f32 %v7967_v14, %v13424_v9  ;;  %9662 = vmatpush3.bf16.msra.mxu1 %v10859_v26  ;;  %9641 = vmatprep.subr.bf16.mxu0 %v10860_v3  ;;  %v10882_v56 = vld [vmem:[#allocation8 + $0x238] sm:$0xff]  }
0x2377   : > { %v7996_v39 = vmul.f32 %v7980_v15, %v13415_v54  ;;  %v7998_v52 = vmul.f32 %v7982_v6, %v13418_v21  ;;  %9663 = vmatprep.subr.bf16.mxu1 %v10861_v57  ;;  %v10883_v14 = vld [vmem:[#allocation8 + $0x2b8] sm:$0xff]  }
0x2378   : > { %v7997_v60 = vmul.f32 %v7981_v20, %v13421_v10  ;;  %v7999_v17 = vmul.f32 %v7983_v4, %v13424_v9  ;;  %v10885_v20 = vld [vmem:[#allocation8 + $0x3c0] sm:$0xff]  }
0x2379   : > { %v8012_v35 = vadd.f32 %v7996_v39, %v13415_v54  ;;  %v8014_v40 = vadd.f32 %v7998_v52, %v13418_v21  ;;  %9642 = vmatpush3.bf16.msra.mxu0 %v10862_v41  ;;  %v7950_v54 = vmul.f32 0.5, %v13418_v21  ;;  %v14178_v3 = vld [vmem:[#allocation139_spill] sm:$0xff] }
0x237a   : > { %9664 = vmatpush3.bf16.msra.mxu1 %v10863_v53  ;;  %9643 = vmatprep.subr.bf16.mxu0 %v10864_v58  ;;  %v8013_v50 = vadd.f32 %v7997_v60, %v13421_v10  ;;  %v8015_v7 = vadd.f32 %v7999_v17, %v13424_v9  ;;  %v10886_v60 = vld [vmem:[#allocation8 + $0x300] sm:$0xff]  }
0x237b   : > { %9665 = vmatprep.subr.bf16.mxu1 %v10865_v32  ;;  %v8028_v47 = vmul.f32 0.7978846, %v8012_v35  ;;  %v8030_v51 = vmul.f32 0.7978846, %v8014_v40  ;;  %v14179_v17 = vld [vmem:[#allocation140_spill] sm:$0xff]  ;;  %v14180_v40 = vld [vmem:[#allocation141_spill] sm:$0xff] }
0x237c   : > { %v8029_v43 = vmul.f32 0.7978846, %v8013_v50  ;;  %v8031_v63 = vmul.f32 0.7978846, %v8015_v7  ;;  %v10887_v53 = vld [vmem:[#allocation8 + $0x380] sm:$0xff]  }
0x237d   : > { %9644 = vmatpush3.bf16.msra.mxu0 %v10866_v61  ;;  %10589 = vtanh.f32 %v8028_v47 }
0x237e   : > { %9666 = vmatpush3.bf16.msra.mxu1 %v10867_v33  ;;  %9645 = vmatprep.subr.bf16.mxu0 %v10868_v36  ;;  %10591 = vtanh.f32 %v8029_v43 }
0x237f   : > { %9667 = vmatprep.subr.bf16.mxu1 %v10869_v37  ;;  %10593 = vtanh.f32 %v8031_v63  ;;  %v10889_v63 = vld [vmem:[#allocation8 + $0x3c8] sm:$0xff]  }
0x2380   : > { %10595 = vtanh.f32 %v8030_v51  ;;  %v10890_v37 = vld [vmem:[#allocation8 + $0x308] sm:$0xff]  }
0x2381   : > { %9646 = vmatpush3.bf16.msra.mxu0 %v10870_v25 }
0x2382   : > { %9668 = vmatpush3.bf16.msra.mxu1 %v10871_v8  ;;  %9647 = vmatprep.subr.bf16.mxu0 %v10872_v49  ;;  %v10891_v49 = vld [vmem:[#allocation8 + $0x388] sm:$0xff]  }
0x2383   : > { %9669 = vmatprep.subr.bf16.mxu1 %v10873_v34  ;;  %v10892_v34 = vld [vmem:[#allocation8 + $0x350] sm:$0xff]  }
0x2385   : > { %9648 = vmatpush3.bf16.msra.mxu0 %v10874_v18 }
0x2386   : > { %9670 = vmatpush3.bf16.msra.mxu1 %v10875_v27  ;;  %9649 = vmatprep.subr.bf16.mxu0 %v10876_v55  ;;  %v10893_v55 = vld [vmem:[#allocation8 + $0x3d0] sm:$0xff]  }
0x2387   : > { %v10590_v59 = vpop.eup %10589  ;;  %9671 = vmatprep.subr.bf16.mxu1 %v10877_v16 }
0x2388   : > { %v10592_v12 = vpop.eup %10591  ;;  %v8060_v11 = vadd.f32 1.0, %v10590_v59 }
0x2389   : > { %v10594_v22 = vpop.eup %10593  ;;  %9650 = vmatpush3.bf16.msra.mxu0 %v10878_v2  ;;  %v8061_v23 = vadd.f32 1.0, %v10592_v12  ;;  %v10896_v2 = vld [vmem:[#allocation8 + $0x358] sm:$0xff]  }
0x238a   : > { %v10596_v30 = vpop.eup %10595  ;;  %9672 = vmatpush3.bf16.msra.mxu1 %v10879_v24  ;;  %9651 = vmatprep.subr.bf16.mxu0 %v10880_v44  ;;  %v8063_v31 = vadd.f32 1.0, %v10594_v22  ;;  %v8076_v42 = vmul.f32 %v8060_v11, %v7948_v29  ;;  %v10894_v11 = vld [vmem:[#allocation8 + $0x310] sm:$0xff]  }
0x238b   : > { %9673 = vmatprep.subr.bf16.mxu1 %v10881_v19  ;;  %v8077_v48 = vmul.f32 %v8061_v23, %v7949_v28  ;;  %v8062_v5 = vadd.f32 1.0, %v10596_v30  ;;  %v10895_v22 = vld [vmem:[#allocation8 + $0x390] sm:$0xff]   ;;  %v10897_v30 = vld [vmem:[#allocation8 + $0x3d8] sm:$0xff]  }
0x238c   : > { %v8079_v1 = vmul.f32 %v8063_v31, %v7951_v13  ;;  %v8092_v6 = vpack.c.bf16 %v8076_v42, %v8076_v42  ;;  %v10898_v42 = vld [vmem:[#allocation8 + $0x318] sm:$0xff]  }
0x238d   : > { %9652 = vmatpush3.bf16.msra.mxu0 %v10882_v56  ;;  %v8093_v10 = vpack.c.bf16 %v8077_v48, %v8077_v48  ;;  %v8078_v62 = vmul.f32 %v8062_v5, %v7950_v54  ;;  %v10899_v19 = vld [vmem:[#allocation8 + $0x398] sm:$0xff]   ;;  %v10900_v48 = vld [vmem:[#allocation8 + $0x360] sm:$0xff]   ;;  %v10904_v56 = vld [vmem:[#allocation8 + $0x368] sm:$0xff]  }
0x238e   : > { %9674 = vmatpush3.bf16.msra.mxu1 %v10883_v14  ;;  %v8095_v15 = vpack.c.bf16 %v8079_v1, %v8079_v1  ;;  %9681 = vmatprep.subr.bf16.mxu0 %v10884_v0  ;;  %v10901_v54 = vld [vmem:[#allocation8 + $0x3e0] sm:$0xff]   ;;  %v10907_v14 = vld [vmem:[#allocation8 + $0x3a8] sm:$0xff]   ;;  %v10909_v0 = vld [vmem:[#allocation8 + $0x3f0] sm:$0xff]  }
0x238f   : > { %8292 = vmatprep.mubr.bf16.mxu0 %v8093_v10  ;;  %v8094_v9 = vpack.c.bf16 %v8078_v62, %v8078_v62  ;;  %9703 = vmatprep.subr.bf16.mxu1 %v10885_v20  ;;  %v10902_v5 = vld [vmem:[#allocation8 + $0x320] sm:$0xff]   ;;  %v10905_v10 = vld [vmem:[#allocation8 + $0x3e8] sm:$0xff]  }
0x2390   : > { %8332 = vmatprep.mubr.bf16.mxu1 %v8095_v15  ;;  %v7892_v4 = vpop.f32.mrb[172].mxu0  ;;  %v7933_v26 = vpop.f32.mrb[200].mxu1  ;;  %8293 = vmatmul.mubr.bf16.vlgmr.msra.gmra.mrb[184].mxu0 %v8092_v6  ;;  %v10903_v1 = vld [vmem:[#allocation8 + $0x3a0] sm:$0xff]   ;;  %v10906_v62 = vld [vmem:[#allocation8 + $0x328] sm:$0xff]   ;;  %v10908_v15 = vld [vmem:[#allocation8 + $0x370] sm:$0xff]  }
0x2391   : > { %v13447_v21 = vadd.f32 %v7892_v4, %v12373_v46  ;;  %v13450_v39 = vadd.f32 %v7933_v26, %v14178_v3  ;;  %8333 = vmatmul.mubr.bf16.vlgmr.msra.gmra.mrb[212].mxu1 %v8094_v9  ;;  %v7894_v52 = vpop.f32.mrb[173].mxu0  ;;  %v7935_v57 = vpop.f32.mrb[201].mxu1  ;;  %9682 = vmatpush3.bf16.msra.mxu0 %v10886_v60  ;;  %v10888_v46 = vld [vmem:[#allocation8 + $0x348] sm:$0xff]   ;;  %v10910_v3 = vld [vmem:[#allocation8 + $0x330] sm:$0xff]  }
0x2392   : > { %v13453_v35 = vadd.f32 %v7894_v52, %v14179_v17  ;;  %v13456_v41 = vadd.f32 %v7935_v57, %v14180_v40  ;;  %9704 = vmatpush3.bf16.msra.mxu1 %v10887_v53  ;;  %v7896_v58 = vpop.f32.mrb[174].mxu0  ;;  %v7937_v50 = vpop.f32.mrb[202].mxu1  ;;  %9683 = vmatprep.subr.bf16.mxu0 %v10888_v46  ;;  %v10911_v17 = vld [vmem:[#allocation8 + $0x3b0] sm:$0xff]   ;;  %v10912_v40 = vld [vmem:[#allocation8 + $0x378] sm:$0xff]  }
0x2393   : > { %v7968_v7 = vmul.f32 0.044715, %v13447_v21  ;;  %v7970_v32 = vmul.f32 0.044715, %v13450_v39  ;;  %v7897_v47 = vpop.f32.mrb[175].mxu0  ;;  %v7938_v43 = vpop.f32.mrb[203].mxu1  ;;  %9705 = vmatprep.subr.bf16.mxu1 %v10889_v63 }
0x2394   : > { %v7969_v51 = vmul.f32 0.044715, %v13453_v35  ;;  %v7971_v61 = vmul.f32 0.044715, %v13456_v41  ;;  %v7952_v20 = vmul.f32 0.5, %v13447_v21  ;;  %v7953_v52 = vmul.f32 0.5, %v13453_v35 }
0x2395   : > { %v7984_v33 = vmul.f32 %v7968_v7, %v13447_v21  ;;  %v7986_v36 = vmul.f32 %v7970_v32, %v13450_v39  ;;  %9684 = vmatpush3.bf16.msra.mxu0 %v10890_v37  ;;  %v7955_v53 = vmul.f32 0.5, %v13456_v41  ;;  %v10913_v46 = vld [vmem:[#allocation8 + $0x3f8] sm:$0xff]  }
0x2396   : > { %v7985_v25 = vmul.f32 %v7969_v51, %v13453_v35  ;;  %v7987_v8 = vmul.f32 %v7971_v61, %v13456_v41  ;;  %9706 = vmatpush3.bf16.msra.mxu1 %v10891_v49  ;;  %9685 = vmatprep.subr.bf16.mxu0 %v10892_v34  ;;  %v10914_v43 = vld [vmem:[#allocation8 + $0x338] sm:$0xff]  }
0x2397   : > { %v8000_v18 = vmul.f32 %v7984_v33, %v13447_v21  ;;  %v8002_v27 = vmul.f32 %v7986_v36, %v13450_v39  ;;  %9707 = vmatprep.subr.bf16.mxu1 %v10893_v55  ;;  %v10915_v51 = vld [vmem:[#allocation8 + $0x3b8] sm:$0xff]  }
0x2398   : > { %v8001_v59 = vmul.f32 %v7985_v25, %v13453_v35  ;;  %v8003_v16 = vmul.f32 %v7987_v8, %v13456_v41  ;;  %v10916_v55 = vld [vmem:[%s13958_s13] ss:$0 sm:$0xff] }
0x2399   : > { %v8016_v12 = vadd.f32 %v8000_v18, %v13447_v21  ;;  %v8018_v29 = vadd.f32 %v8002_v27, %v13450_v39  ;;  %9686 = vmatpush3.bf16.msra.mxu0 %v10894_v11  ;;  %v7954_v21 = vmul.f32 0.5, %v13450_v39 }
0x239a   : > { %9708 = vmatpush3.bf16.msra.mxu1 %v10895_v22  ;;  %9687 = vmatprep.subr.bf16.mxu0 %v10896_v2  ;;  %v8017_v28 = vadd.f32 %v8001_v59, %v13453_v35  ;;  %v8019_v23 = vadd.f32 %v8003_v16, %v13456_v41 }
0x239b   : > { %9709 = vmatprep.subr.bf16.mxu1 %v10897_v30  ;;  %v8032_v24 = vmul.f32 0.7978846, %v8016_v12  ;;  %v8034_v31 = vmul.f32 0.7978846, %v8018_v29 }
0x239c   : > { %v8033_v44 = vmul.f32 0.7978846, %v8017_v28  ;;  %v8035_v13 = vmul.f32 0.7978846, %v8019_v23 }
0x239d   : > { %9688 = vmatpush3.bf16.msra.mxu0 %v10898_v42  ;;  %10597 = vtanh.f32 %v8032_v24 }
0x239e   : > { %9710 = vmatpush3.bf16.msra.mxu1 %v10899_v19  ;;  %9689 = vmatprep.subr.bf16.mxu0 %v10900_v48  ;;  %10599 = vtanh.f32 %v8033_v44 }
0x239f   : > { %9711 = vmatprep.subr.bf16.mxu1 %v10901_v54  ;;  %10601 = vtanh.f32 %v8035_v13 }
0x23a0   : > { %10603 = vtanh.f32 %v8034_v31 }
0x23a1   : > { %9690 = vmatpush3.bf16.msra.mxu0 %v10902_v5 }
0x23a2   : > { %9712 = vmatpush3.bf16.msra.mxu1 %v10903_v1  ;;  %9691 = vmatprep.subr.bf16.mxu0 %v10904_v56 }
0x23a3   : > { %9713 = vmatprep.subr.bf16.mxu1 %v10905_v10 }
0x23a5   : > { %9692 = vmatpush3.bf16.msra.mxu0 %v10906_v62 }
0x23a6   : > { %9714 = vmatpush3.bf16.msra.mxu1 %v10907_v14  ;;  %9693 = vmatprep.subr.bf16.mxu0 %v10908_v15 }
0x23a7   : > { %v10598_v6 = vpop.eup %10597  ;;  %9715 = vmatprep.subr.bf16.mxu1 %v10909_v0 }
0x23a8   : > { %v10600_v9 = vpop.eup %10599  ;;  %v8064_v4 = vadd.f32 1.0, %v10598_v6 }
0x23a9   : > { %v10602_v26 = vpop.eup %10601  ;;  %9694 = vmatpush3.bf16.msra.mxu0 %v10910_v3  ;;  %v8065_v57 = vadd.f32 1.0, %v10600_v9 }
0x23aa   : > { %v10604_v60 = vpop.eup %10603  ;;  %9716 = vmatpush3.bf16.msra.mxu1 %v10911_v17  ;;  %9695 = vmatprep.subr.bf16.mxu0 %v10912_v40  ;;  %v8067_v58 = vadd.f32 1.0, %v10602_v26  ;;  %v8080_v50 = vmul.f32 %v8064_v4, %v7952_v20 }
0x23ab   : > { %9717 = vmatprep.subr.bf16.mxu1 %v10913_v46  ;;  %v8081_v7 = vmul.f32 %v8065_v57, %v7953_v52  ;;  %v8066_v32 = vadd.f32 1.0, %v10604_v60 }
0x23ac   : > { %v8083_v47 = vmul.f32 %v8067_v58, %v7955_v53  ;;  %v8096_v33 = vpack.c.bf16 %v8080_v50, %v8080_v50 }
0x23ad   : > { %9696 = vmatpush3.bf16.msra.mxu0 %v10914_v43  ;;  %v8097_v35 = vpack.c.bf16 %v8081_v7, %v8081_v7  ;;  %v8082_v63 = vmul.f32 %v8066_v32, %v7954_v21  ;;  %v10393_v7 = vld [vmem:[#allocation11] sm:$0xff]   ;;  %v10394_v21 = vld [vmem:[#allocation11 + $0x8] sm:$0xff]  }
0x23ae   : > { %9718 = vmatpush3.bf16.msra.mxu1 %v10915_v51  ;;  %v8099_v61 = vpack.c.bf16 %v8083_v47, %v8083_v47  ;;  %10082 = vmatprep.subr.bf16.mxu0 %v13957_v38  ;;  %v10395_v51 = vld [vmem:[#allocation11 + $0x10] sm:$0xff]  }
0x23af   : > { %8372 = vmatprep.mubr.bf16.mxu0 %v8097_v35  ;;  %v8098_v41 = vpack.c.bf16 %v8082_v63, %v8082_v63 }
0x23b0   : > { %8412 = vmatprep.mubr.bf16.mxu1 %v8099_v61  ;;  %8373 = vmatmul.mubr.bf16.vlgmr.msra.gmra.mrb[188].mxu0 %v8096_v33  ;;  %v10397_v61 = vld [vmem:[#allocation11 + $0x20] sm:$0xff]   ;;  %v10398_v33 = vld [vmem:[#allocation11 + $0x28] sm:$0xff]  }
0x23b1   : > { %8413 = vmatmul.mubr.bf16.vlgmr.msra.gmra.mrb[216].mxu1 %v8098_v41  ;;  %10098 = vmatprep.mubr.msk.bf16.mxu0 %vm11176_vm1, %v13957_v38  ;;  %v10399_v41 = vld [vmem:[#allocation11 + $0x30] sm:$0xff]  }
0x23b2   : > { %10083 = vmatpush3.bf16.msra.mxu0 %v10393_v7 }
0x23b3   : > { %10084 = vmatprep.subr.bf16.mxu0 %v13957_v38 }
0x23b6   : > { %10085 = vmatpush3.bf16.msra.mxu0 %v10394_v21 }
0x23b7   : > { %10086 = vmatprep.subr.bf16.mxu0 %v13957_v38 }
0x23ba   : > { %10087 = vmatpush3.bf16.msra.mxu0 %v10395_v51 }
0x23bb   : > { %10088 = vmatprep.subr.bf16.mxu0 %v13957_v38 }
0x2423   : > { %v9565_v39 = vpop.f32.mrb[176].mxu0 }
0x2424   : > { %v9587_v36 = vpop.f32.mrb[204].mxu1  ;;  %v9566_v37 = vpop.f32.mrb[177].mxu0 }
0x2425   : > { %v9567_v25 = vadd.f32 %v9566_v37, %v9565_v39  ;;  %v9588_v8 = vpop.f32.mrb[205].mxu1  ;;  %v9568_v49 = vpop.f32.mrb[178].mxu0  ;;  %v10400_v39 = vld [vmem:[#allocation11 + $0x38] sm:$0xff]  }
0x2426   : > { %v9589_v34 = vadd.f32 %v9588_v8, %v9587_v36  ;;  %v9590_v18 = vpop.f32.mrb[206].mxu1  ;;  %v9569_v27 = vpop.f32.mrb[179].mxu0  ;;  %v8421_v49 = vld [vmem:[%s14182_s0] sm:$0x1] }
0x2427   : > { %v8135_v59 = vadd.f32 %v10916_v55, %v9567_v25  ;;  %v9591_v16 = vpop.f32.mrb[207].mxu1  ;;  %v8422_v18 = vld [vmem:[#allocation9] sm:$0x1] }
0x2429   : > { %v8175_v12 = vadd.f32 %v9589_v34, %v8135_v59 }
0x2443   : > { %v9609_v29 = vpop.f32.mrb[180].mxu0 }
0x2444   : > { %v9631_v11 = vpop.f32.mrb[208].mxu1  ;;  %v9610_v22 = vpop.f32.mrb[181].mxu0 }
0x2445   : > { %v9611_v2 = vadd.f32 %v9610_v22, %v9609_v29  ;;  %v9632_v28 = vpop.f32.mrb[209].mxu1  ;;  %v9612_v23 = vpop.f32.mrb[182].mxu0 }
0x2446   : > { %v9633_v30 = vadd.f32 %v9632_v28, %v9631_v11  ;;  %v9634_v24 = vpop.f32.mrb[210].mxu1  ;;  %v9613_v44 = vpop.f32.mrb[183].mxu0 }
0x2447   : > { %v8215_v13 = vadd.f32 %v9611_v2, %v8175_v12  ;;  %v9635_v31 = vpop.f32.mrb[211].mxu1 }
0x2449   : > { %v8255_v42 = vadd.f32 %v9633_v30, %v8215_v13 }
0x2463   : > { %v9653_v19 = vpop.f32.mrb[184].mxu0 }
0x2464   : > { %v9675_v48 = vpop.f32.mrb[212].mxu1  ;;  %v9654_v54 = vpop.f32.mrb[185].mxu0 }
0x2465   : > { %v9655_v5 = vadd.f32 %v9654_v54, %v9653_v19  ;;  %v9676_v1 = vpop.f32.mrb[213].mxu1  ;;  %v9656_v56 = vpop.f32.mrb[186].mxu0 }
0x2466   : > { %v9677_v10 = vadd.f32 %v9676_v1, %v9675_v48  ;;  %v9678_v62 = vpop.f32.mrb[214].mxu1  ;;  %v9657_v14 = vpop.f32.mrb[187].mxu0 }
0x2467   : > { %v8295_v15 = vadd.f32 %v9655_v5, %v8255_v42  ;;  %v9679_v6 = vpop.f32.mrb[215].mxu1 }
0x2469   : > { %v8335_v0 = vadd.f32 %v9677_v10, %v8295_v15 }
0x2483   : > { %v9697_v9 = vpop.f32.mrb[188].mxu0 }
0x2484   : > { %v9719_v20 = vpop.f32.mrb[216].mxu1  ;;  %v9698_v4 = vpop.f32.mrb[189].mxu0 }
0x2485   : > { %v9699_v26 = vadd.f32 %v9698_v4, %v9697_v9  ;;  %v9720_v3 = vpop.f32.mrb[217].mxu1  ;;  %v9700_v52 = vpop.f32.mrb[190].mxu0 }
0x2486   : > { %v9721_v57 = vadd.f32 %v9720_v3, %v9719_v20  ;;  %v9722_v60 = vpop.f32.mrb[218].mxu1  ;;  %v9701_v17 = vpop.f32.mrb[191].mxu0 }
0x2487   : > { %v8375_v40 = vadd.f32 %v9699_v26, %v8335_v0  ;;  %v9723_v53 = vpop.f32.mrb[219].mxu1 }
0x2489   : > { %v8415_v58 = vadd.f32 %v9721_v57, %v8375_v40 }
0x248b   : > { %v8420_v50 = vadd.f32 %v8415_v58, %v13260_v45  ;;  %v10396_v45 = vld [vmem:[#allocation11 + $0x18] sm:$0xff]  }
0x248c   : > { %10089 = vmatpush3.bf16.msra.mxu0 %v10396_v45 }
0x248d   : > { %v8424_v46 = vsel %vm8423_vm13, %v8420_v50, 0.0  ;;  %10090 = vmatprep.subr.bf16.mxu0 %v13957_v38 }
0x248e   : > { %8425 = vadd.xlane.f32.xlu0 %v8424_v46 }
0x2490   : > { %10091 = vmatpush3.bf16.msra.mxu0 %v10397_v61 }
0x2491   : > { %10092 = vmatprep.subr.bf16.mxu0 %v13957_v38 }
0x2494   : > { %10093 = vmatpush3.bf16.msra.mxu0 %v10398_v33 }
0x2495   : > { %10094 = vmatprep.subr.bf16.mxu0 %v13957_v38 }
0x2498   : > { %10095 = vmatpush3.bf16.msra.mxu0 %v10399_v41 }
0x2499   : > { %10096 = vmatprep.subr.bf16.mxu0 %v13957_v38  ;;  %v8456_v38 = vld [vmem:[#allocation12] sm:$0x1] }
0x249c   : > { %10097 = vmatpush3.bf16.msra.mxu0 %v10400_v39 }
0x251b   : > { %v8426_v32 = vpop.xlane.xlu0 %8425 }
0x251c   : > { %v8427_v47 = vmul.f32 0.0078125, %v8426_v32 }
0x251e   : > { %v8428_v43 = vsub.f32 %v8420_v50, %v8427_v47 }
0x2520   : > { %v8429_v35 = vmul.f32 %v8428_v43, %v8428_v43 }
0x2522   : > { %v8430_v63 = vsel %vm8423_vm13, %v8429_v35, 0.0 }
0x2523   : > { %8431 = vadd.xlane.f32.xlu0 %v8430_v63 }
0x25b0   : > { %v8432_v36 = vpop.xlane.xlu0 %8431 }
0x25b1   : > { %v8433_v37 = vmul.f32 0.0078125, %v8432_v36 }
0x25b3   : > { %v8434_v25 = vadd.f32 1e-05, %v8433_v37 }
0x25b5   : > { %10605 = vrsqrt.f32 %v8434_v25 }
0x25bf   : > { %v10606_v8 = vpop.eup %10605 }
0x25c0   : > { %v8436_v34 = vmul.f32 %v10606_v8, %v8428_v43 }
0x25c2   : > { %v8437_v27 = vmul.f32 %v8436_v34, %v8421_v49 }
0x25c4   : > { %v8438_v55 = vadd.f32 %v8437_v27, %v8422_v18 }
0x25c6   : > { %v8439_v59 = vpack.c.bf16 %v8438_v55, %v8438_v55 }
0x25c8   : > { %10099 = vmatmul.mubr.bf16.vlgmr.msra.gmra.mrb[192].mxu0 %v8439_v59 }
0x269b   : > { %v8539_v16 = vpop.f32.mrb[192].mxu0 }
0x269c   : > { %v8540_v12 = vadd.f32 %v8539_v16, %v8456_v38  ;;  %v10100_v29 = vpop.f32.mrb[193].mxu0 }
0x269d   : > { %v8542_v11 = vpop.f32.mrb[194].mxu0 }
0x269e   : > { %8545 = vst [vmem:[%s624_s19] sm:$0x1] %v8540_v12  ;;  %v10101_v22 = vpop.f32.mrb[195].mxu0 }
0x269f   : > { %11098 = shalt.err (!%p11095_p2)
}
0x26a0   : > { %s11099_s29 = scalar_lea.hbm %s13500_s24, 16  ;;  %s11103_s22 = scalar_lea.hbm %s14184_s1, 32 }
0x26a1   : > { %p11100_p3 = scmp.ne.s32.totalorder %s13500_s24, %s11099_s29  ;;  %p11104_p7 = scmp.lt.u32.totalorder %s13500_s24, %s14184_s1 }
0x26a2   : > { %p11105_p8 = scmp.lt.u32.totalorder %s11103_s22, %s11099_s29  ;;  %p11107_p13 = scmp.lt.u32.totalorder %s11099_s29, %s13500_s24 }
0x26a3   : > { %p11101_p4 = pnand %p11100_p3, %p14185_p1 }
0x26a4   : > { %p11106_p11 = por %p11105_p8, %p11104_p7 }
0x26a5   : > { %p11102_p12 = pneg %p11101_p4 }
0x26a6   : > { %p11108_p6 = por %p11107_p13, %p11106_p11 }
0x26a8   : > { %p11109_p9 = pnand %p11108_p6, %p11102_p12 }
0x26aa   : > { %11112 = shalt.err (!%p11109_p9)
}
0x26ab   : > { %10126 = dma.vmem_to_hbm [thread:$0]  (%p14185_p1), %s13502_s27, 16, %s13500_s24, %s8547_s18  }
0x26ac PF: > { %s14186_s23 = sld [smem:[#allocation23_spill]]  ;;  %s14187_s26 = sld [smem:[#allocation20_spill]] }
0x26ad   : > { %s14188_s28 = sld [smem:[#allocation27_spill]] }
0x26b2   : > { %p10163_p5 = scmp.ge.s32.totalorder %s14186_s23, 2  ;;  %s8571_s12 = sand.u32 1, %s14187_s26  }
0x26b3   : > { %p14189_p10 = scmp.ne.s32.totalorder %s14188_s28, 0  ;;  %s8572_s17 = scalar_lea.sflag [#allocation5], %s8571_s12 }
0x26b5   : > { %p10148_p0 = pnand %p10163_p5, %p14189_p10 }
0x26b7   : > { %11146 = dma.done.wait (!%p10148_p0), %s8572_s17, 16  }
0x26b8   : > { %11148 = vsyncadd (!%p10148_p0), %s8572_s17, 4294967280  ;;  %s14190_s27 = sld [smem:[#allocation24_spill]]  ;;  %s14191_s24 = sld [smem:[#allocation21_spill]] }
0x26b9   : > { %s14192_s25 = sld [smem:[#allocation22_spill]]  ;;  %s14193_s26 = sld [smem:[#allocation25_spill]] }
0x26be   : > { %p31_p2 = scmp.ge.s32.totalorder %s14190_s27, 4  }
0x26c0   :  { %33 = sbr.rel (!%p31_p2) target bundleno = 13 (0xd), region = 148 }
0x26c7   :  { %8576 = vsyncpa [#allocation4], 1 }
0x26c8   :  { %8578 = vsyncpa [#allocation4 + $0x1], 1 }
0x26c9   :  { %8579 = vsyncpa [#allocation7], 1 }
0x26ca   :  { %8580 = vsyncpa [#allocation10], 1 }
0x26cb   :  { %8581 = vsyncpa [#allocation13], 1 }
0x26cc   :  { %8582 = vsyncpa [#allocation5], 1 }
0x26cd   :  { %8584 = vsyncpa [#allocation5 + $0x1], 1 }

</bundles_post_ra>
